<compile_context>
chip_gen: v7x
topology: tpu7x:2x2x1
jax: 0.10.0
libtpu: 0.0.40
codegen_flags: <defaults>
</compile_context>

<pallas_src>
import functools
import math

import jax
import jax.numpy as jnp
from jax import lax
from jax.experimental import pallas as pl
from jax.experimental.pallas import tpu as pltpu


def _round8(x):
    return (x + 7) // 8 * 8


# ----------------------------- in-kernel helpers -----------------------------

def _erf(x):
    # Abramowitz & Stegun 7.1.26, |err| < 1.5e-7: matches torch.nn.GELU()
    # (exact erf variant) to float32 precision.
    p = 0.3275911
    a1, a2, a3, a4, a5 = (0.254829592, -0.284496736, 1.421413741,
                          -1.453152027, 1.061405429)
    ax = jnp.abs(x)
    t = 1.0 / (1.0 + p * ax)
    poly = ((((a5 * t + a4) * t + a3) * t + a2) * t + a1) * t
    y = 1.0 - poly * jnp.exp(-ax * ax)
    return jnp.where(x >= 0, y, -y)


def _gelu(x):
    return 0.5 * x * (1.0 + _erf(x * 0.7071067811865476))


def _softmax_last(x):
    m = jnp.max(x, axis=-1, keepdims=True)
    e = jnp.exp(x - m)
    s = jnp.sum(e, axis=-1, keepdims=True)
    # EUP approximate reciprocal (~1e-3 rel err); use approx=False for
    # bit-level parity with the PyTorch reference.
    return e * pl.reciprocal(s, approx=True)


# ------------------------------ fused kernel ----------------------------------
# Layout: everything is (pixels, channels) with channels on lanes.  Zero-padded
# images live in flat padded-row VMEM buffers of width Wp (multiple of 8):
# pixel (r, c) sits at row ext + (r+pad)*Wp + (c+pad); a 3x3/5x5 tap (dy, dx)
# is a row shift of dy*Wp (8-aligned) + dx.  The pad ring is genuinely zero, so
# interior rows match torch's zero-padded convolutions exactly; ring-row conv
# outputs are garbage and are never gathered.

def _msa_fused_kernel(
        x1_ref, x2_ref,
        qkvpw_w, qkvpw_b, qkvdw_w, qkvdw_b,
        apw_w, apw_b, adw_w, adw_b,
        rep_w, rep_b,
        m1_w, m1_b, mdw_w, mdw_b, m3_w, m3_b,
        sk_w, sk_b,
        o_ref,
        padA, convA, padB, padD, hcat, repro, padE, convE,
        *, H, W, H2, W2, dim, num_heads):
    N, N2 = H * W, H2 * W2
    hd = dim // num_heads

    # static geometry (must match wrapper's scratch shapes)
    Wp3 = _round8(W + 2)
    Mp3 = (H + 2) * Wp3
    E3 = _round8(Wp3 + 1)
    Wp2 = _round8(W2 + 2)
    Mp2 = (H2 + 2) * Wp2
    E2 = _round8(Wp2 + 1)
    Wp5 = _round8(W + 4)
    Mp5 = (H + 4) * Wp5
    E5 = _round8(2 * Wp5 + 2)
    Mh = Mp5 + 4 * Wp5
    c0 = E5 - 2 * Wp5 - 2          # hcat piece j reads padD[c0+j : c0+j+Mh]

    def pw(x, w_ref, b_ref, act=False):
        y = jnp.dot(x, w_ref[...], preferred_element_type=jnp.float32) + b_ref[...]
        return _gelu(y) if act else y

    def scatter_pad(dst_ref, y, Hh, Ww, Wp, ext, pad):
        # zero the padded flat buffer, then write image rows into the interior
        dst_ref[...] = jnp.zeros_like(dst_ref)
        for r in range(Hh):
            d = ext + (r + pad) * Wp + pad
            dst_ref[d:d + Ww, :] = y[r * Ww:(r + 1) * Ww, :]

    def dw3x3(src_ref, Mp, Wp, ext, w_ref, b_ref, act=False):
        # depthwise 3x3: 9 shift-MAC taps; dy component of the shift is
        # 8-aligned (Wp multiple of 8), dx = +-1 stays sub-vreg (accepted).
        w = w_ref[...]
        acc = jnp.zeros((Mp, w.shape[-1]), jnp.float32)
        for t in range(9):
            dy, dx = divmod(t, 3)
            s = ext + (dy - 1) * Wp + (dx - 1)
            acc = acc + src_ref[s:s + Mp, :] * w[t:t + 1, :]
        acc = acc + b_ref[...]
        return _gelu(acc) if act else acc

    def gather_interior(src, Hh, Ww, Wp, pad):
        return jnp.concatenate(
            [src[(r + pad) * Wp + pad:(r + pad) * Wp + pad + Ww, :]
             for r in range(Hh)], axis=0)

    # ---------------- stage A: fused Q/K/V pointwise + depthwise 3x3 ----------
    x1 = x1_ref[0]                                          # (N, dim)
    yA = pw(x1, qkvpw_w, qkvpw_b)                           # (N, 3*dim)
    scatter_pad(padA, yA, H, W, Wp3, E3, 1)
    convA[...] = dw3x3(padA, Mp3, Wp3, E3, qkvdw_w, qkvdw_b)
    qkv = gather_interior(convA, H, W, Wp3, 1)              # (N, 3*dim)

    # ---------------- stage B: anchors pointwise + depthwise 3x3 --------------
    x2 = x2_ref[0]                                          # (N2, dim)
    yB = pw(x2, apw_w, apw_b)                               # (N2, dim)
    scatter_pad(padB, yB, H2, W2, Wp2, E2, 1)
    convB = dw3x3(padB, Mp2, Wp2, E2, adw_w, adw_b)         # value (Mp2, dim)
    anc = gather_interior(convB, H2, W2, Wp2, 1)            # (N2, dim)

    # ---------------- stage C: anchor attention (all heads, no transposes) ----
    # No 1/sqrt(head_dim) scaling: the PyTorch reference applies none.
    # torch softmax(dim=1) maps to softmax over the last axis of these
    # transposed-layout logits ((N2,N): over key positions N; (N,N2): over
    # anchor positions N2).
    dn_t = (((1,), (1,)), ((), ()))          # contract last dims (A @ B^T)
    heads = []
    for h in range(num_heads):
        lo, hi = h * hd, (h + 1) * hd
        q = qkv[:, lo:hi]                                   # (N, hd)
        k = qkv[:, dim + lo:dim + hi]                       # (N, hd)
        v = qkv[:, 2 * dim + lo:2 * dim + hi]               # (N, hd)
        a = anc[:, lo:hi]                                   # (N2, hd)
        ka = _softmax_last(lax.dot_general(
            a, k, dn_t, preferred_element_type=jnp.float32))    # (N2, N)
        qa = _softmax_last(lax.dot_general(
            q, a, dn_t, preferred_element_type=jnp.float32))    # (N, N2)
        ctx = jnp.dot(ka, v, preferred_element_type=jnp.float32)        # (N2, hd)
        heads.append(jnp.dot(qa, ctx, preferred_element_type=jnp.float32))
    agg = jnp.concatenate(heads, axis=-1)                   # (N, dim)

    # ---------------- stage D: 5x5 reprojection -------------------------------
    # Pre-concatenate the 5 horizontal taps on lanes (K = 5*dim), then 5
    # sublane-aligned row-shifted matmuls instead of 25 K=dim tap matmuls.
    scatter_pad(padD, agg, H, W, Wp5, E5, 2)
    hcat[...] = jnp.concatenate(
        [padD[c0 + j:c0 + j + Mh, :] for j in range(5)], axis=-1)   # (Mh, 5*dim)
    K5 = 5 * dim
    accD = jnp.zeros((Mp5, rep_w.shape[-1]), jnp.float32)
    for dy in range(5):
        accD = accD + jnp.dot(hcat[dy * Wp5:dy * Wp5 + Mp5, :],
                              rep_w[dy * K5:(dy + 1) * K5, :],
                              preferred_element_type=jnp.float32)
    repro[...] = accD + rep_b[...]
    attn = gather_interior(repro, H, W, Wp5, 2)             # (N, hid)

    # ---------------- stage E: MLP 1x1(+GELU) -> dw3x3(+GELU) ------------------
    yE = pw(attn, m1_w, m1_b, act=True)                     # (N, mlp_hid)
    scatter_pad(padE, yE, H, W, Wp3, E3, 1)
    convE[...] = dw3x3(padE, Mp3, Wp3, E3, mdw_w, mdw_b, act=True)
    m = gather_interior(convE, H, W, Wp3, 1)                # (N, mlp_hid)

    # ---------------- stage F: skip + mlp3 + add --------------------------------
    out = (jnp.dot(attn, sk_w[...], preferred_element_type=jnp.float32) + sk_b[...]
           + jnp.dot(m, m3_w[...], preferred_element_type=jnp.float32) + m3_b[...])
    o_ref[0] = out.astype(o_ref.dtype)


# ------------------------------ wrapper ----------------------------------------

def _fused_call(x1r, x2r, P, *, H, W, H2, W2, dim, num_heads, out_dim):
    B = x1r.shape[0]
    hid = P["rep_w"].shape[-1]
    mlp_hid = P["mlp1_w"].shape[-1]

    Wp3 = _round8(W + 2)
    Mp3 = (H + 2) * Wp3
    E3 = _round8(Wp3 + 1)
    MeA = Mp3 + 2 * E3
    Wp2 = _round8(W2 + 2)
    Mp2 = (H2 + 2) * Wp2
    E2 = _round8(Wp2 + 1)
    MeB = Mp2 + 2 * E2
    Wp5 = _round8(W + 4)
    Mp5 = (H + 4) * Wp5
    E5 = _round8(2 * Wp5 + 2)
    MeD = Mp5 + 2 * E5
    Mh = Mp5 + 4 * Wp5

    weights = [P["qkv_pw_w"], P["qkv_pw_b"], P["qkv_dw_w"], P["qkv_dw_b"],
               P["anc_pw_w"], P["anc_pw_b"], P["anc_dw_w"], P["anc_dw_b"],
               P["rep_w"], P["rep_b"],
               P["mlp1_w"], P["mlp1_b"], P["mlp_dw_w"], P["mlp_dw_b"],
               P["mlp3_w"], P["mlp3_b"], P["skip_w"], P["skip_b"]]
    w_specs = [pl.BlockSpec(w.shape, lambda b: (0, 0)) for w in weights]

    # TODO(synk): gridless-per-batch (whole image in VMEM) is right for 8x8
    # spatial inputs; add pixel-row BlockSpec tiling + vmem_limit_bytes before
    # scaling to large spatial sizes (v7x only has 64 MiB physical VMEM).
    return pl.pallas_call(
        functools.partial(_msa_fused_kernel, H=H, W=W, H2=H2, W2=W2,
                          dim=dim, num_heads=num_heads),
        out_shape=jax.ShapeDtypeStruct((B, H * W, out_dim), jnp.float32),
        grid_spec=pltpu.PrefetchScalarGridSpec(
            num_scalar_prefetch=0,
            grid=(B,),
            in_specs=[pl.BlockSpec((1, H * W, dim), lambda b: (b, 0, 0)),
                      pl.BlockSpec((1, H2 * W2, dim), lambda b: (b, 0, 0))]
                     + w_specs,
            out_specs=pl.BlockSpec((1, H * W, out_dim), lambda b: (b, 0, 0)),
            scratch_shapes=[
                pltpu.VMEM((MeA, 3 * dim), jnp.float32),   # padA  (QKV pw out)
                pltpu.VMEM((Mp3, 3 * dim), jnp.float32),   # convA (QKV dw out)
                pltpu.VMEM((MeB, dim), jnp.float32),       # padB  (anchors)
                pltpu.VMEM((MeD, dim), jnp.float32),       # padD  (agg, 5x5 in)
                pltpu.VMEM((Mh, 5 * dim), jnp.float32),    # hcat  (lane-concat taps)
                pltpu.VMEM((Mp5, hid), jnp.float32),       # repro (5x5 out)
                pltpu.VMEM((MeA, mlp_hid), jnp.float32),   # padE  (mlp dw in)
                pltpu.VMEM((Mp3, mlp_hid), jnp.float32),   # convE (mlp dw out)
            ]),
        compiler_params=pltpu.CompilerParams(
            dimension_semantics=("parallel",)),            # v7x: batch over 2 TCs
    )(x1r, x2r, *weights)


# -------------------------------- parameters ----------------------------------

def init_params(key, dim=32, ms_dim=32, out_dim=64):
    # Deterministic synthetic init (shapes follow the PyTorch module).  The
    # Q/K/V branch fusion (concat along output channels) and the 5x5 weight
    # reshape to (dy,dx,cin)-major rows are done HERE, once, per review item 2.
    # TODO(synk): the anchors branch's grouped 3x3 conv is only implemented for
    # ms_dim == dim (groups == dim, i.e. depthwise), which holds by default.
    assert ms_dim == dim, "only the default ms_dim == dim configuration"
    hid = out_dim * 3 // 2          # 96
    mlp_hid = out_dim * 2           # 128
    ks = iter(jax.random.split(key, 32))

    def dense(k, cin, cout):
        return jax.random.normal(k, (cin, cout), jnp.float32) / math.sqrt(cin)

    def dwk(k, c):
        return jax.random.normal(k, (9, c), jnp.float32) / 3.0

    def bias(k, c):
        return (jax.random.normal(k, (c,), jnp.float32) * 0.01).reshape(1, c)

    br = {n: (dense(next(ks), dim, dim), bias(next(ks), dim),
              dwk(next(ks), dim), bias(next(ks), dim))
          for n in ("queries", "keys", "values", "anchors")}

    p = {}
    qkv = ("queries", "keys", "values")
    p["qkv_pw_w"] = jnp.concatenate([br[n][0] for n in qkv], axis=1)   # (dim, 3*dim)
    p["qkv_pw_b"] = jnp.concatenate([br[n][1] for n in qkv], axis=1)   # (1, 3*dim)
    p["qkv_dw_w"] = jnp.concatenate([br[n][2] for n in qkv], axis=1)   # (9, 3*dim)
    p["qkv_dw_b"] = jnp.concatenate([br[n][3] for n in qkv], axis=1)
    p["anc_pw_w"], p["anc_pw_b"], p["anc_dw_w"], p["anc_dw_b"] = br["anchors"]

    rep_hwio = jax.random.normal(next(ks), (5, 5, dim, hid),
                                 jnp.float32) / math.sqrt(25 * dim)
    p["rep_w"] = rep_hwio.reshape(25 * dim, hid)      # rows: dy*5*dim + dx*dim + cin
    p["rep_b"] = bias(next(ks), hid)
    p["mlp1_w"] = dense(next(ks), hid, mlp_hid)
    p["mlp1_b"] = bias(next(ks), mlp_hid)
    p["mlp_dw_w"] = dwk(next(ks), mlp_hid)
    p["mlp_dw_b"] = bias(next(ks), mlp_hid)
    p["mlp3_w"] = dense(next(ks), mlp_hid, out_dim)
    p["mlp3_b"] = bias(next(ks), out_dim)
    p["skip_w"] = dense(next(ks), hid, out_dim)
    p["skip_b"] = bias(next(ks), out_dim)
    return p


# --------------------------------- forward ------------------------------------

def forward(x1, x2, params, num_heads=2):
    # x1: (B, dim, H, W), x2: (B, ms_dim, H2, W2)  -- NCHW like PyTorch.
    B, dim, H, W = x1.shape
    _, _, H2, W2 = x2.shape
    out_dim = params["skip_w"].shape[1]
    # only remaining XLA glue: NCHW <-> (pixels, channels) transposes
    x1r = jnp.transpose(x1, (0, 2, 3, 1)).reshape(B, H * W, dim)
    x2r = jnp.transpose(x2, (0, 2, 3, 1)).reshape(B, H2 * W2, dim)
    out = _fused_call(x1r, x2r, params, H=H, W=W, H2=H2, W2=W2,
                      dim=dim, num_heads=num_heads, out_dim=out_dim)
    # keep the module's NCHW output convention
    return jnp.transpose(out.reshape(B, H, W, out_dim), (0, 3, 1, 2))


# ----------------------------------- main --------------------------------------

if __name__ == "__main__":
    key = jax.random.PRNGKey(0)
    k1, k2, kp = jax.random.split(key, 3)

    B, dim, H, W = 2, 32, 8, 8
    ms_dim, H2, W2 = 32, 4, 4
    out_dim, num_heads = 64, 2

    x1 = jax.random.normal(k1, (B, dim, H, W), jnp.float32)
    x2 = jax.random.normal(k2, (B, ms_dim, H2, W2), jnp.float32)
    params = init_params(kp, dim=dim, ms_dim=ms_dim, out_dim=out_dim)

    fwd = jax.jit(functools.partial(forward, num_heads=num_heads))
    out = fwd(x1, x2, params)
    jax.block_until_ready(out)
    assert out.shape == (B, out_dim, H, W), out.shape
    assert bool(jnp.all(jnp.isfinite(out)))
    print("KERNEL_OK")
</pallas_src>

<mosaic_0001>
module attributes {stable_mosaic.version = 11 : i64} {
  func.func @_msa_fused_kernel(%arg0: i32, %arg1: memref<1x64x32xf32, #tpu.memory_space<vmem>>, %arg2: memref<1x16x32xf32, #tpu.memory_space<vmem>>, %arg3: memref<32x96xf32, #tpu.memory_space<vmem>>, %arg4: memref<1x96xf32, #tpu.memory_space<vmem>>, %arg5: memref<9x96xf32, #tpu.memory_space<vmem>>, %arg6: memref<1x96xf32, #tpu.memory_space<vmem>>, %arg7: memref<32x32xf32, #tpu.memory_space<vmem>>, %arg8: memref<1x32xf32, #tpu.memory_space<vmem>>, %arg9: memref<9x32xf32, #tpu.memory_space<vmem>>, %arg10: memref<1x32xf32, #tpu.memory_space<vmem>>, %arg11: memref<800x96xf32, #tpu.memory_space<vmem>>, %arg12: memref<1x96xf32, #tpu.memory_space<vmem>>, %arg13: memref<96x128xf32, #tpu.memory_space<vmem>>, %arg14: memref<1x128xf32, #tpu.memory_space<vmem>>, %arg15: memref<9x128xf32, #tpu.memory_space<vmem>>, %arg16: memref<1x128xf32, #tpu.memory_space<vmem>>, %arg17: memref<128x64xf32, #tpu.memory_space<vmem>>, %arg18: memref<1x64xf32, #tpu.memory_space<vmem>>, %arg19: memref<96x64xf32, #tpu.memory_space<vmem>>, %arg20: memref<1x64xf32, #tpu.memory_space<vmem>>, %arg21: memref<1x64x64xf32, #tpu.memory_space<vmem>>, %arg22: memref<208x96xf32, #tpu.memory_space<vmem>>, %arg23: memref<160x96xf32, #tpu.memory_space<vmem>>, %arg24: memref<80x32xf32, #tpu.memory_space<vmem>>, %arg25: memref<272x32xf32, #tpu.memory_space<vmem>>, %arg26: memref<256x160xf32, #tpu.memory_space<vmem>>, %arg27: memref<192x96xf32, #tpu.memory_space<vmem>>, %arg28: memref<208x128xf32, #tpu.memory_space<vmem>>, %arg29: memref<160x128xf32, #tpu.memory_space<vmem>>) attributes {dimension_semantics = [#tpu.dimension_semantics<parallel>], iteration_bounds = array<i64: 2>, scalar_prefetch = 0 : i64, scratch_operands = 8 : i64, tpu.core_type = #tpu.core_type<tc>, window_params = [{transform_indices = @transform_0, window_bounds = array<i64: 1, 64, 32>}, {transform_indices = @transform_1, window_bounds = array<i64: 1, 16, 32>}, {pipeline_mode = #tpu.pipeline_mode<synchronous>, transform_indices = @transform_2, window_bounds = array<i64: 32, 96>}, {pipeline_mode = #tpu.pipeline_mode<synchronous>, transform_indices = @transform_3, window_bounds = array<i64: 1, 96>}, {pipeline_mode = #tpu.pipeline_mode<synchronous>, transform_indices = @transform_4, window_bounds = array<i64: 9, 96>}, {pipeline_mode = #tpu.pipeline_mode<synchronous>, transform_indices = @transform_5, window_bounds = array<i64: 1, 96>}, {pipeline_mode = #tpu.pipeline_mode<synchronous>, transform_indices = @transform_6, window_bounds = array<i64: 32, 32>}, {pipeline_mode = #tpu.pipeline_mode<synchronous>, transform_indices = @transform_7, window_bounds = array<i64: 1, 32>}, {pipeline_mode = #tpu.pipeline_mode<synchronous>, transform_indices = @transform_8, window_bounds = array<i64: 9, 32>}, {pipeline_mode = #tpu.pipeline_mode<synchronous>, transform_indices = @transform_9, window_bounds = array<i64: 1, 32>}, {pipeline_mode = #tpu.pipeline_mode<synchronous>, transform_indices = @transform_10, window_bounds = array<i64: 800, 96>}, {pipeline_mode = #tpu.pipeline_mode<synchronous>, transform_indices = @transform_11, window_bounds = array<i64: 1, 96>}, {pipeline_mode = #tpu.pipeline_mode<synchronous>, transform_indices = @transform_12, window_bounds = array<i64: 96, 128>}, {pipeline_mode = #tpu.pipeline_mode<synchronous>, transform_indices = @transform_13, window_bounds = array<i64: 1, 128>}, {pipeline_mode = #tpu.pipeline_mode<synchronous>, transform_indices = @transform_14, window_bounds = array<i64: 9, 128>}, {pipeline_mode = #tpu.pipeline_mode<synchronous>, transform_indices = @transform_15, window_bounds = array<i64: 1, 128>}, {pipeline_mode = #tpu.pipeline_mode<synchronous>, transform_indices = @transform_16, window_bounds = array<i64: 128, 64>}, {pipeline_mode = #tpu.pipeline_mode<synchronous>, transform_indices = @transform_17, window_bounds = array<i64: 1, 64>}, {pipeline_mode = #tpu.pipeline_mode<synchronous>, transform_indices = @transform_18, window_bounds = array<i64: 96, 64>}, {pipeline_mode = #tpu.pipeline_mode<synchronous>, transform_indices = @transform_19, window_bounds = array<i64: 1, 64>}, {transform_indices = @transform_20, window_bounds = array<i64: 1, 64, 64>}]} {
    %c0 = arith.constant 0 : index
    %c0_0 = arith.constant 0 : index
    %c0_1 = arith.constant 0 : index
    %0 = vector.load %arg1[%c0, %c0_0, %c0_1] : memref<1x64x32xf32, #tpu.memory_space<vmem>>, vector<1x64x32xf32>
    %1 = vector.shape_cast %0 : vector<1x64x32xf32> to vector<64x32xf32>
    %c0_2 = arith.constant 0 : index
    %c0_3 = arith.constant 0 : index
    %2 = vector.load %arg3[%c0_2, %c0_3] : memref<32x96xf32, #tpu.memory_space<vmem>>, vector<32x96xf32>
    %cst = arith.constant dense<0.000000e+00> : vector<64x96xf32>
    %3 = tpu.matmul %1, %2, %cst {dimension_numbers = #tpu.dot_dimension_numbers<[1], [0], [0], [1], [0, 0, 1, 1], [], []>} : vector<64x32xf32>, vector<32x96xf32>, vector<64x96xf32> -> vector<64x96xf32>
    %c0_4 = arith.constant 0 : index
    %c0_5 = arith.constant 0 : index
    %4 = vector.load %arg4[%c0_4, %c0_5] : memref<1x96xf32, #tpu.memory_space<vmem>>, vector<1x96xf32>
    %5 = vector.broadcast %4 : vector<1x96xf32> to vector<64x96xf32>
    %6 = arith.addf %3, %5 : vector<64x96xf32>
    %cst_6 = arith.constant 0.000000e+00 : f32
    %7 = vector.broadcast %cst_6 : f32 to vector<208x96xf32>
    %c0_7 = arith.constant 0 : index
    %c0_8 = arith.constant 0 : index
    %8 = vector.load %arg22[%c0_7, %c0_8] : memref<208x96xf32, #tpu.memory_space<vmem>>, vector<208x96xf32>
    tpu.vector_store %arg22[%c0_7, %c0_8], %7 {strides = array<i32>} : memref<208x96xf32, #tpu.memory_space<vmem>>, vector<208x96xf32>,
    %9 = vector.extract_strided_slice %6 {offsets = [0, 0], sizes = [8, 96], strides = [1, 1]} : vector<64x96xf32> to vector<8x96xf32>
    %c41 = arith.constant 41 : index
    %c0_9 = arith.constant 0 : index
    %10 = vector.load %arg22[%c41, %c0_9] : memref<208x96xf32, #tpu.memory_space<vmem>>, vector<8x96xf32>
    tpu.vector_store %arg22[%c41, %c0_9], %9 {strides = array<i32>} : memref<208x96xf32, #tpu.memory_space<vmem>>, vector<8x96xf32>,
    %11 = vector.extract_strided_slice %6 {offsets = [8, 0], sizes = [8, 96], strides = [1, 1]} : vector<64x96xf32> to vector<8x96xf32>
    %c57 = arith.constant 57 : index
    %c0_10 = arith.constant 0 : index
    %12 = vector.load %arg22[%c57, %c0_10] : memref<208x96xf32, #tpu.memory_space<vmem>>, vector<8x96xf32>
    tpu.vector_store %arg22[%c57, %c0_10], %11 {strides = array<i32>} : memref<208x96xf32, #tpu.memory_space<vmem>>, vector<8x96xf32>,
    %13 = vector.extract_strided_slice %6 {offsets = [16, 0], sizes = [8, 96], strides = [1, 1]} : vector<64x96xf32> to vector<8x96xf32>
    %c73 = arith.constant 73 : index
    %c0_11 = arith.constant 0 : index
    %14 = vector.load %arg22[%c73, %c0_11] : memref<208x96xf32, #tpu.memory_space<vmem>>, vector<8x96xf32>
    tpu.vector_store %arg22[%c73, %c0_11], %13 {strides = array<i32>} : memref<208x96xf32, #tpu.memory_space<vmem>>, vector<8x96xf32>,
    %15 = vector.extract_strided_slice %6 {offsets = [24, 0], sizes = [8, 96], strides = [1, 1]} : vector<64x96xf32> to vector<8x96xf32>
    %c89 = arith.constant 89 : index
    %c0_12 = arith.constant 0 : index
    %16 = vector.load %arg22[%c89, %c0_12] : memref<208x96xf32, #tpu.memory_space<vmem>>, vector<8x96xf32>
    tpu.vector_store %arg22[%c89, %c0_12], %15 {strides = array<i32>} : memref<208x96xf32, #tpu.memory_space<vmem>>, vector<8x96xf32>,
    %17 = vector.extract_strided_slice %6 {offsets = [32, 0], sizes = [8, 96], strides = [1, 1]} : vector<64x96xf32> to vector<8x96xf32>
    %c105 = arith.constant 105 : index
    %c0_13 = arith.constant 0 : index
    %18 = vector.load %arg22[%c105, %c0_13] : memref<208x96xf32, #tpu.memory_space<vmem>>, vector<8x96xf32>
    tpu.vector_store %arg22[%c105, %c0_13], %17 {strides = array<i32>} : memref<208x96xf32, #tpu.memory_space<vmem>>, vector<8x96xf32>,
    %19 = vector.extract_strided_slice %6 {offsets = [40, 0], sizes = [8, 96], strides = [1, 1]} : vector<64x96xf32> to vector<8x96xf32>
    %c121 = arith.constant 121 : index
    %c0_14 = arith.constant 0 : index
    %20 = vector.load %arg22[%c121, %c0_14] : memref<208x96xf32, #tpu.memory_space<vmem>>, vector<8x96xf32>
    tpu.vector_store %arg22[%c121, %c0_14], %19 {strides = array<i32>} : memref<208x96xf32, #tpu.memory_space<vmem>>, vector<8x96xf32>,
    %21 = vector.extract_strided_slice %6 {offsets = [48, 0], sizes = [8, 96], strides = [1, 1]} : vector<64x96xf32> to vector<8x96xf32>
    %c137 = arith.constant 137 : index
    %c0_15 = arith.constant 0 : index
    %22 = vector.load %arg22[%c137, %c0_15] : memref<208x96xf32, #tpu.memory_space<vmem>>, vector<8x96xf32>
    tpu.vector_store %arg22[%c137, %c0_15], %21 {strides = array<i32>} : memref<208x96xf32, #tpu.memory_space<vmem>>, vector<8x96xf32>,
    %23 = vector.extract_strided_slice %6 {offsets = [56, 0], sizes = [8, 96], strides = [1, 1]} : vector<64x96xf32> to vector<8x96xf32>
    %c153 = arith.constant 153 : index
    %c0_16 = arith.constant 0 : index
    %24 = vector.load %arg22[%c153, %c0_16] : memref<208x96xf32, #tpu.memory_space<vmem>>, vector<8x96xf32>
    tpu.vector_store %arg22[%c153, %c0_16], %23 {strides = array<i32>} : memref<208x96xf32, #tpu.memory_space<vmem>>, vector<8x96xf32>,
    %c0_17 = arith.constant 0 : index
    %c0_18 = arith.constant 0 : index
    %25 = vector.load %arg5[%c0_17, %c0_18] : memref<9x96xf32, #tpu.memory_space<vmem>>, vector<9x96xf32>
    %cst_19 = arith.constant 0.000000e+00 : f32
    %26 = vector.broadcast %cst_19 : f32 to vector<160x96xf32>
    %c7 = arith.constant 7 : index
    %c0_20 = arith.constant 0 : index
    %27 = vector.load %arg22[%c7, %c0_20] : memref<208x96xf32, #tpu.memory_space<vmem>>, vector<160x96xf32>
    %28 = vector.extract_strided_slice %25 {offsets = [0, 0], sizes = [1, 96], strides = [1, 1]} : vector<9x96xf32> to vector<1x96xf32>
    %29 = vector.broadcast %28 : vector<1x96xf32> to vector<160x96xf32>
    %30 = arith.mulf %27, %29 : vector<160x96xf32>
    %31 = arith.addf %26, %30 : vector<160x96xf32>
    %c8 = arith.constant 8 : index
    %c0_21 = arith.constant 0 : index
    %32 = vector.load %arg22[%c8, %c0_21] : memref<208x96xf32, #tpu.memory_space<vmem>>, vector<160x96xf32>
    %33 = vector.extract_strided_slice %25 {offsets = [1, 0], sizes = [1, 96], strides = [1, 1]} : vector<9x96xf32> to vector<1x96xf32>
    %34 = vector.broadcast %33 : vector<1x96xf32> to vector<160x96xf32>
    %35 = arith.mulf %32, %34 : vector<160x96xf32>
    %36 = arith.addf %31, %35 : vector<160x96xf32>
    %c9 = arith.constant 9 : index
    %c0_22 = arith.constant 0 : index
    %37 = vector.load %arg22[%c9, %c0_22] : memref<208x96xf32, #tpu.memory_space<vmem>>, vector<160x96xf32>
    %38 = vector.extract_strided_slice %25 {offsets = [2, 0], sizes = [1, 96], strides = [1, 1]} : vector<9x96xf32> to vector<1x96xf32>
    %39 = vector.broadcast %38 : vector<1x96xf32> to vector<160x96xf32>
    %40 = arith.mulf %37, %39 : vector<160x96xf32>
    %41 = arith.addf %36, %40 : vector<160x96xf32>
    %c23 = arith.constant 23 : index
    %c0_23 = arith.constant 0 : index
    %42 = vector.load %arg22[%c23, %c0_23] : memref<208x96xf32, #tpu.memory_space<vmem>>, vector<160x96xf32>
    %43 = vector.extract_strided_slice %25 {offsets = [3, 0], sizes = [1, 96], strides = [1, 1]} : vector<9x96xf32> to vector<1x96xf32>
    %44 = vector.broadcast %43 : vector<1x96xf32> to vector<160x96xf32>
    %45 = arith.mulf %42, %44 : vector<160x96xf32>
    %46 = arith.addf %41, %45 : vector<160x96xf32>
    %c24 = arith.constant 24 : index
    %c0_24 = arith.constant 0 : index
    %47 = vector.load %arg22[%c24, %c0_24] : memref<208x96xf32, #tpu.memory_space<vmem>>, vector<160x96xf32>
    %48 = vector.extract_strided_slice %25 {offsets = [4, 0], sizes = [1, 96], strides = [1, 1]} : vector<9x96xf32> to vector<1x96xf32>
    %49 = vector.broadcast %48 : vector<1x96xf32> to vector<160x96xf32>
    %50 = arith.mulf %47, %49 : vector<160x96xf32>
    %51 = arith.addf %46, %50 : vector<160x96xf32>
    %c25 = arith.constant 25 : index
    %c0_25 = arith.constant 0 : index
    %52 = vector.load %arg22[%c25, %c0_25] : memref<208x96xf32, #tpu.memory_space<vmem>>, vector<160x96xf32>
    %53 = vector.extract_strided_slice %25 {offsets = [5, 0], sizes = [1, 96], strides = [1, 1]} : vector<9x96xf32> to vector<1x96xf32>
    %54 = vector.broadcast %53 : vector<1x96xf32> to vector<160x96xf32>
    %55 = arith.mulf %52, %54 : vector<160x96xf32>
    %56 = arith.addf %51, %55 : vector<160x96xf32>
    %c39 = arith.constant 39 : index
    %c0_26 = arith.constant 0 : index
    %57 = vector.load %arg22[%c39, %c0_26] : memref<208x96xf32, #tpu.memory_space<vmem>>, vector<160x96xf32>
    %58 = vector.extract_strided_slice %25 {offsets = [6, 0], sizes = [1, 96], strides = [1, 1]} : vector<9x96xf32> to vector<1x96xf32>
    %59 = vector.broadcast %58 : vector<1x96xf32> to vector<160x96xf32>
    %60 = arith.mulf %57, %59 : vector<160x96xf32>
    %61 = arith.addf %56, %60 : vector<160x96xf32>
    %c40 = arith.constant 40 : index
    %c0_27 = arith.constant 0 : index
    %62 = vector.load %arg22[%c40, %c0_27] : memref<208x96xf32, #tpu.memory_space<vmem>>, vector<160x96xf32>
    %63 = vector.extract_strided_slice %25 {offsets = [7, 0], sizes = [1, 96], strides = [1, 1]} : vector<9x96xf32> to vector<1x96xf32>
    %64 = vector.broadcast %63 : vector<1x96xf32> to vector<160x96xf32>
    %65 = arith.mulf %62, %64 : vector<160x96xf32>
    %66 = arith.addf %61, %65 : vector<160x96xf32>
    %c41_28 = arith.constant 41 : index
    %c0_29 = arith.constant 0 : index
    %67 = vector.load %arg22[%c41_28, %c0_29] : memref<208x96xf32, #tpu.memory_space<vmem>>, vector<160x96xf32>
    %68 = vector.extract_strided_slice %25 {offsets = [8, 0], sizes = [1, 96], strides = [1, 1]} : vector<9x96xf32> to vector<1x96xf32>
    %69 = vector.broadcast %68 : vector<1x96xf32> to vector<160x96xf32>
    %70 = arith.mulf %67, %69 : vector<160x96xf32>
    %71 = arith.addf %66, %70 : vector<160x96xf32>
    %c0_30 = arith.constant 0 : index
    %c0_31 = arith.constant 0 : index
    %72 = vector.load %arg6[%c0_30, %c0_31] : memref<1x96xf32, #tpu.memory_space<vmem>>, vector<1x96xf32>
    %73 = vector.broadcast %72 : vector<1x96xf32> to vector<160x96xf32>
    %74 = arith.addf %71, %73 : vector<160x96xf32>
    %c0_32 = arith.constant 0 : index
    %c0_33 = arith.constant 0 : index
    %75 = vector.load %arg23[%c0_32, %c0_33] : memref<160x96xf32, #tpu.memory_space<vmem>>, vector<160x96xf32>
    tpu.vector_store %arg23[%c0_32, %c0_33], %74 {strides = array<i32>} : memref<160x96xf32, #tpu.memory_space<vmem>>, vector<160x96xf32>,
    %c17 = arith.constant 17 : index
    %c0_34 = arith.constant 0 : index
    %76 = vector.load %arg23[%c17, %c0_34] : memref<160x96xf32, #tpu.memory_space<vmem>>, vector<8x96xf32>
    %c33 = arith.constant 33 : index
    %c0_35 = arith.constant 0 : index
    %77 = vector.load %arg23[%c33, %c0_35] : memref<160x96xf32, #tpu.memory_space<vmem>>, vector<8x96xf32>
    %c49 = arith.constant 49 : index
    %c0_36 = arith.constant 0 : index
    %78 = vector.load %arg23[%c49, %c0_36] : memref<160x96xf32, #tpu.memory_space<vmem>>, vector<8x96xf32>
    %c65 = arith.constant 65 : index
    %c0_37 = arith.constant 0 : index
    %79 = vector.load %arg23[%c65, %c0_37] : memref<160x96xf32, #tpu.memory_space<vmem>>, vector<8x96xf32>
    %c81 = arith.constant 81 : index
    %c0_38 = arith.constant 0 : index
    %80 = vector.load %arg23[%c81, %c0_38] : memref<160x96xf32, #tpu.memory_space<vmem>>, vector<8x96xf32>
    %c97 = arith.constant 97 : index
    %c0_39 = arith.constant 0 : index
    %81 = vector.load %arg23[%c97, %c0_39] : memref<160x96xf32, #tpu.memory_space<vmem>>, vector<8x96xf32>
    %c113 = arith.constant 113 : index
    %c0_40 = arith.constant 0 : index
    %82 = vector.load %arg23[%c113, %c0_40] : memref<160x96xf32, #tpu.memory_space<vmem>>, vector<8x96xf32>
    %c129 = arith.constant 129 : index
    %c0_41 = arith.constant 0 : index
    %83 = vector.load %arg23[%c129, %c0_41] : memref<160x96xf32, #tpu.memory_space<vmem>>, vector<8x96xf32>
    %84 = tpu.concatenate %76, %77, %78, %79, %80, %81, %82, %83 in 0 : vector<8x96xf32>, vector<8x96xf32>, vector<8x96xf32>, vector<8x96xf32>, vector<8x96xf32>, vector<8x96xf32>, vector<8x96xf32>, vector<8x96xf32> -> vector<64x96xf32>
    %c0_42 = arith.constant 0 : index
    %c0_43 = arith.constant 0 : index
    %c0_44 = arith.constant 0 : index
    %85 = vector.load %arg2[%c0_42, %c0_43, %c0_44] : memref<1x16x32xf32, #tpu.memory_space<vmem>>, vector<1x16x32xf32>
    %86 = vector.shape_cast %85 : vector<1x16x32xf32> to vector<16x32xf32>
    %c0_45 = arith.constant 0 : index
    %c0_46 = arith.constant 0 : index
    %87 = vector.load %arg7[%c0_45, %c0_46] : memref<32x32xf32, #tpu.memory_space<vmem>>, vector<32x32xf32>
    %cst_47 = arith.constant dense<0.000000e+00> : vector<16x32xf32>
    %88 = tpu.matmul %86, %87, %cst_47 {dimension_numbers = #tpu.dot_dimension_numbers<[1], [0], [0], [1], [0, 0, 1, 1], [], []>} : vector<16x32xf32>, vector<32x32xf32>, vector<16x32xf32> -> vector<16x32xf32>
    %c0_48 = arith.constant 0 : index
    %c0_49 = arith.constant 0 : index
    %89 = vector.load %arg8[%c0_48, %c0_49] : memref<1x32xf32, #tpu.memory_space<vmem>>, vector<1x32xf32>
    %90 = vector.broadcast %89 : vector<1x32xf32> to vector<16x32xf32>
    %91 = arith.addf %88, %90 : vector<16x32xf32>
    %cst_50 = arith.constant 0.000000e+00 : f32
    %92 = vector.broadcast %cst_50 : f32 to vector<80x32xf32>
    %c0_51 = arith.constant 0 : index
    %c0_52 = arith.constant 0 : index
    %93 = vector.load %arg24[%c0_51, %c0_52] : memref<80x32xf32, #tpu.memory_space<vmem>>, vector<80x32xf32>
    tpu.vector_store %arg24[%c0_51, %c0_52], %92 {strides = array<i32>} : memref<80x32xf32, #tpu.memory_space<vmem>>, vector<80x32xf32>,
    %94 = vector.extract_strided_slice %91 {offsets = [0, 0], sizes = [4, 32], strides = [1, 1]} : vector<16x32xf32> to vector<4x32xf32>
    %c25_53 = arith.constant 25 : index
    %c0_54 = arith.constant 0 : index
    %95 = vector.load %arg24[%c25_53, %c0_54] : memref<80x32xf32, #tpu.memory_space<vmem>>, vector<4x32xf32>
    tpu.vector_store %arg24[%c25_53, %c0_54], %94 {strides = array<i32>} : memref<80x32xf32, #tpu.memory_space<vmem>>, vector<4x32xf32>,
    %96 = vector.extract_strided_slice %91 {offsets = [4, 0], sizes = [4, 32], strides = [1, 1]} : vector<16x32xf32> to vector<4x32xf32>
    %c33_55 = arith.constant 33 : index
    %c0_56 = arith.constant 0 : index
    %97 = vector.load %arg24[%c33_55, %c0_56] : memref<80x32xf32, #tpu.memory_space<vmem>>, vector<4x32xf32>
    tpu.vector_store %arg24[%c33_55, %c0_56], %96 {strides = array<i32>} : memref<80x32xf32, #tpu.memory_space<vmem>>, vector<4x32xf32>,
    %98 = vector.extract_strided_slice %91 {offsets = [8, 0], sizes = [4, 32], strides = [1, 1]} : vector<16x32xf32> to vector<4x32xf32>
    %c41_57 = arith.constant 41 : index
    %c0_58 = arith.constant 0 : index
    %99 = vector.load %arg24[%c41_57, %c0_58] : memref<80x32xf32, #tpu.memory_space<vmem>>, vector<4x32xf32>
    tpu.vector_store %arg24[%c41_57, %c0_58], %98 {strides = array<i32>} : memref<80x32xf32, #tpu.memory_space<vmem>>, vector<4x32xf32>,
    %100 = vector.extract_strided_slice %91 {offsets = [12, 0], sizes = [4, 32], strides = [1, 1]} : vector<16x32xf32> to vector<4x32xf32>
    %c49_59 = arith.constant 49 : index
    %c0_60 = arith.constant 0 : index
    %101 = vector.load %arg24[%c49_59, %c0_60] : memref<80x32xf32, #tpu.memory_space<vmem>>, vector<4x32xf32>
    tpu.vector_store %arg24[%c49_59, %c0_60], %100 {strides = array<i32>} : memref<80x32xf32, #tpu.memory_space<vmem>>, vector<4x32xf32>,
    %c0_61 = arith.constant 0 : index
    %c0_62 = arith.constant 0 : index
    %102 = vector.load %arg9[%c0_61, %c0_62] : memref<9x32xf32, #tpu.memory_space<vmem>>, vector<9x32xf32>
    %cst_63 = arith.constant 0.000000e+00 : f32
    %103 = vector.broadcast %cst_63 : f32 to vector<48x32xf32>
    %c7_64 = arith.constant 7 : index
    %c0_65 = arith.constant 0 : index
    %104 = vector.load %arg24[%c7_64, %c0_65] : memref<80x32xf32, #tpu.memory_space<vmem>>, vector<48x32xf32>
    %105 = vector.extract_strided_slice %102 {offsets = [0, 0], sizes = [1, 32], strides = [1, 1]} : vector<9x32xf32> to vector<1x32xf32>
    %106 = vector.broadcast %105 : vector<1x32xf32> to vector<48x32xf32>
    %107 = arith.mulf %104, %106 : vector<48x32xf32>
    %108 = arith.addf %103, %107 : vector<48x32xf32>
    %c8_66 = arith.constant 8 : index
    %c0_67 = arith.constant 0 : index
    %109 = vector.load %arg24[%c8_66, %c0_67] : memref<80x32xf32, #tpu.memory_space<vmem>>, vector<48x32xf32>
    %110 = vector.extract_strided_slice %102 {offsets = [1, 0], sizes = [1, 32], strides = [1, 1]} : vector<9x32xf32> to vector<1x32xf32>
    %111 = vector.broadcast %110 : vector<1x32xf32> to vector<48x32xf32>
    %112 = arith.mulf %109, %111 : vector<48x32xf32>
    %113 = arith.addf %108, %112 : vector<48x32xf32>
    %c9_68 = arith.constant 9 : index
    %c0_69 = arith.constant 0 : index
    %114 = vector.load %arg24[%c9_68, %c0_69] : memref<80x32xf32, #tpu.memory_space<vmem>>, vector<48x32xf32>
    %115 = vector.extract_strided_slice %102 {offsets = [2, 0], sizes = [1, 32], strides = [1, 1]} : vector<9x32xf32> to vector<1x32xf32>
    %116 = vector.broadcast %115 : vector<1x32xf32> to vector<48x32xf32>
    %117 = arith.mulf %114, %116 : vector<48x32xf32>
    %118 = arith.addf %113, %117 : vector<48x32xf32>
    %c15 = arith.constant 15 : index
    %c0_70 = arith.constant 0 : index
    %119 = vector.load %arg24[%c15, %c0_70] : memref<80x32xf32, #tpu.memory_space<vmem>>, vector<48x32xf32>
    %120 = vector.extract_strided_slice %102 {offsets = [3, 0], sizes = [1, 32], strides = [1, 1]} : vector<9x32xf32> to vector<1x32xf32>
    %121 = vector.broadcast %120 : vector<1x32xf32> to vector<48x32xf32>
    %122 = arith.mulf %119, %121 : vector<48x32xf32>
    %123 = arith.addf %118, %122 : vector<48x32xf32>
    %c16 = arith.constant 16 : index
    %c0_71 = arith.constant 0 : index
    %124 = vector.load %arg24[%c16, %c0_71] : memref<80x32xf32, #tpu.memory_space<vmem>>, vector<48x32xf32>
    %125 = vector.extract_strided_slice %102 {offsets = [4, 0], sizes = [1, 32], strides = [1, 1]} : vector<9x32xf32> to vector<1x32xf32>
    %126 = vector.broadcast %125 : vector<1x32xf32> to vector<48x32xf32>
    %127 = arith.mulf %124, %126 : vector<48x32xf32>
    %128 = arith.addf %123, %127 : vector<48x32xf32>
    %c17_72 = arith.constant 17 : index
    %c0_73 = arith.constant 0 : index
    %129 = vector.load %arg24[%c17_72, %c0_73] : memref<80x32xf32, #tpu.memory_space<vmem>>, vector<48x32xf32>
    %130 = vector.extract_strided_slice %102 {offsets = [5, 0], sizes = [1, 32], strides = [1, 1]} : vector<9x32xf32> to vector<1x32xf32>
    %131 = vector.broadcast %130 : vector<1x32xf32> to vector<48x32xf32>
    %132 = arith.mulf %129, %131 : vector<48x32xf32>
    %133 = arith.addf %128, %132 : vector<48x32xf32>
    %c23_74 = arith.constant 23 : index
    %c0_75 = arith.constant 0 : index
    %134 = vector.load %arg24[%c23_74, %c0_75] : memref<80x32xf32, #tpu.memory_space<vmem>>, vector<48x32xf32>
    %135 = vector.extract_strided_slice %102 {offsets = [6, 0], sizes = [1, 32], strides = [1, 1]} : vector<9x32xf32> to vector<1x32xf32>
    %136 = vector.broadcast %135 : vector<1x32xf32> to vector<48x32xf32>
    %137 = arith.mulf %134, %136 : vector<48x32xf32>
    %138 = arith.addf %133, %137 : vector<48x32xf32>
    %c24_76 = arith.constant 24 : index
    %c0_77 = arith.constant 0 : index
    %139 = vector.load %arg24[%c24_76, %c0_77] : memref<80x32xf32, #tpu.memory_space<vmem>>, vector<48x32xf32>
    %140 = vector.extract_strided_slice %102 {offsets = [7, 0], sizes = [1, 32], strides = [1, 1]} : vector<9x32xf32> to vector<1x32xf32>
    %141 = vector.broadcast %140 : vector<1x32xf32> to vector<48x32xf32>
    %142 = arith.mulf %139, %141 : vector<48x32xf32>
    %143 = arith.addf %138, %142 : vector<48x32xf32>
    %c25_78 = arith.constant 25 : index
    %c0_79 = arith.constant 0 : index
    %144 = vector.load %arg24[%c25_78, %c0_79] : memref<80x32xf32, #tpu.memory_space<vmem>>, vector<48x32xf32>
    %145 = vector.extract_strided_slice %102 {offsets = [8, 0], sizes = [1, 32], strides = [1, 1]} : vector<9x32xf32> to vector<1x32xf32>
    %146 = vector.broadcast %145 : vector<1x32xf32> to vector<48x32xf32>
    %147 = arith.mulf %144, %146 : vector<48x32xf32>
    %148 = arith.addf %143, %147 : vector<48x32xf32>
    %c0_80 = arith.constant 0 : index
    %c0_81 = arith.constant 0 : index
    %149 = vector.load %arg10[%c0_80, %c0_81] : memref<1x32xf32, #tpu.memory_space<vmem>>, vector<1x32xf32>
    %150 = vector.broadcast %149 : vector<1x32xf32> to vector<48x32xf32>
    %151 = arith.addf %148, %150 : vector<48x32xf32>
    %152 = vector.extract_strided_slice %151 {offsets = [9, 0], sizes = [4, 32], strides = [1, 1]} : vector<48x32xf32> to vector<4x32xf32>
    %153 = vector.extract_strided_slice %151 {offsets = [17, 0], sizes = [4, 32], strides = [1, 1]} : vector<48x32xf32> to vector<4x32xf32>
    %154 = vector.extract_strided_slice %151 {offsets = [25, 0], sizes = [4, 32], strides = [1, 1]} : vector<48x32xf32> to vector<4x32xf32>
    %155 = vector.extract_strided_slice %151 {offsets = [33, 0], sizes = [4, 32], strides = [1, 1]} : vector<48x32xf32> to vector<4x32xf32>
    %156 = tpu.concatenate %152, %153, %154, %155 in 0 : vector<4x32xf32>, vector<4x32xf32>, vector<4x32xf32>, vector<4x32xf32> -> vector<16x32xf32>
    %157 = vector.extract_strided_slice %84 {offsets = [0, 0], sizes = [64, 16], strides = [1, 1]} : vector<64x96xf32> to vector<64x16xf32>
    %158 = vector.extract_strided_slice %84 {offsets = [0, 32], sizes = [64, 16], strides = [1, 1]} : vector<64x96xf32> to vector<64x16xf32>
    %159 = vector.extract_strided_slice %84 {offsets = [0, 64], sizes = [64, 16], strides = [1, 1]} : vector<64x96xf32> to vector<64x16xf32>
    %160 = vector.extract_strided_slice %156 {offsets = [0, 0], sizes = [16, 16], strides = [1, 1]} : vector<16x32xf32> to vector<16x16xf32>
    %cst_82 = arith.constant dense<0.000000e+00> : vector<16x64xf32>
    %161 = tpu.matmul %160, %158, %cst_82 {dimension_numbers = #tpu.dot_dimension_numbers<[1], [1], [0], [0], [0, 0, 1, 0], [], []>} : vector<16x16xf32>, vector<64x16xf32>, vector<16x64xf32> -> vector<16x64xf32>
    %cst_83 = arith.constant dense<0xFF800000> : vector<16xf32>
    %162 = vector.multi_reduction <maximumf>, %161, %cst_83 [1] : vector<16x64xf32> to vector<16xf32>
    %163 = vector.shape_cast %162 : vector<16xf32> to vector<16x1xf32>
    %164 = vector.broadcast %163 : vector<16x1xf32> to vector<16x64xf32>
    %165 = arith.subf %161, %164 : vector<16x64xf32>
    %166 = math.exp %165 : vector<16x64xf32>
    %cst_84 = arith.constant dense<0.000000e+00> : vector<16xf32>
    %167 = vector.multi_reduction <add>, %166, %cst_84 [1] : vector<16x64xf32> to vector<16xf32>
    %168 = vector.shape_cast %167 : vector<16xf32> to vector<16x1xf32>
    %169 = tpu.reciprocal %168 {approx = true} : vector<16x1xf32> -> vector<16x1xf32>
    %170 = vector.broadcast %169 : vector<16x1xf32> to vector<16x64xf32>
    %171 = arith.mulf %166, %170 : vector<16x64xf32>
    %cst_85 = arith.constant dense<0.000000e+00> : vector<64x16xf32>
    %172 = tpu.matmul %157, %160, %cst_85 {dimension_numbers = #tpu.dot_dimension_numbers<[1], [1], [0], [0], [0, 0, 1, 0], [], []>} : vector<64x16xf32>, vector<16x16xf32>, vector<64x16xf32> -> vector<64x16xf32>
    %cst_86 = arith.constant dense<0xFF800000> : vector<64xf32>
    %173 = vector.multi_reduction <maximumf>, %172, %cst_86 [1] : vector<64x16xf32> to vector<64xf32>
    %174 = vector.shape_cast %173 : vector<64xf32> to vector<64x1xf32>
    %175 = vector.broadcast %174 : vector<64x1xf32> to vector<64x16xf32>
    %176 = arith.subf %172, %175 : vector<64x16xf32>
    %177 = math.exp %176 : vector<64x16xf32>
    %cst_87 = arith.constant dense<0.000000e+00> : vector<64xf32>
    %178 = vector.multi_reduction <add>, %177, %cst_87 [1] : vector<64x16xf32> to vector<64xf32>
    %179 = vector.shape_cast %178 : vector<64xf32> to vector<64x1xf32>
    %180 = tpu.reciprocal %179 {approx = true} : vector<64x1xf32> -> vector<64x1xf32>
    %181 = vector.broadcast %180 : vector<64x1xf32> to vector<64x16xf32>
    %182 = arith.mulf %177, %181 : vector<64x16xf32>
    %cst_88 = arith.constant dense<0.000000e+00> : vector<16x16xf32>
    %183 = tpu.matmul %171, %159, %cst_88 {dimension_numbers = #tpu.dot_dimension_numbers<[1], [0], [0], [1], [0, 0, 1, 1], [], []>} : vector<16x64xf32>, vector<64x16xf32>, vector<16x16xf32> -> vector<16x16xf32>
    %cst_89 = arith.constant dense<0.000000e+00> : vector<64x16xf32>
    %184 = tpu.matmul %182, %183, %cst_89 {dimension_numbers = #tpu.dot_dimension_numbers<[1], [0], [0], [1], [0, 0, 1, 1], [], []>} : vector<64x16xf32>, vector<16x16xf32>, vector<64x16xf32> -> vector<64x16xf32>
    %185 = vector.extract_strided_slice %84 {offsets = [0, 16], sizes = [64, 16], strides = [1, 1]} : vector<64x96xf32> to vector<64x16xf32>
    %186 = vector.extract_strided_slice %84 {offsets = [0, 48], sizes = [64, 16], strides = [1, 1]} : vector<64x96xf32> to vector<64x16xf32>
    %187 = vector.extract_strided_slice %84 {offsets = [0, 80], sizes = [64, 16], strides = [1, 1]} : vector<64x96xf32> to vector<64x16xf32>
    %188 = vector.extract_strided_slice %156 {offsets = [0, 16], sizes = [16, 16], strides = [1, 1]} : vector<16x32xf32> to vector<16x16xf32>
    %cst_90 = arith.constant dense<0.000000e+00> : vector<16x64xf32>
    %189 = tpu.matmul %188, %186, %cst_90 {dimension_numbers = #tpu.dot_dimension_numbers<[1], [1], [0], [0], [0, 0, 1, 0], [], []>} : vector<16x16xf32>, vector<64x16xf32>, vector<16x64xf32> -> vector<16x64xf32>
    %cst_91 = arith.constant dense<0xFF800000> : vector<16xf32>
    %190 = vector.multi_reduction <maximumf>, %189, %cst_91 [1] : vector<16x64xf32> to vector<16xf32>
    %191 = vector.shape_cast %190 : vector<16xf32> to vector<16x1xf32>
    %192 = vector.broadcast %191 : vector<16x1xf32> to vector<16x64xf32>
    %193 = arith.subf %189, %192 : vector<16x64xf32>
    %194 = math.exp %193 : vector<16x64xf32>
    %cst_92 = arith.constant dense<0.000000e+00> : vector<16xf32>
    %195 = vector.multi_reduction <add>, %194, %cst_92 [1] : vector<16x64xf32> to vector<16xf32>
    %196 = vector.shape_cast %195 : vector<16xf32> to vector<16x1xf32>
    %197 = tpu.reciprocal %196 {approx = true} : vector<16x1xf32> -> vector<16x1xf32>
    %198 = vector.broadcast %197 : vector<16x1xf32> to vector<16x64xf32>
    %199 = arith.mulf %194, %198 : vector<16x64xf32>
    %cst_93 = arith.constant dense<0.000000e+00> : vector<64x16xf32>
    %200 = tpu.matmul %185, %188, %cst_93 {dimension_numbers = #tpu.dot_dimension_numbers<[1], [1], [0], [0], [0, 0, 1, 0], [], []>} : vector<64x16xf32>, vector<16x16xf32>, vector<64x16xf32> -> vector<64x16xf32>
    %cst_94 = arith.constant dense<0xFF800000> : vector<64xf32>
    %201 = vector.multi_reduction <maximumf>, %200, %cst_94 [1] : vector<64x16xf32> to vector<64xf32>
    %202 = vector.shape_cast %201 : vector<64xf32> to vector<64x1xf32>
    %203 = vector.broadcast %202 : vector<64x1xf32> to vector<64x16xf32>
    %204 = arith.subf %200, %203 : vector<64x16xf32>
    %205 = math.exp %204 : vector<64x16xf32>
    %cst_95 = arith.constant dense<0.000000e+00> : vector<64xf32>
    %206 = vector.multi_reduction <add>, %205, %cst_95 [1] : vector<64x16xf32> to vector<64xf32>
    %207 = vector.shape_cast %206 : vector<64xf32> to vector<64x1xf32>
    %208 = tpu.reciprocal %207 {approx = true} : vector<64x1xf32> -> vector<64x1xf32>
    %209 = vector.broadcast %208 : vector<64x1xf32> to vector<64x16xf32>
    %210 = arith.mulf %205, %209 : vector<64x16xf32>
    %cst_96 = arith.constant dense<0.000000e+00> : vector<16x16xf32>
    %211 = tpu.matmul %199, %187, %cst_96 {dimension_numbers = #tpu.dot_dimension_numbers<[1], [0], [0], [1], [0, 0, 1, 1], [], []>} : vector<16x64xf32>, vector<64x16xf32>, vector<16x16xf32> -> vector<16x16xf32>
    %cst_97 = arith.constant dense<0.000000e+00> : vector<64x16xf32>
    %212 = tpu.matmul %210, %211, %cst_97 {dimension_numbers = #tpu.dot_dimension_numbers<[1], [0], [0], [1], [0, 0, 1, 1], [], []>} : vector<64x16xf32>, vector<16x16xf32>, vector<64x16xf32> -> vector<64x16xf32>
    %213 = tpu.concatenate %184, %212 in 1 : vector<64x16xf32>, vector<64x16xf32> -> vector<64x32xf32>
    %cst_98 = arith.constant 0.000000e+00 : f32
    %214 = vector.broadcast %cst_98 : f32 to vector<272x32xf32>
    %c0_99 = arith.constant 0 : index
    %c0_100 = arith.constant 0 : index
    %215 = vector.load %arg25[%c0_99, %c0_100] : memref<272x32xf32, #tpu.memory_space<vmem>>, vector<272x32xf32>
    tpu.vector_store %arg25[%c0_99, %c0_100], %214 {strides = array<i32>} : memref<272x32xf32, #tpu.memory_space<vmem>>, vector<272x32xf32>,
    %216 = vector.extract_strided_slice %213 {offsets = [0, 0], sizes = [8, 32], strides = [1, 1]} : vector<64x32xf32> to vector<8x32xf32>
    %c74 = arith.constant 74 : index
    %c0_101 = arith.constant 0 : index
    %217 = vector.load %arg25[%c74, %c0_101] : memref<272x32xf32, #tpu.memory_space<vmem>>, vector<8x32xf32>
    tpu.vector_store %arg25[%c74, %c0_101], %216 {strides = array<i32>} : memref<272x32xf32, #tpu.memory_space<vmem>>, vector<8x32xf32>,
    %218 = vector.extract_strided_slice %213 {offsets = [8, 0], sizes = [8, 32], strides = [1, 1]} : vector<64x32xf32> to vector<8x32xf32>
    %c90 = arith.constant 90 : index
    %c0_102 = arith.constant 0 : index
    %219 = vector.load %arg25[%c90, %c0_102] : memref<272x32xf32, #tpu.memory_space<vmem>>, vector<8x32xf32>
    tpu.vector_store %arg25[%c90, %c0_102], %218 {strides = array<i32>} : memref<272x32xf32, #tpu.memory_space<vmem>>, vector<8x32xf32>,
    %220 = vector.extract_strided_slice %213 {offsets = [16, 0], sizes = [8, 32], strides = [1, 1]} : vector<64x32xf32> to vector<8x32xf32>
    %c106 = arith.constant 106 : index
    %c0_103 = arith.constant 0 : index
    %221 = vector.load %arg25[%c106, %c0_103] : memref<272x32xf32, #tpu.memory_space<vmem>>, vector<8x32xf32>
    tpu.vector_store %arg25[%c106, %c0_103], %220 {strides = array<i32>} : memref<272x32xf32, #tpu.memory_space<vmem>>, vector<8x32xf32>,
    %222 = vector.extract_strided_slice %213 {offsets = [24, 0], sizes = [8, 32], strides = [1, 1]} : vector<64x32xf32> to vector<8x32xf32>
    %c122 = arith.constant 122 : index
    %c0_104 = arith.constant 0 : index
    %223 = vector.load %arg25[%c122, %c0_104] : memref<272x32xf32, #tpu.memory_space<vmem>>, vector<8x32xf32>
    tpu.vector_store %arg25[%c122, %c0_104], %222 {strides = array<i32>} : memref<272x32xf32, #tpu.memory_space<vmem>>, vector<8x32xf32>,
    %224 = vector.extract_strided_slice %213 {offsets = [32, 0], sizes = [8, 32], strides = [1, 1]} : vector<64x32xf32> to vector<8x32xf32>
    %c138 = arith.constant 138 : index
    %c0_105 = arith.constant 0 : index
    %225 = vector.load %arg25[%c138, %c0_105] : memref<272x32xf32, #tpu.memory_space<vmem>>, vector<8x32xf32>
    tpu.vector_store %arg25[%c138, %c0_105], %224 {strides = array<i32>} : memref<272x32xf32, #tpu.memory_space<vmem>>, vector<8x32xf32>,
    %226 = vector.extract_strided_slice %213 {offsets = [40, 0], sizes = [8, 32], strides = [1, 1]} : vector<64x32xf32> to vector<8x32xf32>
    %c154 = arith.constant 154 : index
    %c0_106 = arith.constant 0 : index
    %227 = vector.load %arg25[%c154, %c0_106] : memref<272x32xf32, #tpu.memory_space<vmem>>, vector<8x32xf32>
    tpu.vector_store %arg25[%c154, %c0_106], %226 {strides = array<i32>} : memref<272x32xf32, #tpu.memory_space<vmem>>, vector<8x32xf32>,
    %228 = vector.extract_strided_slice %213 {offsets = [48, 0], sizes = [8, 32], strides = [1, 1]} : vector<64x32xf32> to vector<8x32xf32>
    %c170 = arith.constant 170 : index
    %c0_107 = arith.constant 0 : index
    %229 = vector.load %arg25[%c170, %c0_107] : memref<272x32xf32, #tpu.memory_space<vmem>>, vector<8x32xf32>
    tpu.vector_store %arg25[%c170, %c0_107], %228 {strides = array<i32>} : memref<272x32xf32, #tpu.memory_space<vmem>>, vector<8x32xf32>,
    %230 = vector.extract_strided_slice %213 {offsets = [56, 0], sizes = [8, 32], strides = [1, 1]} : vector<64x32xf32> to vector<8x32xf32>
    %c186 = arith.constant 186 : index
    %c0_108 = arith.constant 0 : index
    %231 = vector.load %arg25[%c186, %c0_108] : memref<272x32xf32, #tpu.memory_space<vmem>>, vector<8x32xf32>
    tpu.vector_store %arg25[%c186, %c0_108], %230 {strides = array<i32>} : memref<272x32xf32, #tpu.memory_space<vmem>>, vector<8x32xf32>,
    %c6 = arith.constant 6 : index
    %c0_109 = arith.constant 0 : index
    %232 = vector.load %arg25[%c6, %c0_109] : memref<272x32xf32, #tpu.memory_space<vmem>>, vector<256x32xf32>
    %c7_110 = arith.constant 7 : index
    %c0_111 = arith.constant 0 : index
    %233 = vector.load %arg25[%c7_110, %c0_111] : memref<272x32xf32, #tpu.memory_space<vmem>>, vector<256x32xf32>
    %c8_112 = arith.constant 8 : index
    %c0_113 = arith.constant 0 : index
    %234 = vector.load %arg25[%c8_112, %c0_113] : memref<272x32xf32, #tpu.memory_space<vmem>>, vector<256x32xf32>
    %c9_114 = arith.constant 9 : index
    %c0_115 = arith.constant 0 : index
    %235 = vector.load %arg25[%c9_114, %c0_115] : memref<272x32xf32, #tpu.memory_space<vmem>>, vector<256x32xf32>
    %c10 = arith.constant 10 : index
    %c0_116 = arith.constant 0 : index
    %236 = vector.load %arg25[%c10, %c0_116] : memref<272x32xf32, #tpu.memory_space<vmem>>, vector<256x32xf32>
    %237 = tpu.concatenate %232, %233, %234, %235, %236 in 1 : vector<256x32xf32>, vector<256x32xf32>, vector<256x32xf32>, vector<256x32xf32>, vector<256x32xf32> -> vector<256x160xf32>
    %c0_117 = arith.constant 0 : index
    %c0_118 = arith.constant 0 : index
    %238 = vector.load %arg26[%c0_117, %c0_118] : memref<256x160xf32, #tpu.memory_space<vmem>>, vector<256x160xf32>
    tpu.vector_store %arg26[%c0_117, %c0_118], %237 {strides = array<i32>} : memref<256x160xf32, #tpu.memory_space<vmem>>, vector<256x160xf32>,
    %cst_119 = arith.constant 0.000000e+00 : f32
    %239 = vector.broadcast %cst_119 : f32 to vector<192x96xf32>
    %c0_120 = arith.constant 0 : index
    %c0_121 = arith.constant 0 : index
    %240 = vector.load %arg26[%c0_120, %c0_121] : memref<256x160xf32, #tpu.memory_space<vmem>>, vector<192x160xf32>
    %c0_122 = arith.constant 0 : index
    %c0_123 = arith.constant 0 : index
    %241 = vector.load %arg11[%c0_122, %c0_123] : memref<800x96xf32, #tpu.memory_space<vmem>>, vector<160x96xf32>
    %cst_124 = arith.constant dense<0.000000e+00> : vector<192x96xf32>
    %242 = tpu.matmul %240, %241, %cst_124 {dimension_numbers = #tpu.dot_dimension_numbers<[1], [0], [0], [1], [0, 0, 1, 1], [], []>} : vector<192x160xf32>, vector<160x96xf32>, vector<192x96xf32> -> vector<192x96xf32>
    %243 = arith.addf %239, %242 : vector<192x96xf32>
    %c16_125 = arith.constant 16 : index
    %c0_126 = arith.constant 0 : index
    %244 = vector.load %arg26[%c16_125, %c0_126] : memref<256x160xf32, #tpu.memory_space<vmem>>, vector<192x160xf32>
    %c160 = arith.constant 160 : index
    %c0_127 = arith.constant 0 : index
    %245 = vector.load %arg11[%c160, %c0_127] : memref<800x96xf32, #tpu.memory_space<vmem>>, vector<160x96xf32>
    %cst_128 = arith.constant dense<0.000000e+00> : vector<192x96xf32>
    %246 = tpu.matmul %244, %245, %cst_128 {dimension_numbers = #tpu.dot_dimension_numbers<[1], [0], [0], [1], [0, 0, 1, 1], [], []>} : vector<192x160xf32>, vector<160x96xf32>, vector<192x96xf32> -> vector<192x96xf32>
    %247 = arith.addf %243, %246 : vector<192x96xf32>
    %c32 = arith.constant 32 : index
    %c0_129 = arith.constant 0 : index
    %248 = vector.load %arg26[%c32, %c0_129] : memref<256x160xf32, #tpu.memory_space<vmem>>, vector<192x160xf32>
    %c320 = arith.constant 320 : index
    %c0_130 = arith.constant 0 : index
    %249 = vector.load %arg11[%c320, %c0_130] : memref<800x96xf32, #tpu.memory_space<vmem>>, vector<160x96xf32>
    %cst_131 = arith.constant dense<0.000000e+00> : vector<192x96xf32>
    %250 = tpu.matmul %248, %249, %cst_131 {dimension_numbers = #tpu.dot_dimension_numbers<[1], [0], [0], [1], [0, 0, 1, 1], [], []>} : vector<192x160xf32>, vector<160x96xf32>, vector<192x96xf32> -> vector<192x96xf32>
    %251 = arith.addf %247, %250 : vector<192x96xf32>
    %c48 = arith.constant 48 : index
    %c0_132 = arith.constant 0 : index
    %252 = vector.load %arg26[%c48, %c0_132] : memref<256x160xf32, #tpu.memory_space<vmem>>, vector<192x160xf32>
    %c480 = arith.constant 480 : index
    %c0_133 = arith.constant 0 : index
    %253 = vector.load %arg11[%c480, %c0_133] : memref<800x96xf32, #tpu.memory_space<vmem>>, vector<160x96xf32>
    %cst_134 = arith.constant dense<0.000000e+00> : vector<192x96xf32>
    %254 = tpu.matmul %252, %253, %cst_134 {dimension_numbers = #tpu.dot_dimension_numbers<[1], [0], [0], [1], [0, 0, 1, 1], [], []>} : vector<192x160xf32>, vector<160x96xf32>, vector<192x96xf32> -> vector<192x96xf32>
    %255 = arith.addf %251, %254 : vector<192x96xf32>
    %c64 = arith.constant 64 : index
    %c0_135 = arith.constant 0 : index
    %256 = vector.load %arg26[%c64, %c0_135] : memref<256x160xf32, #tpu.memory_space<vmem>>, vector<192x160xf32>
    %c640 = arith.constant 640 : index
    %c0_136 = arith.constant 0 : index
    %257 = vector.load %arg11[%c640, %c0_136] : memref<800x96xf32, #tpu.memory_space<vmem>>, vector<160x96xf32>
    %cst_137 = arith.constant dense<0.000000e+00> : vector<192x96xf32>
    %258 = tpu.matmul %256, %257, %cst_137 {dimension_numbers = #tpu.dot_dimension_numbers<[1], [0], [0], [1], [0, 0, 1, 1], [], []>} : vector<192x160xf32>, vector<160x96xf32>, vector<192x96xf32> -> vector<192x96xf32>
    %259 = arith.addf %255, %258 : vector<192x96xf32>
    %c0_138 = arith.constant 0 : index
    %c0_139 = arith.constant 0 : index
    %260 = vector.load %arg12[%c0_138, %c0_139] : memref<1x96xf32, #tpu.memory_space<vmem>>, vector<1x96xf32>
    %261 = vector.broadcast %260 : vector<1x96xf32> to vector<192x96xf32>
    %262 = arith.addf %259, %261 : vector<192x96xf32>
    %c0_140 = arith.constant 0 : index
    %c0_141 = arith.constant 0 : index
    %263 = vector.load %arg27[%c0_140, %c0_141] : memref<192x96xf32, #tpu.memory_space<vmem>>, vector<192x96xf32>
    tpu.vector_store %arg27[%c0_140, %c0_141], %262 {strides = array<i32>} : memref<192x96xf32, #tpu.memory_space<vmem>>, vector<192x96xf32>,
    %c34 = arith.constant 34 : index
    %c0_142 = arith.constant 0 : index
    %264 = vector.load %arg27[%c34, %c0_142] : memref<192x96xf32, #tpu.memory_space<vmem>>, vector<8x96xf32>
    %c50 = arith.constant 50 : index
    %c0_143 = arith.constant 0 : index
    %265 = vector.load %arg27[%c50, %c0_143] : memref<192x96xf32, #tpu.memory_space<vmem>>, vector<8x96xf32>
    %c66 = arith.constant 66 : index
    %c0_144 = arith.constant 0 : index
    %266 = vector.load %arg27[%c66, %c0_144] : memref<192x96xf32, #tpu.memory_space<vmem>>, vector<8x96xf32>
    %c82 = arith.constant 82 : index
    %c0_145 = arith.constant 0 : index
    %267 = vector.load %arg27[%c82, %c0_145] : memref<192x96xf32, #tpu.memory_space<vmem>>, vector<8x96xf32>
    %c98 = arith.constant 98 : index
    %c0_146 = arith.constant 0 : index
    %268 = vector.load %arg27[%c98, %c0_146] : memref<192x96xf32, #tpu.memory_space<vmem>>, vector<8x96xf32>
    %c114 = arith.constant 114 : index
    %c0_147 = arith.constant 0 : index
    %269 = vector.load %arg27[%c114, %c0_147] : memref<192x96xf32, #tpu.memory_space<vmem>>, vector<8x96xf32>
    %c130 = arith.constant 130 : index
    %c0_148 = arith.constant 0 : index
    %270 = vector.load %arg27[%c130, %c0_148] : memref<192x96xf32, #tpu.memory_space<vmem>>, vector<8x96xf32>
    %c146 = arith.constant 146 : index
    %c0_149 = arith.constant 0 : index
    %271 = vector.load %arg27[%c146, %c0_149] : memref<192x96xf32, #tpu.memory_space<vmem>>, vector<8x96xf32>
    %272 = tpu.concatenate %264, %265, %266, %267, %268, %269, %270, %271 in 0 : vector<8x96xf32>, vector<8x96xf32>, vector<8x96xf32>, vector<8x96xf32>, vector<8x96xf32>, vector<8x96xf32>, vector<8x96xf32>, vector<8x96xf32> -> vector<64x96xf32>
    %c0_150 = arith.constant 0 : index
    %c0_151 = arith.constant 0 : index
    %273 = vector.load %arg13[%c0_150, %c0_151] : memref<96x128xf32, #tpu.memory_space<vmem>>, vector<96x128xf32>
    %cst_152 = arith.constant dense<0.000000e+00> : vector<64x128xf32>
    %274 = tpu.matmul %272, %273, %cst_152 {dimension_numbers = #tpu.dot_dimension_numbers<[1], [0], [0], [1], [0, 0, 1, 1], [], []>} : vector<64x96xf32>, vector<96x128xf32>, vector<64x128xf32> -> vector<64x128xf32>
    %c0_153 = arith.constant 0 : index
    %c0_154 = arith.constant 0 : index
    %275 = vector.load %arg14[%c0_153, %c0_154] : memref<1x128xf32, #tpu.memory_space<vmem>>, vector<1x128xf32>
    %276 = vector.broadcast %275 : vector<1x128xf32> to vector<64x128xf32>
    %277 = arith.addf %274, %276 : vector<64x128xf32>
    %cst_155 = arith.constant 5.000000e-01 : f32
    %278 = vector.broadcast %cst_155 : f32 to vector<64x128xf32>
    %279 = arith.mulf %278, %277 : vector<64x128xf32>
    %cst_156 = arith.constant 0.707106769 : f32
    %280 = vector.broadcast %cst_156 : f32 to vector<64x128xf32>
    %281 = arith.mulf %277, %280 : vector<64x128xf32>
    %282 = math.absf %281 : vector<64x128xf32>
    %cst_157 = arith.constant 0.327591091 : f32
    %283 = vector.broadcast %cst_157 : f32 to vector<64x128xf32>
    %284 = arith.mulf %283, %282 : vector<64x128xf32>
    %cst_158 = arith.constant 1.000000e+00 : f32
    %285 = vector.broadcast %cst_158 : f32 to vector<64x128xf32>
    %286 = arith.addf %285, %284 : vector<64x128xf32>
    %cst_159 = arith.constant 1.000000e+00 : f32
    %287 = vector.broadcast %cst_159 : f32 to vector<64x128xf32>
    %288 = arith.divf %287, %286 : vector<64x128xf32>
    %cst_160 = arith.constant 1.06140542 : f32
    %289 = vector.broadcast %cst_160 : f32 to vector<64x128xf32>
    %290 = arith.mulf %289, %288 : vector<64x128xf32>
    %cst_161 = arith.constant -1.45315206 : f32
    %291 = vector.broadcast %cst_161 : f32 to vector<64x128xf32>
    %292 = arith.addf %290, %291 : vector<64x128xf32>
    %293 = arith.mulf %292, %288 : vector<64x128xf32>
    %cst_162 = arith.constant 1.42141378 : f32
    %294 = vector.broadcast %cst_162 : f32 to vector<64x128xf32>
    %295 = arith.addf %293, %294 : vector<64x128xf32>
    %296 = arith.mulf %295, %288 : vector<64x128xf32>
    %cst_163 = arith.constant -0.284496725 : f32
    %297 = vector.broadcast %cst_163 : f32 to vector<64x128xf32>
    %298 = arith.addf %296, %297 : vector<64x128xf32>
    %299 = arith.mulf %298, %288 : vector<64x128xf32>
    %cst_164 = arith.constant 0.254829586 : f32
    %300 = vector.broadcast %cst_164 : f32 to vector<64x128xf32>
    %301 = arith.addf %299, %300 : vector<64x128xf32>
    %302 = arith.mulf %301, %288 : vector<64x128xf32>
    %cst_165 = arith.constant 0.000000e+00 : f32
    %303 = vector.broadcast %cst_165 : f32 to vector<64x128xf32>
    %304 = arith.subf %303, %282 : vector<64x128xf32>
    %305 = arith.mulf %304, %282 : vector<64x128xf32>
    %306 = math.exp %305 : vector<64x128xf32>
    %307 = arith.mulf %302, %306 : vector<64x128xf32>
    %cst_166 = arith.constant 1.000000e+00 : f32
    %308 = vector.broadcast %cst_166 : f32 to vector<64x128xf32>
    %309 = arith.subf %308, %307 : vector<64x128xf32>
    %cst_167 = arith.constant 0.000000e+00 : f32
    %310 = vector.broadcast %cst_167 : f32 to vector<64x128xf32>
    %311 = arith.cmpf oge, %281, %310 : vector<64x128xf32>
    %cst_168 = arith.constant 0.000000e+00 : f32
    %312 = vector.broadcast %cst_168 : f32 to vector<64x128xf32>
    %313 = arith.subf %312, %309 : vector<64x128xf32>
    %314 = arith.select %311, %309, %313 : vector<64x128xi1>, vector<64x128xf32>
    %cst_169 = arith.constant 1.000000e+00 : f32
    %315 = vector.broadcast %cst_169 : f32 to vector<64x128xf32>
    %316 = arith.addf %315, %314 : vector<64x128xf32>
    %317 = arith.mulf %279, %316 : vector<64x128xf32>
    %cst_170 = arith.constant 0.000000e+00 : f32
    %318 = vector.broadcast %cst_170 : f32 to vector<208x128xf32>
    %c0_171 = arith.constant 0 : index
    %c0_172 = arith.constant 0 : index
    %319 = vector.load %arg28[%c0_171, %c0_172] : memref<208x128xf32, #tpu.memory_space<vmem>>, vector<208x128xf32>
    tpu.vector_store %arg28[%c0_171, %c0_172], %318 {strides = array<i32>} : memref<208x128xf32, #tpu.memory_space<vmem>>, vector<208x128xf32>,
    %320 = vector.extract_strided_slice %317 {offsets = [0, 0], sizes = [8, 128], strides = [1, 1]} : vector<64x128xf32> to vector<8x128xf32>
    %c41_173 = arith.constant 41 : index
    %c0_174 = arith.constant 0 : index
    %321 = vector.load %arg28[%c41_173, %c0_174] : memref<208x128xf32, #tpu.memory_space<vmem>>, vector<8x128xf32>
    tpu.vector_store %arg28[%c41_173, %c0_174], %320 {strides = array<i32>} : memref<208x128xf32, #tpu.memory_space<vmem>>, vector<8x128xf32>,
    %322 = vector.extract_strided_slice %317 {offsets = [8, 0], sizes = [8, 128], strides = [1, 1]} : vector<64x128xf32> to vector<8x128xf32>
    %c57_175 = arith.constant 57 : index
    %c0_176 = arith.constant 0 : index
    %323 = vector.load %arg28[%c57_175, %c0_176] : memref<208x128xf32, #tpu.memory_space<vmem>>, vector<8x128xf32>
    tpu.vector_store %arg28[%c57_175, %c0_176], %322 {strides = array<i32>} : memref<208x128xf32, #tpu.memory_space<vmem>>, vector<8x128xf32>,
    %324 = vector.extract_strided_slice %317 {offsets = [16, 0], sizes = [8, 128], strides = [1, 1]} : vector<64x128xf32> to vector<8x128xf32>
    %c73_177 = arith.constant 73 : index
    %c0_178 = arith.constant 0 : index
    %325 = vector.load %arg28[%c73_177, %c0_178] : memref<208x128xf32, #tpu.memory_space<vmem>>, vector<8x128xf32>
    tpu.vector_store %arg28[%c73_177, %c0_178], %324 {strides = array<i32>} : memref<208x128xf32, #tpu.memory_space<vmem>>, vector<8x128xf32>,
    %326 = vector.extract_strided_slice %317 {offsets = [24, 0], sizes = [8, 128], strides = [1, 1]} : vector<64x128xf32> to vector<8x128xf32>
    %c89_179 = arith.constant 89 : index
    %c0_180 = arith.constant 0 : index
    %327 = vector.load %arg28[%c89_179, %c0_180] : memref<208x128xf32, #tpu.memory_space<vmem>>, vector<8x128xf32>
    tpu.vector_store %arg28[%c89_179, %c0_180], %326 {strides = array<i32>} : memref<208x128xf32, #tpu.memory_space<vmem>>, vector<8x128xf32>,
    %328 = vector.extract_strided_slice %317 {offsets = [32, 0], sizes = [8, 128], strides = [1, 1]} : vector<64x128xf32> to vector<8x128xf32>
    %c105_181 = arith.constant 105 : index
    %c0_182 = arith.constant 0 : index
    %329 = vector.load %arg28[%c105_181, %c0_182] : memref<208x128xf32, #tpu.memory_space<vmem>>, vector<8x128xf32>
    tpu.vector_store %arg28[%c105_181, %c0_182], %328 {strides = array<i32>} : memref<208x128xf32, #tpu.memory_space<vmem>>, vector<8x128xf32>,
    %330 = vector.extract_strided_slice %317 {offsets = [40, 0], sizes = [8, 128], strides = [1, 1]} : vector<64x128xf32> to vector<8x128xf32>
    %c121_183 = arith.constant 121 : index
    %c0_184 = arith.constant 0 : index
    %331 = vector.load %arg28[%c121_183, %c0_184] : memref<208x128xf32, #tpu.memory_space<vmem>>, vector<8x128xf32>
    tpu.vector_store %arg28[%c121_183, %c0_184], %330 {strides = array<i32>} : memref<208x128xf32, #tpu.memory_space<vmem>>, vector<8x128xf32>,
    %332 = vector.extract_strided_slice %317 {offsets = [48, 0], sizes = [8, 128], strides = [1, 1]} : vector<64x128xf32> to vector<8x128xf32>
    %c137_185 = arith.constant 137 : index
    %c0_186 = arith.constant 0 : index
    %333 = vector.load %arg28[%c137_185, %c0_186] : memref<208x128xf32, #tpu.memory_space<vmem>>, vector<8x128xf32>
    tpu.vector_store %arg28[%c137_185, %c0_186], %332 {strides = array<i32>} : memref<208x128xf32, #tpu.memory_space<vmem>>, vector<8x128xf32>,
    %334 = vector.extract_strided_slice %317 {offsets = [56, 0], sizes = [8, 128], strides = [1, 1]} : vector<64x128xf32> to vector<8x128xf32>
    %c153_187 = arith.constant 153 : index
    %c0_188 = arith.constant 0 : index
    %335 = vector.load %arg28[%c153_187, %c0_188] : memref<208x128xf32, #tpu.memory_space<vmem>>, vector<8x128xf32>
    tpu.vector_store %arg28[%c153_187, %c0_188], %334 {strides = array<i32>} : memref<208x128xf32, #tpu.memory_space<vmem>>, vector<8x128xf32>,
    %c0_189 = arith.constant 0 : index
    %c0_190 = arith.constant 0 : index
    %336 = vector.load %arg15[%c0_189, %c0_190] : memref<9x128xf32, #tpu.memory_space<vmem>>, vector<9x128xf32>
    %cst_191 = arith.constant 0.000000e+00 : f32
    %337 = vector.broadcast %cst_191 : f32 to vector<160x128xf32>
    %c7_192 = arith.constant 7 : index
    %c0_193 = arith.constant 0 : index
    %338 = vector.load %arg28[%c7_192, %c0_193] : memref<208x128xf32, #tpu.memory_space<vmem>>, vector<160x128xf32>
    %339 = vector.extract_strided_slice %336 {offsets = [0, 0], sizes = [1, 128], strides = [1, 1]} : vector<9x128xf32> to vector<1x128xf32>
    %340 = vector.broadcast %339 : vector<1x128xf32> to vector<160x128xf32>
    %341 = arith.mulf %338, %340 : vector<160x128xf32>
    %342 = arith.addf %337, %341 : vector<160x128xf32>
    %c8_194 = arith.constant 8 : index
    %c0_195 = arith.constant 0 : index
    %343 = vector.load %arg28[%c8_194, %c0_195] : memref<208x128xf32, #tpu.memory_space<vmem>>, vector<160x128xf32>
    %344 = vector.extract_strided_slice %336 {offsets = [1, 0], sizes = [1, 128], strides = [1, 1]} : vector<9x128xf32> to vector<1x128xf32>
    %345 = vector.broadcast %344 : vector<1x128xf32> to vector<160x128xf32>
    %346 = arith.mulf %343, %345 : vector<160x128xf32>
    %347 = arith.addf %342, %346 : vector<160x128xf32>
    %c9_196 = arith.constant 9 : index
    %c0_197 = arith.constant 0 : index
    %348 = vector.load %arg28[%c9_196, %c0_197] : memref<208x128xf32, #tpu.memory_space<vmem>>, vector<160x128xf32>
    %349 = vector.extract_strided_slice %336 {offsets = [2, 0], sizes = [1, 128], strides = [1, 1]} : vector<9x128xf32> to vector<1x128xf32>
    %350 = vector.broadcast %349 : vector<1x128xf32> to vector<160x128xf32>
    %351 = arith.mulf %348, %350 : vector<160x128xf32>
    %352 = arith.addf %347, %351 : vector<160x128xf32>
    %c23_198 = arith.constant 23 : index
    %c0_199 = arith.constant 0 : index
    %353 = vector.load %arg28[%c23_198, %c0_199] : memref<208x128xf32, #tpu.memory_space<vmem>>, vector<160x128xf32>
    %354 = vector.extract_strided_slice %336 {offsets = [3, 0], sizes = [1, 128], strides = [1, 1]} : vector<9x128xf32> to vector<1x128xf32>
    %355 = vector.broadcast %354 : vector<1x128xf32> to vector<160x128xf32>
    %356 = arith.mulf %353, %355 : vector<160x128xf32>
    %357 = arith.addf %352, %356 : vector<160x128xf32>
    %c24_200 = arith.constant 24 : index
    %c0_201 = arith.constant 0 : index
    %358 = vector.load %arg28[%c24_200, %c0_201] : memref<208x128xf32, #tpu.memory_space<vmem>>, vector<160x128xf32>
    %359 = vector.extract_strided_slice %336 {offsets = [4, 0], sizes = [1, 128], strides = [1, 1]} : vector<9x128xf32> to vector<1x128xf32>
    %360 = vector.broadcast %359 : vector<1x128xf32> to vector<160x128xf32>
    %361 = arith.mulf %358, %360 : vector<160x128xf32>
    %362 = arith.addf %357, %361 : vector<160x128xf32>
    %c25_202 = arith.constant 25 : index
    %c0_203 = arith.constant 0 : index
    %363 = vector.load %arg28[%c25_202, %c0_203] : memref<208x128xf32, #tpu.memory_space<vmem>>, vector<160x128xf32>
    %364 = vector.extract_strided_slice %336 {offsets = [5, 0], sizes = [1, 128], strides = [1, 1]} : vector<9x128xf32> to vector<1x128xf32>
    %365 = vector.broadcast %364 : vector<1x128xf32> to vector<160x128xf32>
    %366 = arith.mulf %363, %365 : vector<160x128xf32>
    %367 = arith.addf %362, %366 : vector<160x128xf32>
    %c39_204 = arith.constant 39 : index
    %c0_205 = arith.constant 0 : index
    %368 = vector.load %arg28[%c39_204, %c0_205] : memref<208x128xf32, #tpu.memory_space<vmem>>, vector<160x128xf32>
    %369 = vector.extract_strided_slice %336 {offsets = [6, 0], sizes = [1, 128], strides = [1, 1]} : vector<9x128xf32> to vector<1x128xf32>
    %370 = vector.broadcast %369 : vector<1x128xf32> to vector<160x128xf32>
    %371 = arith.mulf %368, %370 : vector<160x128xf32>
    %372 = arith.addf %367, %371 : vector<160x128xf32>
    %c40_206 = arith.constant 40 : index
    %c0_207 = arith.constant 0 : index
    %373 = vector.load %arg28[%c40_206, %c0_207] : memref<208x128xf32, #tpu.memory_space<vmem>>, vector<160x128xf32>
    %374 = vector.extract_strided_slice %336 {offsets = [7, 0], sizes = [1, 128], strides = [1, 1]} : vector<9x128xf32> to vector<1x128xf32>
    %375 = vector.broadcast %374 : vector<1x128xf32> to vector<160x128xf32>
    %376 = arith.mulf %373, %375 : vector<160x128xf32>
    %377 = arith.addf %372, %376 : vector<160x128xf32>
    %c41_208 = arith.constant 41 : index
    %c0_209 = arith.constant 0 : index
    %378 = vector.load %arg28[%c41_208, %c0_209] : memref<208x128xf32, #tpu.memory_space<vmem>>, vector<160x128xf32>
    %379 = vector.extract_strided_slice %336 {offsets = [8, 0], sizes = [1, 128], strides = [1, 1]} : vector<9x128xf32> to vector<1x128xf32>
    %380 = vector.broadcast %379 : vector<1x128xf32> to vector<160x128xf32>
    %381 = arith.mulf %378, %380 : vector<160x128xf32>
    %382 = arith.addf %377, %381 : vector<160x128xf32>
    %c0_210 = arith.constant 0 : index
    %c0_211 = arith.constant 0 : index
    %383 = vector.load %arg16[%c0_210, %c0_211] : memref<1x128xf32, #tpu.memory_space<vmem>>, vector<1x128xf32>
    %384 = vector.broadcast %383 : vector<1x128xf32> to vector<160x128xf32>
    %385 = arith.addf %382, %384 : vector<160x128xf32>
    %cst_212 = arith.constant 5.000000e-01 : f32
    %386 = vector.broadcast %cst_212 : f32 to vector<160x128xf32>
    %387 = arith.mulf %386, %385 : vector<160x128xf32>
    %cst_213 = arith.constant 0.707106769 : f32
    %388 = vector.broadcast %cst_213 : f32 to vector<160x128xf32>
    %389 = arith.mulf %385, %388 : vector<160x128xf32>
    %390 = math.absf %389 : vector<160x128xf32>
    %cst_214 = arith.constant 0.327591091 : f32
    %391 = vector.broadcast %cst_214 : f32 to vector<160x128xf32>
    %392 = arith.mulf %391, %390 : vector<160x128xf32>
    %cst_215 = arith.constant 1.000000e+00 : f32
    %393 = vector.broadcast %cst_215 : f32 to vector<160x128xf32>
    %394 = arith.addf %393, %392 : vector<160x128xf32>
    %cst_216 = arith.constant 1.000000e+00 : f32
    %395 = vector.broadcast %cst_216 : f32 to vector<160x128xf32>
    %396 = arith.divf %395, %394 : vector<160x128xf32>
    %cst_217 = arith.constant 1.06140542 : f32
    %397 = vector.broadcast %cst_217 : f32 to vector<160x128xf32>
    %398 = arith.mulf %397, %396 : vector<160x128xf32>
    %cst_218 = arith.constant -1.45315206 : f32
    %399 = vector.broadcast %cst_218 : f32 to vector<160x128xf32>
    %400 = arith.addf %398, %399 : vector<160x128xf32>
    %401 = arith.mulf %400, %396 : vector<160x128xf32>
    %cst_219 = arith.constant 1.42141378 : f32
    %402 = vector.broadcast %cst_219 : f32 to vector<160x128xf32>
    %403 = arith.addf %401, %402 : vector<160x128xf32>
    %404 = arith.mulf %403, %396 : vector<160x128xf32>
    %cst_220 = arith.constant -0.284496725 : f32
    %405 = vector.broadcast %cst_220 : f32 to vector<160x128xf32>
    %406 = arith.addf %404, %405 : vector<160x128xf32>
    %407 = arith.mulf %406, %396 : vector<160x128xf32>
    %cst_221 = arith.constant 0.254829586 : f32
    %408 = vector.broadcast %cst_221 : f32 to vector<160x128xf32>
    %409 = arith.addf %407, %408 : vector<160x128xf32>
    %410 = arith.mulf %409, %396 : vector<160x128xf32>
    %cst_222 = arith.constant 0.000000e+00 : f32
    %411 = vector.broadcast %cst_222 : f32 to vector<160x128xf32>
    %412 = arith.subf %411, %390 : vector<160x128xf32>
    %413 = arith.mulf %412, %390 : vector<160x128xf32>
    %414 = math.exp %413 : vector<160x128xf32>
    %415 = arith.mulf %410, %414 : vector<160x128xf32>
    %cst_223 = arith.constant 1.000000e+00 : f32
    %416 = vector.broadcast %cst_223 : f32 to vector<160x128xf32>
    %417 = arith.subf %416, %415 : vector<160x128xf32>
    %cst_224 = arith.constant 0.000000e+00 : f32
    %418 = vector.broadcast %cst_224 : f32 to vector<160x128xf32>
    %419 = arith.cmpf oge, %389, %418 : vector<160x128xf32>
    %cst_225 = arith.constant 0.000000e+00 : f32
    %420 = vector.broadcast %cst_225 : f32 to vector<160x128xf32>
    %421 = arith.subf %420, %417 : vector<160x128xf32>
    %422 = arith.select %419, %417, %421 : vector<160x128xi1>, vector<160x128xf32>
    %cst_226 = arith.constant 1.000000e+00 : f32
    %423 = vector.broadcast %cst_226 : f32 to vector<160x128xf32>
    %424 = arith.addf %423, %422 : vector<160x128xf32>
    %425 = arith.mulf %387, %424 : vector<160x128xf32>
    %c0_227 = arith.constant 0 : index
    %c0_228 = arith.constant 0 : index
    %426 = vector.load %arg29[%c0_227, %c0_228] : memref<160x128xf32, #tpu.memory_space<vmem>>, vector<160x128xf32>
    tpu.vector_store %arg29[%c0_227, %c0_228], %425 {strides = array<i32>} : memref<160x128xf32, #tpu.memory_space<vmem>>, vector<160x128xf32>,
    %c17_229 = arith.constant 17 : index
    %c0_230 = arith.constant 0 : index
    %427 = vector.load %arg29[%c17_229, %c0_230] : memref<160x128xf32, #tpu.memory_space<vmem>>, vector<8x128xf32>
    %c33_231 = arith.constant 33 : index
    %c0_232 = arith.constant 0 : index
    %428 = vector.load %arg29[%c33_231, %c0_232] : memref<160x128xf32, #tpu.memory_space<vmem>>, vector<8x128xf32>
    %c49_233 = arith.constant 49 : index
    %c0_234 = arith.constant 0 : index
    %429 = vector.load %arg29[%c49_233, %c0_234] : memref<160x128xf32, #tpu.memory_space<vmem>>, vector<8x128xf32>
    %c65_235 = arith.constant 65 : index
    %c0_236 = arith.constant 0 : index
    %430 = vector.load %arg29[%c65_235, %c0_236] : memref<160x128xf32, #tpu.memory_space<vmem>>, vector<8x128xf32>
    %c81_237 = arith.constant 81 : index
    %c0_238 = arith.constant 0 : index
    %431 = vector.load %arg29[%c81_237, %c0_238] : memref<160x128xf32, #tpu.memory_space<vmem>>, vector<8x128xf32>
    %c97_239 = arith.constant 97 : index
    %c0_240 = arith.constant 0 : index
    %432 = vector.load %arg29[%c97_239, %c0_240] : memref<160x128xf32, #tpu.memory_space<vmem>>, vector<8x128xf32>
    %c113_241 = arith.constant 113 : index
    %c0_242 = arith.constant 0 : index
    %433 = vector.load %arg29[%c113_241, %c0_242] : memref<160x128xf32, #tpu.memory_space<vmem>>, vector<8x128xf32>
    %c129_243 = arith.constant 129 : index
    %c0_244 = arith.constant 0 : index
    %434 = vector.load %arg29[%c129_243, %c0_244] : memref<160x128xf32, #tpu.memory_space<vmem>>, vector<8x128xf32>
    %435 = tpu.concatenate %427, %428, %429, %430, %431, %432, %433, %434 in 0 : vector<8x128xf32>, vector<8x128xf32>, vector<8x128xf32>, vector<8x128xf32>, vector<8x128xf32>, vector<8x128xf32>, vector<8x128xf32>, vector<8x128xf32> -> vector<64x128xf32>
    %c0_245 = arith.constant 0 : index
    %c0_246 = arith.constant 0 : index
    %436 = vector.load %arg19[%c0_245, %c0_246] : memref<96x64xf32, #tpu.memory_space<vmem>>, vector<96x64xf32>
    %cst_247 = arith.constant dense<0.000000e+00> : vector<64x64xf32>
    %437 = tpu.matmul %272, %436, %cst_247 {dimension_numbers = #tpu.dot_dimension_numbers<[1], [0], [0], [1], [0, 0, 1, 1], [], []>} : vector<64x96xf32>, vector<96x64xf32>, vector<64x64xf32> -> vector<64x64xf32>
    %c0_248 = arith.constant 0 : index
    %c0_249 = arith.constant 0 : index
    %438 = vector.load %arg20[%c0_248, %c0_249] : memref<1x64xf32, #tpu.memory_space<vmem>>, vector<1x64xf32>
    %439 = vector.broadcast %438 : vector<1x64xf32> to vector<64x64xf32>
    %440 = arith.addf %437, %439 : vector<64x64xf32>
    %c0_250 = arith.constant 0 : index
    %c0_251 = arith.constant 0 : index
    %441 = vector.load %arg17[%c0_250, %c0_251] : memref<128x64xf32, #tpu.memory_space<vmem>>, vector<128x64xf32>
    %cst_252 = arith.constant dense<0.000000e+00> : vector<64x64xf32>
    %442 = tpu.matmul %435, %441, %cst_252 {dimension_numbers = #tpu.dot_dimension_numbers<[1], [0], [0], [1], [0, 0, 1, 1], [], []>} : vector<64x128xf32>, vector<128x64xf32>, vector<64x64xf32> -> vector<64x64xf32>
    %443 = arith.addf %440, %442 : vector<64x64xf32>
    %c0_253 = arith.constant 0 : index
    %c0_254 = arith.constant 0 : index
    %444 = vector.load %arg18[%c0_253, %c0_254] : memref<1x64xf32, #tpu.memory_space<vmem>>, vector<1x64xf32>
    %445 = vector.broadcast %444 : vector<1x64xf32> to vector<64x64xf32>
    %446 = arith.addf %443, %445 : vector<64x64xf32>
    %c0_255 = arith.constant 0 : index
    %c0_256 = arith.constant 0 : index
    %c0_257 = arith.constant 0 : index
    %447 = vector.load %arg21[%c0_255, %c0_256, %c0_257] : memref<1x64x64xf32, #tpu.memory_space<vmem>>, vector<1x64x64xf32>
    %448 = vector.shape_cast %447 : vector<1x64x64xf32> to vector<64x64xf32>
    %449 = vector.shape_cast %446 : vector<64x64xf32> to vector<1x64x64xf32>
    tpu.vector_store %arg21[%c0_255, %c0_256, %c0_257], %449 {strides = array<i32>} : memref<1x64x64xf32, #tpu.memory_space<vmem>>, vector<1x64x64xf32>,
    return
  }
  func.func @transform_0(%arg0: i32) -> (i32, i32, i32) {
    %c0_i32 = arith.constant 0 : i32
    %c0_i32_0 = arith.constant 0 : i32
    %c0_i32_1 = arith.constant 0 : i32
    return %arg0, %c0_i32, %c0_i32_0 : i32, i32, i32
  }
  func.func @transform_1(%arg0: i32) -> (i32, i32, i32) {
    %c0_i32 = arith.constant 0 : i32
    %c0_i32_0 = arith.constant 0 : i32
    %c0_i32_1 = arith.constant 0 : i32
    return %arg0, %c0_i32, %c0_i32_0 : i32, i32, i32
  }
  func.func @transform_2(%arg0: i32) -> (i32, i32) {
    %c0_i32 = arith.constant 0 : i32
    %c0_i32_0 = arith.constant 0 : i32
    %c0_i32_1 = arith.constant 0 : i32
    return %c0_i32, %c0_i32_0 : i32, i32
  }
  func.func @transform_3(%arg0: i32) -> (i32, i32) {
    %c0_i32 = arith.constant 0 : i32
    %c0_i32_0 = arith.constant 0 : i32
    %c0_i32_1 = arith.constant 0 : i32
    return %c0_i32, %c0_i32_0 : i32, i32
  }
  func.func @transform_4(%arg0: i32) -> (i32, i32) {
    %c0_i32 = arith.constant 0 : i32
    %c0_i32_0 = arith.constant 0 : i32
    %c0_i32_1 = arith.constant 0 : i32
    return %c0_i32, %c0_i32_0 : i32, i32
  }
  func.func @transform_5(%arg0: i32) -> (i32, i32) {
    %c0_i32 = arith.constant 0 : i32
    %c0_i32_0 = arith.constant 0 : i32
    %c0_i32_1 = arith.constant 0 : i32
    return %c0_i32, %c0_i32_0 : i32, i32
  }
  func.func @transform_6(%arg0: i32) -> (i32, i32) {
    %c0_i32 = arith.constant 0 : i32
    %c0_i32_0 = arith.constant 0 : i32
    %c0_i32_1 = arith.constant 0 : i32
    return %c0_i32, %c0_i32_0 : i32, i32
  }
  func.func @transform_7(%arg0: i32) -> (i32, i32) {
    %c0_i32 = arith.constant 0 : i32
    %c0_i32_0 = arith.constant 0 : i32
    %c0_i32_1 = arith.constant 0 : i32
    return %c0_i32, %c0_i32_0 : i32, i32
  }
  func.func @transform_8(%arg0: i32) -> (i32, i32) {
    %c0_i32 = arith.constant 0 : i32
    %c0_i32_0 = arith.constant 0 : i32
    %c0_i32_1 = arith.constant 0 : i32
    return %c0_i32, %c0_i32_0 : i32, i32
  }
  func.func @transform_9(%arg0: i32) -> (i32, i32) {
    %c0_i32 = arith.constant 0 : i32
    %c0_i32_0 = arith.constant 0 : i32
    %c0_i32_1 = arith.constant 0 : i32
    return %c0_i32, %c0_i32_0 : i32, i32
  }
  func.func @transform_10(%arg0: i32) -> (i32, i32) {
    %c0_i32 = arith.constant 0 : i32
    %c0_i32_0 = arith.constant 0 : i32
    %c0_i32_1 = arith.constant 0 : i32
    return %c0_i32, %c0_i32_0 : i32, i32
  }
  func.func @transform_11(%arg0: i32) -> (i32, i32) {
    %c0_i32 = arith.constant 0 : i32
    %c0_i32_0 = arith.constant 0 : i32
    %c0_i32_1 = arith.constant 0 : i32
    return %c0_i32, %c0_i32_0 : i32, i32
  }
  func.func @transform_12(%arg0: i32) -> (i32, i32) {
    %c0_i32 = arith.constant 0 : i32
    %c0_i32_0 = arith.constant 0 : i32
    %c0_i32_1 = arith.constant 0 : i32
    return %c0_i32, %c0_i32_0 : i32, i32
  }
  func.func @transform_13(%arg0: i32) -> (i32, i32) {
    %c0_i32 = arith.constant 0 : i32
    %c0_i32_0 = arith.constant 0 : i32
    %c0_i32_1 = arith.constant 0 : i32
    return %c0_i32, %c0_i32_0 : i32, i32
  }
  func.func @transform_14(%arg0: i32) -> (i32, i32) {
    %c0_i32 = arith.constant 0 : i32
    %c0_i32_0 = arith.constant 0 : i32
    %c0_i32_1 = arith.constant 0 : i32
    return %c0_i32, %c0_i32_0 : i32, i32
  }
  func.func @transform_15(%arg0: i32) -> (i32, i32) {
    %c0_i32 = arith.constant 0 : i32
    %c0_i32_0 = arith.constant 0 : i32
    %c0_i32_1 = arith.constant 0 : i32
    return %c0_i32, %c0_i32_0 : i32, i32
  }
  func.func @transform_16(%arg0: i32) -> (i32, i32) {
    %c0_i32 = arith.constant 0 : i32
    %c0_i32_0 = arith.constant 0 : i32
    %c0_i32_1 = arith.constant 0 : i32
    return %c0_i32, %c0_i32_0 : i32, i32
  }
  func.func @transform_17(%arg0: i32) -> (i32, i32) {
    %c0_i32 = arith.constant 0 : i32
    %c0_i32_0 = arith.constant 0 : i32
    %c0_i32_1 = arith.constant 0 : i32
    return %c0_i32, %c0_i32_0 : i32, i32
  }
  func.func @transform_18(%arg0: i32) -> (i32, i32) {
    %c0_i32 = arith.constant 0 : i32
    %c0_i32_0 = arith.constant 0 : i32
    %c0_i32_1 = arith.constant 0 : i32
    return %c0_i32, %c0_i32_0 : i32, i32
  }
  func.func @transform_19(%arg0: i32) -> (i32, i32) {
    %c0_i32 = arith.constant 0 : i32
    %c0_i32_0 = arith.constant 0 : i32
    %c0_i32_1 = arith.constant 0 : i32
    return %c0_i32, %c0_i32_0 : i32, i32
  }
  func.func @transform_20(%arg0: i32) -> (i32, i32, i32) {
    %c0_i32 = arith.constant 0 : i32
    %c0_i32_0 = arith.constant 0 : i32
    %c0_i32_1 = arith.constant 0 : i32
    return %arg0, %c0_i32, %c0_i32_0 : i32, i32, i32
  }
}

</mosaic_0001>

<bundles_post_ra>
// kernel: forward.1
= control target key start
LH: loop header
LB: loop body
LE: loop exit
PB: predicated region body
PF: predicated region fallthrough
CT: control target
= control target key end

     0   :  { %s12353_s0 = inlined_call_operand.vmem [shape: f32[2,64,32], index: 0, kind: input, shape index: {}]   ;;  %s12354_s1 = inlined_call_operand.vmem [shape: f32[2,16,32], index: 1, kind: input, shape index: {}]   ;;  %s12355_s2 = inlined_call_operand.vmem [shape: f32[32,96], index: 2, kind: input, shape index: {}]   ;;  %s12356_s3 = inlined_call_operand.vmem [shape: f32[1,96], index: 3, kind: input, shape index: {}]   ;;  %s12357_s4 = inlined_call_operand.vmem [shape: f32[9,96], index: 4, kind: input, shape index: {}]   ;;  %s12358_s5 = inlined_call_operand.vmem [shape: f32[1,96], index: 5, kind: input, shape index: {}]   ;;  %s12359_s6 = inlined_call_operand.vmem [shape: f32[32,32], index: 6, kind: input, shape index: {}]   ;;  %s12360_s7 = inlined_call_operand.vmem [shape: f32[1,32], index: 7, kind: input, shape index: {}]   ;;  %s12361_s8 = inlined_call_operand.vmem [shape: f32[9,32], index: 8, kind: input, shape index: {}]   ;;  %s12362_s9 = inlined_call_operand.vmem [shape: f32[1,32], index: 9, kind: input, shape index: {}]   ;;  %s12363_s10 = inlined_call_operand.vmem [shape: f32[800,96], index: 10, kind: input, shape index: {}]   ;;  %s12364_s11 = inlined_call_operand.vmem [shape: f32[1,96], index: 11, kind: input, shape index: {}]   ;;  %s12365_s12 = inlined_call_operand.vmem [shape: f32[96,128], index: 12, kind: input, shape index: {}]   ;;  %s12366_s13 = inlined_call_operand.vmem [shape: f32[1,128], index: 13, kind: input, shape index: {}]   ;;  %s12367_s14 = inlined_call_operand.vmem [shape: f32[9,128], index: 14, kind: input, shape index: {}]   ;;  %s12368_s15 = inlined_call_operand.vmem [shape: f32[1,128], index: 15, kind: input, shape index: {}]   ;;  %s12369_s16 = inlined_call_operand.vmem [shape: f32[128,64], index: 16, kind: input, shape index: {}]   ;;  %s12370_s17 = inlined_call_operand.vmem [shape: f32[1,64], index: 17, kind: input, shape index: {}]   ;;  %s12371_s18 = inlined_call_operand.vmem [shape: f32[96,64], index: 18, kind: input, shape index: {}]   ;;  %s12372_s19 = inlined_call_operand.vmem [shape: f32[1,64], index: 19, kind: input, shape index: {}]   ;;  %s12373_s20 = inlined_call_operand.hbm [shape: f32[2,64,64], index: 20, kind: output, shape index: {}]  }
   0x1   :  { %12425 = sst [smem:[#allocation68_spill]] %s12353_s0 }
   0x2   :  { %12426 = sst [smem:[#allocation69_spill]] %s12354_s1 }
   0x3   :  { %12427 = sst [smem:[#allocation70_spill]] %s12355_s2 }
   0x4   :  { %12428 = sst [smem:[#allocation71_spill]] %s12356_s3 }
   0x5   :  { %12429 = sst [smem:[#allocation72_spill]] %s12357_s4 }
   0x6   :  { %25 = vsyncpa [#allocation11], 0 }
   0x7   :  { %27 = vsyncpa [#allocation11 + $0x1], 0  ;;  %s8635_s1 = smov 0   ;;  %s8637_s22 = smov 0  }
   0x8   :  { %s8639_s23 = smov 0   ;;  %s8641_s24 = smov 0  }
   0x9 LB: > { %12430 = sst [smem:[#allocation13_spill]] %s8504_s1  ;;  %s8656_s2 = sadd.s32 4294967295, %s8516_s24   ;;  %s8516_s24 = sphi %s8641_s24, %s12652_s24   ;;  %s8512_s23 = sphi %s8639_s23, %s12654_s23   ;;  %s8508_s22 = sphi %s8637_s22, %s12656_s22   ;;  %s8504_s1 = sphi %s8635_s1, %s12655_s1  }
   0xa   : > { %12431 = sst [smem:[#allocation14_spill]] %s8512_s23  ;;  %s7068_s25 = sadd.s32 4294967294, %s8516_s24  }
   0xb   : > { %12432 = sst [smem:[#allocation15_spill]] %s8516_s24  ;;  %s8660_s3 = sadd.s32 1, %s8516_s24  }
   0xc   : > { %12433 = sst [smem:[#allocation16_spill]] %s8660_s3  ;;  %s470_s26 = sadd.s32 1, %s8512_s23 }
   0xd   : > { %s467_s27 = ssub.s32 %s8516_s24, %s8660_s3  ;;  %p480_p0 = scmp.ne.s32.totalorder %s8512_s23, %s8508_s22 }
   0xe   : > { %p468_p1 = scmp.eq.s32.totalorder %s467_s27, 0  ;;  %p481_p2 = scmp.eq.s32.totalorder %s8656_s2, 1 }
   0xf   : > { %p486_p3 = scmp.ne.s32.totalorder %s8508_s22, %s8504_s1  ;;  %p487_p4 = scmp.eq.s32.totalorder %s7068_s25, 1 }
  0x10   : > { %s8671_s28 = scalar_select %p468_p1, %s8512_s23, %s470_s26  }
  0x11   : > { %p8673_p5 = por %p481_p2, %p480_p0  ;;  %p8677_p6 = por %p487_p4, %p486_p3 }
  0x12   : > { %12434 = sst [smem:[#allocation17_spill]] %s8671_s28  ;;  %p7071_p7 = scmp.ge.s32.totalorder %s8516_s24, 1 }
  0x13   : > { %s12436_s29 = scalar_select %p8677_p6, 1, 0 }
  0x14   : > { %p575_p8 = scmp.lt.s32.totalorder %s8516_s24, 3 }
  0x15   : > { %12437 = sst [smem:[#allocation18_spill]] %s12436_s29 }
  0x16   : > { %p576_p9 = pnand %p7071_p7, %p575_p8 }
  0x18   : > { %579 = sbr.rel (%p576_p9) target bundleno = 3703 (0xe77), region = 100 }
  0x1f   : > { %s12438_s21 = sld [smem:[#allocation70_spill]]  ;;  %p638_p10 = scmp.lt.s32.totalorder %s8656_s2, 1  ;;  %v1359_v6 = vld [vmem:[%s12359_s6] sm:$0xff]  ;;  %v1360_v7 = vld [vmem:[%s12359_s6 + $0x8] sm:$0xff]  ;;  %vm667_vm0 = vcmask 261120   ;;  %v1361_v10 = vld [vmem:[%s12359_s6 + $0x10] sm:$0xff]  ;;  %v854_v23 = vlaneseq }
  0x20   : > { %s12439_s3 = sld [smem:[#allocation68_spill]]  ;;  %v7760_v8 = vpack.c.bf16 %v1360_v7, %v1359_v6  ;;  %v1362_v11 = vld [vmem:[%s12359_s6 + $0x18] sm:$0xff]  ;;  %s12440_s26 = sld [smem:[#allocation69_spill]]  ;;  %vm797_vm1 = vcmask 785408   ;;  %v8518_v22 = vmov 0.0   ;;  %v8937_v55 = vld [vmem:[%s12361_s8] sm:$0xff] }
  0x21   : > { %s8697_s29 = scalar_select %p638_p10, %s8656_s2, 1  ;;  %v7764_v14 = vpack.c.bf16 %v1362_v11, %v1361_v10  ;;  %805 = vst.msk [vmem:[#allocation2 + $0x38] sm:$0xff] %vm797_vm1, %v8518_v22  ;;  %806 = vst.msk [vmem:[#allocation2 + $0x40] sm:$0xff] %vm797_vm1, %v8518_v22  ;;  %v855_v24 = vshrl.u32 %v854_v23, 7  ;;  %vm1461_vm2 = vcmask 257024   ;;  %vm1463_vm3 = vcmask 261124  }
  0x22   : > { %798 = vst.msk [vmem:[#allocation2] sm:$0xff] %vm797_vm1, %v8518_v22  ;;  %799 = vst.msk [vmem:[#allocation2 + $0x8] sm:$0xff] %vm797_vm1, %v8518_v22  ;;  %s12443_s27 = sld [smem:[#allocation72_spill]]  ;;  %s12452_s25 = sld [smem:[#allocation71_spill]]  ;;  %vm1645_vm4 = vcmask 130048   ;;  %vm1618_vm5 = vcmask 1043456  }
  0x23   : > { %s7300_s28 = sshll.u32 %s8697_s29, 6  ;;  %s7301_s1 = sshll.u32 %s8697_s29, 4  ;;  %800 = vst.msk [vmem:[#allocation2 + $0x10] sm:$0xff] %vm797_vm1, %v8518_v22  ;;  %801 = vst.msk [vmem:[#allocation2 + $0x18] sm:$0xff] %vm797_vm1, %v8518_v22  ;;  %v8891_v25 = vsub.s32 0, %v855_v24  ;;  %v8893_v26 = vsub.s32 1, %v855_v24 }
  0x24   : > { %802 = vst.msk [vmem:[#allocation2 + $0x20] sm:$0xff] %vm797_vm1, %v8518_v22  ;;  %803 = vst.msk [vmem:[#allocation2 + $0x28] sm:$0xff] %vm797_vm1, %v8518_v22  ;;  %v8904_v30 = vsub.s32 2, %v855_v24  ;;  %v8909_v32 = vsub.s32 3, %v855_v24  ;;  %v8914_v34 = vsub.s32 4, %v855_v24  ;;  %v8919_v38 = vsub.s32 5, %v855_v24 }
  0x25   : > { %v656_v0 = vld [vmem:[%s12438_s21] sm:$0xff]  ;;  %v657_v1 = vld [vmem:[%s12438_s21 + $0x8] sm:$0xff]  ;;  %v658_v2 = vld [vmem:[%s12438_s21 + $0x10] sm:$0xff]  ;;  %804 = vst.msk [vmem:[#allocation2 + $0x30] sm:$0xff] %vm797_vm1, %v8518_v22  ;;  %v8928_v48 = vsub.s32 6, %v855_v24  ;;  %v8930_v49 = vsub.s32 7, %v855_v24 }
  0x26   : > { %v7752_v3 = vpack.c.bf16 %v657_v1, %v656_v0  ;;  %v659_v4 = vld [vmem:[%s12438_s21 + $0x18] sm:$0xff]  ;;  %s642_s21 = scalar_lea.vmem %s12439_s3, %s7300_s28  ;;  %s647_s28 = scalar_lea.vmem %s12440_s26, %s7301_s1  ;;  %807 = vst.msk [vmem:[#allocation2 + $0x48] sm:$0xff] %vm797_vm1, %v8518_v22  ;;  %808 = vst.msk [vmem:[#allocation2 + $0x50] sm:$0xff] %vm797_vm1, %v8518_v22  ;;  %vm1743_vm7 = vcmask 523264  }
  0x27   : > { %v7756_v5 = vpack.c.bf16 %v659_v4, %v658_v2  ;;  %v648_v9 = vld [vmem:[%s642_s21] sm:$0xff]  ;;  %v649_v12 = vld [vmem:[%s642_s21 + $0x8] sm:$0xff]  ;;  %v650_v13 = vld [vmem:[%s642_s21 + $0x10] sm:$0xff]  ;;  %809 = vst.msk [vmem:[#allocation2 + $0x58] sm:$0xff] %vm797_vm1, %v8518_v22  ;;  %v8959_v2 = vrot.slane %v8937_v55, %v8891_v25  ;;  %s12407_s30 = smov 96   ;;  %s8520_s24 = smov 64  }
  0x28   : > { %7753 = vmatprep.subr.bf16.mxu1 %v7752_v3  ;;  %7473 = vmatprep.mubr.msk.f32.mxu1 %vm667_vm0, %v648_v9  ;;  %v651_v15 = vld [vmem:[%s642_s21 + $0x18] sm:$0xff]  ;;  %v652_v16 = vld [vmem:[%s642_s21 + $0x20] sm:$0xff]  ;;  %v653_v17 = vld [vmem:[%s642_s21 + $0x28] sm:$0xff]  ;;  %810 = vst.msk [vmem:[#allocation2 + $0x60] sm:$0xff] %vm797_vm1, %v8518_v22  ;;  %s8522_s26 = smov 112   ;;  %s8524_s29 = smov 32  }
  0x29   : > { %7755 = vmatpush3.bf16.msra.mxu1 %v7752_v3  ;;  %v654_v18 = vld [vmem:[%s642_s21 + $0x30] sm:$0xff]  ;;  %v655_v19 = vld [vmem:[%s642_s21 + $0x38] sm:$0xff]  ;;  %v1357_v20 = vld [vmem:[%s647_s28] sm:$0xff]  ;;  %811 = vst.msk [vmem:[#allocation2 + $0x68] sm:$0xff] %vm797_vm1, %v8518_v22  ;;  %v8963_v3 = vrot.slane %v8937_v55, %v8893_v26  ;;  %s8526_s21 = smov 16   ;;  %s7302_s3 = sshll.u32 %s8656_s2, 10 }
  0x2a   : > { %7757 = vmatprep.subr.bf16.mxu1 %v7756_v5  ;;  %v1358_v21 = vld [vmem:[%s647_s28 + $0x8] sm:$0xff]  ;;  %812 = vst.msk [vmem:[#allocation2 + $0x70] sm:$0xff] %vm797_vm1, %v8518_v22  ;;  %813 = vst.msk [vmem:[#allocation2 + $0x78] sm:$0xff] %vm797_vm1, %v8518_v22  ;;  %v832_v27 = vld [vmem:[%s12443_s27] sm:$0xff]  ;;  %s8523_s28 = smov 48  }
  0x2b   : > { %814 = vst.msk [vmem:[#allocation2 + $0x80] sm:$0xff] %vm797_vm1, %v8518_v22  ;;  %815 = vst.msk [vmem:[#allocation2 + $0x88] sm:$0xff] %vm797_vm1, %v8518_v22  ;;  %v8899_v28 = vrot.slane %v832_v27, %v8891_v25  ;;  %v8902_v29 = vrot.slane %v832_v27, %v8893_v26  ;;  %v8907_v31 = vrot.slane %v832_v27, %v8904_v30  ;;  %v836_v35 = vld [vmem:[#allocation2 + $0x17] sm:$0xff]  ;;  %v837_v36 = vld [vmem:[#allocation2 + $0x1f] sm:$0xff] }
  0x2c   : > { %816 = vst.msk [vmem:[#allocation2 + $0x90] sm:$0xff] %vm797_vm1, %v8518_v22  ;;  %817 = vst.msk [vmem:[#allocation2 + $0x98] sm:$0xff] %vm797_vm1, %v8518_v22  ;;  %v8912_v33 = vrot.slane %v832_v27, %v8909_v32  ;;  %v8917_v37 = vrot.slane %v832_v27, %v8914_v34  ;;  %v900_v39 = vld [vmem:[#allocation2 + $0x18] sm:$0xff]  ;;  %v901_v40 = vld [vmem:[#allocation2 + $0x20] sm:$0xff]  ;;  %v8926_v45 = vrot.slane %v832_v27, %v8919_v38 }
  0x2d   : > { %7759 = vmatpush3.bf16.msra.mxu1 %v7756_v5  ;;  %818 = vst.msk [vmem:[#allocation2 + $0xa0] sm:$0xff] %vm797_vm1, %v8518_v22  ;;  %819 = vst.msk [vmem:[#allocation2 + $0xa8] sm:$0xff] %vm797_vm1, %v8518_v22  ;;  %v860_v41 = vmul.f32 %v8899_v28, %v836_v35  ;;  %v861_v42 = vmul.f32 %v8899_v28, %v837_v36  ;;  %v924_v43 = vmul.f32 %v8902_v29, %v900_v39  ;;  %v964_v46 = vld [vmem:[#allocation2 + $0x19] sm:$0xff]  ;;  %v965_v47 = vld [vmem:[#allocation2 + $0x21] sm:$0xff] }
  0x2e   : > { %7761 = vmatprep.subr.bf16.mxu1 %v7760_v8  ;;  %820 = vst.msk [vmem:[#allocation2 + $0xb0] sm:$0xff] %vm797_vm1, %v8518_v22  ;;  %821 = vst.msk [vmem:[#allocation2 + $0xb8] sm:$0xff] %vm797_vm1, %v8518_v22  ;;  %v925_v44 = vmul.f32 %v8902_v29, %v901_v40  ;;  %v988_v52 = vmul.f32 %v8907_v31, %v964_v46  ;;  %v989_v53 = vmul.f32 %v8907_v31, %v965_v47  ;;  %v967_v54 = vld [vmem:[#allocation2 + $0x31] sm:$0xff]  ;;  %v969_v56 = vld [vmem:[#allocation2 + $0x41] sm:$0xff] }
  0x2f   : > { %822 = vst.msk [vmem:[#allocation2 + $0xc0] sm:$0xff] %vm797_vm1, %v8518_v22  ;;  %823 = vst.msk [vmem:[#allocation2 + $0xc8] sm:$0xff] %vm797_vm1, %v8518_v22  ;;  %v944_v50 = vadd.f32 %v924_v43, %v860_v41  ;;  %v8940_v57 = vrot.slane %v832_v27, %v8928_v48  ;;  %v8943_v58 = vrot.slane %v832_v27, %v8930_v49  ;;  %v971_v61 = vld [vmem:[#allocation2 + $0x51] sm:$0xff]  ;;  %v8952_v63 = vld [vmem:[%s12443_s27 + $0x8] ss:$0 sm:$0xff] }
  0x30   : > { %7474 = vmatmul.mubr.msk.f32.vlgmr.msra.gmra.mrb[0].mxu1 %vm667_vm0, %v649_v12  ;;  %1452 = vst.msk [vmem:[#allocation4 + $0x8] sm:$0xff] %vm667_vm0, %v8518_v22  ;;  %1453 = vst.msk [vmem:[#allocation4 + $0x10] sm:$0xff] %vm667_vm0, %v8518_v22  ;;  %v945_v51 = vadd.f32 %v925_v44, %v861_v42  ;;  %v973_v62 = vld [vmem:[#allocation2 + $0x61] sm:$0xff]  ;;  %v8955_v0 = vmul.f32 %v8907_v31, %v967_v54  ;;  %v8966_v4 = vmul.f32 %v8926_v45, %v967_v54 }
  0x31   : > { %7476 = vmatprep.mubr.msk.f32.mxu1 %vm667_vm0, %v650_v13  ;;  %7763 = vmatpush3.bf16.msra.mxu1 %v7760_v8  ;;  %1454 = vst.msk [vmem:[#allocation4 + $0x18] sm:$0xff] %vm667_vm0, %v8518_v22  ;;  %1455 = vst.msk [vmem:[#allocation4 + $0x20] sm:$0xff] %vm667_vm0, %v8518_v22  ;;  %v8945_v59 = vadd.f32 %v988_v52, %v944_v50  ;;  %v975_v1 = vld [vmem:[#allocation2 + $0x71] sm:$0xff]  ;;  %v8969_v5 = vmul.f32 %v8907_v31, %v969_v56 }
  0x32   : > { %7765 = vmatprep.subr.bf16.mxu1 %v7764_v14  ;;  %1456 = vst.msk [vmem:[#allocation4 + $0x28] sm:$0xff] %vm667_vm0, %v8518_v22  ;;  %1457 = vst.msk [vmem:[#allocation4 + $0x30] sm:$0xff] %vm667_vm0, %v8518_v22  ;;  %v8947_v60 = vadd.f32 %v989_v53, %v945_v51  ;;  %v8972_v8 = vmul.f32 %v8907_v31, %v971_v61  ;;  %v8975_v9 = vmul.f32 %v8926_v45, %v969_v56  ;;  %v977_v13 = vld [vmem:[#allocation2 + $0x81] sm:$0xff] }
  0x33   : > { %1458 = vst.msk [vmem:[#allocation4 + $0x38] sm:$0xff] %vm667_vm0, %v8518_v22  ;;  %1459 = vst.msk [vmem:[#allocation4 + $0x40] sm:$0xff] %vm667_vm0, %v8518_v22  ;;  %v8978_v10 = vmul.f32 %v8926_v45, %v971_v61  ;;  %v8981_v11 = vmul.f32 %v8907_v31, %v973_v62  ;;  %v9007_v27 = vrot.slane %v8937_v55, %v8904_v30 }
  0x34   : > { %7477 = vmatmul.mubr.msk.f32.gmra.mrb[2].mxu1 %vm667_vm0, %v651_v15  ;;  %2845 = vst.msk [vmem:[#allocation5] sm:$0xff] %vm667_vm0, %v8518_v22  ;;  %2846 = vst.msk [vmem:[#allocation5 + $0x8] sm:$0xff] %vm667_vm0, %v8518_v22  ;;  %v981_v12 = vld [vmem:[#allocation2 + $0xa1] sm:$0xff]  ;;  %v8989_v15 = vmul.f32 %v8907_v31, %v975_v1  ;;  %v9013_v39 = vmul.f32 %v8907_v31, %v977_v13  ;;  %v9016_v40 = vmul.f32 %v8952_v63, %v969_v56 }
  0x35   : > { %7479 = vmatprep.mubr.msk.f32.mxu1 %vm667_vm0, %v652_v16  ;;  %7767 = vmatpush3.bf16.msra.mxu1 %v7764_v14  ;;  %2847 = vst.msk [vmem:[#allocation5 + $0x10] sm:$0xff] %vm667_vm0, %v8518_v22  ;;  %2848 = vst.msk [vmem:[#allocation5 + $0x18] sm:$0xff] %vm667_vm0, %v8518_v22  ;;  %v8986_v14 = vld [vmem:[%s12452_s25] ss:$0 sm:$0xff]  ;;  %v8992_v16 = vmul.f32 %v8926_v45, %v973_v62  ;;  %v9010_v36 = vmul.f32 %v8926_v45, %v981_v12  ;;  %v1073_v44 = vld [vmem:[#allocation2 + $0xb0] sm:$0xff]  ;;  %s8521_s25 = smov 80  }
  0x36   : > { %2849 = vst.msk [vmem:[#allocation5 + $0x20] sm:$0xff] %vm667_vm0, %v8518_v22  ;;  %2850 = vst.msk [vmem:[#allocation5 + $0x28] sm:$0xff] %vm667_vm0, %v8518_v22  ;;  %v9031_v52 = vmul.f32 %v8952_v63, %v981_v12  ;;  %v1072_v53 = vld [vmem:[#allocation2 + $0xa8] sm:$0xff]  ;;  %v9034_v54 = vmul.f32 %v8926_v45, %v977_v13  ;;  %v9047_v12 = vrot.slane %v8937_v55, %v8930_v49 }
  0x37   : > { %2851 = vst.msk [vmem:[#allocation5 + $0x30] sm:$0xff] %vm667_vm0, %v8518_v22  ;;  %2852 = vst.msk [vmem:[#allocation5 + $0x38] sm:$0xff] %vm667_vm0, %v8518_v22  ;;  %v1469_v6 = vld [vmem:[#allocation4 + $0xf] sm:$0xff] }
  0x38   : > { %7480 = vmatmul.mubr.msk.f32.gmra.mrb[4].mxu1 %vm667_vm0, %v653_v17  ;;  %2853 = vst.msk [vmem:[#allocation5 + $0x40] sm:$0xff] %vm667_vm0, %v8518_v22  ;;  %2854 = vst.msk [vmem:[#allocation5 + $0x48] sm:$0xff] %vm667_vm0, %v8518_v22  ;;  %v1485_v7 = vld [vmem:[#allocation4 + $0x10] sm:$0xff]  ;;  %v8995_v17 = vmul.f32 %v8926_v45, %v975_v1  ;;  %v1477_v23 = vmul.f32 %v8959_v2, %v1469_v6  ;;  %v1118_v6 = vld [vmem:[#allocation2 + $0xa9] sm:$0xff] }
  0x39   : > { %7482 = vmatprep.mubr.msk.f32.mxu1 %vm667_vm0, %v654_v18  ;;  %2855 = vst.msk [vmem:[#allocation5 + $0x50] sm:$0xff] %vm667_vm0, %v8518_v22  ;;  %2856 = vst.msk [vmem:[#allocation5 + $0x58] sm:$0xff] %vm667_vm0, %v8518_v22  ;;  %v8998_v18 = vmul.f32 %v8952_v63, %v973_v62  ;;  %v1493_v24 = vmul.f32 %v8963_v3, %v1485_v7  ;;  %v1501_v41 = vld [vmem:[#allocation4 + $0x11] sm:$0xff] }
  0x3a   : > { %2857 = vst.msk [vmem:[#allocation5 + $0x60] sm:$0xff] %vm667_vm0, %v8518_v22  ;;  %2858 = vst.msk [vmem:[#allocation5 + $0x68] sm:$0xff] %vm667_vm0, %v8518_v22  ;;  %v1509_v62 = vmul.f32 %v9007_v27, %v1501_v41  ;;  %v1569_v41 = vld [vmem:[#allocation4 + $0x38] sm:$0xff] }
  0x3b   : > { %2859 = vst.msk [vmem:[#allocation5 + $0x70] sm:$0xff] %vm667_vm0, %v8518_v22  ;;  %2860 = vst.msk [vmem:[#allocation5 + $0x78] sm:$0xff] %vm667_vm0, %v8518_v22  ;;  %v1497_v56 = vadd.f32 %v1493_v24, %v1477_v23  ;;  %v9051_v24 = vmul.f32 %v8952_v63, %v977_v13 }
  0x3c   : > { %7483 = vmatmul.mubr.msk.f32.gmra.mrb[6].mxu1 %vm667_vm0, %v655_v19  ;;  %2861 = vst.msk [vmem:[#allocation5 + $0x80] sm:$0xff] %vm667_vm0, %v8518_v22  ;;  %2862 = vst.msk [vmem:[#allocation5 + $0x88] sm:$0xff] %vm667_vm0, %v8518_v22  ;;  %v1026_v19 = vld [vmem:[#allocation2 + $0xa7] sm:$0xff] }
  0x3d   : > { %7493 = vmatprep.mubr.msk.f32.mxu1 %vm667_vm0, %v1357_v20  ;;  %2863 = vst.msk [vmem:[#allocation5 + $0x90] sm:$0xff] %vm667_vm0, %v8518_v22  ;;  %2864 = vst.msk [vmem:[#allocation5 + $0x98] sm:$0xff] %vm667_vm0, %v8518_v22  ;;  %v9001_v20 = vmul.f32 %v8952_v63, %v975_v1  ;;  %v9020_v46 = vmul.f32 %v8940_v57, %v1026_v19  ;;  %v9043_v19 = vrot.slane %v8937_v55, %v8928_v48 }
  0x3e   : > { %2865 = vst.msk [vmem:[#allocation5 + $0xa0] sm:$0xff] %vm667_vm0, %v8518_v22  ;;  %2866 = vst.msk [vmem:[#allocation5 + $0xa8] sm:$0xff] %vm667_vm0, %v8518_v22  ;;  %v9066_v13 = vadd.f32 %v1509_v62, %v1497_v56  ;;  %v9085_v56 = vmul.f32 %v9047_v12, %v1569_v41  ;;  %v9088_v62 = vmul.f32 %v8943_v58, %v1072_v53 }
  0x3f   : > { %2867 = vst.msk [vmem:[#allocation5 + $0xb0] sm:$0xff] %vm667_vm0, %v8518_v22  ;;  %2868 = vst.msk [vmem:[#allocation5 + $0xb8] sm:$0xff] %vm667_vm0, %v8518_v22  ;;  %v9099_v41 = vmul.f32 %v8952_v63, %v1118_v6 }
  0x40   : > { %7494 = vmatmul.mubr.msk.f32.vlgmr.msra.gmra.mrb[8].mxu1 %vm667_vm0, %v1358_v21  ;;  %2869 = vst.msk [vmem:[#allocation5 + $0xc0] sm:$0xff] %vm667_vm0, %v8518_v22  ;;  %2870 = vst.msk [vmem:[#allocation5 + $0xc8] sm:$0xff] %vm667_vm0, %v8518_v22  ;;  %v1027_v21 = vld [vmem:[#allocation2 + $0xaf] sm:$0xff] }
  0x41   : > { %2871 = vst.msk [vmem:[#allocation5 + $0xd0] sm:$0xff] %vm667_vm0, %v8518_v22  ;;  %2872 = vst.msk [vmem:[#allocation5 + $0xd8] sm:$0xff] %vm667_vm0, %v8518_v22  ;;  %v9024_v50 = vmul.f32 %v8940_v57, %v1027_v21 }
  0x42   : > { %2873 = vst.msk [vmem:[#allocation5 + $0xe0] sm:$0xff] %vm667_vm0, %v8518_v22  ;;  %2874 = vst.msk [vmem:[#allocation5 + $0xe8] sm:$0xff] %vm667_vm0, %v8518_v22 }
  0x43   : > { %2875 = vst.msk [vmem:[#allocation5 + $0xf0] sm:$0xff] %vm667_vm0, %v8518_v22  ;;  %2876 = vst.msk [vmem:[#allocation5 + $0xf8] sm:$0xff] %vm667_vm0, %v8518_v22 }
  0x44   : > { %2877 = vst.msk [vmem:[#allocation5 + $0x100] sm:$0xff] %vm667_vm0, %v8518_v22  ;;  %2878 = vst.msk [vmem:[#allocation5 + $0x108] sm:$0xff] %vm667_vm0, %v8518_v22 }
  0x45   : > { %5605 = vst [vmem:[#allocation8] sm:$0xff] %v8518_v22  ;;  %5606 = vst [vmem:[#allocation8 + $0x8] sm:$0xff] %v8518_v22 }
  0x46   : > { %5607 = vst [vmem:[#allocation8 + $0x10] sm:$0xff] %v8518_v22  ;;  %5608 = vst [vmem:[#allocation8 + $0x18] sm:$0xff] %v8518_v22 }
  0x47   : > { %5609 = vst [vmem:[#allocation8 + $0x20] sm:$0xff] %v8518_v22  ;;  %5610 = vst [vmem:[#allocation8 + $0x28] sm:$0xff] %v8518_v22 }
  0x48   : > { %5611 = vst [vmem:[#allocation8 + $0x30] sm:$0xff] %v8518_v22  ;;  %5612 = vst [vmem:[#allocation8 + $0x38] sm:$0xff] %v8518_v22 }
  0x49   : > { %5613 = vst [vmem:[#allocation8 + $0x40] sm:$0xff] %v8518_v22  ;;  %5614 = vst [vmem:[#allocation8 + $0x48] sm:$0xff] %v8518_v22 }
  0x4a   : > { %5615 = vst [vmem:[#allocation8 + $0x50] sm:$0xff] %v8518_v22  ;;  %5616 = vst [vmem:[#allocation8 + $0x58] sm:$0xff] %v8518_v22 }
  0x4b   : > { %5617 = vst [vmem:[#allocation8 + $0x60] sm:$0xff] %v8518_v22  ;;  %5618 = vst [vmem:[#allocation8 + $0x68] sm:$0xff] %v8518_v22 }
  0x4c   : > { %5619 = vst [vmem:[#allocation8 + $0x70] sm:$0xff] %v8518_v22  ;;  %5620 = vst [vmem:[#allocation8 + $0x78] sm:$0xff] %v8518_v22 }
  0x4d   : > { %5621 = vst [vmem:[#allocation8 + $0x80] sm:$0xff] %v8518_v22  ;;  %5622 = vst [vmem:[#allocation8 + $0x88] sm:$0xff] %v8518_v22 }
  0x4e   : > { %5623 = vst [vmem:[#allocation8 + $0x90] sm:$0xff] %v8518_v22  ;;  %5624 = vst [vmem:[#allocation8 + $0x98] sm:$0xff] %v8518_v22 }
  0x4f   : > { %5625 = vst [vmem:[#allocation8 + $0xa0] sm:$0xff] %v8518_v22  ;;  %5626 = vst [vmem:[#allocation8 + $0xa8] sm:$0xff] %v8518_v22 }
  0x50   : > { %5627 = vst [vmem:[#allocation8 + $0xb0] sm:$0xff] %v8518_v22  ;;  %5628 = vst [vmem:[#allocation8 + $0xb8] sm:$0xff] %v8518_v22 }
  0x51   : > { %5629 = vst [vmem:[#allocation8 + $0xc0] sm:$0xff] %v8518_v22  ;;  %5630 = vst [vmem:[#allocation8 + $0xc8] sm:$0xff] %v8518_v22  ;;  %v979_v22 = vld [vmem:[#allocation2 + $0x91] sm:$0xff] }
  0x52   : > { %12441 = vst [vmem:[#allocation19_spill] sm:$0xff] %v8891_v25  ;;  %12442 = vst [vmem:[#allocation20_spill] sm:$0xff] %v8893_v26  ;;  %v9027_v51 = vmul.f32 %v8907_v31, %v979_v22  ;;  %v9039_v7 = vmul.f32 %v8926_v45, %v979_v22 }
  0x53   : > { %12444 = vst [vmem:[#allocation21_spill] sm:$0xff] %v8904_v30  ;;  %12445 = vst [vmem:[#allocation22_spill] sm:$0xff] %v8909_v32 }
  0x54   : > { %12446 = vst [vmem:[#allocation23_spill] sm:$0xff] %v8914_v34  ;;  %12447 = vst [vmem:[#allocation24_spill] sm:$0xff] %v8919_v38 }
  0x55   : > { %12448 = vst [vmem:[#allocation25_spill] sm:$0xff] %v8928_v48  ;;  %12449 = vst [vmem:[#allocation26_spill] sm:$0xff] %v8930_v49  ;;  %v1582_v49 = vld [vmem:[#allocation4 + $0x39] sm:$0xff]  ;;  %v9070_v48 = vrot.slane %v8937_v55, %v8909_v32 }
  0x56   : > { %12450 = vst [vmem:[#allocation27_spill] sm:$0xff] %v8959_v2  ;;  %12451 = vst [vmem:[#allocation28_spill] sm:$0xff] %v8963_v3 }
  0x57   : > { %12453 = vst [vmem:[#allocation29_spill] sm:$0xff] %v8998_v18  ;;  %12454 = vst [vmem:[#allocation30_spill] sm:$0xff] %v9001_v20 }
  0x58   : > { %12455 = vst [vmem:[#allocation31_spill] sm:$0xff] %v9007_v27  ;;  %12456 = vst [vmem:[#allocation32_spill] sm:$0xff] %v9010_v36 }
  0x59   : > { %12457 = vst [vmem:[#allocation33_spill] sm:$0xff] %v9013_v39  ;;  %12458 = vst [vmem:[#allocation34_spill] sm:$0xff] %v9016_v40 }
  0x5a   : > { %12459 = vst [vmem:[#allocation35_spill] sm:$0xff] %v9020_v46  ;;  %12460 = vst [vmem:[#allocation36_spill] sm:$0xff] %v9024_v50 }
  0x5b   : > { %12461 = vst [vmem:[#allocation37_spill] sm:$0xff] %v9027_v51  ;;  %12462 = vst [vmem:[#allocation38_spill] sm:$0xff] %v9031_v52 }
  0x5c   : > { %12463 = vst [vmem:[#allocation39_spill] sm:$0xff] %v9034_v54  ;;  %12464 = vst [vmem:[#allocation40_spill] sm:$0xff] %v9039_v7 }
  0x5d   : > { %12465 = vst [vmem:[#allocation41_spill] sm:$0xff] %v9043_v19  ;;  %12466 = vst [vmem:[#allocation42_spill] sm:$0xff] %v9047_v12 }
  0x5e   : > { %12467 = vst [vmem:[#allocation43_spill] sm:$0xff] %v9051_v24  ;;  %12471 = vst [vmem:[#allocation47_spill] sm:$0xff] %v9066_v13 }
  0x5f   : > { %12472 = vst [vmem:[#allocation48_spill] sm:$0xff] %v9070_v48  ;;  %12476 = vst [vmem:[#allocation52_spill] sm:$0xff] %v9085_v56 }
  0x60   : > { %12477 = vst [vmem:[#allocation53_spill] sm:$0xff] %v9088_v62  ;;  %12480 = vst [vmem:[#allocation56_spill] sm:$0xff] %v9099_v41 }
  0x61   : > { %vm9535_vm6 = vmpackc.low %vm1645_vm4, %vm1645_vm4 }
 0x103   : > { %v7475_v35 = vpop.f32.mrb[0].mxu1 }
 0x104   : > { %v764_v42 = vadd.f32 %v7475_v35, %v8986_v14  ;;  %v758_v43 = vpop.f32.mrb[1].mxu1  ;;  %v1556_v35 = vld [vmem:[#allocation4 + $0x37] sm:$0xff] }
 0x105   : > { %v759_v47 = vadd.f32 %v8986_v14, %v758_v43  ;;  %v9055_v43 = vmul.f32 %v8952_v63, %v971_v61  ;;  %v9074_v61 = vrot.slane %v8937_v55, %v8914_v34 }
 0x106   : > { %825 = vst.msk [vmem:[#allocation2 + $0x39] sm:$0xff] %vm797_vm1, %v764_v42 }
 0x107   : > { %824 = vst.msk [vmem:[#allocation2 + $0x29] sm:$0xff] %vm797_vm1, %v759_v47  ;;  %v7478_v1 = vpop.f32.mrb[2].mxu1  ;;  %12468 = vst [vmem:[#allocation44_spill] sm:$0xff] %v9055_v43  ;;  %v9060_v47 = vld [vmem:[%s12361_s8 + $0x8] ss:$0 sm:$0xff] }
 0x108   : > { %v774_v21 = vadd.f32 %v7478_v1, %v8986_v14  ;;  %v768_v23 = vpop.f32.mrb[3].mxu1  ;;  %12469 = vst [vmem:[#allocation45_spill] sm:$0xff] %v9060_v47  ;;  %v9064_v1 = vmul.f32 %v8952_v63, %v979_v22  ;;  %12473 = vst [vmem:[#allocation49_spill] sm:$0xff] %v9074_v61  ;;  %v9082_v22 = vmul.f32 %v9043_v19, %v1556_v35 }
 0x109   : > { %v769_v42 = vadd.f32 %v8986_v14, %v768_v23  ;;  %v1119_v23 = vld [vmem:[#allocation2 + $0xb1] sm:$0xff]  ;;  %v9092_v26 = vmul.f32 %v9060_v47, %v1582_v49 }
 0x10a   : > { %827 = vst.msk [vmem:[#allocation2 + $0x59] sm:$0xff] %vm797_vm1, %v774_v21  ;;  %12470 = vst [vmem:[#allocation46_spill] sm:$0xff] %v9064_v1  ;;  %v9079_v21 = vrot.slane %v8937_v55, %v8919_v38  ;;  %v9102_v53 = vmul.f32 %v8952_v63, %v1119_v23 }
 0x10b   : > { %826 = vst.msk [vmem:[#allocation2 + $0x49] sm:$0xff] %vm797_vm1, %v769_v42  ;;  %v7481_v30 = vpop.f32.mrb[4].mxu1  ;;  %12475 = vst [vmem:[#allocation51_spill] sm:$0xff] %v9082_v22  ;;  %v9095_v42 = vmul.f32 %v8943_v58, %v1073_v44 }
 0x10c   : > { %12474 = vst [vmem:[#allocation50_spill] sm:$0xff] %v9079_v21  ;;  %v784_v34 = vadd.f32 %v7481_v30, %v8986_v14  ;;  %v778_v32 = vpop.f32.mrb[5].mxu1  ;;  %12478 = vst [vmem:[#allocation54_spill] sm:$0xff] %v9092_v26 }
 0x10d   : > { %12479 = vst [vmem:[#allocation55_spill] sm:$0xff] %v9095_v42  ;;  %v841_v55 = vld [vmem:[#allocation2 + $0x3f] sm:$0xff]  ;;  %v779_v35 = vadd.f32 %v8986_v14, %v778_v32  ;;  %12481 = vst [vmem:[#allocation57_spill] sm:$0xff] %v9102_v53  ;;  %v840_v47 = vld [vmem:[#allocation2 + $0x37] sm:$0xff] }
 0x10e   : > { %v904_v38 = vld [vmem:[#allocation2 + $0x38] sm:$0xff]  ;;  %v905_v25 = vld [vmem:[#allocation2 + $0x40] sm:$0xff]  ;;  %v865_v30 = vmul.f32 %v8899_v28, %v841_v55  ;;  %v839_v56 = vld [vmem:[#allocation2 + $0x2f] sm:$0xff]  ;;  %829 = vst.msk [vmem:[#allocation2 + $0x79] sm:$0xff] %vm797_vm1, %v784_v34  ;;  %v1037_v6 = vmul.f32 %v8912_v33, %v841_v55  ;;  %v9129_v22 = vmul.f32 %v8940_v57, %v841_v55 }
 0x10f   : > { %v929_v52 = vmul.f32 %v8902_v29, %v905_v25  ;;  %v968_v49 = vld [vmem:[#allocation2 + $0x39] sm:$0xff]  ;;  %v838_v26 = vld [vmem:[#allocation2 + $0x27] sm:$0xff]  ;;  %v9108_v44 = vmul.f32 %v8902_v29, %v904_v38  ;;  %v9115_v23 = vmul.f32 %v8917_v37, %v904_v38  ;;  %v903_v41 = vld [vmem:[#allocation2 + $0x30] sm:$0xff]  ;;  %828 = vst.msk [vmem:[#allocation2 + $0x69] sm:$0xff] %vm797_vm1, %v779_v35  ;;  %v9118_v42 = vpop.f32.mrb[6].mxu1  ;;  %v9123_v34 = vmul.f32 %v8917_v37, %v905_v25 }
 0x110   : > { %v9111_v32 = vmul.f32 %v8907_v31, %v968_v49  ;;  %v902_v53 = vld [vmem:[#allocation2 + $0x28] sm:$0xff]  ;;  %v9126_v50 = vmul.f32 %v8926_v45, %v968_v49  ;;  %12482 = vst [vmem:[#allocation58_spill] sm:$0xff] %v9129_v22  ;;  %v9131_v19 = vpop.f32.mrb[7].mxu1  ;;  %v9134_v21 = vmul.f32 %v8943_v58, %v904_v38  ;;  %v9137_v35 = vmul.f32 %v8943_v58, %v905_v25 }
 0x111   : > { %v9120_v62 = vadd.f32 %v929_v52, %v865_v30  ;;  %v966_v12 = vld [vmem:[#allocation2 + $0x29] sm:$0xff]  ;;  %12483 = vst [vmem:[#allocation59_spill] sm:$0xff] %v9131_v19  ;;  %v862_v52 = vmul.f32 %v8899_v28, %v838_v26  ;;  %v863_v30 = vmul.f32 %v8899_v28, %v839_v56  ;;  %v9142_v61 = vmul.f32 %v8952_v63, %v968_v49  ;;  %v845_v54 = vld [vmem:[#allocation2 + $0x5f] sm:$0xff] }
 0x112   : > { %12484 = vst [vmem:[#allocation60_spill] sm:$0xff] %v9134_v21  ;;  %12485 = vst [vmem:[#allocation61_spill] sm:$0xff] %v9137_v35  ;;  %v926_v55 = vmul.f32 %v8902_v29, %v902_v53  ;;  %v927_v13 = vmul.f32 %v8902_v29, %v903_v41  ;;  %v1034_v48 = vmul.f32 %v8912_v33, %v838_v26 }
 0x113   : > { %12486 = vst [vmem:[#allocation62_spill] sm:$0xff] %v9142_v61  ;;  %v990_v27 = vmul.f32 %v8907_v31, %v966_v12  ;;  %v1035_v38 = vmul.f32 %v8912_v33, %v839_v56  ;;  %v1036_v25 = vmul.f32 %v8912_v33, %v840_v47  ;;  %v1080_v3 = vmul.f32 %v8917_v37, %v902_v53  ;;  %v9151_v2 = vpop.f32.mrb[8].mxu1  ;;  %v909_v61 = vld [vmem:[#allocation2 + $0x60] sm:$0xff] }
 0x114   : > { %12487 = vst [vmem:[#allocation63_spill] sm:$0xff] %v9151_v2  ;;  %v946_v1 = vadd.f32 %v926_v55, %v862_v52  ;;  %v947_v24 = vadd.f32 %v927_v13, %v863_v30  ;;  %v1054_v49 = vadd.f32 %v1034_v48, %v8945_v59  ;;  %v1081_v46 = vmul.f32 %v8917_v37, %v903_v41  ;;  %v9155_v36 = vpop.f32.mrb[9].mxu1  ;;  %v908_v59 = vld [vmem:[#allocation2 + $0x58] sm:$0xff] }
 0x115   : > { %12488 = vst [vmem:[#allocation64_spill] sm:$0xff] %v9155_v36  ;;  %v1055_v26 = vadd.f32 %v1035_v38, %v8947_v60  ;;  %v1126_v7 = vmul.f32 %v8926_v45, %v966_v12  ;;  %v864_v52 = vmul.f32 %v8899_v28, %v840_v47  ;;  %v1172_v48 = vmul.f32 %v8940_v57, %v840_v47  ;;  %v972_v41 = vld [vmem:[#allocation2 + $0x59] sm:$0xff]  ;;  %v907_v38 = vld [vmem:[#allocation2 + $0x50] sm:$0xff] }
 0x116   : > { %v1010_v51 = vadd.f32 %v990_v27, %v946_v1  ;;  %v1011_v56 = vadd.f32 %v8955_v0, %v947_v24  ;;  %v1100_v40 = vadd.f32 %v1080_v3, %v1054_v49  ;;  %v869_v55 = vmul.f32 %v8899_v28, %v845_v54  ;;  %v9171_v0 = vld [vmem:[%s12358_s5] ss:$0 sm:$0xff] }
 0x117   : > { %v1101_v53 = vadd.f32 %v1081_v46, %v1055_v26  ;;  %12491 = vst [vmem:[#allocation67_spill] sm:$0xff] %v9171_v0  ;;  %v933_v3 = vmul.f32 %v8902_v29, %v909_v61  ;;  %v9178_v46 = vmul.f32 %v8907_v31, %v972_v41  ;;  %v9184_v47 = vmul.f32 %v8917_v37, %v908_v59 }
 0x118   : > { %v1056_v13 = vadd.f32 %v1036_v25, %v1010_v51  ;;  %v1146_v30 = vadd.f32 %v1126_v7, %v1100_v40  ;;  %v1057_v60 = vadd.f32 %v1037_v6, %v1011_v56  ;;  %v9175_v40 = vmul.f32 %v8902_v29, %v908_v59  ;;  %v842_v51 = vld [vmem:[#allocation2 + $0x47] sm:$0xff]  ;;  %v843_v7 = vld [vmem:[#allocation2 + $0x4f] sm:$0xff] }
 0x119   : > { %v9164_v12 = vadd.f32 %v8966_v4, %v1101_v53  ;;  %v9180_v24 = vadd.f32 %v933_v3, %v869_v55  ;;  %v1041_v4 = vmul.f32 %v8912_v33, %v845_v54  ;;  %v9187_v1 = vmul.f32 %v8917_v37, %v909_v61  ;;  %v906_v6 = vld [vmem:[#allocation2 + $0x48] sm:$0xff]  ;;  %v844_v55 = vld [vmem:[#allocation2 + $0x57] sm:$0xff] }
 0x11a   : > { %v9166_v27 = vadd.f32 %v1172_v48, %v1146_v30  ;;  %v970_v25 = vld [vmem:[#allocation2 + $0x49] sm:$0xff]  ;;  %v9190_v49 = vmul.f32 %v8926_v45, %v972_v41  ;;  %v1177_v26 = vmul.f32 %v8940_v57, %v845_v54  ;;  %v1222_v56 = vmul.f32 %v8943_v58, %v908_v59 }
 0x11b   : > { %12489 = vst [vmem:[#allocation65_spill] sm:$0xff] %v9164_v12  ;;  %v9195_v53 = vmul.f32 %v8943_v58, %v909_v61  ;;  %v866_v30 = vmul.f32 %v8899_v28, %v842_v51  ;;  %v867_v48 = vmul.f32 %v8899_v28, %v843_v7  ;;  %v930_v3 = vmul.f32 %v8902_v29, %v906_v6 }
 0x11c   : > { %12490 = vst [vmem:[#allocation66_spill] sm:$0xff] %v9166_v27  ;;  %v931_v43 = vmul.f32 %v8902_v29, %v907_v38  ;;  %v948_v35 = vadd.f32 %v9108_v44, %v864_v52  ;;  %v994_v21 = vmul.f32 %v8907_v31, %v970_v25  ;;  %v1013_v54 = vadd.f32 %v8969_v5, %v9120_v62 }
 0x11d   : > { %v1038_v59 = vmul.f32 %v8912_v33, %v842_v51  ;;  %v1039_v61 = vmul.f32 %v8912_v33, %v843_v7  ;;  %v1040_v27 = vmul.f32 %v8912_v33, %v844_v55  ;;  %v950_v39 = vadd.f32 %v930_v3, %v866_v30  ;;  %v847_v3 = vld [vmem:[#allocation2 + $0x6f] sm:$0xff] }
 0x11e   : > { %v951_v0 = vadd.f32 %v931_v43, %v867_v48  ;;  %v1012_v22 = vadd.f32 %v9111_v32, %v948_v35  ;;  %v1084_v12 = vmul.f32 %v8917_v37, %v906_v6  ;;  %v1085_v44 = vmul.f32 %v8917_v37, %v907_v38 }
 0x11f   : > { %v1059_v36 = vadd.f32 %v1039_v61, %v1013_v54  ;;  %v1102_v52 = vadd.f32 %v9115_v23, %v1056_v13  ;;  %v1103_v20 = vadd.f32 %v9123_v34, %v1057_v60  ;;  %v1014_v5 = vadd.f32 %v994_v21, %v950_v39  ;;  %v849_v21 = vld [vmem:[#allocation2 + $0x7f] sm:$0xff]  ;;  %v910_v54 = vld [vmem:[#allocation2 + $0x68] sm:$0xff] }
 0x120   : > { %v1015_v62 = vadd.f32 %v8972_v8, %v951_v0  ;;  %v1058_v2 = vadd.f32 %v1038_v59, %v1012_v22  ;;  %v1130_v18 = vmul.f32 %v8926_v45, %v970_v25  ;;  %v1174_v35 = vmul.f32 %v8940_v57, %v842_v51  ;;  %v913_v60 = vld [vmem:[#allocation2 + $0x80] sm:$0xff]  ;;  %v911_v59 = vld [vmem:[#allocation2 + $0x70] sm:$0xff] }
 0x121   : > { %v1105_v19 = vadd.f32 %v1085_v44, %v1059_v36  ;;  %v1148_v43 = vadd.f32 %v9126_v50, %v1102_v52  ;;  %v1149_v32 = vadd.f32 %v8975_v9, %v1103_v20  ;;  %v9219_v30 = vmul.f32 %v8952_v63, %v972_v41  ;;  %v912_v50 = vld [vmem:[#allocation2 + $0x78] sm:$0xff] }
 0x122   : > { %v868_v23 = vmul.f32 %v8899_v28, %v844_v55  ;;  %v1104_v13 = vadd.f32 %v1084_v12, %v1058_v2  ;;  %v1175_v39 = vmul.f32 %v8940_v57, %v843_v7  ;;  %v1060_v8 = vadd.f32 %v1040_v27, %v1014_v5  ;;  %v9226_v51 = vld [vmem:[#allocation2 + $0x79] sm:$0xff]  ;;  %v974_v5 = vld [vmem:[#allocation2 + $0x69] sm:$0xff] }
 0x123   : > { %v1151_v22 = vadd.f32 %v8978_v10, %v1105_v19  ;;  %v1194_v34 = vadd.f32 %v1174_v35, %v1148_v43  ;;  %v1220_v36 = vmul.f32 %v8943_v58, %v906_v6  ;;  %v1061_v9 = vadd.f32 %v1041_v4, %v1015_v62 }
 0x124   : > { %v1150_v20 = vadd.f32 %v1130_v18, %v1104_v13  ;;  %v1176_v0 = vmul.f32 %v8940_v57, %v844_v55  ;;  %v1195_v41 = vadd.f32 %v1175_v39, %v1149_v32  ;;  %v1221_v2 = vmul.f32 %v8943_v58, %v907_v38  ;;  %v846_v18 = vld [vmem:[#allocation2 + $0x67] sm:$0xff] }
 0x125   : > { %v1240_v12 = vadd.f32 %v1220_v36, %v1194_v34  ;;  %v1266_v7 = vmul.f32 %v8952_v63, %v970_v25  ;;  %v873_v27 = vmul.f32 %v8899_v28, %v849_v21  ;;  %v1197_v19 = vadd.f32 %v1177_v26, %v1151_v22  ;;  %v848_v34 = vld [vmem:[#allocation2 + $0x77] sm:$0xff] }
 0x126   : > { %v1196_v10 = vadd.f32 %v1176_v0, %v1150_v20  ;;  %v9232_v6 = vmul.f32 %v8902_v29, %v912_v50  ;;  %v937_v4 = vmul.f32 %v8902_v29, %v913_v60  ;;  %v9235_v48 = vadd.f32 %v1221_v2, %v1195_v41 }
 0x127   : > { %v9237_v55 = vadd.f32 %v1266_v7, %v1240_v12  ;;  %v9241_v38 = vmul.f32 %v8907_v31, %v9226_v51  ;;  %v1045_v25 = vmul.f32 %v8912_v33, %v849_v21  ;;  %v9249_v44 = vmul.f32 %v8917_v37, %v912_v50 }
 0x128   : > { %v9244_v26 = vadd.f32 %v1222_v56, %v1196_v10  ;;  %v9246_v61 = vadd.f32 %v937_v4, %v873_v27  ;;  %v9252_v52 = vmul.f32 %v8917_v37, %v913_v60  ;;  %v9256_v62 = vmul.f32 %v8926_v45, %v9226_v51 }
 0x129   : > { %v1181_v43 = vmul.f32 %v8940_v57, %v849_v21  ;;  %v9260_v32 = vmul.f32 %v8943_v58, %v912_v50  ;;  %v870_v56 = vmul.f32 %v8899_v28, %v846_v18  ;;  %v9264_v35 = vmul.f32 %v8943_v58, %v913_v60 }
 0x12a   : > { %v871_v13 = vmul.f32 %v8899_v28, %v847_v3  ;;  %v934_v39 = vmul.f32 %v8902_v29, %v910_v54  ;;  %v935_v22 = vmul.f32 %v8902_v29, %v911_v59  ;;  %v952_v36 = vadd.f32 %v9175_v40, %v868_v23 }
 0x12b   : > { %v998_v20 = vmul.f32 %v8907_v31, %v974_v5  ;;  %v1017_v21 = vadd.f32 %v8981_v11, %v9180_v24  ;;  %v1042_v50 = vmul.f32 %v8912_v33, %v846_v18  ;;  %v1043_v60 = vmul.f32 %v8912_v33, %v847_v3 }
 0x12c   : > { %v954_v0 = vadd.f32 %v934_v39, %v870_v56  ;;  %v955_v41 = vadd.f32 %v935_v22, %v871_v13  ;;  %v1044_v2 = vmul.f32 %v8912_v33, %v848_v34  ;;  %v1016_v12 = vadd.f32 %v9178_v46, %v952_v36 }
 0x12d   : > { %v1088_v7 = vmul.f32 %v8917_v37, %v910_v54  ;;  %v1089_v27 = vmul.f32 %v8917_v37, %v911_v59  ;;  %v1106_v40 = vadd.f32 %v9184_v47, %v1060_v8  ;;  %v1063_v24 = vadd.f32 %v1043_v60, %v1017_v21  ;;  %v12492_v60 = vld [vmem:[#allocation59_spill] sm:$0xff] }
 0x12e   : > { %v1018_v23 = vadd.f32 %v998_v20, %v954_v0  ;;  %v1019_v11 = vadd.f32 %v8989_v15, %v955_v41  ;;  %v1107_v10 = vadd.f32 %v9187_v1, %v1061_v9  ;;  %v1062_v4 = vadd.f32 %v1042_v50, %v1016_v12 }
 0x12f   : > { %v1134_v56 = vmul.f32 %v8926_v45, %v974_v5  ;;  %v1152_v13 = vadd.f32 %v9190_v49, %v1106_v40  ;;  %v1178_v46 = vmul.f32 %v8940_v57, %v846_v18  ;;  %v872_v39 = vmul.f32 %v8899_v28, %v848_v34 }
 0x130   : > { %v1064_v22 = vadd.f32 %v1044_v2, %v1018_v23  ;;  %v1109_v36 = vadd.f32 %v1089_v27, %v1063_v24  ;;  %v1153_v47 = vadd.f32 %v8992_v16, %v1107_v10  ;;  %v1108_v8 = vadd.f32 %v1088_v7, %v1062_v4  ;;  %v12494_v27 = vld [vmem:[#allocation63_spill] sm:$0xff]  ;;  %v12497_v24 = vld [vmem:[#allocation65_spill] sm:$0xff]  ;;  %v12498_v10 = vld [vmem:[#allocation58_spill] sm:$0xff] }
 0x131   : > { %v1179_v15 = vmul.f32 %v8940_v57, %v847_v3  ;;  %v1180_v20 = vmul.f32 %v8940_v57, %v848_v34  ;;  %v1198_v1 = vadd.f32 %v1178_v46, %v1152_v13  ;;  %v1224_v21 = vmul.f32 %v8943_v58, %v910_v54  ;;  %v7088_v3 = vld [vmem:[%s12360_s7] ss:$0 sm:$0xff]  ;;  %v12500_v46 = vld [vmem:[#allocation33_spill] sm:$0xff] }
 0x132   : > { %v1155_v9 = vadd.f32 %v8995_v17, %v1109_v36  ;;  %v1225_v49 = vmul.f32 %v8943_v58, %v911_v59  ;;  %v1243_v18 = vadd.f32 %v9195_v53, %v1197_v19  ;;  %v1065_v50 = vadd.f32 %v1045_v25, %v1019_v11  ;;  %v12493_v25 = vld [vmem:[#allocation29_spill] sm:$0xff] }
 0x133   : > { %v1154_v0 = vadd.f32 %v1134_v56, %v1108_v8  ;;  %v1199_v41 = vadd.f32 %v1179_v15, %v1153_v47  ;;  %v794_v16 = vadd.f32 %v9118_v42, %v8986_v14  ;;  %v1272_v34 = vmul.f32 %v8952_v63, %v9226_v51  ;;  %v12499_v56 = vld [vmem:[#allocation67_spill] sm:$0xff]  ;;  %v12504_v8 = vld [vmem:[#allocation44_spill] sm:$0xff] }
 0x134   : > { %v1244_v17 = vadd.f32 %v1224_v21, %v1198_v1  ;;  %v1270_v54 = vmul.f32 %v8952_v63, %v974_v5  ;;  %v789_v59 = vadd.f32 %v8986_v14, %v12492_v60  ;;  %v1201_v53 = vadd.f32 %v1181_v43, %v1155_v9  ;;  %v12495_v5 = vld [vmem:[#allocation30_spill] sm:$0xff]  ;;  %v12496_v43 = vld [vmem:[#allocation64_spill] sm:$0xff] }
 0x135   : > { %v1245_v19 = vadd.f32 %v1225_v49, %v1199_v41  ;;  %v1289_v2 = vadd.f32 %v12493_v25, %v1243_v18  ;;  %831 = vst.msk [vmem:[#allocation2 + $0x99] sm:$0xff] %vm797_vm1, %v794_v16  ;;  %v956_v42 = vadd.f32 %v9232_v6, %v872_v39  ;;  %v1200_v12 = vadd.f32 %v1180_v20, %v1154_v0  ;;  %v12505_v20 = vld [vmem:[#allocation62_spill] sm:$0xff] }
 0x136   : > { %v1290_v7 = vadd.f32 %v1270_v54, %v1244_v17  ;;  %830 = vst.msk [vmem:[#allocation2 + $0x89] sm:$0xff] %vm797_vm1, %v789_v59  ;;  %v1110_v51 = vadd.f32 %v9249_v44, %v1064_v22  ;;  %v1448_v40 = vadd.f32 %v12494_v27, %v7088_v3  ;;  %v1111_v14 = vadd.f32 %v9252_v52, %v1065_v50  ;;  %v12501_v44 = vld [vmem:[#allocation66_spill] sm:$0xff]  ;;  %v12502_v22 = vld [vmem:[#allocation60_spill] sm:$0xff]  ;;  %v12503_v52 = vld [vmem:[#allocation61_spill] sm:$0xff] }
 0x137   : > { %v1291_v23 = vadd.f32 %v12495_v5, %v1245_v19  ;;  %v1443_v11 = vadd.f32 %v7088_v3, %v12496_v43  ;;  %v1193_v4 = vadd.f32 %v12498_v10, %v12497_v24  ;;  %v1020_v6 = vadd.f32 %v9241_v38, %v956_v42  ;;  %v12506_v50 = vld [vmem:[#allocation39_spill] sm:$0xff]  ;;  %v12507_v16 = vld [vmem:[#allocation34_spill] sm:$0xff] }
 0x138   : > { %v1317_v13 = vadd.f32 %v12499_v56, %v1290_v7  ;;  %v1021_v39 = vadd.f32 %v12500_v46, %v9246_v61  ;;  %1465 = vst.msk [vmem:[#allocation4 + $0x29] sm:$0xf] %vm1461_vm2, %v1448_v40  ;;  %v1238_v36 = vadd.f32 %v12502_v22, %v12501_v44  ;;  %v1287_v15 = vadd.f32 %v12504_v8, %v9235_v48 }
 0x139   : > { %1466 = vst.msk [vmem:[#allocation4 + $0x2d] sm:$0xf0] %vm1463_vm3, %v1448_v40  ;;  %1464 = vst.msk [vmem:[#allocation4 + $0x1d] sm:$0xf0] %vm1463_vm3, %v1443_v11  ;;  %v1239_v47 = vadd.f32 %v12503_v52, %v1193_v4  ;;  %v1313_v38 = vadd.f32 %v12499_v56, %v9237_v55  ;;  %v1288_v61 = vadd.f32 %v9219_v30, %v9244_v26 }
 0x13a   : > { %1462 = vst.msk [vmem:[#allocation4 + $0x19] sm:$0xf] %vm1461_vm2, %v1443_v11  ;;  %v1284_v1 = vadd.f32 %v12505_v20, %v1238_v36  ;;  %v1316_v9 = vadd.f32 %v12499_v56, %v1289_v2  ;;  %v1318_v21 = vadd.f32 %v12499_v56, %v1291_v23  ;;  %v1246_v49 = vadd.f32 %v9260_v32, %v1200_v12 }
 0x13b   : > { %1337 = vst.msk [vmem:[#allocation3 + $0x40] sm:$0xff] %vm797_vm1, %v1317_v13  ;;  %v1156_v18 = vadd.f32 %v9256_v62, %v1110_v51  ;;  %v1157_v48 = vadd.f32 %v12506_v50, %v1111_v14  ;;  %v1314_v0 = vadd.f32 %v12499_v56, %v1287_v15  ;;  %1333 = vst.msk [vmem:[#allocation3 + $0x20] sm:$0xff] %vm797_vm1, %v1313_v38 }
 0x13c   : > { %v1315_v30 = vadd.f32 %v12499_v56, %v1288_v61  ;;  %v853_v55 = vld [vmem:[#allocation2 + $0x9f] sm:$0xff]  ;;  %v9342_v3 = vadd.f32 %v12507_v16, %v1239_v47  ;;  %v1311_v17 = vadd.f32 %v12499_v56, %v1284_v1  ;;  %1336 = vst.msk [vmem:[#allocation3 + $0x38] sm:$0xff] %vm797_vm1, %v1316_v9  ;;  %1338 = vst.msk [vmem:[#allocation3 + $0x48] sm:$0xff] %vm797_vm1, %v1318_v21  ;;  %v852_v51 = vld [vmem:[#allocation2 + $0x97] sm:$0xff] }
 0x13d   : > { %v916_v26 = vld [vmem:[#allocation2 + $0x98] sm:$0xff]  ;;  %v917_v41 = vld [vmem:[#allocation2 + $0xa0] sm:$0xff]  ;;  %v9348_v62 = vadd.f32 %v9264_v35, %v1201_v53  ;;  %v9350_v32 = vadd.f32 %v1272_v34, %v1246_v49  ;;  %v1049_v60 = vmul.f32 %v8912_v33, %v853_v55  ;;  %v851_v19 = vld [vmem:[#allocation2 + $0x8f] sm:$0xff]  ;;  %1334 = vst.msk [vmem:[#allocation3 + $0x28] sm:$0xff] %vm797_vm1, %v1314_v0  ;;  %v1185_v34 = vmul.f32 %v8940_v57, %v853_v55 }
 0x13e   : > { %v980_v54 = vld [vmem:[#allocation2 + $0x99] sm:$0xff]  ;;  %v850_v59 = vld [vmem:[#allocation2 + $0x87] sm:$0xff]  ;;  %1335 = vst.msk [vmem:[#allocation3 + $0x30] sm:$0xff] %vm797_vm1, %v1315_v30  ;;  %v1094_v25 = vmul.f32 %v8917_v37, %v916_v26  ;;  %v1095_v2 = vmul.f32 %v8917_v37, %v917_v41  ;;  %v915_v35 = vld [vmem:[#allocation2 + $0x90] sm:$0xff]  ;;  %v1230_v53 = vmul.f32 %v8943_v58, %v916_v26  ;;  %v1231_v7 = vmul.f32 %v8943_v58, %v917_v41 }
 0x13f   : > { %v1140_v42 = vmul.f32 %v8926_v45, %v980_v54  ;;  %v914_v12 = vld [vmem:[#allocation2 + $0x88] sm:$0xff]  ;;  %1331 = vst.msk [vmem:[#allocation3 + $0x10] sm:$0xff] %vm797_vm1, %v1311_v17  ;;  %v9363_v40 = vmul.f32 %v8952_v63, %v980_v54  ;;  %v874_v5 = vmul.f32 %v8899_v28, %v850_v59  ;;  %v875_v23 = vmul.f32 %v8899_v28, %v851_v19  ;;  %v12508_v47 = vld [vmem:[#allocation37_spill] sm:$0xff] }
 0x140   : > { %v978_v27 = vld [vmem:[#allocation2 + $0x89] sm:$0xff]  ;;  %v938_v14 = vmul.f32 %v8902_v29, %v914_v12  ;;  %v939_v43 = vmul.f32 %v8902_v29, %v915_v35  ;;  %v1046_v24 = vmul.f32 %v8912_v33, %v850_v59  ;;  %v1047_v10 = vmul.f32 %v8912_v33, %v851_v19 }
 0x141   : > { %v1002_v11 = vmul.f32 %v8907_v31, %v978_v27  ;;  %v1048_v4 = vmul.f32 %v8912_v33, %v852_v51  ;;  %v1092_v44 = vmul.f32 %v8917_v37, %v914_v12  ;;  %v1093_v28 = vmul.f32 %v8917_v37, %v915_v35  ;;  %v12510_v16 = vld [vmem:[#allocation32_spill] sm:$0xff] }
 0x142   : > { %v958_v13 = vadd.f32 %v938_v14, %v874_v5  ;;  %v959_v46 = vadd.f32 %v939_v43, %v875_v23  ;;  %v1066_v22 = vadd.f32 %v1046_v24, %v1020_v6  ;;  %v1067_v36 = vadd.f32 %v1047_v10, %v1021_v39  ;;  %v12509_v6 = vld [vmem:[#allocation40_spill] sm:$0xff]  ;;  %v9415_v14 = vld [vmem:[#allocation4 + $0x20] sm:$0xff]  ;;  %v12514_v24 = vld [vmem:[#allocation27_spill] sm:$0xff] }
 0x143   : > { %v1138_v29 = vmul.f32 %v8926_v45, %v978_v27  ;;  %v1182_v38 = vmul.f32 %v8940_v57, %v850_v59  ;;  %v1183_v33 = vmul.f32 %v8940_v57, %v851_v19  ;;  %v1184_v1 = vmul.f32 %v8940_v57, %v852_v51  ;;  %v9383_v26 = vld [vmem:[#allocation3 + $0x41] sm:$0xff]  ;;  %v1502_v43 = vld [vmem:[#allocation4 + $0x19] sm:$0xff] }
 0x144   : > { %v1022_v52 = vadd.f32 %v1002_v11, %v958_v13  ;;  %v1023_v8 = vadd.f32 %v12508_v47, %v959_v46  ;;  %v1112_v31 = vadd.f32 %v1092_v44, %v1066_v22  ;;  %v1113_v15 = vadd.f32 %v1093_v28, %v1067_v36  ;;  %v9417_v11 = vld [vmem:[#allocation4 + $0x21] sm:$0xff]  ;;  %v9426_v13 = vld [vmem:[#allocation4 + $0x29] sm:$0xff]  ;;  %v12515_v44 = vld [vmem:[#allocation28_spill] sm:$0xff] }
 0x145   : > { %v1202_v21 = vadd.f32 %v1182_v38, %v1156_v18  ;;  %v1203_v50 = vadd.f32 %v1183_v33, %v1157_v48  ;;  %v1228_v0 = vmul.f32 %v8943_v58, %v914_v12  ;;  %v1229_v55 = vmul.f32 %v8943_v58, %v915_v35  ;;  %v9395_v19 = vld [vmem:[#allocation3 + $0x31] sm:$0xff] }
 0x146   : > { %v1068_v61 = vadd.f32 %v1048_v4, %v1022_v52  ;;  %v1069_v20 = vadd.f32 %v1049_v60, %v1023_v8  ;;  %v1158_v9 = vadd.f32 %v1138_v29, %v1112_v31  ;;  %v1159_v39 = vadd.f32 %v12509_v6, %v1113_v15  ;;  %v9389_v60 = vld [vmem:[#allocation4 + $0x27] sm:$0xff]  ;;  %v1470_v58 = vld [vmem:[#allocation4 + $0x17] sm:$0xff]  ;;  %v1517_v29 = vld [vmem:[#allocation4 + $0x2f] sm:$0xff] }
 0x147   : > { %v1248_v57 = vadd.f32 %v1228_v0, %v1202_v21  ;;  %v1274_v54 = vmul.f32 %v8952_v63, %v978_v27  ;;  %v1249_v18 = vadd.f32 %v1229_v55, %v1203_v50  ;;  %v1312_v63 = vadd.f32 %v12499_v56, %v9342_v3  ;;  %v12513_v27 = vld [vmem:[#allocation46_spill] sm:$0xff]  ;;  %v12516_v52 = vld [vmem:[#allocation31_spill] sm:$0xff]  ;;  %v12517_v38 = vld [vmem:[#allocation48_spill] sm:$0xff] }
 0x148   : > { %v1114_v37 = vadd.f32 %v1094_v25, %v1068_v61  ;;  %v1115_v49 = vadd.f32 %v1095_v2, %v1069_v20  ;;  %v1204_v45 = vadd.f32 %v1184_v1, %v1158_v9  ;;  %v1205_v30 = vadd.f32 %v1185_v34, %v1159_v39  ;;  %v9397_v25 = vld [vmem:[#allocation4 + $0x1f] sm:$0xff]  ;;  %v12511_v2 = vld [vmem:[#allocation35_spill] sm:$0xff] }
 0x149   : > { %v1294_v12 = vadd.f32 %v1274_v54, %v1248_v57  ;;  %v9406_v35 = vpack.i.bf16 %v9383_v26, %v9395_v19  ;;  %v1486_v34 = vld [vmem:[#allocation4 + $0x18] sm:$0xff]  ;;  %v1295_v5 = vadd.f32 %v12513_v27, %v1249_v18  ;;  %v1319_v23 = vadd.f32 %v12499_v56, %v9350_v32  ;;  %1332 = vst.msk [vmem:[#allocation3 + $0x18] sm:$0xff] %vm797_vm1, %v1312_v63  ;;  %v1530_v6 = vld [vmem:[#allocation4 + $0x30] sm:$0xff]  ;;  %v9449_v39 = vld [vmem:[#allocation3 + $0x21] sm:$0xff] }
 0x14a   : > { %v1160_v41 = vadd.f32 %v1140_v42, %v1114_v37  ;;  %v9386_v17 = vadd.f32 %v12510_v16, %v1115_v49  ;;  %v9391_v59 = vadd.f32 %v1230_v53, %v1204_v45  ;;  %v9393_v48 = vadd.f32 %v1231_v7, %v1205_v30  ;;  %v9408_v53 = vld [vmem:[#allocation4 + $0x28] sm:$0xff]  ;;  %v12512_v7 = vld [vmem:[#allocation43_spill] sm:$0xff]  ;;  %v12519_v0 = vld [vmem:[#allocation49_spill] sm:$0xff] }
 0x14b   : > { %v1293_v51 = vadd.f32 %v12512_v7, %v9348_v62  ;;  %v1321_v3 = vadd.f32 %v12499_v56, %v1294_v12  ;;  %v1478_v10 = vmul.f32 %v12514_v24, %v1470_v58  ;;  %v1479_v4 = vmul.f32 %v12514_v24, %v9397_v25  ;;  %1339 = vst.msk [vmem:[#allocation3 + $0x50] sm:$0xff] %vm797_vm1, %v1319_v23  ;;  %v12518_v49 = vld [vmem:[#allocation47_spill] sm:$0xff]  ;;  %v12520_v12 = vld [vmem:[#allocation50_spill] sm:$0xff] }
 0x14c   : > { %v9400_v42 = vadd.f32 %v12511_v2, %v1160_v41  ;;  %v1480_v62 = vmul.f32 %v12514_v24, %v9389_v60  ;;  %v1322_v46 = vadd.f32 %v12499_v56, %v1295_v5  ;;  %v1494_v22 = vmul.f32 %v12515_v44, %v1486_v34  ;;  %v1543_v57 = vld [vmem:[#allocation4 + $0x31] sm:$0xff] }
 0x14d   : > { %v1320_v32 = vadd.f32 %v12499_v56, %v1293_v51  ;;  %1341 = vst.msk [vmem:[#allocation3 + $0x60] sm:$0xff] %vm797_vm1, %v1321_v3  ;;  %v1495_v36 = vmul.f32 %v12515_v44, %v9415_v14  ;;  %v1496_v28 = vmul.f32 %v12515_v44, %v9408_v53  ;;  %v1510_v47 = vmul.f32 %v12516_v52, %v1502_v43 }
 0x14e   : > { %v1511_v8 = vmul.f32 %v12516_v52, %v9417_v11  ;;  %1342 = vst.msk [vmem:[#allocation3 + $0x68] sm:$0xff] %vm797_vm1, %v1322_v46  ;;  %v1498_v31 = vadd.f32 %v1494_v22, %v1478_v10  ;;  %v1512_v15 = vmul.f32 %v12516_v52, %v9426_v13  ;;  %v1522_v61 = vmul.f32 %v12517_v38, %v1470_v58  ;;  %v12522_v52 = vld [vmem:[#allocation42_spill] sm:$0xff] }
 0x14f   : > { %1340 = vst.msk [vmem:[#allocation3 + $0x58] sm:$0xff] %vm797_vm1, %v1320_v32  ;;  %v1499_v20 = vadd.f32 %v1495_v36, %v1479_v4  ;;  %v1500_v33 = vadd.f32 %v1496_v28, %v1480_v62  ;;  %v1523_v1 = vmul.f32 %v12517_v38, %v9397_v25  ;;  %v1524_v9 = vmul.f32 %v12517_v38, %v9389_v60  ;;  %v12521_v32 = vld [vmem:[#allocation41_spill] sm:$0xff] }
 0x150   : > { %v1514_v21 = vadd.f32 %v1510_v47, %v1498_v31  ;;  %v1525_v37 = vmul.f32 %v12517_v38, %v1517_v29  ;;  %v1526_v50 = vadd.f32 %v1522_v61, %v12518_v49  ;;  %v1535_v45 = vmul.f32 %v12519_v0, %v1486_v34  ;;  %v9458_v54 = vld [vmem:[#allocation3 + $0x11] sm:$0xff]  ;;  %v12523_v61 = vld [vmem:[#allocation45_spill] sm:$0xff] }
 0x151   : > { %v1515_v30 = vadd.f32 %v1511_v8, %v1499_v20  ;;  %v1516_v55 = vadd.f32 %v1512_v15, %v1500_v33  ;;  %v1536_v41 = vmul.f32 %v12519_v0, %v9415_v14  ;;  %v1537_v16 = vmul.f32 %v12519_v0, %v9408_v53  ;;  %7519 = vmatprep.mubr.msk.f32.mxu1 %vm1645_vm4, %v9458_v54  ;;  %v12524_v33 = vld [vmem:[#allocation51_spill] sm:$0xff]  ;;  %v12526_v49 = vld [vmem:[#allocation53_spill] sm:$0xff] }
 0x152   : > { %v1527_v18 = vadd.f32 %v1523_v1, %v1514_v21  ;;  %v1538_v58 = vmul.f32 %v12519_v0, %v1530_v6  ;;  %v1539_v2 = vadd.f32 %v1535_v45, %v1526_v50  ;;  %v1548_v63 = vmul.f32 %v12520_v12, %v1502_v43  ;;  %v12527_v0 = vld [vmem:[#allocation52_spill] sm:$0xff] }
 0x153   : > { %v9466_v34 = vpack.i.bf16 %v9449_v39, %v9458_v54  ;;  %v1528_v7 = vadd.f32 %v1524_v9, %v1515_v30  ;;  %v1529_v51 = vadd.f32 %v1525_v37, %v1516_v55  ;;  %v1549_v27 = vmul.f32 %v12520_v12, %v9417_v11  ;;  %v12525_v37 = vld [vmem:[#allocation36_spill] sm:$0xff] }
 0x154   : > { %v1540_v5 = vadd.f32 %v1536_v41, %v1527_v18  ;;  %v1550_v23 = vmul.f32 %v12520_v12, %v9426_v13  ;;  %v1551_v3 = vmul.f32 %v12520_v12, %v1543_v57  ;;  %v1552_v24 = vadd.f32 %v1548_v63, %v1539_v2  ;;  %v12529_v18 = vld [vmem:[#allocation38_spill] sm:$0xff] }
 0x155   : > { %8165 = vrot.lane.b32.xlu0 %v9466_v34, %s12407_s30  ;;  %v9477_v10 = vld [vmem:[#allocation3 + $0x61] sm:$0xff]  ;;  %v1541_v4 = vadd.f32 %v1537_v16, %v1528_v7  ;;  %v1542_v62 = vadd.f32 %v1538_v58, %v1529_v51  ;;  %v1561_v46 = vmul.f32 %v12521_v32, %v9397_v25  ;;  %v1562_v44 = vmul.f32 %v12521_v32, %v9389_v60  ;;  %v12528_v16 = vld [vmem:[#allocation55_spill] sm:$0xff]  ;;  %v12531_v7 = vld [vmem:[#allocation56_spill] sm:$0xff] }
 0x156   : > { %v9475_v43 = vld [vmem:[#allocation3 + $0x51] sm:$0xff]  ;;  %v1553_v36 = vadd.f32 %v1549_v27, %v1540_v5  ;;  %v1563_v28 = vmul.f32 %v12521_v32, %v1517_v29  ;;  %v1574_v47 = vmul.f32 %v12522_v52, %v9415_v14  ;;  %v1575_v38 = vmul.f32 %v12522_v52, %v9408_v53  ;;  %v12530_v12 = vld [vmem:[#allocation54_spill] sm:$0xff]  ;;  %v12532_v27 = vld [vmem:[#allocation57_spill] sm:$0xff] }
 0x157   : > { %v9485_v22 = vpack.i.bf16 %v9477_v10, %v9475_v43  ;;  %v1554_v8 = vadd.f32 %v1550_v23, %v1541_v4  ;;  %v1555_v31 = vadd.f32 %v1551_v3, %v1542_v62  ;;  %v1565_v15 = vadd.f32 %v1561_v46, %v1552_v24 }
 0x158   : > { %v1566_v60 = vadd.f32 %v1562_v44, %v1553_v36  ;;  %v1576_v25 = vmul.f32 %v12522_v52, %v1530_v6  ;;  %v1587_v20 = vmul.f32 %v12523_v61, %v9417_v11  ;;  %v1588_v29 = vmul.f32 %v12523_v61, %v9426_v13  ;;  %v7092_v6 = vld [vmem:[%s12362_s9] ss:$0 sm:$0xff] }
 0x159   : > { %8175 = vrot.lane.b32.xlu1 %v9485_v22, %s12407_s30  ;;  %8170 = vrot.lane.b32.xlu0 %v9406_v35, %s12407_s30  ;;  %v1567_v14 = vadd.f32 %v1563_v28, %v1554_v8  ;;  %v1568_v1 = vadd.f32 %v12524_v33, %v1555_v31  ;;  %v1578_v53 = vadd.f32 %v1574_v47, %v1565_v15 }
 0x15a   : > { %v1589_v9 = vmul.f32 %v12523_v61, %v1543_v57  ;;  %v1579_v21 = vadd.f32 %v1575_v38, %v1566_v60  ;;  %v1207_v11 = vadd.f32 %v12525_v37, %v9386_v17  ;;  %v1252_v13 = vadd.f32 %v12526_v49, %v9400_v42 }
 0x15b   : > { %v1580_v50 = vadd.f32 %v1576_v25, %v1567_v14  ;;  %v1581_v45 = vadd.f32 %v12527_v0, %v1568_v1  ;;  %v1591_v30 = vadd.f32 %v1587_v20, %v1578_v53  ;;  %v1296_v55 = vadd.f32 %v9363_v40, %v9391_v59 }
 0x15c   : > { %v1592_v41 = vadd.f32 %v1588_v29, %v1579_v21  ;;  %v1253_v57 = vadd.f32 %v12528_v16, %v1207_v11  ;;  %v1297_v58 = vadd.f32 %v12529_v18, %v9393_v48  ;;  %v1298_v51 = vadd.f32 %v12531_v7, %v1252_v13 }
 0x15d   : > { %v1593_v2 = vadd.f32 %v1589_v9, %v1580_v50  ;;  %v1594_v63 = vadd.f32 %v12530_v12, %v1581_v45  ;;  %v1602_v17 = vadd.f32 %v7092_v6, %v1591_v30  ;;  %v1323_v23 = vadd.f32 %v12499_v56, %v1296_v55 }
 0x15e   : > { %v1603_v42 = vadd.f32 %v7092_v6, %v1592_v41  ;;  %v1299_v5 = vadd.f32 %v12532_v27, %v1253_v57  ;;  %v1324_v59 = vadd.f32 %v12499_v56, %v1297_v58  ;;  %v1325_v62 = vadd.f32 %v12499_v56, %v1298_v51 }
 0x15f   : > { %v1604_v3 = vadd.f32 %v7092_v6, %v1593_v2  ;;  %v1605_v24 = vadd.f32 %v7092_v6, %v1594_v63  ;;  %v1607_v40 = vrot.slane %v1602_v17, 1  ;;  %1343 = vst.msk [vmem:[#allocation3 + $0x70] sm:$0xff] %vm797_vm1, %v1323_v23 }
 0x160   : > { %v1610_v4 = vrot.slane %v1603_v42, 5  ;;  %v1326_v48 = vadd.f32 %v12499_v56, %v1299_v5  ;;  %1344 = vst.msk [vmem:[#allocation3 + $0x78] sm:$0xff] %vm797_vm1, %v1324_v59  ;;  %1345 = vst.msk [vmem:[#allocation3 + $0x80] sm:$0xff] %vm797_vm1, %v1325_v62 }
 0x161   : > { %v1613_v32 = vrot.slane %v1604_v3, 1  ;;  %v1616_v46 = vrot.slane %v1605_v24, 5 }
 0x162   : > { %v9526_v44 = vsel %vm1618_vm5, %v1607_v40, %v1610_v4  ;;  %1346 = vst.msk [vmem:[#allocation3 + $0x88] sm:$0xff] %vm797_vm1, %v1326_v48 }
 0x163   : > { %v9531_v36 = vsel %vm1618_vm5, %v1613_v32, %v1616_v46  ;;  %7512 = vmatprep.mubr.msk.f32.mxu0 %vm1645_vm4, %v9526_v44 }
 0x164   : > { %v7792_v28 = vpack.c.bf16 %v9531_v36, %v9526_v44 }
 0x166   : > { %7794 = vmatprep.subr.msk.bf16.mxu1 %vm9535_vm6, %v7792_v28 }
 0x167   : > { %7797 = vmatpush3.bf16.xpose.msk.msra.mxu1 %vm9535_vm6, %v7792_v28  ;;  %v9547_v52 = vld [vmem:[#allocation3 + $0x71] sm:$0xff] }
 0x169   : > { %v9549_v47 = vld [vmem:[#allocation3 + $0x81] sm:$0xff] }
 0x16a   : > { %v9553_v8 = vpack.i.bf16 %v9549_v47, %v9547_v52 }
 0x16c   : > { %8180 = vrot.lane.b32.xlu1 %v9553_v8, %s12407_s30 }
 0x16e   : > { %7520 = vmatmul.mubr.msk.f32.vlgmr.msra.gmra.mrb[10].mxu1 %vm1645_vm4, %v9449_v39 }
 0x16f   : > { %7522 = vmatprep.mubr.msk.f32.mxu1 %vm1645_vm4, %v9395_v19 }
 0x172   : > { %7523 = vmatmul.mubr.msk.f32.gmra.mrb[12].mxu1 %vm1645_vm4, %v9383_v26 }
 0x173   : > { %7525 = vmatprep.mubr.msk.f32.mxu1 %vm1645_vm4, %v9475_v43 }
 0x176   : > { %7526 = vmatmul.mubr.msk.f32.gmra.mrb[14].mxu1 %vm1645_vm4, %v9477_v10 }
 0x177   : > { %7528 = vmatprep.mubr.msk.f32.mxu1 %vm1645_vm4, %v9547_v52 }
 0x17a   : > { %7529 = vmatmul.mubr.msk.f32.gmra.mrb[16].mxu1 %vm1645_vm4, %v9549_v47 }
 0x1c7   : > { %v8166_v31 = vpop.permute.xlu0 %8165 }
 0x1c8   : > { %v8168_v15 = vunpack.i.h.bf16 %v8166_v31  ;;  %v8167_v38 = vunpack.i.l.bf16 %v8166_v31 }
 0x1ca   : > { %v7768_v60 = vpack.c.bf16 %v8168_v15, %v8167_v38 }
 0x1cb   : > { %v8171_v25 = vpop.permute.xlu0 %8170  ;;  %v8176_v29 = vpop.permute.xlu1 %8175 }
 0x1cc   : > { %v8173_v61 = vunpack.i.h.bf16 %v8171_v25  ;;  %v8172_v20 = vunpack.i.l.bf16 %v8171_v25  ;;  %7770 = vmatprep.subr.msk.bf16.mxu0 %vm9535_vm6, %v7768_v60  ;;  %v8178_v33 = vunpack.i.h.bf16 %v8176_v29  ;;  %v8177_v1 = vunpack.i.l.bf16 %v8176_v29 }
 0x1cd   : > { %7773 = vmatpush3.bf16.xpose.msk.msra.mxu0 %vm9535_vm6, %v7768_v60 }
 0x1ce   : > { %v7774_v14 = vpack.c.bf16 %v8173_v61, %v8172_v20  ;;  %v7780_v53 = vpack.c.bf16 %v8178_v33, %v8177_v1 }
 0x1d0   : > { %7776 = vmatprep.subr.msk.bf16.mxu0 %vm9535_vm6, %v7774_v14 }
 0x1d5   : > { %7779 = vmatpush3.bf16.xpose.msk.msra.mxu0 %vm9535_vm6, %v7774_v14 }
 0x1d6   : > { %7782 = vmatprep.subr.msk.bf16.mxu0 %vm9535_vm6, %v7780_v53 }
 0x1dd   : > { %7785 = vmatpush3.bf16.xpose.msk.msra.mxu0 %vm9535_vm6, %v7780_v53 }
 0x1de   : > { %v8181_v9 = vpop.permute.xlu1 %8180 }
 0x1df   : > { %v8183_v21 = vunpack.i.h.bf16 %v8181_v9  ;;  %v8182_v6 = vunpack.i.l.bf16 %v8181_v9 }
 0x1e1   : > { %v7786_v37 = vpack.c.bf16 %v8183_v21, %v8182_v6 }
 0x1e3   : > { %7788 = vmatprep.subr.msk.bf16.mxu0 %vm9535_vm6, %v7786_v37 }
 0x1e5   : > { %7791 = vmatpush3.bf16.xpose.msk.msra.mxu0 %vm9535_vm6, %v7786_v37 }
 0x1ec   : > { %7513 = vmatmul.mubr.msk.f32.vlgmr.msra.gmra.mrb[0].mxu0 %vm1645_vm4, %v9531_v36 }
 0x241   : > { %v7521_v11 = vpop.f32.mrb[10].mxu1 }
 0x242   : > { %v9589_v49 = vpop.f32.mrb[11].mxu1  ;;  %v1890_v58 = vsel %vm1645_vm4, %v7521_v11, -inf }
 0x243   : > { %v1887_v31 = vsel %vm1645_vm4, %v9589_v49, -inf }
 0x245   : > { %v9591_v13 = vpop.f32.mrb[12].mxu1 }
 0x246   : > { %v9593_v50 = vpop.f32.mrb[13].mxu1  ;;  %v1896_v60 = vsel %vm1645_vm4, %v9591_v13, -inf }
 0x247   : > { %v1893_v38 = vsel %vm1645_vm4, %v9593_v50, -inf }
 0x249   : > { %v9595_v0 = vpop.f32.mrb[14].mxu1 }
 0x24a   : > { %v9597_v45 = vpop.f32.mrb[15].mxu1  ;;  %v1902_v25 = vsel %vm1645_vm4, %v9595_v0, -inf }
 0x24b   : > { %v1899_v2 = vsel %vm1645_vm4, %v9597_v45, -inf }
 0x24d   : > { %v9599_v30 = vpop.f32.mrb[16].mxu1 }
 0x24e   : > { %v9601_v55 = vpop.f32.mrb[17].mxu1  ;;  %v1908_v61 = vsel %vm1645_vm4, %v9599_v30, -inf }
 0x24f   : > { %v1905_v12 = vsel %vm1645_vm4, %v9601_v55, -inf }
 0x2bf   : > { %v7514_v41 = vpop.f32.mrb[0].mxu0 }
 0x2c0   : > { %v1734_v16 = vpop.f32.mrb[1].mxu0  ;;  %v1747_v57 = vsel %vm1743_vm7, %v7514_v41, -inf }
 0x2c1   : > { %1748 = vmax.xlane.f32.xlu1 %v1747_v57  ;;  %v1744_v18 = vsel %vm1743_vm7, %v1734_v16, -inf }
 0x2c2   : > { %1745 = vmax.xlane.f32.xlu0 %v1744_v18 }
 0x2d2   : > { %8185 = vrot.lane.b32.xlu1 %v9466_v34, %s8520_s24 }
 0x2d6   : > { %8195 = vrot.lane.b32.xlu1 %v9485_v22, %s8520_s24 }
 0x2da   : > { %8200 = vrot.lane.b32.xlu1 %v9553_v8, %s8520_s24 }
 0x2fe   : > { %1891 = vmax.xlane.f32.xlu1 %v1890_v58 }
 0x302   : > { %1900 = vmax.xlane.f32.xlu1 %v1899_v2 }
 0x306   : > { %1906 = vmax.xlane.f32.xlu1 %v1905_v12 }
 0x34e   : > { %v1749_v63 = vpop.xlane.xlu1 %1748 }
 0x34f   : > { %v1751_v17 = vsub.f32 %v7514_v41, %v1749_v63  ;;  %v1746_v7 = vpop.xlane.xlu0 %1745 }
 0x350   : > { %v1750_v51 = vsub.f32 %v1734_v16, %v1746_v7 }
 0x351   : > { %v1754_v42 = vmul.f32 1.442695, %v1751_v17 }
 0x352   : > { %v1752_v27 = vmul.f32 1.442695, %v1750_v51  ;;  %v8186_v5 = vpop.permute.xlu1 %8185 }
 0x353   : > { %8244 = vpow2.f32 %v1754_v42  ;;  %v8188_v23 = vunpack.i.h.bf16 %v8186_v5  ;;  %v8187_v3 = vunpack.i.l.bf16 %v8186_v5 }
 0x354   : > { %8246 = vpow2.f32 %v1752_v27 }
 0x355   : > { %v7798_v24 = vpack.c.bf16 %v8188_v23, %v8187_v3 }
 0x356   : > { %v8196_v48 = vpop.permute.xlu1 %8195 }
 0x357   : > { %7799 = vmatprep.subr.bf16.mxu1 %v7798_v24  ;;  %v8198_v53 = vunpack.i.h.bf16 %v8196_v48  ;;  %v8197_v9 = vunpack.i.l.bf16 %v8196_v48 }
 0x358   : > { %7801 = vmatpush3.bf16.msra.mxu1 %v7798_v24 }
 0x359   : > { %v7806_v16 = vpack.c.bf16 %v8198_v53, %v8197_v9 }
 0x35a   : > { %v8201_v32 = vpop.permute.xlu1 %8200 }
 0x35b   : > { %v8202_v41 = vunpack.i.l.bf16 %v8201_v32 }
 0x35d   : > { %v8245_v40 = vpop.eup %8244 }
 0x35e   : > { %v1759_v59 = vsel %vm1743_vm7, %v8245_v40, 0.0  ;;  %v8247_v4 = vpop.eup %8246 }
 0x35f   : > { %1760 = vadd.xlane.f32.xlu0 %v1759_v59  ;;  %v1756_v62 = vsel %vm1743_vm7, %v8247_v4, 0.0 }
 0x363   : > { %1757 = vadd.xlane.f32.xlu0 %v1756_v62 }
 0x379   : > { %8190 = vrot.lane.b32.xlu0 %v9406_v35, %s8520_s24 }
 0x38b   : > { %v1892_v46 = vpop.xlane.xlu1 %1891 }
 0x38c   : > { %v1912_v28 = vsub.f32 %v7521_v11, %v1892_v46  ;;  %v8203_v11 = vunpack.i.h.bf16 %v8201_v32 }
 0x38e   : > { %v1921_v15 = vmul.f32 1.442695, %v1912_v28  ;;  %v7810_v58 = vpack.c.bf16 %v8203_v11, %v8202_v41 }
 0x38f   : > { %v1901_v63 = vpop.xlane.xlu1 %1900 }
 0x390   : > { %8248 = vpow2.f32 %v1921_v15  ;;  %v1915_v51 = vsub.f32 %v9597_v45, %v1901_v63 }
 0x392   : > { %v1927_v23 = vmul.f32 1.442695, %v1915_v51 }
 0x393   : > { %v1907_v24 = vpop.xlane.xlu1 %1906 }
 0x398   : > { %1888 = vmax.xlane.f32.xlu0 %v1887_v31 }
 0x39a   : > { %v9630_v20 = vpop.eup %8248 }
 0x39b   : > { %v1938_v29 = vsel %vm1645_vm4, %v9630_v20, 0.0 }
 0x39c   : > { %1894 = vmax.xlane.f32.xlu0 %v1893_v38 }
 0x3a0   : > { %1897 = vmax.xlane.f32.xlu0 %v1896_v60 }
 0x3a4   : > { %1903 = vmax.xlane.f32.xlu0 %v1902_v25 }
 0x3a8   : > { %1909 = vmax.xlane.f32.xlu0 %v1908_v61 }
 0x3ac   : > { %1939 = vadd.xlane.f32.xlu0 %v1938_v29 }
 0x3ec   : > { %v1761_v14 = vpop.xlane.xlu0 %1760 }
 0x3f0   : > { %v1758_v33 = vpop.xlane.xlu0 %1757 }
 0x3f1   : > { %8250 = vrcp.f32 %v1758_v33 }
 0x3f2   : > { %8252 = vrcp.f32 %v1761_v14 }
 0x3f4   : > { %v8191_v1 = vpop.permute.xlu0 %8190 }
 0x3f5   : > { %v8193_v21 = vunpack.i.h.bf16 %v8191_v1  ;;  %v8192_v6 = vunpack.i.l.bf16 %v8191_v1 }
 0x3f7   : > { %v7802_v37 = vpack.c.bf16 %v8193_v21, %v8192_v6 }
 0x3f9   : > { %7803 = vmatprep.subr.bf16.mxu1 %v7802_v37 }
 0x3fa   : > { %7805 = vmatpush3.bf16.msra.mxu1 %v7802_v37 }
 0x3fb   : > { %v8251_v57 = vpop.eup %8250  ;;  %7807 = vmatprep.subr.bf16.mxu1 %v7806_v16 }
 0x3fc   : > { %v1764_v18 = vmul.f32 %v8251_v57, %v8247_v4  ;;  %v8253_v2 = vpop.eup %8252  ;;  %v1917_v4 = vsub.f32 %v9601_v55, %v1907_v24 }
 0x3fd   : > { %v1765_v12 = vmul.f32 %v8253_v2, %v8245_v40 }
 0x3fe   : > { %7809 = vmatpush3.bf16.msra.mxu1 %v7806_v16  ;;  %7547 = vmatprep.mubr.msk.f32.mxu1 %vm1743_vm7, %v1764_v18  ;;  %v1931_v32 = vmul.f32 1.442695, %v1917_v4 }
 0x3ff   : > { %7811 = vmatprep.subr.bf16.mxu1 %v7810_v58 }
 0x402   : > { %7813 = vmatpush3.bf16.msra.mxu1 %v7810_v58 }
 0x405   : > { %7548 = vmatmul.mubr.msk.f32.vlgmr.msra.gmra.mrb[18].mxu1 %vm1743_vm7, %v1765_v12 }
 0x425   : > { %v1889_v17 = vpop.xlane.xlu0 %1888 }
 0x426   : > { %v1911_v7 = vsub.f32 %v9589_v49, %v1889_v17 }
 0x428   : > { %v1919_v42 = vmul.f32 1.442695, %v1911_v7 }
 0x429   : > { %v1895_v27 = vpop.xlane.xlu0 %1894 }
 0x42a   : > { %8254 = vpow2.f32 %v1919_v42  ;;  %v1913_v5 = vsub.f32 %v9593_v50, %v1895_v27 }
 0x42c   : > { %v1923_v3 = vmul.f32 1.442695, %v1913_v5 }
 0x42d   : > { %v1898_v59 = vpop.xlane.xlu0 %1897 }
 0x42e   : > { %8256 = vpow2.f32 %v1923_v3  ;;  %v1914_v40 = vsub.f32 %v9591_v13, %v1898_v59 }
 0x42f   : > { %8258 = vpow2.f32 %v1927_v23 }
 0x430   : > { %v1925_v62 = vmul.f32 1.442695, %v1914_v40 }
 0x431   : > { %v1904_v48 = vpop.xlane.xlu0 %1903 }
 0x432   : > { %8260 = vpow2.f32 %v1925_v62  ;;  %v1916_v49 = vsub.f32 %v9595_v0, %v1904_v48 }
 0x434   : > { %v8255_v45 = vpop.eup %8254  ;;  %v1929_v46 = vmul.f32 1.442695, %v1916_v49 }
 0x435   : > { %v1910_v28 = vpop.xlane.xlu0 %1909  ;;  %v1935_v50 = vsel %vm1645_vm4, %v8255_v45, 0.0 }
 0x436   : > { %8262 = vpow2.f32 %v1929_v46  ;;  %v1918_v31 = vsub.f32 %v9599_v30, %v1910_v28  ;;  %1936 = vadd.xlane.f32.xlu1 %v1935_v50 }
 0x437   : > { %8264 = vpow2.f32 %v1931_v32 }
 0x438   : > { %v9644_v15 = vpop.eup %8256  ;;  %v1933_v13 = vmul.f32 1.442695, %v1918_v31 }
 0x439   : > { %v1941_v55 = vsel %vm1645_vm4, %v9644_v15, 0.0  ;;  %v9648_v38 = vpop.eup %8258 }
 0x43a   : > { %1942 = vadd.xlane.f32.xlu1 %v1941_v55  ;;  %8266 = vpow2.f32 %v1933_v13  ;;  %v1947_v30 = vsel %vm1645_vm4, %v9648_v38, 0.0 }
 0x43c   : > { %v9650_v0 = vpop.eup %8260 }
 0x43d   : > { %v1944_v60 = vsel %vm1645_vm4, %v9650_v0, 0.0 }
 0x43e   : > { %1945 = vadd.xlane.f32.xlu0 %v1944_v60  ;;  %1948 = vadd.xlane.f32.xlu1 %v1947_v30 }
 0x440   : > { %v9656_v25 = vpop.eup %8262 }
 0x441   : > { %v1950_v61 = vsel %vm1645_vm4, %v9656_v25, 0.0  ;;  %v9660_v29 = vpop.eup %8264 }
 0x442   : > { %1951 = vadd.xlane.f32.xlu0 %v1950_v61  ;;  %v1953_v14 = vsel %vm1645_vm4, %v9660_v29, 0.0 }
 0x444   : > { %v9664_v33 = vpop.eup %8266 }
 0x445   : > { %v1956_v1 = vsel %vm1645_vm4, %v9664_v33, 0.0 }
 0x446   : > { %1954 = vadd.xlane.f32.xlu0 %v1953_v14 }
 0x44a   : > { %1957 = vadd.xlane.f32.xlu0 %v1956_v1 }
 0x44f   : > { %8205 = vrot.lane.b32.xlu1 %v9466_v34, %s8521_s25 }
 0x453   : > { %8215 = vrot.lane.b32.xlu1 %v9485_v22, %s8521_s25 }
 0x457   : > { %8220 = vrot.lane.b32.xlu1 %v9553_v8, %s8521_s25 }
 0x45b   : > { %2209 = vrot.lane.b32.xlu1 %v9526_v44, %s8522_s26 }
 0x45f   : > { %2211 = vrot.lane.b32.xlu1 %v9531_v36, %s8522_s26  ;;  %v1940_v36 = vpop.xlane.xlu0 %1939 }
 0x460   : > { %8210 = vrot.lane.b32.xlu0 %v9406_v35, %s8521_s25 }
 0x463   : > { %2348 = vrot.lane.b32.xlu1 %v9449_v39, %s8522_s26 }
 0x464   : > { %2346 = vrot.lane.b32.xlu0 %v9458_v54, %s8522_s26 }
 0x467   : > { %2352 = vrot.lane.b32.xlu1 %v9383_v26, %s8522_s26 }
 0x468   : > { %2350 = vrot.lane.b32.xlu0 %v9395_v19, %s8522_s26 }
 0x46b   : > { %2356 = vrot.lane.b32.xlu1 %v9477_v10, %s8522_s26 }
 0x46c   : > { %2354 = vrot.lane.b32.xlu0 %v9475_v43, %s8522_s26 }
 0x46f   : > { %2360 = vrot.lane.b32.xlu1 %v9549_v47, %s8522_s26 }
 0x470   : > { %2358 = vrot.lane.b32.xlu0 %v9547_v52, %s8522_s26  ;;  %s635_s26 = sand.u32 1, %s8508_s22  }
 0x471   : > { %s12312_s2 = scalar_lea.sflag [#allocation11], %s635_s26 }
 0x4c3   : > { %v1937_v44 = vpop.xlane.xlu1 %1936 }
 0x4c4   : > { %8268 = vrcp.f32 %v1937_v44 }
 0x4c5   : > { %8270 = vrcp.f32 %v1940_v36 }
 0x4c7   : > { %v1943_v53 = vpop.xlane.xlu1 %1942 }
 0x4c8   : > { %8272 = vrcp.f32 %v1943_v53 }
 0x4cb   : > { %v1946_v9 = vpop.xlane.xlu0 %1945  ;;  %v1949_v39 = vpop.xlane.xlu1 %1948 }
 0x4cc   : > { %8274 = vrcp.f32 %v1946_v9 }
 0x4cd   : > { %8276 = vrcp.f32 %v1949_v39 }
 0x4ce   : > { %v8269_v21 = vpop.eup %8268 }
 0x4cf   : > { %v1952_v54 = vpop.xlane.xlu0 %1951  ;;  %v8206_v6 = vpop.permute.xlu1 %8205  ;;  %v1967_v26 = vmul.f32 %v8269_v21, %v8255_v45 }
 0x4d0   : > { %v8208_v47 = vunpack.i.h.bf16 %v8206_v6  ;;  %v8207_v37 = vunpack.i.l.bf16 %v8206_v6  ;;  %8278 = vrcp.f32 %v1952_v54  ;;  %v8271_v57 = vpop.eup %8270 }
 0x4d1   : > { %7554 = vmatprep.mubr.msk.f32.mxu1 %vm1645_vm4, %v1967_v26  ;;  %v1968_v63 = vmul.f32 %v8271_v57, %v9630_v20 }
 0x4d2   : > { %v8273_v2 = vpop.eup %8272  ;;  %v7818_v12 = vpack.c.bf16 %v8208_v47, %v8207_v37 }
 0x4d3   : > { %v1955_v19 = vpop.xlane.xlu0 %1954  ;;  %v8216_v43 = vpop.permute.xlu1 %8215  ;;  %v1969_v42 = vmul.f32 %v8273_v2, %v9644_v15 }
 0x4d4   : > { %8280 = vrcp.f32 %v1955_v19  ;;  %v8218_v46 = vunpack.i.h.bf16 %v8216_v43  ;;  %v8217_v28 = vunpack.i.l.bf16 %v8216_v43 }
 0x4d6   : > { %v8275_v17 = vpop.eup %8274  ;;  %v7830_v13 = vpack.c.bf16 %v8218_v46, %v8217_v28 }
 0x4d7   : > { %v1958_v10 = vpop.xlane.xlu0 %1957  ;;  %v9683_v52 = vpop.permute.xlu1 %8220  ;;  %v1970_v20 = vmul.f32 %v8275_v17, %v9650_v0 }
 0x4d8   : > { %v7549_v11 = vpop.f32.mrb[18].mxu1  ;;  %8282 = vrcp.f32 %v1958_v10  ;;  %v8277_v27 = vpop.eup %8276  ;;  %v8222_v0 = vunpack.i.l.bf16 %v9683_v52 }
 0x4d9   : > { %v2071_v41 = vpop.f32.mrb[19].mxu1  ;;  %v1971_v40 = vmul.f32 %v8277_v27, %v9648_v38  ;;  %v8223_v38 = vunpack.i.h.bf16 %v9683_v52 }
 0x4da   : > { %v7814_v16 = vpack.c.bf16 %v7549_v11, %v2071_v41  ;;  %v8279_v24 = vpop.eup %8278 }
 0x4db   : > { %v8211_v18 = vpop.permute.xlu0 %8210  ;;  %v2210_v58 = vpop.permute.xlu1 %2209  ;;  %v1972_v49 = vmul.f32 %v8279_v24, %v9656_v25  ;;  %v7836_v30 = vpack.c.bf16 %v8223_v38, %v8222_v0 }
 0x4dc   : > { %7815 = vmatprep.subr.bf16.mxu1 %v7814_v16  ;;  %v8213_v23 = vunpack.i.h.bf16 %v8211_v18  ;;  %v8212_v3 = vunpack.i.l.bf16 %v8211_v18 }
 0x4dd   : > { %7817 = vmatpush3.bf16.msra.mxu1 %v7814_v16 }
 0x4de   : > { %7820 = vmatprep.subr.msk.bf16.mxu1 %vm9535_vm6, %v7818_v12  ;;  %v8281_v4 = vpop.eup %8280  ;;  %v7824_v62 = vpack.c.bf16 %v8213_v23, %v8212_v3 }
 0x4df   : > { %v2347_v7 = vpop.permute.xlu0 %2346  ;;  %v2212_v51 = vpop.permute.xlu1 %2211  ;;  %v1973_v32 = vmul.f32 %v8281_v4, %v9660_v29 }
 0x4e0   : > { %v7842_v5 = vpack.c.bf16 %v2212_v51, %v2210_v58  ;;  %7555 = vmatmul.mubr.msk.f32.vlgmr.msra.gmra.mrb[20].mxu1 %vm1645_vm4, %v1968_v63  ;;  %7589 = vmatprep.mubr.msk.f32.mxu0 %vm1645_vm4, %v2347_v7 }
 0x4e1   : > { %7557 = vmatprep.mubr.msk.f32.mxu1 %vm1645_vm4, %v1969_v42 }
 0x4e2   : > { %7844 = vmatprep.subr.msk.bf16.mxu0 %vm9535_vm6, %v7842_v5  ;;  %v8283_v45 = vpop.eup %8282 }
 0x4e3   : > { %7847 = vmatpush3.bf16.xpose.msk.msra.mxu0 %vm9535_vm6, %v7842_v5  ;;  %v2349_v59 = vpop.permute.xlu1 %2348  ;;  %v2351_v48 = vpop.permute.xlu0 %2350  ;;  %v1974_v31 = vmul.f32 %v8283_v45, %v9664_v33 }
 0x4e4   : > { %7558 = vmatmul.mubr.msk.f32.gmra.mrb[22].mxu1 %vm1645_vm4, %v1970_v20 }
 0x4e5   : > { %7560 = vmatprep.mubr.msk.f32.mxu1 %vm1645_vm4, %v1971_v40 }
 0x4e6   : > { %7823 = vmatpush3.bf16.xpose.msk.msra.mxu1 %vm9535_vm6, %v7818_v12 }
 0x4e7   : > { %7826 = vmatprep.subr.msk.bf16.mxu1 %vm9535_vm6, %v7824_v62  ;;  %v2353_v50 = vpop.permute.xlu1 %2352  ;;  %v2355_v15 = vpop.permute.xlu0 %2354 }
 0x4e8   : > { %7561 = vmatmul.mubr.msk.f32.gmra.mrb[24].mxu1 %vm1645_vm4, %v1972_v49 }
 0x4e9   : > { %7563 = vmatprep.mubr.msk.f32.mxu1 %vm1645_vm4, %v1973_v32 }
 0x4ea   : > { %7590 = vmatmul.mubr.msk.f32.vlgmr.msra.gmra.mrb[2].mxu0 %vm1645_vm4, %v2349_v59 }
 0x4eb   : > { %7592 = vmatprep.mubr.msk.f32.mxu0 %vm1645_vm4, %v2351_v48  ;;  %v2357_v55 = vpop.permute.xlu1 %2356  ;;  %v2359_v60 = vpop.permute.xlu0 %2358 }
 0x4ec   : > { %7564 = vmatmul.mubr.msk.f32.gmra.mrb[26].mxu1 %vm1645_vm4, %v1974_v31 }
 0x4ed   : > { %7582 = vmatprep.mubr.msk.f32.mxu1 %vm1645_vm4, %v2210_v58 }
 0x4ee   : > { %7829 = vmatpush3.bf16.xpose.msk.msra.mxu1 %vm9535_vm6, %v7824_v62  ;;  %7593 = vmatmul.mubr.msk.f32.gmra.mrb[4].mxu0 %vm1645_vm4, %v2353_v50 }
 0x4ef   : > { %7595 = vmatprep.mubr.msk.f32.mxu0 %vm1645_vm4, %v2355_v15  ;;  %7832 = vmatprep.subr.msk.bf16.mxu1 %vm9535_vm6, %v7830_v13  ;;  %v2361_v25 = vpop.permute.xlu1 %2360 }
 0x4f2   : > { %7596 = vmatmul.mubr.msk.f32.gmra.mrb[6].mxu0 %vm1645_vm4, %v2357_v55 }
 0x4f3   : > { %7598 = vmatprep.mubr.msk.f32.mxu0 %vm1645_vm4, %v2359_v60 }
 0x4f6   : > { %7835 = vmatpush3.bf16.xpose.msk.msra.mxu1 %vm9535_vm6, %v7830_v13  ;;  %7599 = vmatmul.mubr.msk.f32.gmra.mrb[8].mxu0 %vm1645_vm4, %v2361_v25 }
 0x4f7   : > { %7838 = vmatprep.subr.msk.bf16.mxu1 %vm9535_vm6, %v7836_v30 }
 0x4fe   : > { %7841 = vmatpush3.bf16.xpose.msk.msra.mxu1 %vm9535_vm6, %v7836_v30 }
 0x505   : > { %7583 = vmatmul.mubr.msk.f32.vlgmr.msra.gmra.mrb[28].mxu1 %vm1645_vm4, %v2212_v51 }
 0x5b3   : > { %v9731_v61 = vpop.f32.mrb[20].mxu1 }
 0x5b4   : > { %v9733_v29 = vpop.f32.mrb[21].mxu1 }
 0x5b7   : > { %v9735_v14 = vpop.f32.mrb[22].mxu1 }
 0x5b8   : > { %v9737_v33 = vpop.f32.mrb[23].mxu1 }
 0x5bb   : > { %v9739_v1 = vpop.f32.mrb[24].mxu1 }
 0x5bc   : > { %v9741_v44 = vpop.f32.mrb[25].mxu1 }
 0x5bd   : > { %v7591_v36 = vpop.f32.mrb[2].mxu0 }
 0x5be   : > { %v9743_v53 = vpop.f32.mrb[3].mxu0  ;;  %v2486_v37 = vsel %vm1645_vm4, %v7591_v36, -inf }
 0x5bf   : > { %v9745_v9 = vpop.f32.mrb[26].mxu1  ;;  %v2483_v20 = vsel %vm1645_vm4, %v9743_v53, -inf }
 0x5c0   : > { %v9747_v56 = vpop.f32.mrb[27].mxu1 }
 0x5c1   : > { %v9749_v39 = vpop.f32.mrb[4].mxu0 }
 0x5c2   : > { %v9751_v21 = vpop.f32.mrb[5].mxu0  ;;  %v2492_v40 = vsel %vm1645_vm4, %v9749_v39, -inf }
 0x5c3   : > { %v2489_v59 = vsel %vm1645_vm4, %v9751_v21, -inf }
 0x5c5   : > { %v9753_v54 = vpop.f32.mrb[6].mxu0 }
 0x5c6   : > { %v9755_v6 = vpop.f32.mrb[7].mxu0 }
 0x5c7   : > { %v2495_v11 = vsel %vm1645_vm4, %v9755_v6, -inf }
 0x5c9   : > { %v9757_v26 = vpop.f32.mrb[8].mxu0 }
 0x5ca   : > { %v9759_v19 = vpop.f32.mrb[9].mxu0  ;;  %v2504_v4 = vsel %vm1645_vm4, %v9757_v26, -inf }
 0x5cb   : > { %v2501_v41 = vsel %vm1645_vm4, %v9759_v19, -inf }
 0x5d8   : > { %v7584_v43 = vpop.f32.mrb[28].mxu1 }
 0x5d9   : > { %v2315_v10 = vpop.f32.mrb[29].mxu1  ;;  %v2327_v52 = vsel %vm1743_vm7, %v7584_v43, -inf }
 0x5da   : > { %2328 = vmax.xlane.f32.xlu1 %v2327_v52  ;;  %v2324_v47 = vsel %vm1743_vm7, %v2315_v10, -inf }
 0x5db   : > { %2325 = vmax.xlane.f32.xlu0 %v2324_v47 }
 0x5eb   : > { %8225 = vrot.lane.b32.xlu1 %v9466_v34, %s8523_s28 }
 0x5ef   : > { %8235 = vrot.lane.b32.xlu1 %v9485_v22, %s8523_s28 }
 0x5f3   : > { %8240 = vrot.lane.b32.xlu1 %v9553_v8, %s8523_s28 }
 0x617   : > { %2487 = vmax.xlane.f32.xlu1 %v2486_v37 }
 0x61b   : > { %2496 = vmax.xlane.f32.xlu1 %v2495_v11 }
 0x61f   : > { %2502 = vmax.xlane.f32.xlu1 %v2501_v41 }
 0x667   : > { %v2329_v16 = vpop.xlane.xlu1 %2328 }
 0x668   : > { %v2331_v57 = vsub.f32 %v7584_v43, %v2329_v16  ;;  %v2326_v18 = vpop.xlane.xlu0 %2325 }
 0x669   : > { %v2330_v58 = vsub.f32 %v2315_v10, %v2326_v18 }
 0x66a   : > { %v2334_v34 = vmul.f32 1.442695, %v2331_v57 }
 0x66b   : > { %v2332_v2 = vmul.f32 1.442695, %v2330_v58  ;;  %v8226_v22 = vpop.permute.xlu1 %8225 }
 0x66c   : > { %8284 = vpow2.f32 %v2334_v34  ;;  %v8228_v8 = vunpack.i.h.bf16 %v8226_v22  ;;  %v8227_v12 = vunpack.i.l.bf16 %v8226_v22 }
 0x66d   : > { %8286 = vpow2.f32 %v2332_v2 }
 0x66e   : > { %v7848_v63 = vpack.c.bf16 %v8228_v8, %v8227_v12 }
 0x66f   : > { %v8236_v27 = vpop.permute.xlu1 %8235 }
 0x670   : > { %7849 = vmatprep.subr.bf16.mxu0 %v7848_v63  ;;  %v8238_v46 = vunpack.i.h.bf16 %v8236_v27  ;;  %v8237_v28 = vunpack.i.l.bf16 %v8236_v27 }
 0x671   : > { %7851 = vmatpush3.bf16.msra.mxu0 %v7848_v63 }
 0x672   : > { %v7856_v38 = vpack.c.bf16 %v8238_v46, %v8237_v28  ;;  %v2955_v46 = vld [vmem:[#allocation5 + $0x28] sm:$0xff] }
 0x673   : > { %v8241_v5 = vpop.permute.xlu1 %8240  ;;  %v2987_v28 = vld [vmem:[#allocation5 + $0x29] sm:$0xff] }
 0x674   : > { %v8243_v13 = vunpack.i.h.bf16 %v8241_v5  ;;  %v8242_v55 = vunpack.i.l.bf16 %v8241_v5 }
 0x676   : > { %v8285_v17 = vpop.eup %8284  ;;  %v7860_v30 = vpack.c.bf16 %v8243_v13, %v8242_v55  ;;  %v2925_v13 = vld [vmem:[#allocation5 + $0x37] sm:$0xff] }
 0x677   : > { %v2339_v7 = vsel %vm1743_vm7, %v8285_v17, 0.0  ;;  %v8287_v51 = vpop.eup %8286  ;;  %v2957_v55 = vld [vmem:[#allocation5 + $0x38] sm:$0xff] }
 0x678   : > { %2340 = vadd.xlane.f32.xlu0 %v2339_v7  ;;  %v2336_v42 = vsel %vm1743_vm7, %v8287_v51, 0.0 }
 0x67c   : > { %2337 = vadd.xlane.f32.xlu0 %v2336_v42 }
 0x692   : > { %8230 = vrot.lane.b32.xlu0 %v9406_v35, %s8523_s28  ;;  %v2498_v35 = vsel %vm1645_vm4, %v9753_v54, -inf  ;;  %s12304_s28 = scalar_lea.hbm %s12373_s20, %s7302_s3 }
 0x6a4   : > { %v2488_v23 = vpop.xlane.xlu1 %2487 }
 0x6a5   : > { %v2508_v3 = vsub.f32 %v7591_v36, %v2488_v23 }
 0x6a7   : > { %v2517_v24 = vmul.f32 1.442695, %v2508_v3 }
 0x6a8   : > { %v2497_v43 = vpop.xlane.xlu1 %2496 }
 0x6a9   : > { %8288 = vpow2.f32 %v2517_v24  ;;  %v2511_v47 = vsub.f32 %v9755_v6, %v2497_v43 }
 0x6ab   : > { %v2523_v57 = vmul.f32 1.442695, %v2511_v47 }
 0x6ac   : > { %v2503_v11 = vpop.xlane.xlu1 %2502 }
 0x6ad   : > { %v2513_v18 = vsub.f32 %v9759_v19, %v2503_v11 }
 0x6af   : > { %v2527_v22 = vmul.f32 1.442695, %v2513_v18 }
 0x6b1   : > { %2484 = vmax.xlane.f32.xlu0 %v2483_v20 }
 0x6b3   : > { %v9784_v62 = vpop.eup %8288 }
 0x6b4   : > { %v2534_v48 = vsel %vm1645_vm4, %v9784_v62, 0.0 }
 0x6b5   : > { %2490 = vmax.xlane.f32.xlu0 %v2489_v59 }
 0x6b9   : > { %2493 = vmax.xlane.f32.xlu0 %v2492_v40  ;;  %v2953_v40 = vld [vmem:[#allocation5 + $0x18] sm:$0xff] }
 0x6bd   : > { %2499 = vmax.xlane.f32.xlu0 %v2498_v35  ;;  %v2921_v35 = vld [vmem:[#allocation5 + $0x17] sm:$0xff] }
 0x6c1   : > { %2505 = vmax.xlane.f32.xlu0 %v2504_v4  ;;  %v2922_v4 = vld [vmem:[#allocation5 + $0x1f] sm:$0xff] }
 0x6c5   : > { %2535 = vadd.xlane.f32.xlu0 %v2534_v48  ;;  %v2985_v48 = vld [vmem:[#allocation5 + $0x19] sm:$0xff] }
 0x705   : > { %v2341_v49 = vpop.xlane.xlu0 %2340 }
 0x709   : > { %v2338_v45 = vpop.xlane.xlu0 %2337 }
 0x70a   : > { %8290 = vrcp.f32 %v2338_v45  ;;  %v2986_v45 = vld [vmem:[#allocation5 + $0x21] sm:$0xff] }
 0x70b   : > { %8292 = vrcp.f32 %v2341_v49  ;;  %v2954_v49 = vld [vmem:[#allocation5 + $0x20] sm:$0xff] }
 0x70d   : > { %v8231_v32 = vpop.permute.xlu0 %8230 }
 0x70e   : > { %v8233_v50 = vunpack.i.h.bf16 %v8231_v32  ;;  %v8232_v31 = vunpack.i.l.bf16 %v8231_v32  ;;  %v2923_v32 = vld [vmem:[#allocation5 + $0x27] sm:$0xff] }
 0x710   : > { %v7852_v15 = vpack.c.bf16 %v8233_v50, %v8232_v31  ;;  %v2924_v50 = vld [vmem:[#allocation5 + $0x2f] sm:$0xff] }
 0x711   : > { %v2956_v31 = vld [vmem:[#allocation5 + $0x30] sm:$0xff] }
 0x712   : > { %7853 = vmatprep.subr.bf16.mxu0 %v7852_v15 }
 0x713   : > { %7855 = vmatpush3.bf16.msra.mxu0 %v7852_v15  ;;  %v2988_v15 = vld [vmem:[#allocation5 + $0x31] sm:$0xff] }
 0x714   : > { %v8291_v0 = vpop.eup %8290  ;;  %7857 = vmatprep.subr.bf16.mxu0 %v7856_v38 }
 0x715   : > { %v2344_v60 = vmul.f32 %v8291_v0, %v8287_v51  ;;  %v8293_v25 = vpop.eup %8292 }
 0x716   : > { %v2345_v36 = vmul.f32 %v8293_v25, %v8285_v17 }
 0x717   : > { %7859 = vmatpush3.bf16.msra.mxu0 %v7856_v38  ;;  %7617 = vmatprep.mubr.msk.f32.mxu0 %vm1743_vm7, %v2344_v60 }
 0x718   : > { %7861 = vmatprep.subr.bf16.mxu0 %v7860_v30 }
 0x71b   : > { %7863 = vmatpush3.bf16.msra.mxu0 %v7860_v30 }
 0x71e   : > { %7618 = vmatmul.mubr.msk.f32.vlgmr.msra.gmra.mrb[10].mxu0 %vm1743_vm7, %v2345_v36 }
 0x73e   : > { %v2485_v10 = vpop.xlane.xlu0 %2484 }
 0x73f   : > { %v2507_v52 = vsub.f32 %v9743_v53, %v2485_v10 }
 0x741   : > { %v2515_v37 = vmul.f32 1.442695, %v2507_v52 }
 0x742   : > { %v2491_v41 = vpop.xlane.xlu0 %2490 }
 0x743   : > { %8294 = vpow2.f32 %v2515_v37  ;;  %v2509_v16 = vsub.f32 %v9751_v21, %v2491_v41 }
 0x745   : > { %v2519_v58 = vmul.f32 1.442695, %v2509_v16 }
 0x746   : > { %v2494_v34 = vpop.xlane.xlu0 %2493 }
 0x747   : > { %8296 = vpow2.f32 %v2519_v58  ;;  %v2510_v2 = vsub.f32 %v9749_v39, %v2494_v34 }
 0x748   : > { %8298 = vpow2.f32 %v2523_v57 }
 0x749   : > { %v2521_v8 = vmul.f32 1.442695, %v2510_v2 }
 0x74a   : > { %v2500_v53 = vpop.xlane.xlu0 %2499 }
 0x74b   : > { %8300 = vpow2.f32 %v2521_v8  ;;  %v2512_v6 = vsub.f32 %v9753_v54, %v2500_v53 }
 0x74c   : > { %8302 = vpow2.f32 %v2527_v22 }
 0x74d   : > { %v9796_v12 = vpop.eup %8294  ;;  %v2525_v63 = vmul.f32 1.442695, %v2512_v6 }
 0x74e   : > { %v2506_v21 = vpop.xlane.xlu0 %2505  ;;  %v2531_v19 = vsel %vm1645_vm4, %v9796_v12, 0.0 }
 0x74f   : > { %8304 = vpow2.f32 %v2525_v63  ;;  %v2514_v17 = vsub.f32 %v9757_v26, %v2506_v21  ;;  %2532 = vadd.xlane.f32.xlu1 %v2531_v19  ;;  %v3663_v19 = vld [vmem:[%s12363_s10 + $0xa0] sm:$0xff] }
 0x751   : > { %v9801_v39 = vpop.eup %8296  ;;  %v2529_v7 = vmul.f32 1.442695, %v2514_v17  ;;  %v3664_v17 = vld [vmem:[%s12363_s10 + $0xa8] sm:$0xff] }
 0x752   : > { %v2537_v51 = vsel %vm1645_vm4, %v9801_v39, 0.0  ;;  %v9805_v42 = vpop.eup %8298  ;;  %v2536_v0 = vpop.xlane.xlu0 %2535 }
 0x753   : > { %8306 = vpow2.f32 %v2529_v7  ;;  %2538 = vadd.xlane.f32.xlu1 %v2537_v51  ;;  %v2543_v27 = vsel %vm1645_vm4, %v9805_v42, 0.0 }
 0x755   : > { %v9807_v54 = vpop.eup %8300 }
 0x756   : > { %v2540_v5 = vsel %vm1645_vm4, %v9807_v54, 0.0  ;;  %v9813_v26 = vpop.eup %8302 }
 0x757   : > { %2544 = vadd.xlane.f32.xlu1 %v2543_v27  ;;  %2541 = vadd.xlane.f32.xlu0 %v2540_v5  ;;  %v2549_v3 = vsel %vm1645_vm4, %v9813_v26, 0.0  ;;  %v3666_v27 = vld [vmem:[%s12363_s10 + $0xb8] sm:$0xff] }
 0x759   : > { %v9815_v23 = vpop.eup %8304 }
 0x75a   : > { %v2546_v20 = vsel %vm1645_vm4, %v9815_v23, 0.0 }
 0x75b   : > { %2550 = vadd.xlane.f32.xlu1 %v2549_v3  ;;  %2547 = vadd.xlane.f32.xlu0 %v2546_v20  ;;  %v2889_v3 = vld [vmem:[#allocation5 + $0x16] sm:$0xff] }
 0x75d   : > { %v9821_v24 = vpop.eup %8306 }
 0x75e   : > { %v2552_v59 = vsel %vm1645_vm4, %v9821_v24, 0.0 }
 0x75f   : > { %2553 = vadd.xlane.f32.xlu0 %v2552_v59 }
 0x76c   : > { %3211 = vrot.lane.b32.xlu1 %v2953_v40, %s8520_s24  ;;  %v2890_v40 = vld [vmem:[#allocation5 + $0x1e] sm:$0xff] }
 0x770   : > { %3085 = vrot.lane.b32.xlu1 %v2922_v4, %s8524_s29 }
 0x774   : > { %3213 = vrot.lane.b32.xlu1 %v2954_v49, %s8520_s24  ;;  %v3669_v49 = vld [vmem:[%s12363_s10 + $0xd0] sm:$0xff] }
 0x775   : > { %3083 = vrot.lane.b32.xlu0 %v2921_v35, %s8524_s29 }
 0x778   : > { %3087 = vrot.lane.b32.xlu1 %v2923_v32, %s8524_s29  ;;  %v3017_v32 = vld [vmem:[#allocation5 + $0x1a] sm:$0xff] }
 0x779   : > { %3339 = vrot.lane.b32.xlu0 %v2985_v48, %s12407_s30  ;;  %3532 = vst.msk [vmem:[#allocation6 + $0x28] sm:$0xff] %vm667_vm0, %v3017_v32  ;;  %v2990_v32 = vld [vmem:[#allocation5 + $0x41] sm:$0xff] }
 0x77c   : > { %3343 = vrot.lane.b32.xlu1 %v2987_v28, %s12407_s30 }
 0x77d   : > { %3341 = vrot.lane.b32.xlu0 %v2986_v45, %s12407_s30 }
 0x780   : > { %3345 = vrot.lane.b32.xlu1 %v2988_v15, %s12407_s30  ;;  %v3019_v15 = vld [vmem:[#allocation5 + $0x2a] sm:$0xff] }
 0x781   : > { %3215 = vrot.lane.b32.xlu0 %v2955_v46, %s8520_s24  ;;  %v3670_v46 = vld [vmem:[%s12363_s10 + $0xd8] sm:$0xff]  ;;  %3536 = vst.msk [vmem:[#allocation6 + $0x48] sm:$0xff] %vm667_vm0, %v3019_v15 }
 0x784   : > { %3219 = vrot.lane.b32.xlu1 %v2957_v55, %s8520_s24  ;;  %v3020_v55 = vld [vmem:[#allocation5 + $0x32] sm:$0xff] }
 0x785   : > { %3089 = vrot.lane.b32.xlu0 %v2924_v50, %s8524_s29  ;;  %3538 = vst.msk [vmem:[#allocation6 + $0x58] sm:$0xff] %vm667_vm0, %v3020_v55 }
 0x789   : > { %3217 = vrot.lane.b32.xlu0 %v2956_v31, %s8520_s24  ;;  %v3018_v31 = vld [vmem:[#allocation5 + $0x22] sm:$0xff] }
 0x78a   : > { %3534 = vst.msk [vmem:[#allocation6 + $0x38] sm:$0xff] %vm667_vm0, %v3018_v31 }
 0x78d   : > { %3091 = vrot.lane.b32.xlu0 %v2925_v13, %s8524_s29 }
 0x7dc   : > { %v2533_v38 = vpop.xlane.xlu1 %2532 }
 0x7dd   : > { %8308 = vrcp.f32 %v2533_v38 }
 0x7de   : > { %8310 = vrcp.f32 %v2536_v0  ;;  %v2891_v0 = vld [vmem:[#allocation5 + $0x26] sm:$0xff] }
 0x7e0   : > { %v2539_v60 = vpop.xlane.xlu1 %2538 }
 0x7e1   : > { %8312 = vrcp.f32 %v2539_v60  ;;  %v7878_v60 = vpack.c.bf16 %v3670_v46, %v3669_v49  ;;  %v2958_v49 = vld [vmem:[#allocation5 + $0x40] sm:$0xff] }
 0x7e4   : > { %v2542_v25 = vpop.xlane.xlu0 %2541  ;;  %v2545_v43 = vpop.xlane.xlu1 %2544 }
 0x7e5   : > { %8314 = vrcp.f32 %v2542_v25  ;;  %v3672_v25 = vld [vmem:[%s12363_s10 + $0xe8] sm:$0xff] }
 0x7e6   : > { %8316 = vrcp.f32 %v2545_v43 }
 0x7e7   : > { %v8309_v30 = vpop.eup %8308 }
 0x7e8   : > { %v2563_v36 = vmul.f32 %v8309_v30, %v9796_v12  ;;  %v2548_v10 = vpop.xlane.xlu0 %2547  ;;  %v2551_v52 = vpop.xlane.xlu1 %2550  ;;  %v3671_v30 = vld [vmem:[%s12363_s10 + $0xe0] sm:$0xff] }
 0x7e9   : > { %8318 = vrcp.f32 %v2548_v10  ;;  %v8311_v16 = vpop.eup %8310 }
 0x7ea   : > { %7624 = vmatprep.mubr.msk.f32.mxu0 %vm1645_vm4, %v2563_v36  ;;  %8320 = vrcp.f32 %v2551_v52  ;;  %v2564_v18 = vmul.f32 %v8311_v16, %v9784_v62  ;;  %v3674_v16 = vld [vmem:[%s12363_s10 + $0xf8] sm:$0xff] }
 0x7eb   : > { %v8313_v57 = vpop.eup %8312 }
 0x7ec   : > { %v2554_v11 = vpop.xlane.xlu0 %2553  ;;  %v2565_v34 = vmul.f32 %v8313_v57, %v9801_v39  ;;  %v3665_v39 = vld [vmem:[%s12363_s10 + $0xb0] sm:$0xff]  ;;  %v3212_v7 = vpop.permute.xlu1 %3211 }
 0x7ed   : > { %8322 = vrcp.f32 %v2554_v11  ;;  %v7872_v5 = vpack.c.bf16 %v3666_v27, %v3665_v39  ;;  %v2892_v11 = vld [vmem:[#allocation5 + $0x2e] sm:$0xff]  ;;  %v3679_v39 = vld [vmem:[%s12363_s10 + $0x120] sm:$0xff]  ;;  %v3682_v27 = vld [vmem:[%s12363_s10 + $0x138] sm:$0xff] }
 0x7ef   : > { %v8315_v58 = vpop.eup %8314 }
 0x7f0   : > { %v8317_v2 = vpop.eup %8316  ;;  %v2566_v22 = vmul.f32 %v8315_v58, %v9807_v54  ;;  %v3084_v51 = vpop.permute.xlu0 %3083  ;;  %v7869_v54 = vpack.c.bf16 %v3664_v17, %v3663_v19  ;;  %v3678_v19 = vld [vmem:[%s12363_s10 + $0x118] sm:$0xff] }
 0x7f1   : > { %v7619_v47 = vpop.f32.mrb[10].mxu0  ;;  %v2567_v53 = vmul.f32 %v8317_v2, %v9805_v42  ;;  %v8525_v42 = vmov 0.0|0.0   ;;  %v3086_v20 = vpop.permute.xlu1 %3085  ;;  %v3433_v59 = vsel %vm667_vm0, %v2889_v3, %v3084_v51  ;;  %v3602_v3 = vld [vmem:[#allocation6 + $0x58] sm:$0xff] }
 0x7f2   : > { %v2667_v37 = vpop.f32.mrb[11].mxu0  ;;  %7898 = vmatprep.subr.bf16.mxu1 %v8525_v42  ;;  %v3434_v35 = vsel %vm667_vm0, %v2890_v40, %v3086_v20  ;;  %v3465_v4 = vsel %vm1743_vm7, %v3433_v59, %v3212_v7  ;;  %v3680_v7 = vld [vmem:[%s12363_s10 + $0x128] sm:$0xff]  ;;  %v3021_v20 = vld [vmem:[#allocation5 + $0x3a] sm:$0xff] }
 0x7f3   : > { %v7864_v41 = vpack.c.bf16 %v7619_v47, %v2667_v37  ;;  %v8319_v8 = vpop.eup %8318  ;;  %v7881_v47 = vpack.c.bf16 %v3672_v25, %v3671_v30  ;;  %v3596_v37 = vld [vmem:[#allocation6 + $0x28] sm:$0xff]  ;;  %v7893_v51 = vpack.c.bf16 %v3680_v7, %v3679_v39  ;;  %3540 = vst.msk [vmem:[#allocation6 + $0x68] sm:$0xff] %vm667_vm0, %v3021_v20  ;;  %v4179_v20 = vld [vmem:[%s12363_s10 + $0x140] sm:$0xff] }
 0x7f4   : > { %v8321_v6 = vpop.eup %8320  ;;  %v2568_v62 = vmul.f32 %v8319_v8, %v9815_v23  ;;  %v3668_v23 = vld [vmem:[%s12363_s10 + $0xc8] sm:$0xff]  ;;  %v2989_v40 = vld [vmem:[#allocation5 + $0x39] sm:$0xff] }
 0x7f5   : > { %7865 = vmatprep.subr.bf16.mxu0 %v7864_v41  ;;  %v2569_v63 = vmul.f32 %v8321_v6, %v9813_v26  ;;  %v3667_v26 = vld [vmem:[%s12363_s10 + $0xc0] sm:$0xff]  ;;  %v3214_v28 = vpop.permute.xlu1 %3213  ;;  %v3676_v8 = vld [vmem:[%s12363_s10 + $0x108] sm:$0xff] }
 0x7f6   : > { %7867 = vmatpush3.bf16.msra.mxu0 %v7864_v41  ;;  %v7875_v48 = vpack.c.bf16 %v3668_v23, %v3667_v26  ;;  %v3466_v13 = vsel %vm1743_vm7, %v3434_v35, %v3214_v28  ;;  %v3673_v41 = vld [vmem:[%s12363_s10 + $0xf0] sm:$0xff]  ;;  %v3598_v26 = vld [vmem:[#allocation6 + $0x38] sm:$0xff]  ;;  %v3600_v23 = vld [vmem:[#allocation6 + $0x48] sm:$0xff] }
 0x7f7   : > { %v8323_v12 = vpop.eup %8322  ;;  %7868 = vmatprep.subr.bf16.mxu0 %v8525_v42  ;;  %v7884_v2 = vpack.c.bf16 %v3674_v16, %v3673_v41  ;;  %v2926_v35 = vld [vmem:[#allocation5 + $0x3f] sm:$0xff] }
 0x7f8   : > { %v2570_v21 = vmul.f32 %v8323_v12, %v9821_v24  ;;  %v3340_v24 = vpop.permute.xlu0 %3339 }
 0x7f9   : > { %7625 = vmatmul.mubr.msk.f32.vlgmr.msra.gmra.mrb[12].mxu0 %vm1645_vm4, %v2564_v18  ;;  %v9883_v45 = vsel %vm797_vm1, %v3465_v4, %v3340_v24  ;;  %v3088_v36 = vpop.permute.xlu1 %3087 }
 0x7fa   : > { %7627 = vmatprep.mubr.msk.f32.mxu0 %vm1645_vm4, %v2565_v34  ;;  %7870 = vmatpush1.bf16.msra.mxu0 %v7869_v54  ;;  %3531 = vst [vmem:[#allocation6 + $0x20] sm:$0xff] %v9883_v45  ;;  %v3435_v10 = vsel %vm667_vm0, %v2891_v0, %v3088_v36  ;;  %v3681_v54 = vld [vmem:[%s12363_s10 + $0x130] sm:$0xff]  ;;  %v3604_v46 = vld [vmem:[#allocation6 + $0x68] sm:$0xff] }
 0x7fb   : > { %7871 = vmatprep.subr.bf16.mxu0 %v8525_v42 }
 0x7fc   : > { %v3342_v50 = vpop.permute.xlu0 %3341 }
 0x7fd   : > { %7628 = vmatmul.mubr.msk.f32.gmra.mrb[14].mxu0 %vm1645_vm4, %v2566_v22  ;;  %v3498_v38 = vsel %vm797_vm1, %v3466_v13, %v3342_v50  ;;  %v3344_v57 = vpop.permute.xlu1 %3343  ;;  %v3675_v22 = vld [vmem:[%s12363_s10 + $0x100] sm:$0xff] }
 0x7fe   : > { %7630 = vmatprep.mubr.msk.f32.mxu0 %vm1645_vm4, %v2567_v53  ;;  %7873 = vmatpush1.bf16.msra.mxu0 %v7872_v5  ;;  %3533 = vst [vmem:[#allocation6 + $0x30] sm:$0xff] %v3498_v38  ;;  %v7896_v5 = vpack.c.bf16 %v3682_v27, %v3681_v54 }
 0x7ff   : > { %7874 = vmatprep.subr.bf16.mxu0 %v8525_v42 }
 0x800   : > { %v3216_v43 = vpop.permute.xlu0 %3215 }
 0x801   : > { %7631 = vmatmul.mubr.msk.f32.gmra.mrb[16].mxu0 %vm1645_vm4, %v2568_v62  ;;  %v3467_v52 = vsel %vm1743_vm7, %v3435_v10, %v3216_v43  ;;  %v3346_v6 = vpop.permute.xlu1 %3345  ;;  %v2894_v43 = vld [vmem:[#allocation5 + $0x3e] sm:$0xff] }
 0x802   : > { %7633 = vmatprep.mubr.msk.f32.mxu0 %vm1645_vm4, %v2569_v63  ;;  %7876 = vmatpush1.bf16.msra.mxu0 %v7875_v48  ;;  %v3499_v58 = vsel %vm797_vm1, %v3467_v52, %v3344_v57  ;;  %v7887_v63 = vpack.c.bf16 %v3676_v8, %v3675_v22 }
 0x803   : > { %7877 = vmatprep.subr.bf16.mxu0 %v8525_v42  ;;  %3535 = vst [vmem:[#allocation6 + $0x40] sm:$0xff] %v3499_v58 }
 0x804   : > { %v3090_v18 = vpop.permute.xlu0 %3089 }
 0x805   : > { %7634 = vmatmul.mubr.msk.f32.gmra.mrb[18].mxu0 %vm1645_vm4, %v2570_v21  ;;  %v3436_v34 = vsel %vm667_vm0, %v2892_v11, %v3090_v18  ;;  %v3677_v21 = vld [vmem:[%s12363_s10 + $0x110] sm:$0xff]  ;;  %v3220_v55 = vpop.permute.xlu1 %3219 }
 0x806   : > { %7879 = vmatpush1.bf16.msra.mxu0 %v7878_v60  ;;  %7153 = vmatprep.mubr.msk.f32.mxu0 %vm667_vm0, %v3596_v37  ;;  %v7890_v17 = vpack.c.bf16 %v3678_v19, %v3677_v21 }
 0x807   : > { %7880 = vmatprep.subr.bf16.mxu0 %v8525_v42 }
 0x808   : > { %v3218_v53 = vpop.permute.xlu0 %3217 }
 0x809   : > { %v3468_v62 = vsel %vm1743_vm7, %v3436_v34, %v3218_v53 }
 0x80a   : > { %7882 = vmatpush1.bf16.msra.mxu0 %v7881_v47  ;;  %v3500_v12 = vsel %vm797_vm1, %v3468_v62, %v3346_v6 }
 0x80b   : > { %7883 = vmatprep.subr.bf16.mxu0 %v8525_v42  ;;  %3537 = vst [vmem:[#allocation6 + $0x50] sm:$0xff] %v3500_v12 }
 0x80c   : > { %v3092_v13 = vpop.permute.xlu0 %3091 }
 0x80e   : > { %7885 = vmatpush1.bf16.msra.mxu0 %v7884_v2 }
 0x80f   : > { %7886 = vmatprep.subr.bf16.mxu0 %v8525_v42 }
 0x812   : > { %7888 = vmatpush1.bf16.msra.mxu0 %v7887_v63 }
 0x813   : > { %7889 = vmatprep.subr.bf16.mxu0 %v8525_v42 }
 0x816   : > { %7891 = vmatpush1.bf16.msra.mxu0 %v7890_v17 }
 0x817   : > { %7892 = vmatprep.subr.bf16.mxu0 %v8525_v42 }
 0x81a   : > { %7894 = vmatpush1.bf16.msra.mxu0 %v7893_v51 }
 0x81b   : > { %7895 = vmatprep.subr.bf16.mxu0 %v8525_v42 }
 0x81e   : > { %7897 = vmatpush1.bf16.msra.mxu0 %v7896_v5 }
 0x81f   : > { %7928 = vmatprep.subr.bf16.mxu0 %v8525_v42 }
 0x821   : > { %3820 = vmatmul.mubr.f32.vlgmr.msra.gmra.mrb[20].mxu0 %v9883_v45  ;;  %v3022_v45 = vld [vmem:[#allocation5 + $0x42] sm:$0xff] }
 0x822   : > { %7154 = vmatprep.mubr.msk.f32.mxu0 %vm667_vm0, %v3598_v26  ;;  %3542 = vst.msk [vmem:[#allocation6 + $0x78] sm:$0xff] %vm667_vm0, %v3022_v45 }
 0x825   : > { %3825 = vmatmul.mubr.f32.gmra.mrb[22].mxu0 %v3498_v38  ;;  %v2893_v38 = vld [vmem:[#allocation5 + $0x36] sm:$0xff] }
 0x826   : > { %7155 = vmatprep.mubr.msk.f32.mxu0 %vm667_vm0, %v3600_v23  ;;  %v3437_v60 = vsel %vm667_vm0, %v2893_v38, %v3092_v13 }
 0x827   : > { %v3469_v10 = vsel %vm1743_vm7, %v3437_v60, %v3220_v55 }
 0x829   : > { %3830 = vmatmul.mubr.f32.gmra.mrb[24].mxu0 %v3499_v58  ;;  %v3606_v47 = vld [vmem:[#allocation6 + $0x78] sm:$0xff] }
 0x82a   : > { %7156 = vmatprep.mubr.msk.f32.mxu0 %vm667_vm0, %v3602_v3  ;;  %v3024_v3 = vld [vmem:[#allocation5 + $0x52] sm:$0xff] }
 0x82b   : > { %3546 = vst.msk [vmem:[#allocation6 + $0x98] sm:$0xff] %vm667_vm0, %v3024_v3 }
 0x82d   : > { %3835 = vmatmul.mubr.f32.gmra.mrb[26].mxu0 %v3500_v12 }
 0x82e   : > { %7157 = vmatprep.mubr.msk.f32.mxu0 %vm667_vm0, %v3604_v46 }
 0x8cc   : > { %v7626_v24 = vpop.f32.mrb[12].mxu0 }
 0x8cd   : > { %2815 = vrot.lane.b32.xlu0 %v7626_v24, %s8526_s21  ;;  %v2766_v59 = vpop.f32.mrb[13].mxu0 }
 0x8ce   : > { %2813 = vrot.lane.b32.xlu1 %v2766_v59, %s8526_s21 }
 0x8d0   : > { %v7629_v4 = vpop.f32.mrb[14].mxu0 }
 0x8d1   : > { %3347 = vrot.lane.b32.xlu0 %v2989_v40, %s12407_s30  ;;  %v2776_v48 = vpop.f32.mrb[15].mxu0 }
 0x8d2   : > { %3093 = vrot.lane.b32.xlu1 %v2926_v35, %s8524_s29  ;;  %v3026_v35 = vld [vmem:[#allocation5 + $0x62] sm:$0xff] }
 0x8d3   : > { %3550 = vst.msk [vmem:[#allocation6 + $0xb8] sm:$0xff] %vm667_vm0, %v3026_v35 }
 0x8d4   : > { %v7632_v28 = vpop.f32.mrb[16].mxu0 }
 0x8d5   : > { %3221 = vrot.lane.b32.xlu0 %v2958_v49, %s8520_s24  ;;  %v2786_v50 = vpop.f32.mrb[17].mxu0 }
 0x8d6   : > { %3349 = vrot.lane.b32.xlu1 %v2990_v32, %s12407_s30 }
 0x8d8   : > { %v7635_v31 = vpop.f32.mrb[18].mxu0 }
 0x8d9   : > { %2821 = vrot.lane.b32.xlu0 %v2786_v50, %s8526_s21  ;;  %v2796_v15 = vpop.f32.mrb[19].mxu0 }
 0x8da   : > { %2819 = vrot.lane.b32.xlu1 %v7629_v4, %s8526_s21  ;;  %v4181_v4 = vld [vmem:[%s12363_s10 + $0x150] sm:$0xff] }
 0x8dd   : > { %2825 = vrot.lane.b32.xlu0 %v2796_v15, %s8526_s21 }
 0x8de   : > { %2817 = vrot.lane.b32.xlu1 %v2776_v48, %s8526_s21  ;;  %v4182_v48 = vld [vmem:[%s12363_s10 + $0x158] sm:$0xff] }
 0x8df   : > { %v7932_v46 = vpack.c.bf16 %v4182_v48, %v4181_v4  ;;  %v4191_v4 = vld [vmem:[%s12363_s10 + $0x1a0] sm:$0xff]  ;;  %v4192_v48 = vld [vmem:[%s12363_s10 + $0x1a8] sm:$0xff] }
 0x8e2   : > { %2823 = vrot.lane.b32.xlu1 %v7632_v28, %s8526_s21 }
 0x8e6   : > { %2827 = vrot.lane.b32.xlu1 %v7635_v31, %s8526_s21 }
 0x93f   : > { %v2816_v0 = vpop.permute.xlu0 %2815 }
 0x940   : > { %v2838_v30 = vsel %vm1645_vm4, %v9731_v61, %v2816_v0  ;;  %v2814_v25 = vpop.permute.xlu1 %2813 }
 0x941   : > { %2880 = vst.msk [vmem:[#allocation5 + $0x5a] sm:$0xff] %vm667_vm0, %v2838_v30  ;;  %v2837_v36 = vsel %vm1645_vm4, %v9733_v29, %v2814_v25  ;;  %v4183_v30 = vld [vmem:[%s12363_s10 + $0x160] sm:$0xff]  ;;  %v4184_v25 = vld [vmem:[%s12363_s10 + $0x168] sm:$0xff] }
 0x942   : > { %2879 = vst.msk [vmem:[#allocation5 + $0x4a] sm:$0xff] %vm667_vm0, %v2837_v36  ;;  %v7935_v36 = vpack.c.bf16 %v4184_v25, %v4183_v30  ;;  %v4193_v30 = vld [vmem:[%s12363_s10 + $0x1b0] sm:$0xff]  ;;  %v4194_v25 = vld [vmem:[%s12363_s10 + $0x1b8] sm:$0xff] }
 0x943   : > { %v3348_v52 = vpop.permute.xlu0 %3347 }
 0x944   : > { %v3501_v37 = vsel %vm797_vm1, %v3469_v10, %v3348_v52  ;;  %v3094_v11 = vpop.permute.xlu1 %3093  ;;  %v3028_v52 = vld [vmem:[#allocation5 + $0x72] sm:$0xff] }
 0x945   : > { %3539 = vst [vmem:[#allocation6 + $0x60] sm:$0xff] %v3501_v37  ;;  %v3438_v41 = vsel %vm667_vm0, %v2894_v43, %v3094_v11  ;;  %3840 = vmatmul.mubr.f32.gmra.mrb[28].mxu0 %v3501_v37  ;;  %3554 = vst.msk [vmem:[#allocation6 + $0xd8] sm:$0xff] %vm667_vm0, %v3028_v52  ;;  %v4185_v11 = vld [vmem:[%s12363_s10 + $0x170] sm:$0xff] }
 0x946   : > { %7158 = vmatprep.mubr.msk.f32.mxu0 %vm667_vm0, %v3606_v47 }
 0x947   : > { %v3222_v61 = vpop.permute.xlu0 %3221 }
 0x948   : > { %v3470_v16 = vsel %vm1743_vm7, %v3438_v41, %v3222_v61  ;;  %v3350_v29 = vpop.permute.xlu1 %3349  ;;  %v2961_v57 = vld [vmem:[#allocation5 + $0x58] sm:$0xff]  ;;  %v2994_v19 = vld [vmem:[#allocation5 + $0x61] sm:$0xff] }
 0x949   : > { %v2929_v18 = vld [vmem:[#allocation5 + $0x57] sm:$0xff]  ;;  %v3502_v58 = vsel %vm797_vm1, %v3470_v16, %v3350_v29  ;;  %3227 = vrot.lane.b32.xlu1 %v2961_v57, %s8520_s24  ;;  %v3023_v34 = vld [vmem:[#allocation5 + $0x4a] sm:$0xff]  ;;  %v2930_v53 = vld [vmem:[#allocation5 + $0x5f] sm:$0xff] }
 0x94a   : > { %3099 = vrot.lane.b32.xlu0 %v2929_v18, %s8524_s29  ;;  %3541 = vst [vmem:[#allocation6 + $0x70] sm:$0xff] %v3502_v58  ;;  %3845 = vmatmul.mubr.f32.gmra.mrb[30].mxu0 %v3502_v58  ;;  %3544 = vst.msk [vmem:[#allocation6 + $0x88] sm:$0xff] %vm667_vm0, %v3023_v34  ;;  %v2993_v6 = vld [vmem:[#allocation5 + $0x59] sm:$0xff]  ;;  %v2959_v51 = vld [vmem:[#allocation5 + $0x48] sm:$0xff] }
 0x94b   : > { %v2822_v2 = vpop.permute.xlu0 %2821  ;;  %v3025_v12 = vld [vmem:[#allocation5 + $0x5a] sm:$0xff]  ;;  %v2928_v27 = vld [vmem:[#allocation5 + $0x4f] sm:$0xff]  ;;  %v3030_v57 = vld [vmem:[#allocation5 + $0x82] sm:$0xff] }
 0x94c   : > { %v2841_v22 = vsel %vm1645_vm4, %v9741_v44, %v2822_v2  ;;  %v2820_v8 = vpop.permute.xlu1 %2819  ;;  %3548 = vst.msk [vmem:[#allocation6 + $0xa8] sm:$0xff] %vm667_vm0, %v3025_v12  ;;  %v2962_v17 = vld [vmem:[#allocation5 + $0x60] sm:$0xff]  ;;  %v2991_v5 = vld [vmem:[#allocation5 + $0x49] sm:$0xff]  ;;  %v2992_v23 = vld [vmem:[#allocation5 + $0x51] sm:$0xff] }
 0x94d   : > { %2883 = vst.msk [vmem:[#allocation5 + $0x8a] sm:$0xff] %vm667_vm0, %v2841_v22  ;;  %v2840_v62 = vsel %vm1645_vm4, %v9735_v14, %v2820_v8  ;;  %3101 = vrot.lane.b32.xlu1 %v2930_v53, %s8524_s29  ;;  %v4186_v41 = vld [vmem:[%s12363_s10 + $0x178] sm:$0xff]  ;;  %3558 = vst.msk [vmem:[#allocation6 + $0xf8] sm:$0xff] %vm667_vm0, %v3030_v57  ;;  %v4187_v22 = vld [vmem:[%s12363_s10 + $0x180] sm:$0xff]  ;;  %v3821_v53 = vpop.f32.mrb[20].mxu0 }
 0x94e   : > { %3355 = vrot.lane.b32.xlu0 %v2993_v6, %s12407_s30  ;;  %2882 = vst.msk [vmem:[#allocation5 + $0x7a] sm:$0xff] %vm667_vm0, %v2840_v62  ;;  %v7938_v61 = vpack.c.bf16 %v4186_v41, %v4185_v11  ;;  %v4188_v8 = vld [vmem:[%s12363_s10 + $0x188] sm:$0xff]  ;;  %v3823_v62 = vpop.f32.mrb[21].mxu0  ;;  %v3036_v11 = vld [vmem:[#allocation5 + $0xb2] sm:$0xff] }
 0x94f   : > { %v2826_v63 = vpop.permute.xlu0 %2825  ;;  %v7941_v6 = vpack.c.bf16 %v4188_v8, %v4187_v22  ;;  %v3649_v41 = vld [vmem:[%s12363_s10 + $0x50] sm:$0xff]  ;;  %3570 = vst.msk [vmem:[#allocation6 + $0x158] sm:$0xff] %vm667_vm0, %v3036_v11  ;;  %v2975_v22 = vld [vmem:[#allocation5 + $0xc8] sm:$0xff] }
 0x950   : > { %v2843_v44 = vsel %vm1645_vm4, %v9747_v56, %v2826_v63  ;;  %v2818_v21 = vpop.permute.xlu1 %2817  ;;  %v2927_v56 = vld [vmem:[#allocation5 + $0x47] sm:$0xff] }
 0x951   : > { %2885 = vst.msk [vmem:[#allocation5 + $0xaa] sm:$0xff] %vm667_vm0, %v2843_v44  ;;  %v2839_v14 = vsel %vm1645_vm4, %v9737_v33, %v2818_v21  ;;  %3357 = vrot.lane.b32.xlu1 %v2994_v19, %s12407_s30  ;;  %v3608_v39 = vld [vmem:[#allocation6 + $0x88] sm:$0xff]  ;;  %v3826_v19 = vpop.f32.mrb[22].mxu0  ;;  %v2943_v8 = vld [vmem:[#allocation5 + $0xc7] sm:$0xff] }
 0x952   : > { %3229 = vrot.lane.b32.xlu0 %v2962_v17, %s8520_s24  ;;  %2881 = vst.msk [vmem:[#allocation5 + $0x6a] sm:$0xff] %vm667_vm0, %v2839_v14  ;;  %7159 = vmatprep.mubr.msk.f32.mxu0 %vm667_vm0, %v3608_v39  ;;  %v3032_v17 = vld [vmem:[#allocation5 + $0x92] sm:$0xff]  ;;  %v3038_v62 = vld [vmem:[#allocation5 + $0xc2] sm:$0xff] }
 0x953   : > { %v4189_v14 = vld [vmem:[%s12363_s10 + $0x190] sm:$0xff]  ;;  %v4190_v39 = vld [vmem:[%s12363_s10 + $0x198] sm:$0xff]  ;;  %3562 = vst.msk [vmem:[#allocation6 + $0x118] sm:$0xff] %vm667_vm0, %v3032_v17  ;;  %3574 = vst.msk [vmem:[#allocation6 + $0x178] sm:$0xff] %vm667_vm0, %v3038_v62 }
 0x954   : > { %v2824_v7 = vpop.permute.xlu1 %2823  ;;  %v3031_v50 = vld [vmem:[#allocation5 + $0x8a] sm:$0xff]  ;;  %v10247_v62 = vld [vmem:[#allocation6 + $0xa8] sm:$0xff] }
 0x955   : > { %v2842_v54 = vsel %vm1645_vm4, %v9739_v1, %v2824_v7  ;;  %3223 = vrot.lane.b32.xlu1 %v2959_v51, %s8520_s24  ;;  %v2960_v1 = vld [vmem:[#allocation5 + $0x50] sm:$0xff]  ;;  %v2965_v24 = vld [vmem:[#allocation5 + $0x78] sm:$0xff]  ;;  %v2998_v31 = vld [vmem:[#allocation5 + $0x81] sm:$0xff]  ;;  %3560 = vst.msk [vmem:[#allocation6 + $0x108] sm:$0xff] %vm667_vm0, %v3031_v50  ;;  %v3828_v7 = vpop.f32.mrb[23].mxu0  ;;  %v7944_v51 = vpack.c.bf16 %v4190_v39, %v4189_v14 }
 0x956   : > { %3095 = vrot.lane.b32.xlu0 %v2927_v56, %s8524_s29  ;;  %2884 = vst.msk [vmem:[#allocation5 + $0x9a] sm:$0xff] %vm667_vm0, %v2842_v54  ;;  %v2933_v59 = vld [vmem:[#allocation5 + $0x77] sm:$0xff]  ;;  %v2934_v45 = vld [vmem:[#allocation5 + $0x7f] sm:$0xff]  ;;  %v2967_v12 = vld [vmem:[#allocation5 + $0x88] sm:$0xff] }
 0x957   : > { %v2997_v32 = vld [vmem:[#allocation5 + $0x79] sm:$0xff]  ;;  %v2935_v63 = vld [vmem:[#allocation5 + $0x87] sm:$0xff]  ;;  %v2936_v44 = vld [vmem:[#allocation5 + $0x8f] sm:$0xff] }
 0x958   : > { %v2828_v33 = vpop.permute.xlu1 %2827  ;;  %v3029_v28 = vld [vmem:[#allocation5 + $0x7a] sm:$0xff]  ;;  %v3035_v55 = vld [vmem:[#allocation5 + $0xaa] sm:$0xff] }
 0x959   : > { %v2844_v26 = vsel %vm1645_vm4, %v9745_v9, %v2828_v33  ;;  %3097 = vrot.lane.b32.xlu1 %v2928_v27, %s8524_s29  ;;  %v4180_v9 = vld [vmem:[%s12363_s10 + $0x148] sm:$0xff]  ;;  %3556 = vst.msk [vmem:[#allocation6 + $0xe8] sm:$0xff] %vm667_vm0, %v3029_v28  ;;  %v2966_v13 = vld [vmem:[#allocation5 + $0x80] sm:$0xff]  ;;  %3568 = vst.msk [vmem:[#allocation6 + $0x148] sm:$0xff] %vm667_vm0, %v3035_v55  ;;  %v3831_v33 = vpop.f32.mrb[24].mxu0 }
 0x95a   : > { %3351 = vrot.lane.b32.xlu0 %v2991_v5, %s12407_s30  ;;  %2886 = vst.msk [vmem:[#allocation5 + $0xba] sm:$0xff] %vm667_vm0, %v2844_v26  ;;  %v7929_v40 = vpack.c.bf16 %v4180_v9, %v4179_v20  ;;  %v3027_v49 = vld [vmem:[#allocation5 + $0x6a] sm:$0xff]  ;;  %v3639_v27 = vld [vmem:[%s12363_s10] sm:$0xff]  ;;  %v3646_v55 = vld [vmem:[%s12363_s10 + $0x38] sm:$0xff] }
 0x95b   : > { %3552 = vst.msk [vmem:[#allocation6 + $0xc8] sm:$0xff] %vm667_vm0, %v3027_v49  ;;  %v2963_v0 = vld [vmem:[#allocation5 + $0x68] sm:$0xff]  ;;  %v2996_v47 = vld [vmem:[#allocation5 + $0x71] sm:$0xff]  ;;  %v7947_v49 = vpack.c.bf16 %v4192_v48, %v4191_v4  ;;  %v3655_v14 = vld [vmem:[%s12363_s10 + $0x80] sm:$0xff] }
 0x95c   : > { %7930 = vmatpush1.bf16.msra.mxu0 %v7929_v40  ;;  %v2931_v60 = vld [vmem:[#allocation5 + $0x67] sm:$0xff]  ;;  %v2932_v43 = vld [vmem:[#allocation5 + $0x6f] sm:$0xff]  ;;  %v4198_v33 = vld [vmem:[%s12363_s10 + $0x1d8] sm:$0xff] }
 0x95d   : > { %3353 = vrot.lane.b32.xlu1 %v2992_v23, %s12407_s30  ;;  %7931 = vmatprep.subr.bf16.mxu0 %v8525_v42  ;;  %v3033_v15 = vld [vmem:[#allocation5 + $0x9a] sm:$0xff]  ;;  %v2995_v10 = vld [vmem:[#allocation5 + $0x69] sm:$0xff]  ;;  %v3000_v56 = vld [vmem:[#allocation5 + $0x91] sm:$0xff] }
 0x95e   : > { %3225 = vrot.lane.b32.xlu0 %v2960_v1, %s8520_s24  ;;  %3564 = vst.msk [vmem:[#allocation6 + $0x128] sm:$0xff] %vm667_vm0, %v3033_v15  ;;  %v2964_v37 = vld [vmem:[#allocation5 + $0x70] sm:$0xff]  ;;  %v2969_v16 = vld [vmem:[#allocation5 + $0x98] sm:$0xff]  ;;  %v3002_v34 = vld [vmem:[#allocation5 + $0xa1] sm:$0xff]  ;;  %v3833_v1 = vpop.f32.mrb[25].mxu0 }
 0x95f   : > { %v2937_v29 = vld [vmem:[#allocation5 + $0x97] sm:$0xff]  ;;  %v2938_v18 = vld [vmem:[#allocation5 + $0x9f] sm:$0xff]  ;;  %v2999_v21 = vld [vmem:[#allocation5 + $0x89] sm:$0xff] }
 0x960   : > { %7933 = vmatpush1.bf16.msra.mxu0 %v7932_v46  ;;  %v3001_v58 = vld [vmem:[#allocation5 + $0x99] sm:$0xff]  ;;  %v2968_v54 = vld [vmem:[#allocation5 + $0x90] sm:$0xff]  ;;  %v3640_v5 = vld [vmem:[%s12363_s10 + $0x8] sm:$0xff] }
 0x961   : > { %3235 = vrot.lane.b32.xlu1 %v2965_v24, %s8520_s24  ;;  %7934 = vmatprep.subr.bf16.mxu0 %v8525_v42  ;;  %v3037_v38 = vld [vmem:[#allocation5 + $0xba] sm:$0xff]  ;;  %v7899_v23 = vpack.c.bf16 %v3640_v5, %v3639_v27  ;;  %v3034_v20 = vld [vmem:[#allocation5 + $0xa2] sm:$0xff]  ;;  %v3641_v9 = vld [vmem:[%s12363_s10 + $0x10] sm:$0xff]  ;;  %v3836_v24 = vpop.f32.mrb[26].mxu0 }
 0x962   : > { %3107 = vrot.lane.b32.xlu0 %v2933_v59, %s8524_s29  ;;  %3572 = vst.msk [vmem:[#allocation6 + $0x168] sm:$0xff] %vm667_vm0, %v3037_v38  ;;  %v2970_v2 = vld [vmem:[#allocation5 + $0xa0] sm:$0xff]  ;;  %v2973_v26 = vld [vmem:[#allocation5 + $0xb8] sm:$0xff]  ;;  %3566 = vst.msk [vmem:[#allocation6 + $0x138] sm:$0xff] %vm667_vm0, %v3034_v20  ;;  %v3838_v40 = vpop.f32.mrb[27].mxu0 }
 0x963   : > { %v2941_v3 = vld [vmem:[#allocation5 + $0xb7] sm:$0xff]  ;;  %7900 = vmatpush1.bf16.msra.mxu1 %v7899_v23  ;;  %v3643_v46 = vld [vmem:[%s12363_s10 + $0x20] sm:$0xff]  ;;  %v3644_v28 = vld [vmem:[%s12363_s10 + $0x28] sm:$0xff] }
 0x964   : > { %7936 = vmatpush1.bf16.msra.mxu0 %v7935_v36  ;;  %v3642_v59 = vld [vmem:[%s12363_s10 + $0x18] sm:$0xff]  ;;  %7901 = vmatprep.subr.bf16.mxu1 %v8525_v42  ;;  %v7905_v50 = vpack.c.bf16 %v3644_v28, %v3643_v46  ;;  %v2974_v15 = vld [vmem:[#allocation5 + $0xc0] sm:$0xff]  ;;  %v2971_v38 = vld [vmem:[#allocation5 + $0xa8] sm:$0xff] }
 0x965   : > { %3109 = vrot.lane.b32.xlu1 %v2934_v45, %s8524_s29  ;;  %7937 = vmatprep.subr.bf16.mxu0 %v8525_v42  ;;  %v7902_v35 = vpack.c.bf16 %v3642_v59, %v3641_v9  ;;  %v2942_v45 = vld [vmem:[#allocation5 + $0xbf] sm:$0xff]  ;;  %v2972_v57 = vld [vmem:[#allocation5 + $0xb0] sm:$0xff]  ;;  %v2919_v39 = vld [vmem:[#allocation5 + $0x7] sm:$0xff] }
 0x966   : > { %3363 = vrot.lane.b32.xlu0 %v2997_v32, %s12407_s30  ;;  %v3005_v32 = vld [vmem:[#allocation5 + $0xb9] sm:$0xff]  ;;  %v3039_v17 = vld [vmem:[#allocation5 + $0xca] sm:$0xff] }
 0x967   : > { %7903 = vmatpush1.bf16.msra.mxu1 %v7902_v35  ;;  %v3647_v36 = vld [vmem:[%s12363_s10 + $0x40] sm:$0xff]  ;;  %v2976_v7 = vld [vmem:[#allocation5 + $0xd0] sm:$0xff]  ;;  %3576 = vst.msk [vmem:[#allocation6 + $0x188] sm:$0xff] %vm667_vm0, %v3039_v17  ;;  %v2951_v27 = vld [vmem:[#allocation5 + $0x8] sm:$0xff] }
 0x968   : > { %7939 = vmatpush1.bf16.msra.mxu0 %v7938_v61  ;;  %7904 = vmatprep.subr.bf16.mxu1 %v8525_v42  ;;  %v3650_v61 = vld [vmem:[%s12363_s10 + $0x58] sm:$0xff]  ;;  %v3657_v1 = vld [vmem:[%s12363_s10 + $0x90] sm:$0xff]  ;;  %v2895_v11 = vld [vmem:[#allocation5 + $0x46] sm:$0xff] }
 0x969   : > { %3365 = vrot.lane.b32.xlu1 %v2998_v31, %s12407_s30  ;;  %7940 = vmatprep.subr.bf16.mxu0 %v8525_v42  ;;  %v3006_v31 = vld [vmem:[#allocation5 + $0xc1] sm:$0xff]  ;;  %v3008_v5 = vld [vmem:[#allocation5 + $0xd1] sm:$0xff]  ;;  %v2983_v59 = vld [vmem:[#allocation5 + $0x9] sm:$0xff] }
 0x96a   : > { %3237 = vrot.lane.b32.xlu0 %v2966_v13, %s8520_s24  ;;  %v3645_v13 = vld [vmem:[%s12363_s10 + $0x30] sm:$0xff] }
 0x96b   : > { %7906 = vmatpush1.bf16.msra.mxu1 %v7905_v50  ;;  %v3040_v23 = vld [vmem:[#allocation5 + $0xd2] sm:$0xff]  ;;  %v3015_v9 = vld [vmem:[#allocation5 + $0xa] sm:$0xff] }
 0x96c   : > { %7942 = vmatpush1.bf16.msra.mxu0 %v7941_v6  ;;  %7907 = vmatprep.subr.bf16.mxu1 %v8525_v42  ;;  %3578 = vst.msk [vmem:[#allocation6 + $0x198] sm:$0xff] %vm667_vm0, %v3040_v23  ;;  %3528 = vst.msk [vmem:[#allocation6 + $0x8] sm:$0xff] %vm667_vm0, %v3015_v9  ;;  %v3016_v24 = vld [vmem:[#allocation5 + $0x12] sm:$0xff]  ;;  %v2899_v9 = vld [vmem:[#allocation5 + $0x66] sm:$0xff] }
 0x96d   : > { %3231 = vrot.lane.b32.xlu1 %v2963_v0, %s8520_s24  ;;  %7943 = vmatprep.subr.bf16.mxu0 %v8525_v42  ;;  %v2939_v0 = vld [vmem:[#allocation5 + $0xa7] sm:$0xff]  ;;  %3530 = vst.msk [vmem:[#allocation6 + $0x18] sm:$0xff] %vm667_vm0, %v3016_v24  ;;  %v2920_v40 = vld [vmem:[#allocation5 + $0xf] sm:$0xff]  ;;  %v2945_v28 = vld [vmem:[#allocation5 + $0xd7] sm:$0xff] }
 0x96e   : > { %3103 = vrot.lane.b32.xlu0 %v2931_v60, %s8524_s29  ;;  %v7908_v60 = vpack.c.bf16 %v3646_v55, %v3645_v13  ;;  %v2952_v35 = vld [vmem:[#allocation5 + $0x10] sm:$0xff]  ;;  %v2977_v50 = vld [vmem:[#allocation5 + $0xd8] sm:$0xff] }
 0x96f   : > { %v2984_v4 = vld [vmem:[#allocation5 + $0x11] sm:$0xff] }
 0x970   : > { %7945 = vmatpush1.bf16.msra.mxu0 %v7944_v51  ;;  %7909 = vmatpush1.bf16.msra.mxu1 %v7908_v60  ;;  %v3656_v51 = vld [vmem:[%s12363_s10 + $0x88] sm:$0xff]  ;;  %v2946_v60 = vld [vmem:[#allocation5 + $0xdf] sm:$0xff] }
 0x971   : > { %3105 = vrot.lane.b32.xlu1 %v2932_v43, %s8524_s29  ;;  %7946 = vmatprep.subr.bf16.mxu0 %v8525_v42  ;;  %v7950_v43 = vpack.c.bf16 %v4194_v25, %v4193_v30 }
 0x972   : > { %3359 = vrot.lane.b32.xlu0 %v2995_v10, %s12407_s30  ;;  %v3648_v10 = vld [vmem:[%s12363_s10 + $0x48] sm:$0xff]  ;;  %7910 = vmatprep.subr.bf16.mxu1 %v8525_v42 }
 0x973   : > { %v7911_v52 = vpack.c.bf16 %v3648_v10, %v3647_v36 }
 0x974   : > { %7948 = vmatpush1.bf16.msra.mxu0 %v7947_v49  ;;  %v2897_v49 = vld [vmem:[#allocation5 + $0x56] sm:$0xff] }
 0x975   : > { %3361 = vrot.lane.b32.xlu1 %v2996_v47, %s12407_s30  ;;  %7949 = vmatprep.subr.bf16.mxu0 %v8525_v42  ;;  %v2940_v47 = vld [vmem:[#allocation5 + $0xaf] sm:$0xff] }
 0x976   : > { %3233 = vrot.lane.b32.xlu0 %v2964_v37, %s8520_s24  ;;  %v3003_v37 = vld [vmem:[#allocation5 + $0xa9] sm:$0xff]  ;;  %7912 = vmatpush1.bf16.msra.mxu1 %v7911_v52  ;;  %v2978_v52 = vld [vmem:[#allocation5 + $0xe0] sm:$0xff] }
 0x977   : > { %7913 = vmatprep.subr.bf16.mxu1 %v8525_v42 }
 0x978   : > { %7951 = vmatpush1.bf16.msra.mxu0 %v7950_v43 }
 0x979   : > { %3243 = vrot.lane.b32.xlu1 %v2969_v16, %s8520_s24  ;;  %7952 = vmatprep.subr.bf16.mxu0 %v8525_v42  ;;  %v7914_v16 = vpack.c.bf16 %v3650_v61, %v3649_v41 }
 0x97a   : > { %3115 = vrot.lane.b32.xlu0 %v2937_v29, %s8524_s29  ;;  %v3004_v29 = vld [vmem:[#allocation5 + $0xb1] sm:$0xff] }
 0x97b   : > { %7915 = vmatpush1.bf16.msra.mxu1 %v7914_v16 }
 0x97c   : > { %7916 = vmatprep.subr.bf16.mxu1 %v8525_v42 }
 0x97d   : > { %3117 = vrot.lane.b32.xlu1 %v2938_v18, %s8524_s29  ;;  %v3651_v18 = vld [vmem:[%s12363_s10 + $0x60] sm:$0xff] }
 0x97e   : > { %3371 = vrot.lane.b32.xlu0 %v3001_v58, %s12407_s30  ;;  %v3652_v58 = vld [vmem:[%s12363_s10 + $0x68] sm:$0xff] }
 0x97f   : > { %v7917_v53 = vpack.c.bf16 %v3652_v58, %v3651_v18  ;;  %v10231_v18 = vld [vmem:[#allocation6 + $0x98] sm:$0xff] }
 0x981   : > { %3373 = vrot.lane.b32.xlu1 %v3002_v34, %s12407_s30  ;;  %v4195_v34 = vld [vmem:[%s12363_s10 + $0x1c0] sm:$0xff]  ;;  %7918 = vmatpush1.bf16.msra.mxu1 %v7917_v53 }
 0x982   : > { %3245 = vrot.lane.b32.xlu0 %v2970_v2, %s8520_s24  ;;  %v4196_v2 = vld [vmem:[%s12363_s10 + $0x1c8] sm:$0xff]  ;;  %7919 = vmatprep.subr.bf16.mxu1 %v8525_v42 }
 0x983   : > { %v7953_v6 = vpack.c.bf16 %v4196_v2, %v4195_v34  ;;  %v2896_v34 = vld [vmem:[#allocation5 + $0x4e] sm:$0xff] }
 0x985   : > { %3239 = vrot.lane.b32.xlu1 %v2967_v12, %s8520_s24  ;;  %7954 = vmatpush1.bf16.msra.mxu0 %v7953_v6  ;;  %v3653_v12 = vld [vmem:[%s12363_s10 + $0x70] sm:$0xff] }
 0x986   : > { %3111 = vrot.lane.b32.xlu0 %v2935_v63, %s8524_s29  ;;  %v2944_v63 = vld [vmem:[#allocation5 + $0xcf] sm:$0xff]  ;;  %7955 = vmatprep.subr.bf16.mxu0 %v8525_v42 }
 0x989   : > { %3113 = vrot.lane.b32.xlu1 %v2936_v44, %s8524_s29  ;;  %v3007_v44 = vld [vmem:[#allocation5 + $0xc9] sm:$0xff] }
 0x98a   : > { %3367 = vrot.lane.b32.xlu0 %v2999_v21, %s12407_s30  ;;  %v3654_v21 = vld [vmem:[%s12363_s10 + $0x78] sm:$0xff] }
 0x98b   : > { %v7920_v19 = vpack.c.bf16 %v3654_v21, %v3653_v12 }
 0x98d   : > { %3369 = vrot.lane.b32.xlu1 %v3000_v56, %s12407_s30  ;;  %7921 = vmatpush1.bf16.msra.mxu1 %v7920_v19  ;;  %v7923_v56 = vpack.c.bf16 %v3656_v51, %v3655_v14  ;;  %v10252_v19 = vld [vmem:[#allocation6 + $0xb8] sm:$0xff]  ;;  %v2902_v51 = vld [vmem:[#allocation5 + $0x7e] sm:$0xff] }
 0x98e   : > { %3241 = vrot.lane.b32.xlu0 %v2968_v54, %s8520_s24  ;;  %7922 = vmatprep.subr.bf16.mxu1 %v8525_v42  ;;  %v4197_v54 = vld [vmem:[%s12363_s10 + $0x1d0] sm:$0xff] }
 0x991   : > { %3251 = vrot.lane.b32.xlu1 %v2973_v26, %s8520_s24  ;;  %v7956_v26 = vpack.c.bf16 %v4198_v33, %v4197_v54  ;;  %7924 = vmatpush1.bf16.msra.mxu1 %v7923_v56  ;;  %v10263_v56 = vld [vmem:[#allocation6 + $0xc8] sm:$0xff]  ;;  %v2947_v54 = vld [vmem:[#allocation5 + $0xe7] sm:$0xff] }
 0x992   : > { %3123 = vrot.lane.b32.xlu0 %v2941_v3, %s8524_s29  ;;  %v3658_v3 = vld [vmem:[%s12363_s10 + $0x98] sm:$0xff]  ;;  %7925 = vmatprep.subr.bf16.mxu1 %v8525_v42 }
 0x993   : > { %7957 = vmatpush1.bf16.msra.mxu0 %v7956_v26  ;;  %v7926_v20 = vpack.c.bf16 %v3658_v3, %v3657_v1  ;;  %v2979_v26 = vld [vmem:[#allocation5 + $0xe8] sm:$0xff] }
 0x994   : > { %7988 = vmatprep.subr.bf16.mxu0 %v8525_v42  ;;  %v3011_v3 = vld [vmem:[#allocation5 + $0xe9] sm:$0xff] }
 0x995   : > { %3125 = vrot.lane.b32.xlu1 %v2942_v45, %s8524_s29  ;;  %7927 = vmatpush1.bf16.msra.mxu1 %v7926_v20 }
 0x996   : > { %3379 = vrot.lane.b32.xlu0 %v3005_v32, %s12407_s30  ;;  %7958 = vmatprep.subr.bf16.mxu1 %v8525_v42  ;;  %v3592_v32 = vld [vmem:[#allocation6 + $0x8] sm:$0xff] }
 0x997   : > { %7177 = vmatprep.mubr.msk.f32.mxu1 %vm667_vm0, %v3592_v32  ;;  %v3012_v32 = vld [vmem:[#allocation5 + $0xf1] sm:$0xff] }
 0x999   : > { %3381 = vrot.lane.b32.xlu1 %v3006_v31, %s12407_s30  ;;  %s12535_s30 = smov 96  }
 0x99a   : > { %3253 = vrot.lane.b32.xlu0 %v2974_v15, %s8520_s24 }
 0x99d   : > { %3247 = vrot.lane.b32.xlu1 %v2971_v38, %s8520_s24  ;;  %v2898_v38 = vld [vmem:[#allocation5 + $0x5e] sm:$0xff] }
 0x99e   : > { %3119 = vrot.lane.b32.xlu0 %v2939_v0, %s8524_s29  ;;  %v3009_v0 = vld [vmem:[#allocation5 + $0xd9] sm:$0xff] }
 0x9a1   : > { %3121 = vrot.lane.b32.xlu1 %v2940_v47, %s8524_s29  ;;  %v3010_v47 = vld [vmem:[#allocation5 + $0xe1] sm:$0xff] }
 0x9a2   : > { %3375 = vrot.lane.b32.xlu0 %v3003_v37, %s12535_s30 }
 0x9a5   : > { %3377 = vrot.lane.b32.xlu1 %v3004_v29, %s12535_s30 }
 0x9a6   : > { %3249 = vrot.lane.b32.xlu0 %v2972_v57, %s8520_s24 }
 0x9a9   : > { %3255 = vrot.lane.b32.xlu1 %v2975_v22, %s8520_s24 }
 0x9aa   : > { %3127 = vrot.lane.b32.xlu0 %v2943_v8, %s8524_s29 }
 0x9ad   : > { %3129 = vrot.lane.b32.xlu1 %v2944_v63, %s8524_s29  ;;  %v2901_v63 = vld [vmem:[#allocation5 + $0x76] sm:$0xff] }
 0x9ae   : > { %3383 = vrot.lane.b32.xlu0 %v3007_v44, %s12535_s30 }
 0x9b1   : > { %3079 = vrot.lane.b32.xlu1 %v2919_v39, %s8524_s29 }
 0x9b2   : > { %3257 = vrot.lane.b32.xlu0 %v2976_v7, %s8520_s24 }
 0x9b5   : > { %3207 = vrot.lane.b32.xlu1 %v2951_v27, %s8520_s24 }
 0x9b6   : > { %3385 = vrot.lane.b32.xlu0 %v3008_v5, %s12535_s30 }
 0x9b9   : > { %3081 = vrot.lane.b32.xlu1 %v2920_v40, %s8524_s29 }
 0x9ba   : > { %3335 = vrot.lane.b32.xlu0 %v2983_v59, %s12535_s30  ;;  %v2948_v59 = vld [vmem:[#allocation5 + $0xef] sm:$0xff] }
 0x9bb   : > { %v3228_v48 = vpop.permute.xlu1 %3227 }
 0x9bc   : > { %v3100_v45 = vpop.permute.xlu0 %3099 }
 0x9bd   : > { %v3441_v46 = vsel %vm667_vm0, %v2897_v49, %v3100_v45  ;;  %3337 = vrot.lane.b32.xlu1 %v2984_v4, %s12535_s30  ;;  %v10279_v45 = vld [vmem:[#allocation6 + $0xd8] sm:$0xff] }
 0x9be   : > { %3209 = vrot.lane.b32.xlu0 %v2952_v35, %s8520_s24  ;;  %v3473_v15 = vsel %vm1743_vm7, %v3441_v46, %v3228_v48  ;;  %v2980_v35 = vld [vmem:[#allocation5 + $0xf0] sm:$0xff] }
 0x9bf   : > { %v3102_v31 = vpop.permute.xlu1 %3101 }
 0x9c0   : > { %v3356_v13 = vpop.permute.xlu0 %3355  ;;  %v3442_v30 = vsel %vm667_vm0, %v2898_v38, %v3102_v31  ;;  %v2981_v31 = vld [vmem:[#allocation5 + $0xf8] sm:$0xff] }
 0x9c1   : > { %v10214_v55 = vsel %vm797_vm1, %v3473_v15, %v3356_v13  ;;  %3259 = vrot.lane.b32.xlu1 %v2977_v50, %s8520_s24  ;;  %v2949_v50 = vld [vmem:[#allocation5 + $0xf7] sm:$0xff] }
 0x9c2   : > { %3547 = vst [vmem:[#allocation6 + $0xa0] sm:$0xff] %v10214_v55  ;;  %3131 = vrot.lane.b32.xlu0 %v2945_v28, %s8524_s29  ;;  %v2900_v28 = vld [vmem:[#allocation5 + $0x6e] sm:$0xff] }
 0x9c3   : > { %v3358_v25 = vpop.permute.xlu1 %3357 }
 0x9c4   : > { %v3230_v36 = vpop.permute.xlu0 %3229 }
 0x9c5   : > { %v3474_v43 = vsel %vm1743_vm7, %v3442_v30, %v3230_v36  ;;  %3133 = vrot.lane.b32.xlu1 %v2946_v60, %s8524_s29  ;;  %v10299_v30 = vld [vmem:[#allocation6 + $0xe8] sm:$0xff] }
 0x9c6   : > { %v10222_v10 = vsel %vm797_vm1, %v3474_v43, %v3358_v25  ;;  %3387 = vrot.lane.b32.xlu0 %v3009_v0, %s12535_s30  ;;  %v3013_v25 = vld [vmem:[#allocation5 + $0xf9] sm:$0xff] }
 0x9c7   : > { %3549 = vst [vmem:[#allocation6 + $0xb0] sm:$0xff] %v10222_v10  ;;  %v3224_v37 = vpop.permute.xlu1 %3223  ;;  %v2905_v43 = vld [vmem:[#allocation5 + $0x96] sm:$0xff] }
 0x9c8   : > { %v3096_v41 = vpop.permute.xlu0 %3095 }
 0x9c9   : > { %v3439_v61 = vsel %vm667_vm0, %v2895_v11, %v3096_v41  ;;  %3389 = vrot.lane.b32.xlu1 %v3010_v47, %s12535_s30  ;;  %v2950_v47 = vld [vmem:[#allocation5 + $0xff] sm:$0xff]  ;;  %v10305_v11 = vld [vmem:[#allocation6 + $0xf8] sm:$0xff] }
 0x9ca   : > { %3261 = vrot.lane.b32.xlu0 %v2978_v52, %s8520_s24  ;;  %v3471_v29 = vsel %vm1743_vm7, %v3439_v61, %v3224_v37  ;;  %v2982_v41 = vld [vmem:[#allocation5 + $0x100] sm:$0xff] }
 0x9cb   : > { %v3098_v16 = vpop.permute.xlu1 %3097  ;;  %v3014_v61 = vld [vmem:[#allocation5 + $0x101] sm:$0xff] }
 0x9cc   : > { %v3352_v57 = vpop.permute.xlu0 %3351  ;;  %v3440_v2 = vsel %vm667_vm0, %v2896_v34, %v3098_v16 }
 0x9cd   : > { %v10234_v58 = vsel %vm797_vm1, %v3471_v29, %v3352_v57  ;;  %3263 = vrot.lane.b32.xlu1 %v2979_v26, %s8520_s24  ;;  %v2904_v26 = vld [vmem:[#allocation5 + $0x8e] sm:$0xff] }
 0x9ce   : > { %3543 = vst [vmem:[#allocation6 + $0x80] sm:$0xff] %v10234_v58  ;;  %3850 = vmatmul.mubr.f32.gmra.mrb[32].mxu0 %v10234_v58  ;;  %3135 = vrot.lane.b32.xlu0 %v2947_v54, %s8524_s29 }
 0x9cf   : > { %7160 = vmatprep.mubr.msk.f32.mxu0 %vm667_vm0, %v10231_v18  ;;  %v3354_v22 = vpop.permute.xlu1 %3353 }
 0x9d0   : > { %v3226_v8 = vpop.permute.xlu0 %3225 }
 0x9d1   : > { %v3472_v53 = vsel %vm1743_vm7, %v3440_v2, %v3226_v8  ;;  %3137 = vrot.lane.b32.xlu1 %v2948_v59, %s8524_s29  ;;  %v2906_v2 = vld [vmem:[#allocation5 + $0x9e] sm:$0xff] }
 0x9d2   : > { %v10243_v6 = vsel %vm797_vm1, %v3472_v53, %v3354_v22  ;;  %3391 = vrot.lane.b32.xlu0 %v3011_v3, %s12535_s30  ;;  %v10319_v22 = vld [vmem:[#allocation6 + $0x108] sm:$0xff] }
 0x9d3   : > { %3545 = vst [vmem:[#allocation6 + $0x90] sm:$0xff] %v10243_v6  ;;  %3855 = vmatmul.mubr.f32.gmra.mrb[34].mxu0 %v10243_v6  ;;  %v3236_v12 = vpop.permute.xlu1 %3235  ;;  %v10347_v59 = vld [vmem:[#allocation6 + $0x128] sm:$0xff] }
 0x9d4   : > { %v3108_v44 = vpop.permute.xlu0 %3107  ;;  %7161 = vmatprep.mubr.msk.f32.mxu0 %vm667_vm0, %v10247_v62 }
 0x9d5   : > { %v3445_v21 = vsel %vm667_vm0, %v2901_v63, %v3108_v44  ;;  %3393 = vrot.lane.b32.xlu1 %v3012_v32, %s12535_s30  ;;  %v10352_v32 = vld [vmem:[#allocation6 + $0x138] sm:$0xff] }
 0x9d6   : > { %v3477_v14 = vsel %vm1743_vm7, %v3445_v21, %v3236_v12  ;;  %3265 = vrot.lane.b32.xlu0 %v2980_v35, %s8520_s24  ;;  %v2909_v35 = vld [vmem:[#allocation5 + $0xb6] sm:$0xff] }
 0x9d7   : > { %3860 = vmatmul.mubr.f32.gmra.mrb[36].mxu0 %v10214_v55  ;;  %v3110_v17 = vpop.permute.xlu1 %3109 }
 0x9d8   : > { %v3364_v39 = vpop.permute.xlu0 %3363  ;;  %7162 = vmatprep.mubr.msk.f32.mxu0 %vm667_vm0, %v10252_v19  ;;  %v3446_v33 = vsel %vm667_vm0, %v2902_v51, %v3110_v17  ;;  %v2903_v17 = vld [vmem:[#allocation5 + $0x86] sm:$0xff] }
 0x9d9   : > { %v10259_v7 = vsel %vm797_vm1, %v3477_v14, %v3364_v39  ;;  %3267 = vrot.lane.b32.xlu1 %v2981_v31, %s8520_s24 }
 0x9da   : > { %3555 = vst [vmem:[#allocation6 + $0xe0] sm:$0xff] %v10259_v7  ;;  %3139 = vrot.lane.b32.xlu0 %v2949_v50, %s8524_s29 }
 0x9db   : > { %3865 = vmatmul.mubr.f32.gmra.mrb[38].mxu0 %v10222_v10  ;;  %v3366_v27 = vpop.permute.xlu1 %3365 }
 0x9dc   : > { %v3238_v5 = vpop.permute.xlu0 %3237  ;;  %7163 = vmatprep.mubr.msk.f32.mxu0 %vm667_vm0, %v10263_v56 }
 0x9dd   : > { %v3478_v23 = vsel %vm1743_vm7, %v3446_v33, %v3238_v5  ;;  %3141 = vrot.lane.b32.xlu1 %v2950_v47, %s8524_s29  ;;  %s7072_s29 = sshll.u32 %s635_s26, 6 }
 0x9de   : > { %v10272_v1 = vsel %vm797_vm1, %v3478_v23, %v3366_v27  ;;  %3395 = vrot.lane.b32.xlu0 %v3013_v25, %s12535_s30  ;;  %v10331_v27 = vld [vmem:[#allocation6 + $0x118] sm:$0xff]  ;;  %s637_s23 = scalar_lea.vmem [#allocation10], %s7072_s29  ;;  %s8527_s29 = smov [#allocation10]  }
 0x9df   : > { %3557 = vst [vmem:[#allocation6 + $0xf0] sm:$0xff] %v10272_v1  ;;  %v3232_v20 = vpop.permute.xlu1 %3231  ;;  %s6994_s0 = sshll.u32 %s637_s23, 4  ;;  %s12306_s0 = int_to_ptr.vmem [resolvable:$true] %s6994_s0 }
 0x9e0   : > { %v3104_v24 = vpop.permute.xlu0 %3103 }
 0x9e1   : > { %v3443_v40 = vsel %vm667_vm0, %v2899_v9, %v3104_v24  ;;  %3397 = vrot.lane.b32.xlu1 %v3014_v61, %s12535_s30  ;;  %s8458_s30 = sshll.u32 %s8527_s29, 4  ;;  %s8459_s30 = int_to_ptr.vmem [resolvable:$false] %s8458_s30 }
 0x9e2   : > { %v3475_v48 = vsel %vm1743_vm7, %v3443_v40, %v3232_v20  ;;  %3269 = vrot.lane.b32.xlu0 %v2982_v41, %s8520_s24  ;;  %v2907_v41 = vld [vmem:[#allocation5 + $0xa6] sm:$0xff]  ;;  %s8454_s24 = scalar_lea.vmem %s12306_s0, 1024  ;;  %s8460_s21 = scalar_lea.vmem %s8459_s30, 2048 }
 0x9e3   : > { %v3106_v4 = vpop.permute.xlu1 %3105  ;;  %p8455_p11 = scmp.ne.s32.totalorder %s12306_s0, %s8454_s24  ;;  %p8461_p0 = scmp.lt.s32.totalorder %s12306_s0, %s8459_s30 }
 0x9e4   : > { %v3360_v49 = vpop.permute.xlu0 %3359  ;;  %v3444_v15 = vsel %vm667_vm0, %v2900_v28, %v3106_v4  ;;  %p8462_p1 = scmp.lt.s32.totalorder %s8460_s21, %s8454_s24 }
 0x9e5   : > { %v10283_v46 = vsel %vm797_vm1, %v3475_v48, %v3360_v49  ;;  %v3041_v48 = vld [vmem:[#allocation5 + $0xda] sm:$0xff]  ;;  %p8456_p12 = pnand %p8455_p11, %p8673_p5 }
 0x9e6   : > { %3551 = vst [vmem:[#allocation6 + $0xc0] sm:$0xff] %v10283_v46  ;;  %3870 = vmatmul.mubr.f32.gmra.mrb[40].mxu0 %v10283_v46  ;;  %3580 = vst.msk [vmem:[#allocation6 + $0x1a8] sm:$0xff] %vm667_vm0, %v3041_v48  ;;  %p8463_p2 = por %p8462_p1, %p8461_p0 }
 0x9e7   : > { %7164 = vmatprep.mubr.msk.f32.mxu0 %vm667_vm0, %v10279_v45  ;;  %v3362_v13 = vpop.permute.xlu1 %3361  ;;  %p8457_p13 = pneg %p8456_p12 }
 0x9e8   : > { %v3234_v38 = vpop.permute.xlu0 %3233 }
 0x9e9   : > { %v3476_v0 = vsel %vm1743_vm7, %v3444_v15, %v3234_v38  ;;  %v3042_v15 = vld [vmem:[#allocation5 + $0xe2] sm:$0xff]  ;;  %p8464_p3 = pnand %p8463_p2, %p8457_p13 }
 0x9ea   : > { %v10295_v60 = vsel %vm797_vm1, %v3476_v0, %v3362_v13  ;;  %3582 = vst.msk [vmem:[#allocation6 + $0x1b8] sm:$0xff] %vm667_vm0, %v3042_v15  ;;  %v2910_v38 = vld [vmem:[#allocation5 + $0xbe] sm:$0xff] }
 0x9eb   : > { %3553 = vst [vmem:[#allocation6 + $0xd0] sm:$0xff] %v10295_v60  ;;  %3875 = vmatmul.mubr.f32.gmra.mrb[42].mxu0 %v10295_v60  ;;  %v3244_v36 = vpop.permute.xlu1 %3243  ;;  %v10365_v0 = vld [vmem:[#allocation6 + $0x148] sm:$0xff] }
 0x9ec   : > { %v3116_v52 = vpop.permute.xlu0 %3115  ;;  %7165 = vmatprep.mubr.msk.f32.mxu0 %vm667_vm0, %v10299_v30 }
 0x9ed   : > { %v3449_v37 = vsel %vm667_vm0, %v2905_v43, %v3116_v52 }
 0x9ee   : > { %v3481_v29 = vsel %vm1743_vm7, %v3449_v37, %v3244_v36 }
 0x9ef   : > { %3880 = vmatmul.mubr.f32.gmra.mrb[44].mxu0 %v10259_v7  ;;  %v3118_v16 = vpop.permute.xlu1 %3117 }
 0x9f0   : > { %v3372_v57 = vpop.permute.xlu0 %3371  ;;  %7166 = vmatprep.mubr.msk.f32.mxu0 %vm667_vm0, %v10305_v11  ;;  %v3450_v8 = vsel %vm667_vm0, %v2906_v2, %v3118_v16 }
 0x9f1   : > { %v10314_v34 = vsel %vm797_vm1, %v3481_v29, %v3372_v57 }
 0x9f2   : > { %3563 = vst [vmem:[#allocation6 + $0x120] sm:$0xff] %v10314_v34 }
 0x9f3   : > { %3885 = vmatmul.mubr.f32.gmra.mrb[46].mxu0 %v10272_v1  ;;  %v3374_v53 = vpop.permute.xlu1 %3373 }
 0x9f4   : > { %v3246_v12 = vpop.permute.xlu0 %3245  ;;  %7167 = vmatprep.mubr.msk.f32.mxu0 %vm667_vm0, %v10319_v22 }
 0x9f5   : > { %v3482_v63 = vsel %vm1743_vm7, %v3450_v8, %v3246_v12  ;;  %v10377_v8 = vld [vmem:[#allocation6 + $0x158] sm:$0xff] }
 0x9f6   : > { %v10326_v44 = vsel %vm797_vm1, %v3482_v63, %v3374_v53  ;;  %v2908_v12 = vld [vmem:[#allocation5 + $0xae] sm:$0xff] }
 0x9f7   : > { %3565 = vst [vmem:[#allocation6 + $0x130] sm:$0xff] %v10326_v44  ;;  %v3240_v21 = vpop.permute.xlu1 %3239 }
 0x9f8   : > { %v3112_v14 = vpop.permute.xlu0 %3111 }
 0x9f9   : > { %v3447_v39 = vsel %vm667_vm0, %v2903_v17, %v3112_v14 }
 0x9fa   : > { %v3479_v54 = vsel %vm1743_vm7, %v3447_v39, %v3240_v21 }
 0x9fb   : > { %v3114_v51 = vpop.permute.xlu1 %3113 }
 0x9fc   : > { %v3368_v33 = vpop.permute.xlu0 %3367  ;;  %v3448_v23 = vsel %vm667_vm0, %v2904_v26, %v3114_v51  ;;  %v10395_v26 = vld [vmem:[#allocation6 + $0x168] sm:$0xff] }
 0x9fd   : > { %v10334_v5 = vsel %vm797_vm1, %v3479_v54, %v3368_v33  ;;  %v2911_v54 = vld [vmem:[#allocation5 + $0xc6] sm:$0xff] }
 0x9fe   : > { %3559 = vst [vmem:[#allocation6 + $0x100] sm:$0xff] %v10334_v5  ;;  %3890 = vmatmul.mubr.f32.gmra.mrb[48].mxu0 %v10334_v5 }
 0x9ff   : > { %7168 = vmatprep.mubr.msk.f32.mxu0 %vm667_vm0, %v10331_v27  ;;  %v3370_v3 = vpop.permute.xlu1 %3369 }
 0xa00   : > { %v3242_v20 = vpop.permute.xlu0 %3241 }
 0xa01   : > { %v3480_v9 = vsel %vm1743_vm7, %v3448_v23, %v3242_v20 }
 0xa02   : > { %v10343_v24 = vsel %vm797_vm1, %v3480_v9, %v3370_v3  ;;  %v10400_v9 = vld [vmem:[#allocation6 + $0x178] sm:$0xff] }
 0xa03   : > { %3561 = vst [vmem:[#allocation6 + $0x110] sm:$0xff] %v10343_v24  ;;  %3895 = vmatmul.mubr.f32.gmra.mrb[50].mxu0 %v10343_v24  ;;  %v3252_v40 = vpop.permute.xlu1 %3251 }
 0xa04   : > { %v3124_v4 = vpop.permute.xlu0 %3123  ;;  %7169 = vmatprep.mubr.msk.f32.mxu0 %vm667_vm0, %v10347_v59 }
 0xa05   : > { %v3453_v49 = vsel %vm667_vm0, %v2909_v35, %v3124_v4 }
 0xa06   : > { %v3485_v50 = vsel %vm1743_vm7, %v3453_v49, %v3252_v40 }
 0xa07   : > { %3900 = vmatmul.mubr.f32.gmra.mrb[52].mxu0 %v10314_v34  ;;  %v3126_v28 = vpop.permute.xlu1 %3125 }
 0xa08   : > { %v3380_v31 = vpop.permute.xlu0 %3379  ;;  %7170 = vmatprep.mubr.msk.f32.mxu0 %vm667_vm0, %v10352_v32  ;;  %v3454_v25 = vsel %vm667_vm0, %v2910_v38, %v3126_v28 }
 0xa09   : > { %v10360_v13 = vsel %vm797_vm1, %v3485_v50, %v3380_v31  ;;  %v10411_v50 = vld [vmem:[#allocation6 + $0x188] sm:$0xff]  ;;  %v2912_v31 = vld [vmem:[#allocation5 + $0xce] sm:$0xff] }
 0xa0a   : > { %3571 = vst [vmem:[#allocation6 + $0x160] sm:$0xff] %v10360_v13 }
 0xa0b   : > { %3905 = vmatmul.mubr.f32.gmra.mrb[54].mxu0 %v10326_v44  ;;  %v3382_v36 = vpop.permute.xlu1 %3381 }
 0xa0c   : > { %v3254_v43 = vpop.permute.xlu0 %3253  ;;  %7171 = vmatprep.mubr.msk.f32.mxu0 %vm667_vm0, %v10365_v0 }
 0xa0d   : > { %v3486_v52 = vsel %vm1743_vm7, %v3454_v25, %v3254_v43  ;;  %v10417_v25 = vld [vmem:[#allocation6 + $0x198] sm:$0xff] }
 0xa0e   : > { %v10372_v47 = vsel %vm797_vm1, %v3486_v52, %v3382_v36  ;;  %v2887_v43 = vld [vmem:[#allocation5 + $0x6] sm:$0xff] }
 0xa0f   : > { %3573 = vst [vmem:[#allocation6 + $0x170] sm:$0xff] %v10372_v47  ;;  %v3248_v37 = vpop.permute.xlu1 %3247 }
 0xa10   : > { %v3120_v61 = vpop.permute.xlu0 %3119 }
 0xa11   : > { %v3451_v16 = vsel %vm667_vm0, %v2907_v41, %v3120_v61  ;;  %v4528_v61 = vld [vmem:[%s12363_s10 + $0x1e0] sm:$0xff] }
 0xa12   : > { %v3483_v57 = vsel %vm1743_vm7, %v3451_v16, %v3248_v37  ;;  %v4529_v16 = vld [vmem:[%s12363_s10 + $0x1e8] sm:$0xff] }
 0xa13   : > { %v3122_v29 = vpop.permute.xlu1 %3121 }
 0xa14   : > { %v3376_v2 = vpop.permute.xlu0 %3375  ;;  %v3452_v63 = vsel %vm667_vm0, %v2908_v12, %v3122_v29  ;;  %v4878_v12 = vld [vmem:[%s12363_s10 + $0x288] sm:$0xff] }
 0xa15   : > { %v10380_v53 = vsel %vm797_vm1, %v3483_v57, %v3376_v2  ;;  %v4132_v57 = vld [vmem:[#allocation6 + $0x48] sm:$0xff]  ;;  %v4877_v2 = vld [vmem:[%s12363_s10 + $0x280] sm:$0xff] }
 0xa16   : > { %3567 = vst [vmem:[#allocation6 + $0x140] sm:$0xff] %v10380_v53  ;;  %3910 = vmatmul.mubr.f32.gmra.mrb[56].mxu0 %v10380_v53 }
 0xa17   : > { %7172 = vmatprep.mubr.msk.f32.mxu0 %vm667_vm0, %v10377_v8  ;;  %v3378_v21 = vpop.permute.xlu1 %3377 }
 0xa18   : > { %v3250_v17 = vpop.permute.xlu0 %3249  ;;  %v10388_v39 = vpop.f32.mrb[28].mxu0 }
 0xa19   : > { %v3484_v14 = vsel %vm1743_vm7, %v3452_v63, %v3250_v17  ;;  %v3843_v33 = vpop.f32.mrb[29].mxu0 }
 0xa1a   : > { %v10391_v51 = vsel %vm797_vm1, %v3484_v14, %v3378_v21  ;;  %v7959_v21 = vpack.c.bf16 %v4529_v16, %v4528_v61 }
 0xa1b   : > { %3569 = vst [vmem:[#allocation6 + $0x150] sm:$0xff] %v10391_v51  ;;  %3915 = vmatmul.mubr.f32.gmra.mrb[58].mxu0 %v10391_v51  ;;  %v3256_v23 = vpop.permute.xlu1 %3255 }
 0xa1c   : > { %v3128_v3 = vpop.permute.xlu0 %3127  ;;  %7173 = vmatprep.mubr.msk.f32.mxu0 %vm667_vm0, %v10395_v26 }
 0xa1d   : > { %v3455_v20 = vsel %vm667_vm0, %v2911_v54, %v3128_v3  ;;  %v10402_v40 = vpop.f32.mrb[30].mxu0  ;;  %v2888_v54 = vld [vmem:[#allocation5 + $0xe] sm:$0xff] }
 0xa1e   : > { %v3848_v35 = vpop.f32.mrb[31].mxu0  ;;  %v3487_v48 = vsel %vm1743_vm7, %v3455_v20, %v3256_v23  ;;  %v4131_v23 = vld [vmem:[#allocation6 + $0x40] sm:$0xff]  ;;  %v3594_v20 = vld [vmem:[#allocation6 + $0x18] sm:$0xff] }
 0xa1f   : > { %3920 = vmatmul.mubr.f32.gmra.mrb[60].mxu0 %v10360_v13  ;;  %v3130_v4 = vpop.permute.xlu1 %3129  ;;  %v4134_v35 = vld [vmem:[#allocation6 + $0x58] sm:$0xff] }
 0xa20   : > { %v3384_v49 = vpop.permute.xlu0 %3383  ;;  %7174 = vmatprep.mubr.msk.f32.mxu0 %vm667_vm0, %v10400_v9  ;;  %v3456_v36 = vsel %vm667_vm0, %v2912_v31, %v3130_v4  ;;  %v7989_v4 = vpack.c.bf16 %v4878_v12, %v4877_v2  ;;  %v4879_v31 = vld [vmem:[%s12363_s10 + $0x290] sm:$0xff]  ;;  %v4533_v2 = vld [vmem:[%s12363_s10 + $0x208] sm:$0xff] }
 0xa21   : > { %v10409_v28 = vsel %vm797_vm1, %v3487_v48, %v3384_v49  ;;  %v4530_v48 = vld [vmem:[%s12363_s10 + $0x1f0] sm:$0xff]  ;;  %v4531_v49 = vld [vmem:[%s12363_s10 + $0x1f8] sm:$0xff] }
 0xa22   : > { %3575 = vst [vmem:[#allocation6 + $0x180] sm:$0xff] %v10409_v28  ;;  %v7962_v61 = vpack.c.bf16 %v4531_v49, %v4530_v48  ;;  %v4535_v49 = vld [vmem:[%s12363_s10 + $0x218] sm:$0xff] }
 0xa23   : > { %3925 = vmatmul.mubr.f32.gmra.mrb[62].mxu0 %v10372_v47  ;;  %v3080_v15 = vpop.permute.xlu1 %3079 }
 0xa24   : > { %v3258_v38 = vpop.permute.xlu0 %3257  ;;  %7175 = vmatprep.mubr.msk.f32.mxu0 %vm667_vm0, %v10411_v50  ;;  %v3431_v63 = vsel %vm667_vm0, %v2887_v43, %v3080_v15  ;;  %v4880_v15 = vld [vmem:[%s12363_s10 + $0x298] sm:$0xff] }
 0xa25   : > { %v3488_v52 = vsel %vm1743_vm7, %v3456_v36, %v3258_v38  ;;  %v7992_v16 = vpack.c.bf16 %v4880_v15, %v4879_v31  ;;  %v4883_v31 = vld [vmem:[%s12363_s10 + $0x2b0] sm:$0xff]  ;;  %v4884_v15 = vld [vmem:[%s12363_s10 + $0x2b8] sm:$0xff] }
 0xa27   : > { %3930 = vmatmul.mubr.f32.gmra.mrb[64].mxu0 %v10409_v28  ;;  %v3208_v37 = vpop.permute.xlu1 %3207 }
 0xa28   : > { %v3386_v41 = vpop.permute.xlu0 %3385  ;;  %7176 = vmatprep.mubr.msk.f32.mxu0 %vm667_vm0, %v10417_v25  ;;  %v3463_v17 = vsel %vm1743_vm7, %v3431_v63, %v3208_v37  ;;  %v4881_v63 = vld [vmem:[%s12363_s10 + $0x2a0] sm:$0xff] }
 0xa29   : > { %v10431_v29 = vsel %vm797_vm1, %v3488_v52, %v3386_v41  ;;  %v4133_v52 = vld [vmem:[#allocation6 + $0x50] sm:$0xff]  ;;  %v10461_v41 = vld [vmem:[#allocation6 + $0x68] sm:$0xff] }
 0xa2a   : > { %3577 = vst [vmem:[#allocation6 + $0x190] sm:$0xff] %v10431_v29 }
 0xa2b   : > { %3935 = vmatmul.mubr.f32.gmra.mrb[66].mxu0 %v10431_v29  ;;  %v3082_v33 = vpop.permute.xlu1 %3081 }
 0xa2c   : > { %v3336_v14 = vpop.permute.xlu0 %3335  ;;  %7201 = vmatprep.mubr.msk.f32.mxu0 %vm667_vm0, %v4132_v57  ;;  %v3432_v38 = vsel %vm667_vm0, %v2888_v54, %v3082_v33  ;;  %v4532_v57 = vld [vmem:[%s12363_s10 + $0x200] sm:$0xff] }
 0xa2d   : > { %v3495_v3 = vsel %vm797_vm1, %v3463_v17, %v3336_v14  ;;  %v2913_v17 = vld [vmem:[#allocation5 + $0xd6] sm:$0xff] }
 0xa2e   : > { %4011 = vmatmul.mubr.f32.vlgmr.msra.gmra.mrb[30].mxu1 %v3495_v3  ;;  %v8436_v14 = vld [vmem:[#allocation6 + $0x28] sm:$0xff]  ;;  %v10483_v3 = vld [vmem:[#allocation6 + $0x78] sm:$0xff] }
 0xa2f   : > { %4336 = vmatmul.mubr.f32.vlgmr.msra.gmra.mrb[68].mxu0 %v4131_v23  ;;  %7960 = vmatpush1.bf16.msra.mxu1 %v7959_v21  ;;  %v3338_v43 = vpop.permute.xlu1 %3337  ;;  %v4882_v21 = vld [vmem:[%s12363_s10 + $0x2a8] sm:$0xff]  ;;  %v10481_v23 = vld [vmem:[#allocation6 + $0x60] sm:$0xff] }
 0xa30   : > { %v3210_v36 = vpop.permute.xlu0 %3209  ;;  %7178 = vmatprep.mubr.msk.f32.mxu1 %vm667_vm0, %v3594_v20  ;;  %7202 = vmatprep.mubr.msk.f32.mxu0 %vm667_vm0, %v4134_v35  ;;  %v7965_v20 = vpack.c.bf16 %v4533_v2, %v4532_v57  ;;  %v7995_v35 = vpack.c.bf16 %v4882_v21, %v4881_v63  ;;  %v7998_v2 = vpack.c.bf16 %v4884_v15, %v4883_v31  ;;  %v4537_v21 = vld [vmem:[%s12363_s10 + $0x228] sm:$0xff]  ;;  %v4538_v15 = vld [vmem:[%s12363_s10 + $0x230] sm:$0xff] }
 0xa31   : > { %v3464_v37 = vsel %vm1743_vm7, %v3432_v38, %v3210_v36  ;;  %7990 = vmatpush1.bf16.msra.mxu0 %v7989_v4  ;;  %7961 = vmatprep.subr.bf16.mxu1 %v8525_v42  ;;  %v4534_v4 = vld [vmem:[%s12363_s10 + $0x210] sm:$0xff] }
 0xa32   : > { %v3496_v12 = vsel %vm797_vm1, %v3464_v37, %v3338_v43  ;;  %7991 = vmatprep.subr.bf16.mxu0 %v8525_v42  ;;  %v8437_v36 = vld [vmem:[#allocation6 + $0x20] sm:$0xff]  ;;  %v2914_v43 = vld [vmem:[#allocation5 + $0xde] sm:$0xff]  ;;  %v7968_v57 = vpack.c.bf16 %v4535_v49, %v4534_v4 }
 0xa33   : > { %4016 = vmatmul.mubr.f32.gmra.mrb[32].mxu1 %v3496_v12  ;;  %4341 = vmatmul.mubr.f32.gmra.mrb[70].mxu0 %v4133_v52  ;;  %v3260_v33 = vpop.permute.xlu1 %3259  ;;  %v8438_v52 = vld [vmem:[#allocation6 + $0x38] sm:$0xff]  ;;  %v4536_v12 = vld [vmem:[%s12363_s10 + $0x220] sm:$0xff] }
 0xa34   : > { %7179 = vmatprep.mubr.msk.f32.mxu1 %vm667_vm0, %v8436_v14  ;;  %7203 = vmatprep.mubr.msk.f32.mxu0 %vm667_vm0, %v10461_v41  ;;  %v3132_v54 = vpop.permute.xlu0 %3131  ;;  %v4886_v14 = vld [vmem:[%s12363_s10 + $0x2c8] sm:$0xff]  ;;  %v7971_v49 = vpack.c.bf16 %v4537_v21, %v4536_v12  ;;  %v4540_v21 = vld [vmem:[%s12363_s10 + $0x240] sm:$0xff] }
 0xa35   : > { %7963 = vmatpush1.bf16.msra.mxu1 %v7962_v61  ;;  %7993 = vmatpush1.bf16.msra.mxu0 %v7992_v16  ;;  %v3457_v48 = vsel %vm667_vm0, %v2913_v17, %v3132_v54  ;;  %v10505_v16 = vld [vmem:[#allocation6 + $0x70] sm:$0xff] }
 0xa36   : > { %7964 = vmatprep.subr.bf16.mxu1 %v8525_v42  ;;  %7994 = vmatprep.subr.bf16.mxu0 %v8525_v42  ;;  %v3489_v38 = vsel %vm1743_vm7, %v3457_v48, %v3260_v33  ;;  %v4885_v17 = vld [vmem:[%s12363_s10 + $0x2c0] sm:$0xff] }
 0xa37   : > { %4021 = vmatmul.mubr.f32.gmra.mrb[34].mxu1 %v8437_v36  ;;  %4346 = vmatmul.mubr.f32.gmra.mrb[72].mxu0 %v10481_v23  ;;  %v3134_v61 = vpop.permute.xlu1 %3133  ;;  %v8439_v33 = vld [vmem:[#allocation6 + $0x30] sm:$0xff]  ;;  %v8001_v31 = vpack.c.bf16 %v4886_v14, %v4885_v17  ;;  %v4539_v36 = vld [vmem:[%s12363_s10 + $0x238] sm:$0xff]  ;;  %v4541_v17 = vld [vmem:[%s12363_s10 + $0x248] sm:$0xff] }
 0xa38   : > { %7180 = vmatprep.mubr.msk.f32.mxu1 %vm667_vm0, %v8438_v52  ;;  %7204 = vmatprep.mubr.msk.f32.mxu0 %vm667_vm0, %v10483_v3  ;;  %v3388_v37 = vpop.permute.xlu0 %3387  ;;  %v3458_v54 = vsel %vm667_vm0, %v2914_v43, %v3134_v61  ;;  %v4887_v43 = vld [vmem:[%s12363_s10 + $0x2d0] sm:$0xff]  ;;  %v4888_v52 = vld [vmem:[%s12363_s10 + $0x2d8] sm:$0xff]  ;;  %v4889_v14 = vld [vmem:[%s12363_s10 + $0x2e0] sm:$0xff] }
 0xa39   : > { %7966 = vmatpush1.bf16.msra.mxu1 %v7965_v20  ;;  %7996 = vmatpush1.bf16.msra.mxu0 %v7995_v35  ;;  %v10511_v63 = vsel %vm797_vm1, %v3489_v38, %v3388_v37  ;;  %v10526_v20 = vld [vmem:[#allocation6 + $0x88] sm:$0xff]  ;;  %v8441_v61 = vld [vmem:[#allocation6 + $0x40] sm:$0xff]  ;;  %v8004_v12 = vpack.c.bf16 %v4888_v52, %v4887_v43  ;;  %v8446_v43 = vld [vmem:[#allocation6 + $0x78] sm:$0xff] }
 0xa3a   : > { %7967 = vmatprep.subr.bf16.mxu1 %v8525_v42  ;;  %7997 = vmatprep.subr.bf16.mxu0 %v8525_v42  ;;  %v8440_v35 = vld [vmem:[#allocation6 + $0x48] sm:$0xff] }
 0xa3b   : > { %4026 = vmatmul.mubr.f32.gmra.mrb[36].mxu1 %v8439_v33  ;;  %4351 = vmatmul.mubr.f32.gmra.mrb[74].mxu0 %v10505_v16  ;;  %v3390_v48 = vpop.permute.xlu1 %3389  ;;  %v8443_v33 = vld [vmem:[#allocation6 + $0x50] sm:$0xff] }
 0xa3c   : > { %7205 = vmatprep.mubr.msk.f32.mxu0 %vm667_vm0, %v10526_v20  ;;  %7181 = vmatprep.mubr.msk.f32.mxu1 %vm667_vm0, %v8440_v35  ;;  %v3262_v4 = vpop.permute.xlu0 %3261  ;;  %v8444_v35 = vld [vmem:[#allocation6 + $0x68] sm:$0xff] }
 0xa3d   : > { %7969 = vmatpush1.bf16.msra.mxu1 %v7968_v57  ;;  %7999 = vmatpush1.bf16.msra.mxu0 %v7998_v2  ;;  %v3490_v38 = vsel %vm1743_vm7, %v3458_v54, %v3262_v4  ;;  %v8442_v57 = vld [vmem:[#allocation6 + $0x58] sm:$0xff]  ;;  %v7974_v2 = vpack.c.bf16 %v4539_v36, %v4538_v15  ;;  %v7977_v4 = vpack.c.bf16 %v4541_v17, %v4540_v21  ;;  %v4891_v15 = vld [vmem:[%s12363_s10 + $0x2f0] sm:$0xff]  ;;  %v8447_v17 = vld [vmem:[#allocation6 + $0x70] sm:$0xff] }
 0xa3e   : > { %7970 = vmatprep.subr.bf16.mxu1 %v8525_v42  ;;  %8000 = vmatprep.subr.bf16.mxu0 %v8525_v42  ;;  %v10547_v37 = vsel %vm797_vm1, %v3490_v38, %v3390_v48  ;;  %v4890_v54 = vld [vmem:[%s12363_s10 + $0x2e8] sm:$0xff]  ;;  %v4892_v38 = vld [vmem:[%s12363_s10 + $0x2f8] sm:$0xff]  ;;  %v8445_v36 = vld [vmem:[#allocation6 + $0x60] sm:$0xff] }
 0xa3f   : > { %4031 = vmatmul.mubr.f32.gmra.mrb[38].mxu1 %v8441_v61  ;;  %4356 = vmatmul.mubr.f32.gmra.mrb[76].mxu0 %v10234_v58  ;;  %v8007_v48 = vpack.c.bf16 %v4890_v54, %v4889_v14  ;;  %v8010_v61 = vpack.c.bf16 %v4892_v38, %v4891_v15  ;;  %v4894_v21 = vld [vmem:[%s12363_s10 + $0x308] sm:$0xff]  ;;  %v8448_v14 = vld [vmem:[#allocation6 + $0x88] sm:$0xff] }
 0xa40   : > { %7182 = vmatprep.mubr.msk.f32.mxu1 %vm667_vm0, %v8442_v57  ;;  %7206 = vmatprep.mubr.msk.f32.mxu0 %vm667_vm0, %v10231_v18  ;;  %v4544_v57 = vld [vmem:[%s12363_s10 + $0x260] sm:$0xff]  ;;  %v3136_v15 = vpop.permute.xlu0 %3135 }
 0xa41   : > { %7972 = vmatpush1.bf16.msra.mxu1 %v7971_v49  ;;  %8002 = vmatpush1.bf16.msra.mxu0 %v8001_v31  ;;  %v4542_v49 = vld [vmem:[%s12363_s10 + $0x250] sm:$0xff]  ;;  %v4543_v31 = vld [vmem:[%s12363_s10 + $0x258] sm:$0xff]  ;;  %v2915_v54 = vld [vmem:[#allocation5 + $0xe6] sm:$0xff] }
 0xa42   : > { %7973 = vmatprep.subr.bf16.mxu1 %v8525_v42  ;;  %8003 = vmatprep.subr.bf16.mxu0 %v8525_v42  ;;  %v7980_v52 = vpack.c.bf16 %v4543_v31, %v4542_v49  ;;  %v4895_v49 = vld [vmem:[%s12363_s10 + $0x310] sm:$0xff]  ;;  %v4896_v31 = vld [vmem:[%s12363_s10 + $0x318] sm:$0xff]  ;;  %v3459_v38 = vsel %vm667_vm0, %v2915_v54, %v3136_v15 }
 0xa43   : > { %4036 = vmatmul.mubr.f32.gmra.mrb[40].mxu1 %v8443_v33  ;;  %4361 = vmatmul.mubr.f32.gmra.mrb[78].mxu0 %v10243_v6  ;;  %v3044_v15 = vld [vmem:[#allocation5 + $0xf2] sm:$0xff] }
 0xa44   : > { %7207 = vmatprep.mubr.msk.f32.mxu0 %vm667_vm0, %v10247_v62  ;;  %7183 = vmatprep.mubr.msk.f32.mxu1 %vm667_vm0, %v8444_v35  ;;  %3586 = vst.msk [vmem:[#allocation6 + $0x1d8] sm:$0xff] %vm667_vm0, %v3044_v15  ;;  %v5241_v15 = vld [vmem:[%s12365_s12] sm:$0xff] }
 0xa45   : > { %7975 = vmatpush1.bf16.msra.mxu1 %v7974_v2  ;;  %8005 = vmatpush1.bf16.msra.mxu0 %v8004_v12  ;;  %v4545_v2 = vld [vmem:[%s12363_s10 + $0x268] sm:$0xff]  ;;  %v4893_v12 = vld [vmem:[%s12363_s10 + $0x300] sm:$0xff] }
 0xa46   : > { %7976 = vmatprep.subr.bf16.mxu1 %v8525_v42  ;;  %8006 = vmatprep.subr.bf16.mxu0 %v8525_v42  ;;  %v7983_v33 = vpack.c.bf16 %v4545_v2, %v4544_v57  ;;  %v8013_v35 = vpack.c.bf16 %v4894_v21, %v4893_v12  ;;  %v2916_v57 = vld [vmem:[#allocation5 + $0xee] sm:$0xff] }
 0xa47   : > { %4041 = vmatmul.mubr.f32.gmra.mrb[42].mxu1 %v8445_v36  ;;  %4366 = vmatmul.mubr.f32.gmra.mrb[80].mxu0 %v10214_v55  ;;  %v3264_v36 = vpop.permute.xlu1 %3263 }
 0xa48   : > { %7184 = vmatprep.mubr.msk.f32.mxu1 %vm667_vm0, %v8446_v43  ;;  %7208 = vmatprep.mubr.msk.f32.mxu0 %vm667_vm0, %v10252_v19  ;;  %v3491_v43 = vsel %vm1743_vm7, %v3459_v38, %v3264_v36  ;;  %v4846_v38 = vld [vmem:[#allocation6 + $0x108] sm:$0xff]  ;;  %v4848_v36 = vld [vmem:[#allocation6 + $0x118] sm:$0xff] }
 0xa49   : > { %7978 = vmatpush1.bf16.msra.mxu1 %v7977_v4  ;;  %8008 = vmatpush1.bf16.msra.mxu0 %v8007_v48  ;;  %v4546_v4 = vld [vmem:[%s12363_s10 + $0x270] sm:$0xff]  ;;  %v4547_v48 = vld [vmem:[%s12363_s10 + $0x278] sm:$0xff] }
 0xa4a   : > { %7979 = vmatprep.subr.bf16.mxu1 %v8525_v42  ;;  %8009 = vmatprep.subr.bf16.mxu0 %v8525_v42 }
 0xa4b   : > { %4046 = vmatmul.mubr.f32.gmra.mrb[44].mxu1 %v8447_v17  ;;  %4371 = vmatmul.mubr.f32.gmra.mrb[82].mxu0 %v10222_v10  ;;  %v3138_v2 = vpop.permute.xlu1 %3137  ;;  %v2917_v17 = vld [vmem:[#allocation5 + $0xf6] sm:$0xff] }
 0xa4c   : > { %7185 = vmatprep.mubr.msk.f32.mxu1 %vm667_vm0, %v8448_v14  ;;  %7209 = vmatprep.mubr.msk.f32.mxu0 %vm667_vm0, %v10263_v56  ;;  %v3460_v12 = vsel %vm667_vm0, %v2916_v57, %v3138_v2  ;;  %v4850_v57 = vld [vmem:[#allocation6 + $0x128] sm:$0xff]  ;;  %v4852_v2 = vld [vmem:[#allocation6 + $0x138] sm:$0xff] }
 0xa4d   : > { %7981 = vmatpush1.bf16.msra.mxu1 %v7980_v52  ;;  %8011 = vmatpush1.bf16.msra.mxu0 %v8010_v61  ;;  %v7986_v52 = vpack.c.bf16 %v4547_v48, %v4546_v4  ;;  %v8016_v61 = vpack.c.bf16 %v4896_v31, %v4895_v49  ;;  %v3043_v48 = vld [vmem:[#allocation5 + $0xea] sm:$0xff] }
 0xa4e   : > { %7982 = vmatprep.subr.bf16.mxu1 %v8525_v42  ;;  %8012 = vmatprep.subr.bf16.mxu0 %v8525_v42  ;;  %3584 = vst.msk [vmem:[#allocation6 + $0x1c8] sm:$0xff] %vm667_vm0, %v3043_v48 }
 0xa4f   : > { %4051 = vmatmul.mubr.f32.gmra.mrb[46].mxu1 %v10234_v58  ;;  %4376 = vmatmul.mubr.f32.gmra.mrb[84].mxu0 %v10283_v46  ;;  %v3392_v58 = vpop.permute.xlu0 %3391  ;;  %v3394_v21 = vpop.permute.xlu1 %3393 }
 0xa50   : > { %7186 = vmatprep.mubr.msk.f32.mxu1 %vm667_vm0, %v10231_v18  ;;  %7210 = vmatprep.mubr.msk.f32.mxu0 %vm667_vm0, %v10279_v45  ;;  %v10634_v18 = vsel %vm797_vm1, %v3491_v43, %v3392_v58  ;;  %v4847_v58 = vld [vmem:[#allocation6 + $0x110] sm:$0xff] }
 0xa51   : > { %7984 = vmatpush1.bf16.msra.mxu1 %v7983_v33  ;;  %8014 = vmatpush1.bf16.msra.mxu0 %v8013_v35  ;;  %v2918_v35 = vld [vmem:[#allocation5 + $0xfe] sm:$0xff] }
 0xa52   : > { %7985 = vmatprep.subr.bf16.mxu1 %v8525_v42  ;;  %8015 = vmatprep.subr.bf16.mxu0 %v8525_v42 }
 0xa53   : > { %4056 = vmatmul.mubr.f32.gmra.mrb[48].mxu1 %v10243_v6  ;;  %4381 = vmatmul.mubr.f32.gmra.mrb[86].mxu0 %v10295_v60  ;;  %v3266_v42 = vpop.permute.xlu0 %3265  ;;  %v3268_v54 = vpop.permute.xlu1 %3267 }
 0xa54   : > { %7187 = vmatprep.mubr.msk.f32.mxu1 %vm667_vm0, %v10247_v62  ;;  %7211 = vmatprep.mubr.msk.f32.mxu0 %vm667_vm0, %v10299_v30  ;;  %v3492_v6 = vsel %vm1743_vm7, %v3460_v12, %v3266_v42  ;;  %v4849_v12 = vld [vmem:[#allocation6 + $0x120] sm:$0xff] }
 0xa55   : > { %7987 = vmatpush1.bf16.msra.mxu1 %v7986_v52  ;;  %8017 = vmatpush1.bf16.msra.mxu0 %v8016_v61  ;;  %v10649_v62 = vsel %vm797_vm1, %v3492_v6, %v3394_v21  ;;  %v4845_v52 = vld [vmem:[#allocation6 + $0x100] sm:$0xff]  ;;  %v4851_v21 = vld [vmem:[#allocation6 + $0x130] sm:$0xff] }
 0xa57   : > { %4061 = vmatmul.mubr.f32.gmra.mrb[50].mxu1 %v10214_v55  ;;  %4386 = vmatmul.mubr.f32.gmra.mrb[88].mxu0 %v10259_v7  ;;  %v3140_v14 = vpop.permute.xlu0 %3139  ;;  %v3142_v4 = vpop.permute.xlu1 %3141 }
 0xa58   : > { %7188 = vmatprep.mubr.msk.f32.mxu1 %vm667_vm0, %v10252_v19  ;;  %7212 = vmatprep.mubr.msk.f32.mxu0 %vm667_vm0, %v10305_v11  ;;  %v3461_v55 = vsel %vm667_vm0, %v2917_v17, %v3140_v14  ;;  %v4854_v17 = vld [vmem:[#allocation6 + $0x148] sm:$0xff] }
 0xa59   : > { %v3493_v19 = vsel %vm1743_vm7, %v3461_v55, %v3268_v54  ;;  %v4853_v55 = vld [vmem:[#allocation6 + $0x140] sm:$0xff] }
 0xa5b   : > { %4066 = vmatmul.mubr.f32.gmra.mrb[52].mxu1 %v10222_v10  ;;  %4391 = vmatmul.mubr.f32.gmra.mrb[90].mxu0 %v10272_v1  ;;  %v3396_v33 = vpop.permute.xlu0 %3395  ;;  %v3398_v31 = vpop.permute.xlu1 %3397 }
 0xa5c   : > { %7189 = vmatprep.mubr.msk.f32.mxu1 %vm667_vm0, %v10263_v56  ;;  %7213 = vmatprep.mubr.msk.f32.mxu0 %vm667_vm0, %v10319_v22  ;;  %v10662_v10 = vsel %vm797_vm1, %v3493_v19, %v3396_v33  ;;  %v3462_v56 = vsel %vm667_vm0, %v2918_v35, %v3142_v4  ;;  %v4855_v33 = vld [vmem:[#allocation6 + $0x150] sm:$0xff]  ;;  %v4511_v4 = vld [vmem:[#allocation6 + $0x158] sm:$0xff] }
 0xa5f   : > { %4071 = vmatmul.mubr.f32.gmra.mrb[54].mxu1 %v10283_v46  ;;  %4396 = vmatmul.mubr.f32.gmra.mrb[92].mxu0 %v10334_v5  ;;  %v3270_v49 = vpop.permute.xlu0 %3269 }
 0xa60   : > { %7190 = vmatprep.mubr.msk.f32.mxu1 %vm667_vm0, %v10279_v45  ;;  %7214 = vmatprep.mubr.msk.f32.mxu0 %vm667_vm0, %v10331_v27  ;;  %v3494_v46 = vsel %vm1743_vm7, %v3462_v56, %v3270_v49  ;;  %v4857_v56 = vld [vmem:[#allocation6 + $0x160] sm:$0xff] }
 0xa61   : > { %v10678_v45 = vsel %vm797_vm1, %v3494_v46, %v3398_v31  ;;  %v4861_v46 = vld [vmem:[#allocation6 + $0x180] sm:$0xff] }
 0xa63   : > { %4076 = vmatmul.mubr.f32.gmra.mrb[56].mxu1 %v10295_v60  ;;  %4401 = vmatmul.mubr.f32.gmra.mrb[94].mxu0 %v10343_v24  ;;  %v3045_v60 = vld [vmem:[#allocation5 + $0xfa] sm:$0xff] }
 0xa64   : > { %7191 = vmatprep.mubr.msk.f32.mxu1 %vm667_vm0, %v10299_v30  ;;  %7215 = vmatprep.mubr.msk.f32.mxu0 %vm667_vm0, %v10347_v59  ;;  %3588 = vst.msk [vmem:[#allocation6 + $0x1e8] sm:$0xff] %vm667_vm0, %v3045_v60  ;;  %v3046_v30 = vld [vmem:[#allocation5 + $0x102] sm:$0xff] }
 0xa65   : > { %3590 = vst.msk [vmem:[#allocation6 + $0x1f8] sm:$0xff] %vm667_vm0, %v3046_v30  ;;  %v4863_v30 = vld [vmem:[#allocation6 + $0x190] sm:$0xff] }
 0xa67   : > { %4081 = vmatmul.mubr.f32.gmra.mrb[58].mxu1 %v10259_v7  ;;  %4406 = vmatmul.mubr.f32.gmra.mrb[96].mxu0 %v10314_v34  ;;  %v10725_v7 = vld [vmem:[#allocation6 + $0x1a8] sm:$0xff] }
 0xa68   : > { %7192 = vmatprep.mubr.msk.f32.mxu1 %vm667_vm0, %v10305_v11  ;;  %7216 = vmatprep.mubr.msk.f32.mxu0 %vm667_vm0, %v10352_v32  ;;  %v4832_v11 = vld [vmem:[#allocation6 + $0x98] sm:$0xff] }
 0xa6b   : > { %4086 = vmatmul.mubr.f32.gmra.mrb[60].mxu1 %v10272_v1  ;;  %4411 = vmatmul.mubr.f32.gmra.mrb[98].mxu0 %v10326_v44  ;;  %v10733_v1 = vld [vmem:[#allocation6 + $0x1b8] sm:$0xff] }
 0xa6c   : > { %7193 = vmatprep.mubr.msk.f32.mxu1 %vm667_vm0, %v10319_v22  ;;  %7217 = vmatprep.mubr.msk.f32.mxu0 %vm667_vm0, %v10365_v0  ;;  %v4831_v22 = vld [vmem:[#allocation6 + $0x90] sm:$0xff] }
 0xa6f   : > { %4091 = vmatmul.mubr.f32.gmra.mrb[62].mxu1 %v10334_v5  ;;  %4416 = vmatmul.mubr.f32.gmra.mrb[100].mxu0 %v10380_v53  ;;  %v4833_v5 = vld [vmem:[#allocation6 + $0xa0] sm:$0xff] }
 0xa70   : > { %7194 = vmatprep.mubr.msk.f32.mxu1 %vm667_vm0, %v10331_v27  ;;  %7218 = vmatprep.mubr.msk.f32.mxu0 %vm667_vm0, %v10377_v8  ;;  %v4836_v27 = vld [vmem:[#allocation6 + $0xb8] sm:$0xff] }
 0xa73   : > { %4096 = vmatmul.mubr.f32.gmra.mrb[64].mxu1 %v10343_v24  ;;  %4421 = vmatmul.mubr.f32.gmra.mrb[102].mxu0 %v10391_v51  ;;  %v4835_v24 = vld [vmem:[#allocation6 + $0xb0] sm:$0xff] }
 0xa74   : > { %7195 = vmatprep.mubr.msk.f32.mxu1 %vm667_vm0, %v10347_v59  ;;  %7219 = vmatprep.mubr.msk.f32.mxu0 %vm667_vm0, %v10395_v26  ;;  %v4838_v59 = vld [vmem:[#allocation6 + $0xc8] sm:$0xff] }
 0xa77   : > { %4101 = vmatmul.mubr.f32.gmra.mrb[66].mxu1 %v10314_v34  ;;  %4426 = vmatmul.mubr.f32.gmra.mrb[104].mxu0 %v10360_v13  ;;  %v4829_v34 = vld [vmem:[#allocation6 + $0x80] sm:$0xff] }
 0xa78   : > { %7196 = vmatprep.mubr.msk.f32.mxu1 %vm667_vm0, %v10352_v32  ;;  %7220 = vmatprep.mubr.msk.f32.mxu0 %vm667_vm0, %v10400_v9  ;;  %v4840_v32 = vld [vmem:[#allocation6 + $0xd8] sm:$0xff] }
 0xa7b   : > { %4106 = vmatmul.mubr.f32.gmra.mrb[68].mxu1 %v10326_v44  ;;  %4431 = vmatmul.mubr.f32.gmra.mrb[106].mxu0 %v10372_v47  ;;  %v4834_v44 = vld [vmem:[#allocation6 + $0xa8] sm:$0xff] }
 0xa7c   : > { %7197 = vmatprep.mubr.msk.f32.mxu1 %vm667_vm0, %v10365_v0  ;;  %7221 = vmatprep.mubr.msk.f32.mxu0 %vm667_vm0, %v10411_v50 }
 0xa7f   : > { %4111 = vmatmul.mubr.f32.gmra.mrb[70].mxu1 %v10380_v53  ;;  %4436 = vmatmul.mubr.f32.gmra.mrb[108].mxu0 %v10409_v28  ;;  %v4839_v53 = vld [vmem:[#allocation6 + $0xd0] sm:$0xff]  ;;  %v4844_v28 = vld [vmem:[#allocation6 + $0xf8] sm:$0xff] }
 0xa80   : > { %7198 = vmatprep.mubr.msk.f32.mxu1 %vm667_vm0, %v10377_v8  ;;  %7222 = vmatprep.mubr.msk.f32.mxu0 %vm667_vm0, %v10417_v25 }
 0xa83   : > { %4116 = vmatmul.mubr.f32.gmra.mrb[72].mxu1 %v10391_v51  ;;  %4441 = vmatmul.mubr.f32.gmra.mrb[110].mxu0 %v10431_v29  ;;  %v4842_v51 = vld [vmem:[#allocation6 + $0xe8] sm:$0xff] }
 0xa84   : > { %7199 = vmatprep.mubr.msk.f32.mxu1 %vm667_vm0, %v10395_v26  ;;  %7223 = vmatprep.mubr.msk.f32.mxu0 %vm667_vm0, %v10725_v7 }
 0xa87   : > { %4121 = vmatmul.mubr.f32.gmra.mrb[74].mxu1 %v10360_v13  ;;  %4446 = vmatmul.mubr.f32.gmra.mrb[112].mxu0 %v10511_v63  ;;  %v4837_v13 = vld [vmem:[#allocation6 + $0xc0] sm:$0xff] }
 0xa88   : > { %7200 = vmatprep.mubr.msk.f32.mxu1 %vm667_vm0, %v10400_v9  ;;  %7224 = vmatprep.mubr.msk.f32.mxu0 %vm667_vm0, %v10733_v1 }
 0xa8b   : > { %4126 = vmatmul.mubr.f32.gmra.mrb[76].mxu1 %v10372_v47  ;;  %4451 = vmatmul.mubr.f32.gmra.mrb[114].mxu0 %v10547_v37 }
 0xa8c   : > { %7249 = vmatprep.mubr.msk.f32.mxu0 %vm667_vm0, %v10526_v20  ;;  %7225 = vmatprep.mubr.msk.f32.mxu1 %vm667_vm0, %v10461_v41  ;;  %v4841_v41 = vld [vmem:[#allocation6 + $0xe0] sm:$0xff] }
 0xa8f   : > { %4685 = vmatmul.mubr.f32.vlgmr.msra.gmra.mrb[78].mxu1 %v10481_v23  ;;  %5034 = vmatmul.mubr.f32.vlgmr.msra.gmra.mrb[116].mxu0 %v4829_v34 }
 0xa90   : > { %7226 = vmatprep.mubr.msk.f32.mxu1 %vm667_vm0, %v10483_v3  ;;  %7250 = vmatprep.mubr.msk.f32.mxu0 %vm667_vm0, %v4832_v11 }
 0xa93   : > { %4690 = vmatmul.mubr.f32.gmra.mrb[80].mxu1 %v10505_v16  ;;  %5039 = vmatmul.mubr.f32.gmra.mrb[118].mxu0 %v4831_v22  ;;  %v4843_v16 = vld [vmem:[#allocation6 + $0xf0] sm:$0xff] }
 0xa94   : > { %7227 = vmatprep.mubr.msk.f32.mxu1 %vm667_vm0, %v10526_v20  ;;  %7251 = vmatprep.mubr.msk.f32.mxu0 %vm667_vm0, %v4834_v44 }
 0xa97   : > { %4695 = vmatmul.mubr.f32.gmra.mrb[82].mxu1 %v4829_v34  ;;  %5044 = vmatmul.mubr.f32.gmra.mrb[120].mxu0 %v4833_v5 }
 0xa98   : > { %7228 = vmatprep.mubr.msk.f32.mxu1 %vm667_vm0, %v4832_v11  ;;  %7252 = vmatprep.mubr.msk.f32.mxu0 %vm667_vm0, %v4836_v27 }
 0xa9b   : > { %4700 = vmatmul.mubr.f32.gmra.mrb[84].mxu1 %v4831_v22  ;;  %5049 = vmatmul.mubr.f32.gmra.mrb[122].mxu0 %v4835_v24  ;;  %v4870_v22 = vld [vmem:[#allocation6 + $0x1c8] sm:$0xff] }
 0xa9c   : > { %7229 = vmatprep.mubr.msk.f32.mxu1 %vm667_vm0, %v4834_v44  ;;  %7253 = vmatprep.mubr.msk.f32.mxu0 %vm667_vm0, %v4838_v59 }
 0xa9f   : > { %4705 = vmatmul.mubr.f32.gmra.mrb[86].mxu1 %v4833_v5  ;;  %5054 = vmatmul.mubr.f32.gmra.mrb[124].mxu0 %v4837_v13 }
 0xaa0   : > { %7230 = vmatprep.mubr.msk.f32.mxu1 %vm667_vm0, %v4836_v27  ;;  %7254 = vmatprep.mubr.msk.f32.mxu0 %vm667_vm0, %v4840_v32  ;;  %v4872_v27 = vld [vmem:[#allocation6 + $0x1d8] sm:$0xff] }
 0xaa1   : > { %v10761_v0 = vpop.f32.mrb[32].mxu0 }
 0xaa2   : > { %v3853_v47 = vpop.f32.mrb[33].mxu0 }
 0xaa3   : > { %4710 = vmatmul.mubr.f32.gmra.mrb[88].mxu1 %v4835_v24  ;;  %5059 = vmatmul.mubr.f32.gmra.mrb[126].mxu0 %v4839_v53 }
 0xaa4   : > { %7231 = vmatprep.mubr.msk.f32.mxu1 %vm667_vm0, %v4838_v59  ;;  %7255 = vmatprep.mubr.msk.f32.mxu0 %vm667_vm0, %v4842_v51  ;;  %v5244_v59 = vld [vmem:[%s12365_s12 + $0x18] sm:$0xff] }
 0xaa6   : > { %v10765_v29 = vpop.f32.mrb[34].mxu0 }
 0xaa7   : > { %v3858_v23 = vpop.f32.mrb[35].mxu0  ;;  %4715 = vmatmul.mubr.f32.gmra.mrb[90].mxu1 %v4837_v13  ;;  %5064 = vmatmul.mubr.f32.gmra.mrb[128].mxu0 %v4841_v41 }
 0xaa8   : > { %7232 = vmatprep.mubr.msk.f32.mxu1 %vm667_vm0, %v4840_v32  ;;  %7256 = vmatprep.mubr.msk.f32.mxu0 %vm667_vm0, %v4844_v28 }
 0xaaa   : > { %v10769_v3 = vpop.f32.mrb[36].mxu0 }
 0xaab   : > { %v3863_v20 = vpop.f32.mrb[37].mxu0  ;;  %4720 = vmatmul.mubr.f32.gmra.mrb[92].mxu1 %v4839_v53  ;;  %5069 = vmatmul.mubr.f32.gmra.mrb[130].mxu0 %v4843_v16 }
 0xaac   : > { %7233 = vmatprep.mubr.msk.f32.mxu1 %vm667_vm0, %v4842_v51  ;;  %7257 = vmatprep.mubr.msk.f32.mxu0 %vm667_vm0, %v4846_v38 }
 0xaae   : > { %v10773_v43 = vpop.f32.mrb[38].mxu0 }
 0xaaf   : > { %v3868_v61 = vpop.f32.mrb[39].mxu0  ;;  %4725 = vmatmul.mubr.f32.gmra.mrb[94].mxu1 %v4841_v41  ;;  %5074 = vmatmul.mubr.f32.gmra.mrb[132].mxu0 %v4845_v52 }
 0xab0   : > { %7234 = vmatprep.mubr.msk.f32.mxu1 %vm667_vm0, %v4844_v28  ;;  %7258 = vmatprep.mubr.msk.f32.mxu0 %vm667_vm0, %v4848_v36 }
 0xab3   : > { %4730 = vmatmul.mubr.f32.gmra.mrb[96].mxu1 %v4843_v16  ;;  %5079 = vmatmul.mubr.f32.gmra.mrb[134].mxu0 %v4847_v58 }
 0xab4   : > { %7235 = vmatprep.mubr.msk.f32.mxu1 %vm667_vm0, %v4846_v38  ;;  %7259 = vmatprep.mubr.msk.f32.mxu0 %vm667_vm0, %v4850_v57 }
 0xab7   : > { %4735 = vmatmul.mubr.f32.gmra.mrb[98].mxu1 %v4845_v52  ;;  %5084 = vmatmul.mubr.f32.gmra.mrb[136].mxu0 %v4849_v12 }
 0xab8   : > { %7236 = vmatprep.mubr.msk.f32.mxu1 %vm667_vm0, %v4848_v36  ;;  %7260 = vmatprep.mubr.msk.f32.mxu0 %vm667_vm0, %v4852_v2 }
 0xab9   : > { %v10781_v42 = vpop.f32.mrb[40].mxu0 }
 0xaba   : > { %v3873_v6 = vpop.f32.mrb[41].mxu0 }
 0xabb   : > { %4740 = vmatmul.mubr.f32.gmra.mrb[100].mxu1 %v4847_v58  ;;  %5089 = vmatmul.mubr.f32.gmra.mrb[138].mxu0 %v4851_v21  ;;  %v5247_v58 = vld [vmem:[%s12365_s12 + $0x30] sm:$0xff] }
 0xabc   : > { %7237 = vmatprep.mubr.msk.f32.mxu1 %vm667_vm0, %v4850_v57  ;;  %7261 = vmatprep.mubr.msk.f32.mxu0 %vm667_vm0, %v4854_v17  ;;  %v5248_v57 = vld [vmem:[%s12365_s12 + $0x38] sm:$0xff] }
 0xabd   : > { %v8030_v6 = vpack.c.bf16 %v5248_v57, %v5247_v58 }
 0xabe   : > { %v10785_v14 = vpop.f32.mrb[42].mxu0 }
 0xabf   : > { %v3878_v54 = vpop.f32.mrb[43].mxu0  ;;  %4745 = vmatmul.mubr.f32.gmra.mrb[102].mxu1 %v4849_v12  ;;  %5094 = vmatmul.mubr.f32.gmra.mrb[140].mxu0 %v4853_v55 }
 0xac0   : > { %7238 = vmatprep.mubr.msk.f32.mxu1 %vm667_vm0, %v4852_v2  ;;  %7262 = vmatprep.mubr.msk.f32.mxu0 %vm667_vm0, %v10377_v8  ;;  %v4859_v8 = vld [vmem:[#allocation6 + $0x170] sm:$0xff]  ;;  %v5250_v54 = vld [vmem:[%s12365_s12 + $0x48] sm:$0xff] }
 0xac2   : > { %v10790_v19 = vpop.f32.mrb[44].mxu0 }
 0xac3   : > { %v3883_v35 = vpop.f32.mrb[45].mxu0  ;;  %4750 = vmatmul.mubr.f32.gmra.mrb[104].mxu1 %v4851_v21  ;;  %5099 = vmatmul.mubr.f32.gmra.mrb[142].mxu0 %v4855_v33 }
 0xac4   : > { %7239 = vmatprep.mubr.msk.f32.mxu1 %vm667_vm0, %v4854_v17  ;;  %7263 = vmatprep.mubr.msk.f32.mxu0 %vm667_vm0, %v10395_v26 }
 0xac6   : > { %v10795_v48 = vpop.f32.mrb[46].mxu0 }
 0xac7   : > { %v3888_v49 = vpop.f32.mrb[47].mxu0  ;;  %4755 = vmatmul.mubr.f32.gmra.mrb[106].mxu1 %v4853_v55  ;;  %5104 = vmatmul.mubr.f32.gmra.mrb[144].mxu0 %v4857_v56  ;;  %v5249_v55 = vld [vmem:[%s12365_s12 + $0x40] sm:$0xff] }
 0xac8   : > { %7240 = vmatprep.mubr.msk.f32.mxu1 %vm667_vm0, %v4511_v4  ;;  %7264 = vmatprep.mubr.msk.f32.mxu0 %vm667_vm0, %v10400_v9  ;;  %v8034_v4 = vpack.c.bf16 %v5250_v54, %v5249_v55 }
 0xacb   : > { %4760 = vmatmul.mubr.f32.gmra.mrb[108].mxu1 %v4855_v33  ;;  %5109 = vmatmul.mubr.f32.gmra.mrb[146].mxu0 %v4859_v8 }
 0xacc   : > { %7241 = vmatprep.mubr.msk.f32.mxu1 %vm667_vm0, %v10395_v26  ;;  %7265 = vmatprep.mubr.msk.f32.mxu0 %vm667_vm0, %v10411_v50  ;;  %v5242_v26 = vld [vmem:[%s12365_s12 + $0x8] sm:$0xff] }
 0xacd   : > { %v8018_v11 = vpack.c.bf16 %v5242_v26, %v5241_v15 }
 0xacf   : > { %4765 = vmatmul.mubr.f32.gmra.mrb[110].mxu1 %v4857_v56  ;;  %5114 = vmatmul.mubr.f32.gmra.mrb[148].mxu0 %v4861_v46 }
 0xad0   : > { %7242 = vmatprep.mubr.msk.f32.mxu1 %vm667_vm0, %v10400_v9  ;;  %7266 = vmatprep.mubr.msk.f32.mxu0 %vm667_vm0, %v10417_v25 }
 0xad1   : > { %v10808_v31 = vpop.f32.mrb[48].mxu0  ;;  %8019 = vmatprep.subr.bf16.mxu1 %v8018_v11 }
 0xad2   : > { %v3893_v60 = vpop.f32.mrb[49].mxu0  ;;  %8021 = vmatpush3.bf16.msra.mxu1 %v8018_v11 }
 0xad3   : > { %4770 = vmatmul.mubr.f32.gmra.mrb[112].mxu1 %v4859_v8  ;;  %5119 = vmatmul.mubr.f32.gmra.mrb[150].mxu0 %v4863_v30  ;;  %v5251_v8 = vld [vmem:[%s12365_s12 + $0x50] sm:$0xff] }
 0xad4   : > { %7243 = vmatprep.mubr.msk.f32.mxu1 %vm667_vm0, %v10411_v50  ;;  %7267 = vmatprep.mubr.msk.f32.mxu0 %vm667_vm0, %v10725_v7 }
 0xad6   : > { %v10820_v9 = vpop.f32.mrb[50].mxu0 }
 0xad7   : > { %v3898_v34 = vpop.f32.mrb[51].mxu0  ;;  %4775 = vmatmul.mubr.f32.gmra.mrb[114].mxu1 %v4861_v46  ;;  %5124 = vmatmul.mubr.f32.gmra.mrb[152].mxu0 %v10511_v63  ;;  %v5252_v46 = vld [vmem:[%s12365_s12 + $0x58] sm:$0xff] }
 0xad8   : > { %7244 = vmatprep.mubr.msk.f32.mxu1 %vm667_vm0, %v10417_v25  ;;  %7268 = vmatprep.mubr.msk.f32.mxu0 %vm667_vm0, %v10733_v1  ;;  %v4874_v25 = vld [vmem:[#allocation6 + $0x1e8] sm:$0xff]  ;;  %v8038_v60 = vpack.c.bf16 %v5252_v46, %v5251_v8 }
 0xada   : > { %v10827_v44 = vpop.f32.mrb[52].mxu0 }
 0xadb   : > { %v3903_v50 = vpop.f32.mrb[53].mxu0  ;;  %4780 = vmatmul.mubr.f32.gmra.mrb[116].mxu1 %v4863_v30  ;;  %5129 = vmatmul.mubr.f32.gmra.mrb[154].mxu0 %v10547_v37 }
 0xadc   : > { %7245 = vmatprep.mubr.msk.f32.mxu1 %vm667_vm0, %v10725_v7  ;;  %7269 = vmatprep.mubr.msk.f32.mxu0 %vm667_vm0, %v4870_v22  ;;  %v5243_v7 = vld [vmem:[%s12365_s12 + $0x10] sm:$0xff] }
 0xadd   : > { %v8022_v32 = vpack.c.bf16 %v5244_v59, %v5243_v7 }
 0xade   : > { %v10833_v5 = vpop.f32.mrb[54].mxu0 }
 0xadf   : > { %v3908_v24 = vpop.f32.mrb[55].mxu0  ;;  %4785 = vmatmul.mubr.f32.gmra.mrb[118].mxu1 %v10511_v63  ;;  %5134 = vmatmul.mubr.f32.gmra.mrb[156].mxu0 %v10634_v18  ;;  %v4876_v63 = vld [vmem:[#allocation6 + $0x1f8] sm:$0xff] }
 0xae0   : > { %7246 = vmatprep.mubr.msk.f32.mxu1 %vm667_vm0, %v10733_v1  ;;  %7270 = vmatprep.mubr.msk.f32.mxu0 %vm667_vm0, %v4872_v27 }
 0xae1   : > { %8023 = vmatprep.subr.bf16.mxu1 %v8022_v32 }
 0xae2   : > { %8025 = vmatpush3.bf16.msra.mxu1 %v8022_v32 }
 0xae3   : > { %4790 = vmatmul.mubr.f32.gmra.mrb[120].mxu1 %v10547_v37  ;;  %5139 = vmatmul.mubr.f32.gmra.mrb[158].mxu0 %v10649_v62 }
 0xae4   : > { %7247 = vmatprep.mubr.msk.f32.mxu1 %vm667_vm0, %v4870_v22  ;;  %7271 = vmatprep.mubr.msk.f32.mxu0 %vm667_vm0, %v4874_v25 }
 0xae7   : > { %4795 = vmatmul.mubr.f32.gmra.mrb[122].mxu1 %v10634_v18  ;;  %5144 = vmatmul.mubr.f32.gmra.mrb[160].mxu0 %v10662_v10  ;;  %v5245_v18 = vld [vmem:[%s12365_s12 + $0x20] sm:$0xff]  ;;  %v5246_v10 = vld [vmem:[%s12365_s12 + $0x28] sm:$0xff] }
 0xae8   : > { %7248 = vmatprep.mubr.msk.f32.mxu1 %vm667_vm0, %v4872_v27  ;;  %7272 = vmatprep.mubr.msk.f32.mxu0 %vm667_vm0, %v4876_v63  ;;  %v8026_v41 = vpack.c.bf16 %v5246_v10, %v5245_v18 }
 0xae9   : > { %v10854_v1 = vpop.f32.mrb[56].mxu0 }
 0xaea   : > { %v3913_v37 = vpop.f32.mrb[57].mxu0  ;;  %8027 = vmatprep.subr.bf16.mxu1 %v8026_v41 }
 0xaeb   : > { %4800 = vmatmul.mubr.f32.gmra.mrb[124].mxu1 %v10649_v62  ;;  %5149 = vmatmul.mubr.f32.gmra.mrb[162].mxu0 %v10678_v45 }
 0xaec   : > { %8029 = vmatpush3.bf16.msra.mxu1 %v8026_v41 }
 0xaed   : > { %8031 = vmatprep.subr.bf16.mxu1 %v8030_v6 }
 0xaee   : > { %v10858_v13 = vpop.f32.mrb[58].mxu0 }
 0xaef   : > { %v3918_v47 = vpop.f32.mrb[59].mxu0 }
 0xaf0   : > { %8033 = vmatpush3.bf16.msra.mxu1 %v8030_v6 }
 0xaf1   : > { %8035 = vmatprep.subr.bf16.mxu1 %v8034_v4 }
 0xaf2   : > { %v3921_v53 = vpop.f32.mrb[60].mxu0 }
 0xaf3   : > { %v3923_v51 = vpop.f32.mrb[61].mxu0 }
 0xaf4   : > { %8037 = vmatpush3.bf16.msra.mxu1 %v8034_v4 }
 0xaf5   : > { %8039 = vmatprep.subr.bf16.mxu1 %v8038_v60 }
 0xaf6   : > { %v3926_v28 = vpop.f32.mrb[62].mxu0 }
 0xaf7   : > { %v3928_v23 = vpop.f32.mrb[63].mxu0 }
 0xaf8   : > { %8041 = vmatpush3.bf16.msra.mxu1 %v8038_v60 }
 0xafa   : > { %v3931_v62 = vpop.f32.mrb[64].mxu0 }
 0xafb   : > { %v3933_v45 = vpop.f32.mrb[65].mxu0 }
 0xafe   : > { %v3936_v16 = vpop.f32.mrb[66].mxu0 }
 0xaff   : > { %v3938_v20 = vpop.f32.mrb[67].mxu0 }
 0xb01   : > { %v4012_v38 = vpop.f32.mrb[30].mxu1 }
 0xb02   : > { %v4014_v36 = vpop.f32.mrb[31].mxu1  ;;  %v4337_v52 = vpop.f32.mrb[68].mxu0 }
 0xb03   : > { %v4339_v61 = vpop.f32.mrb[69].mxu0 }
 0xb06   : > { %v4017_v2 = vpop.f32.mrb[32].mxu1  ;;  %v4342_v12 = vpop.f32.mrb[70].mxu0 }
 0xb07   : > { %v4019_v21 = vpop.f32.mrb[33].mxu1  ;;  %v4344_v17 = vpop.f32.mrb[71].mxu0 }
 0xb0a   : > { %v4022_v33 = vpop.f32.mrb[34].mxu1  ;;  %v4347_v35 = vpop.f32.mrb[72].mxu0 }
 0xb0b   : > { %v4024_v56 = vpop.f32.mrb[35].mxu1  ;;  %v4349_v49 = vpop.f32.mrb[73].mxu0 }
 0xb0e   : > { %v4027_v15 = vpop.f32.mrb[36].mxu1  ;;  %v4352_v26 = vpop.f32.mrb[74].mxu0 }
 0xb0f   : > { %v4029_v30 = vpop.f32.mrb[37].mxu1  ;;  %v4354_v11 = vpop.f32.mrb[75].mxu0 }
 0xb12   : > { %v4032_v34 = vpop.f32.mrb[38].mxu1  ;;  %v4357_v22 = vpop.f32.mrb[76].mxu0 }
 0xb13   : > { %v4033_v50 = vadd.f32 %v4032_v34, %v10388_v39  ;;  %v4034_v27 = vpop.f32.mrb[39].mxu1  ;;  %v4359_v24 = vpop.f32.mrb[77].mxu0 }
 0xb15   : > { %v10885_v25 = vadd.f32 %v4357_v22, %v4033_v50 }
 0xb16   : > { %v4037_v7 = vpop.f32.mrb[40].mxu1  ;;  %v4362_v59 = vpop.f32.mrb[78].mxu0 }
 0xb17   : > { %v4038_v32 = vadd.f32 %v4037_v7, %v10402_v40  ;;  %v4039_v63 = vpop.f32.mrb[41].mxu1  ;;  %v4364_v37 = vpop.f32.mrb[79].mxu0 }
 0xb19   : > { %v10888_v47 = vadd.f32 %v4362_v59, %v4038_v32 }
 0xb1a   : > { %v4042_v53 = vpop.f32.mrb[42].mxu1  ;;  %v4367_v51 = vpop.f32.mrb[80].mxu0 }
 0xb1b   : > { %v4043_v18 = vadd.f32 %v4042_v53, %v10761_v0  ;;  %v4044_v10 = vpop.f32.mrb[43].mxu1  ;;  %v4369_v28 = vpop.f32.mrb[81].mxu0 }
 0xb1d   : > { %v10891_v41 = vadd.f32 %v4367_v51, %v4043_v18 }
 0xb1e   : > { %v4047_v39 = vpop.f32.mrb[44].mxu1  ;;  %v4372_v23 = vpop.f32.mrb[82].mxu0 }
 0xb1f   : > { %v4048_v62 = vadd.f32 %v4047_v39, %v10765_v29  ;;  %v4049_v45 = vpop.f32.mrb[45].mxu1  ;;  %v4374_v16 = vpop.f32.mrb[83].mxu0 }
 0xb21   : > { %v10894_v20 = vadd.f32 %v4372_v23, %v4048_v62 }
 0xb22   : > { %v4052_v40 = vpop.f32.mrb[46].mxu1  ;;  %v4377_v38 = vpop.f32.mrb[84].mxu0 }
 0xb23   : > { %v4053_v36 = vadd.f32 %v4052_v40, %v10769_v3  ;;  %v4054_v52 = vpop.f32.mrb[47].mxu1  ;;  %v4379_v61 = vpop.f32.mrb[85].mxu0  ;;  %v6704_v3 = vld [vmem:[%s12371_s18] sm:$0xff] }
 0xb25   : > { %v10897_v58 = vadd.f32 %v4377_v38, %v4053_v36 }
 0xb26   : > { %v4057_v0 = vpop.f32.mrb[48].mxu1  ;;  %v4382_v57 = vpop.f32.mrb[86].mxu0 }
 0xb27   : > { %v4058_v2 = vadd.f32 %v4057_v0, %v10773_v43  ;;  %v4059_v12 = vpop.f32.mrb[49].mxu1  ;;  %v4384_v6 = vpop.f32.mrb[87].mxu0  ;;  %v6705_v43 = vld [vmem:[%s12371_s18 + $0x8] sm:$0xff] }
 0xb28   : > { %v10911_v49 = vpack.c.bf16 %v6705_v43, %v6704_v3 }
 0xb29   : > { %v10900_v21 = vadd.f32 %v4382_v57, %v4058_v2 }
 0xb2a   : > { %v4062_v29 = vpop.f32.mrb[50].mxu1  ;;  %v4387_v17 = vpop.f32.mrb[88].mxu0  ;;  %8043 = vmatprep.subr.bf16.mxu1 %v10911_v49 }
 0xb2b   : > { %v4063_v55 = vadd.f32 %v4062_v29, %v10781_v42  ;;  %v4064_v54 = vpop.f32.mrb[51].mxu1  ;;  %v4389_v33 = vpop.f32.mrb[89].mxu0 }
 0xb2d   : > { %v10903_v35 = vadd.f32 %v4387_v17, %v4063_v55 }
 0xb2e   : > { %v4067_v4 = vpop.f32.mrb[52].mxu1  ;;  %v4392_v56 = vpop.f32.mrb[90].mxu0 }
 0xb2f   : > { %v4068_v8 = vadd.f32 %v4067_v4, %v10785_v14  ;;  %v4069_v46 = vpop.f32.mrb[53].mxu1  ;;  %v4394_v42 = vpop.f32.mrb[91].mxu0 }
 0xb31   : > { %v10915_v15 = vadd.f32 %v4392_v56, %v4068_v8 }
 0xb32   : > { %v4072_v26 = vpop.f32.mrb[54].mxu1  ;;  %v4397_v60 = vpop.f32.mrb[92].mxu0 }
 0xb33   : > { %v4073_v30 = vadd.f32 %v4072_v26, %v10790_v19  ;;  %v4074_v11 = vpop.f32.mrb[55].mxu1  ;;  %v4399_v34 = vpop.f32.mrb[93].mxu0 }
 0xb35   : > { %v10918_v22 = vadd.f32 %v4397_v60, %v4073_v30 }
 0xb36   : > { %v4077_v50 = vpop.f32.mrb[56].mxu1  ;;  %v4402_v27 = vpop.f32.mrb[94].mxu0 }
 0xb37   : > { %v4078_v24 = vadd.f32 %v4077_v50, %v10795_v48  ;;  %v4079_v7 = vpop.f32.mrb[57].mxu1  ;;  %v4404_v14 = vpop.f32.mrb[95].mxu0 }
 0xb39   : > { %v10921_v59 = vadd.f32 %v4402_v27, %v4078_v24 }
 0xb3a   : > { %v4082_v32 = vpop.f32.mrb[58].mxu1  ;;  %v4407_v63 = vpop.f32.mrb[96].mxu0 }
 0xb3b   : > { %v4083_v37 = vadd.f32 %v4082_v32, %v10808_v31  ;;  %v4084_v53 = vpop.f32.mrb[59].mxu1  ;;  %v4409_v51 = vpop.f32.mrb[97].mxu0 }
 0xb3c   : > { %v10944_v53 = vld [vmem:[%s12364_s11] ss:$0 sm:$0xff] }
 0xb3d   : > { %v10924_v18 = vadd.f32 %v4407_v63, %v4083_v37 }
 0xb3e   : > { %v4087_v19 = vpop.f32.mrb[60].mxu1  ;;  %v4412_v10 = vpop.f32.mrb[98].mxu0 }
 0xb3f   : > { %v4088_v28 = vadd.f32 %v4087_v19, %v10820_v9  ;;  %v4089_v39 = vpop.f32.mrb[61].mxu1  ;;  %v4414_v23 = vpop.f32.mrb[99].mxu0 }
 0xb41   : > { %v10927_v62 = vadd.f32 %v4412_v10, %v4088_v28 }
 0xb42   : > { %v4092_v48 = vpop.f32.mrb[62].mxu1  ;;  %v4417_v45 = vpop.f32.mrb[100].mxu0 }
 0xb43   : > { %v4093_v16 = vadd.f32 %v4092_v48, %v10827_v44  ;;  %v4094_v40 = vpop.f32.mrb[63].mxu1  ;;  %v4419_v38 = vpop.f32.mrb[101].mxu0 }
 0xb45   : > { %v10930_v36 = vadd.f32 %v4417_v45, %v4093_v16 }
 0xb46   : > { %v4097_v31 = vpop.f32.mrb[64].mxu1  ;;  %v4422_v52 = vpop.f32.mrb[102].mxu0 }
 0xb47   : > { %v4098_v61 = vadd.f32 %v4097_v31, %v10833_v5  ;;  %v4099_v0 = vpop.f32.mrb[65].mxu1  ;;  %v4424_v57 = vpop.f32.mrb[103].mxu0 }
 0xb49   : > { %v10933_v2 = vadd.f32 %v4422_v52, %v4098_v61 }
 0xb4a   : > { %v4102_v9 = vpop.f32.mrb[66].mxu1  ;;  %v4427_v12 = vpop.f32.mrb[104].mxu0 }
 0xb4b   : > { %v4103_v6 = vadd.f32 %v4102_v9, %v10854_v1  ;;  %v4104_v29 = vpop.f32.mrb[67].mxu1  ;;  %v4429_v17 = vpop.f32.mrb[105].mxu0 }
 0xb4d   : > { %v10936_v55 = vadd.f32 %v4427_v12, %v4103_v6 }
 0xb4e   : > { %v4107_v44 = vpop.f32.mrb[68].mxu1  ;;  %v4432_v54 = vpop.f32.mrb[106].mxu0 }
 0xb4f   : > { %v4108_v33 = vadd.f32 %v4107_v44, %v10858_v13  ;;  %v4109_v3 = vpop.f32.mrb[69].mxu1  ;;  %v4434_v43 = vpop.f32.mrb[107].mxu0 }
 0xb51   : > { %v10939_v4 = vadd.f32 %v4432_v54, %v4108_v33 }
 0xb52   : > { %v4112_v5 = vpop.f32.mrb[70].mxu1  ;;  %v4437_v56 = vpop.f32.mrb[108].mxu0 }
 0xb53   : > { %v4114_v8 = vpop.f32.mrb[71].mxu1  ;;  %v4439_v46 = vpop.f32.mrb[109].mxu0 }
 0xb56   : > { %v4117_v42 = vpop.f32.mrb[72].mxu1  ;;  %v4442_v26 = vpop.f32.mrb[110].mxu0 }
 0xb57   : > { %v4119_v60 = vpop.f32.mrb[73].mxu1  ;;  %v4444_v1 = vpop.f32.mrb[111].mxu0 }
 0xb5a   : > { %v4122_v30 = vpop.f32.mrb[74].mxu1  ;;  %v4447_v11 = vpop.f32.mrb[112].mxu0 }
 0xb5b   : > { %v4124_v34 = vpop.f32.mrb[75].mxu1  ;;  %v4449_v50 = vpop.f32.mrb[113].mxu0 }
 0xb5e   : > { %v4127_v27 = vpop.f32.mrb[76].mxu1  ;;  %v4452_v24 = vpop.f32.mrb[114].mxu0 }
 0xb5f   : > { %v4129_v7 = vpop.f32.mrb[77].mxu1  ;;  %v4454_v13 = vpop.f32.mrb[115].mxu0 }
 0xb62   : > { %v4686_v14 = vpop.f32.mrb[78].mxu1  ;;  %v5035_v32 = vpop.f32.mrb[116].mxu0 }
 0xb63   : > { %v4688_v63 = vpop.f32.mrb[79].mxu1  ;;  %v5037_v37 = vpop.f32.mrb[117].mxu0 }
 0xb66   : > { %v4691_v51 = vpop.f32.mrb[80].mxu1  ;;  %v5040_v19 = vpop.f32.mrb[118].mxu0 }
 0xb67   : > { %v4693_v10 = vpop.f32.mrb[81].mxu1  ;;  %v5042_v28 = vpop.f32.mrb[119].mxu0 }
 0xb68   : > { %v6707_v28 = vld [vmem:[%s12371_s18 + $0x18] sm:$0xff] }
 0xb6a   : > { %v4696_v39 = vpop.f32.mrb[82].mxu1  ;;  %v5045_v23 = vpop.f32.mrb[120].mxu0 }
 0xb6b   : > { %v4698_v48 = vpop.f32.mrb[83].mxu1  ;;  %v5047_v45 = vpop.f32.mrb[121].mxu0 }
 0xb6e   : > { %v4701_v16 = vpop.f32.mrb[84].mxu1  ;;  %v5050_v40 = vpop.f32.mrb[122].mxu0 }
 0xb6f   : > { %v4703_v38 = vpop.f32.mrb[85].mxu1  ;;  %v5052_v31 = vpop.f32.mrb[123].mxu0 }
 0xb72   : > { %v4706_v52 = vpop.f32.mrb[86].mxu1  ;;  %v5055_v61 = vpop.f32.mrb[124].mxu0 }
 0xb73   : > { %v4809_v0 = vadd.f32 %v4706_v52, %v10885_v25  ;;  %v4708_v57 = vpop.f32.mrb[87].mxu1  ;;  %v5057_v9 = vpop.f32.mrb[125].mxu0  ;;  %v6708_v52 = vld [vmem:[%s12371_s18 + $0x20] sm:$0xff] }
 0xb75   : > { %v5158_v12 = vadd.f32 %v5055_v61, %v4809_v0  ;;  %v6709_v61 = vld [vmem:[%s12371_s18 + $0x28] sm:$0xff] }
 0xb76   : > { %v4711_v6 = vpop.f32.mrb[88].mxu1  ;;  %v5060_v29 = vpop.f32.mrb[126].mxu0 }
 0xb77   : > { %v5189_v17 = vadd.f32 %v10944_v53, %v5158_v12  ;;  %v4810_v44 = vadd.f32 %v4711_v6, %v10888_v47  ;;  %v4713_v54 = vpop.f32.mrb[89].mxu1  ;;  %v5062_v33 = vpop.f32.mrb[127].mxu0 }
 0xb78   : > { %v6711_v54 = vld [vmem:[%s12371_s18 + $0x38] sm:$0xff] }
 0xb79   : > { %5213 = vst.msk [vmem:[#allocation7 + $0x20] sm:$0xff] %vm797_vm1, %v5189_v17  ;;  %v5159_v3 = vadd.f32 %v5060_v29, %v4810_v44  ;;  %v8050_v17 = vpack.c.bf16 %v6709_v61, %v6708_v52  ;;  %v6710_v44 = vld [vmem:[%s12371_s18 + $0x30] sm:$0xff] }
 0xb7a   : > { %v4716_v43 = vpop.f32.mrb[90].mxu1  ;;  %v5065_v5 = vpop.f32.mrb[128].mxu0 }
 0xb7b   : > { %v5190_v56 = vadd.f32 %v10944_v53, %v5159_v3  ;;  %v4811_v25 = vadd.f32 %v4716_v43, %v10891_v41  ;;  %v4718_v8 = vpop.f32.mrb[91].mxu1  ;;  %v5067_v46 = vpop.f32.mrb[129].mxu0 }
 0xb7c   : > { %v6712_v46 = vld [vmem:[%s12371_s18 + $0x40] sm:$0xff] }
 0xb7d   : > { %5214 = vst.msk [vmem:[#allocation7 + $0x28] sm:$0xff] %vm797_vm1, %v5190_v56  ;;  %v5160_v42 = vadd.f32 %v5065_v5, %v4811_v25  ;;  %v8054_v25 = vpack.c.bf16 %v6711_v54, %v6710_v44 }
 0xb7e   : > { %v4721_v26 = vpop.f32.mrb[92].mxu1  ;;  %v5070_v60 = vpop.f32.mrb[130].mxu0 }
 0xb7f   : > { %v5191_v47 = vadd.f32 %v10944_v53, %v5160_v42  ;;  %v4812_v1 = vadd.f32 %v4721_v26, %v10894_v20  ;;  %v4723_v30 = vpop.f32.mrb[93].mxu1  ;;  %v5072_v11 = vpop.f32.mrb[131].mxu0  ;;  %v6713_v42 = vld [vmem:[%s12371_s18 + $0x48] sm:$0xff] }
 0xb81   : > { %5215 = vst.msk [vmem:[#allocation7 + $0x30] sm:$0xff] %vm797_vm1, %v5191_v47  ;;  %v5161_v34 = vadd.f32 %v5070_v60, %v4812_v1 }
 0xb82   : > { %v4726_v50 = vpop.f32.mrb[94].mxu1  ;;  %v5075_v27 = vpop.f32.mrb[132].mxu0 }
 0xb83   : > { %v5192_v41 = vadd.f32 %v10944_v53, %v5161_v34  ;;  %v4813_v24 = vadd.f32 %v4726_v50, %v10897_v58  ;;  %v4728_v7 = vpop.f32.mrb[95].mxu1  ;;  %v5077_v13 = vpop.f32.mrb[133].mxu0  ;;  %v6706_v58 = vld [vmem:[%s12371_s18 + $0x10] sm:$0xff]  ;;  %v8058_v34 = vpack.c.bf16 %v6713_v42, %v6712_v46 }
 0xb84   : > { %v10958_v14 = vld [vmem:[#allocation7 + $0x22] sm:$0xff]  ;;  %v8046_v38 = vpack.c.bf16 %v6707_v28, %v6706_v58 }
 0xb85   : > { %5216 = vst.msk [vmem:[#allocation7 + $0x38] sm:$0xff] %vm797_vm1, %v5192_v41  ;;  %v5162_v32 = vadd.f32 %v5075_v27, %v4813_v24  ;;  %7660 = vmatprep.mubr.msk.f32.mxu1 %vm797_vm1, %v10958_v14  ;;  %v6714_v50 = vld [vmem:[%s12371_s18 + $0x50] sm:$0xff]  ;;  %v6715_v27 = vld [vmem:[%s12371_s18 + $0x58] sm:$0xff] }
 0xb86   : > { %v4731_v20 = vpop.f32.mrb[96].mxu1  ;;  %v5080_v63 = vpop.f32.mrb[134].mxu0 }
 0xb87   : > { %v5193_v37 = vadd.f32 %v10944_v53, %v5162_v32  ;;  %v4814_v51 = vadd.f32 %v4731_v20, %v10900_v21  ;;  %v4733_v19 = vpop.f32.mrb[97].mxu1  ;;  %v5082_v10 = vpop.f32.mrb[135].mxu0 }
 0xb89   : > { %5217 = vst.msk [vmem:[#allocation7 + $0x40] sm:$0xff] %vm797_vm1, %v5193_v37  ;;  %v5163_v39 = vadd.f32 %v5080_v63, %v4814_v51  ;;  %v8062_v63 = vpack.c.bf16 %v6715_v27, %v6714_v50 }
 0xb8a   : > { %v4736_v23 = vpop.f32.mrb[98].mxu1  ;;  %v5085_v48 = vpop.f32.mrb[136].mxu0 }
 0xb8b   : > { %v5194_v45 = vadd.f32 %v10944_v53, %v5163_v39  ;;  %v4815_v16 = vadd.f32 %v4736_v23, %v10903_v35  ;;  %v4738_v21 = vpop.f32.mrb[99].mxu1  ;;  %v5087_v40 = vpop.f32.mrb[137].mxu0 }
 0xb8c   : > { %v10974_v31 = vld [vmem:[#allocation7 + $0x32] sm:$0xff] }
 0xb8d   : > { %5218 = vst.msk [vmem:[#allocation7 + $0x48] sm:$0xff] %vm797_vm1, %v5194_v45  ;;  %v5164_v0 = vadd.f32 %v5085_v48, %v4815_v16  ;;  %7661 = vmatmul.mubr.msk.f32.vlgmr.msra.gmra.mrb[126].mxu1 %vm797_vm1, %v10974_v31 }
 0xb8e   : > { %v4741_v35 = vpop.f32.mrb[100].mxu1  ;;  %v5090_v57 = vpop.f32.mrb[138].mxu0  ;;  %8045 = vmatpush3.bf16.msra.mxu1 %v10911_v49 }
 0xb8f   : > { %v5195_v9 = vadd.f32 %v10944_v53, %v5164_v0  ;;  %v4816_v12 = vadd.f32 %v4741_v35, %v10915_v15  ;;  %v4743_v6 = vpop.f32.mrb[101].mxu1  ;;  %v5092_v29 = vpop.f32.mrb[139].mxu0  ;;  %8047 = vmatprep.subr.bf16.mxu1 %v8046_v38 }
 0xb91   : > { %5219 = vst.msk [vmem:[#allocation7 + $0x50] sm:$0xff] %vm797_vm1, %v5195_v9  ;;  %v5165_v33 = vadd.f32 %v5090_v57, %v4816_v12 }
 0xb92   : > { %v4746_v49 = vpop.f32.mrb[102].mxu1  ;;  %v5095_v3 = vpop.f32.mrb[140].mxu0  ;;  %8049 = vmatpush3.bf16.msra.mxu1 %v8046_v38 }
 0xb93   : > { %v5196_v15 = vadd.f32 %v10944_v53, %v5165_v33  ;;  %v4817_v43 = vadd.f32 %v4746_v49, %v10918_v22  ;;  %v4748_v5 = vpop.f32.mrb[103].mxu1  ;;  %v5097_v56 = vpop.f32.mrb[141].mxu0  ;;  %8051 = vmatprep.subr.bf16.mxu1 %v8050_v17 }
 0xb94   : > { %v10997_v8 = vld [vmem:[#allocation7 + $0x42] sm:$0xff] }
 0xb95   : > { %5220 = vst.msk [vmem:[#allocation7 + $0x58] sm:$0xff] %vm797_vm1, %v5196_v15  ;;  %v5166_v26 = vadd.f32 %v5095_v3, %v4817_v43  ;;  %7663 = vmatprep.mubr.msk.f32.mxu1 %vm797_vm1, %v10997_v8 }
 0xb96   : > { %v4751_v22 = vpop.f32.mrb[104].mxu1  ;;  %v5100_v60 = vpop.f32.mrb[142].mxu0  ;;  %8053 = vmatpush3.bf16.msra.mxu1 %v8050_v17 }
 0xb97   : > { %v5197_v47 = vadd.f32 %v10944_v53, %v5166_v26  ;;  %v4818_v1 = vadd.f32 %v4751_v22, %v10921_v59  ;;  %v4753_v30 = vpop.f32.mrb[105].mxu1  ;;  %v5102_v11 = vpop.f32.mrb[143].mxu0  ;;  %8055 = vmatprep.subr.bf16.mxu1 %v8054_v25 }
 0xb99   : > { %5221 = vst.msk [vmem:[#allocation7 + $0x60] sm:$0xff] %vm797_vm1, %v5197_v47  ;;  %v5167_v41 = vadd.f32 %v5100_v60, %v4818_v1 }
 0xb9a   : > { %v4756_v24 = vpop.f32.mrb[106].mxu1  ;;  %v5105_v7 = vpop.f32.mrb[144].mxu0  ;;  %8057 = vmatpush3.bf16.msra.mxu1 %v8054_v25 }
 0xb9b   : > { %v5198_v59 = vadd.f32 %v10944_v53, %v5167_v41  ;;  %v4819_v13 = vadd.f32 %v4756_v24, %v10924_v18  ;;  %v4758_v32 = vpop.f32.mrb[107].mxu1  ;;  %v5107_v20 = vpop.f32.mrb[145].mxu0  ;;  %8059 = vmatprep.subr.bf16.mxu1 %v8058_v34 }
 0xb9c   : > { %v11019_v37 = vld [vmem:[#allocation7 + $0x52] sm:$0xff] }
 0xb9d   : > { %5222 = vst.msk [vmem:[#allocation7 + $0x68] sm:$0xff] %vm797_vm1, %v5198_v59  ;;  %v5168_v51 = vadd.f32 %v5105_v7, %v4819_v13  ;;  %7664 = vmatmul.mubr.msk.f32.gmra.mrb[128].mxu1 %vm797_vm1, %v11019_v37 }
 0xb9e   : > { %v4761_v19 = vpop.f32.mrb[108].mxu1  ;;  %v5110_v10 = vpop.f32.mrb[146].mxu0  ;;  %8061 = vmatpush3.bf16.msra.mxu1 %v8058_v34 }
 0xb9f   : > { %v5199_v58 = vadd.f32 %v10944_v53, %v5168_v51  ;;  %v4820_v28 = vadd.f32 %v4761_v19, %v10927_v62  ;;  %v4763_v18 = vpop.f32.mrb[109].mxu1  ;;  %v5112_v39 = vpop.f32.mrb[147].mxu0  ;;  %8063 = vmatprep.subr.bf16.mxu1 %v8062_v63 }
 0xba0   : > { %v11079_v18 = vld [vmem:[%s12367_s14] sm:$0xff] }
 0xba1   : > { %5223 = vst.msk [vmem:[#allocation7 + $0x70] sm:$0xff] %vm797_vm1, %v5199_v58  ;;  %v5169_v23 = vadd.f32 %v5110_v10, %v4820_v28 }
 0xba2   : > { %v4766_v48 = vpop.f32.mrb[110].mxu1  ;;  %v5115_v45 = vpop.f32.mrb[148].mxu0  ;;  %8065 = vmatpush3.bf16.msra.mxu1 %v8062_v63 }
 0xba3   : > { %v5200_v16 = vadd.f32 %v10944_v53, %v5169_v23  ;;  %v4821_v21 = vadd.f32 %v4766_v48, %v10930_v36  ;;  %v4768_v40 = vpop.f32.mrb[111].mxu1  ;;  %v5117_v38 = vpop.f32.mrb[149].mxu0  ;;  %v12536_v23 = vld [vmem:[#allocation19_spill] sm:$0xff] }
 0xba4   : > { %v5237_v52 = vld [vmem:[#allocation7 + $0x62] sm:$0xff]  ;;  %v11083_v48 = vrot.slane %v11079_v18, %v12536_v23  ;;  %v5642_v40 = vld [vmem:[#allocation8 + $0xf] sm:$0xff] }
 0xba5   : > { %5224 = vst.msk [vmem:[#allocation7 + $0x78] sm:$0xff] %vm797_vm1, %v5200_v16  ;;  %v5170_v61 = vadd.f32 %v5115_v45, %v4821_v21  ;;  %7666 = vmatprep.mubr.msk.f32.mxu1 %vm797_vm1, %v5237_v52  ;;  %v12537_v45 = vld [vmem:[#allocation20_spill] sm:$0xff]  ;;  %v5641_v21 = vld [vmem:[#allocation8 + $0x7] sm:$0xff] }
 0xba6   : > { %v4771_v62 = vpop.f32.mrb[112].mxu1  ;;  %v5120_v0 = vpop.f32.mrb[150].mxu0  ;;  %v11087_v16 = vrot.slane %v11079_v18, %v12537_v45 }
 0xba7   : > { %v5201_v35 = vadd.f32 %v10944_v53, %v5170_v61  ;;  %v4822_v57 = vadd.f32 %v4771_v62, %v10933_v2  ;;  %v4773_v9 = vpop.f32.mrb[113].mxu1  ;;  %v5122_v12 = vpop.f32.mrb[151].mxu0  ;;  %v5665_v61 = vmul.f32 %v11083_v48, %v5641_v21  ;;  %v8449_v62 = vld [vmem:[#allocation8] sm:$0xff] }
 0xba8   : > { %v12538_v9 = vld [vmem:[#allocation21_spill] sm:$0xff] }
 0xba9   : > { %5225 = vst.msk [vmem:[#allocation7 + $0x80] sm:$0xff] %vm797_vm1, %v5201_v35  ;;  %v5171_v6 = vadd.f32 %v5120_v0, %v4822_v57  ;;  %v5729_v0 = vmul.f32 %v8449_v62, %v11087_v16  ;;  %v11096_v12 = vrot.slane %v11079_v18, %v12538_v9 }
 0xbaa   : > { %v4776_v36 = vpop.f32.mrb[114].mxu1  ;;  %v5125_v29 = vpop.f32.mrb[152].mxu0 }
 0xbab   : > { %v5202_v17 = vadd.f32 %v10944_v53, %v5171_v6  ;;  %v4823_v44 = vadd.f32 %v4776_v36, %v10936_v55  ;;  %v4778_v54 = vpop.f32.mrb[115].mxu1  ;;  %v5127_v33 = vpop.f32.mrb[153].mxu0 }
 0xbac   : > { %v5238_v49 = vld [vmem:[#allocation7 + $0x72] sm:$0xff]  ;;  %v5644_v54 = vld [vmem:[#allocation8 + $0x1f] sm:$0xff]  ;;  %v5666_v33 = vmul.f32 %v11083_v48, %v5642_v40 }
 0xbad   : > { %5226 = vst.msk [vmem:[#allocation7 + $0x88] sm:$0xff] %vm797_vm1, %v5202_v17  ;;  %v5172_v3 = vadd.f32 %v5125_v29, %v4823_v44  ;;  %7667 = vmatmul.mubr.msk.f32.gmra.mrb[130].mxu1 %vm797_vm1, %v5238_v49  ;;  %v12539_v29 = vld [vmem:[#allocation22_spill] sm:$0xff]  ;;  %v5643_v44 = vld [vmem:[#allocation8 + $0x17] sm:$0xff] }
 0xbae   : > { %v4781_v2 = vpop.f32.mrb[116].mxu1  ;;  %v5130_v15 = vpop.f32.mrb[154].mxu0  ;;  %v11103_v17 = vrot.slane %v11079_v18, %v12539_v29 }
 0xbaf   : > { %v5203_v43 = vadd.f32 %v10944_v53, %v5172_v3  ;;  %v4824_v5 = vadd.f32 %v4781_v2, %v10939_v4  ;;  %v4783_v56 = vpop.f32.mrb[117].mxu1  ;;  %v5132_v25 = vpop.f32.mrb[155].mxu0  ;;  %v12541_v2 = vld [vmem:[#allocation23_spill] sm:$0xff] }
 0xbb0   : > { %12540 = vst [vmem:[#allocation59_spill] sm:$0xff] %v11103_v17  ;;  %v5770_v56 = vld [vmem:[#allocation8 + $0x11] sm:$0xff]  ;;  %v5840_v40 = vmul.f32 %v11103_v17, %v5644_v54 }
 0xbb1   : > { %5227 = vst.msk [vmem:[#allocation7 + $0x90] sm:$0xff] %vm797_vm1, %v5203_v43  ;;  %v5173_v46 = vadd.f32 %v5130_v15, %v4824_v5  ;;  %v11111_v15 = vrot.slane %v11079_v18, %v12541_v2  ;;  %v5667_v43 = vmul.f32 %v11083_v48, %v5643_v44  ;;  %v5668_v5 = vmul.f32 %v11083_v48, %v5644_v54  ;;  %v6829_v54 = vld [vmem:[%s12369_s16 + $0x8] sm:$0xff] }
 0xbb2   : > { %v4786_v55 = vpop.f32.mrb[118].mxu1  ;;  %v5135_v42 = vpop.f32.mrb[156].mxu0 }
 0xbb3   : > { %v5204_v26 = vadd.f32 %v10944_v53, %v5173_v46  ;;  %v4788_v22 = vpop.f32.mrb[119].mxu1  ;;  %v5137_v60 = vpop.f32.mrb[157].mxu0  ;;  %v12542_v42 = vld [vmem:[#allocation24_spill] sm:$0xff]  ;;  %v5885_v29 = vmul.f32 %v8449_v62, %v11111_v15 }
 0xbb4   : > { %v5239_v47 = vld [vmem:[#allocation7 + $0x82] sm:$0xff]  ;;  %v5749_v22 = vadd.f32 %v5729_v0, %v5665_v61 }
 0xbb5   : > { %5228 = vst.msk [vmem:[#allocation7 + $0x98] sm:$0xff] %vm797_vm1, %v5204_v26  ;;  %7669 = vmatprep.mubr.msk.f32.mxu1 %vm797_vm1, %v5239_v47  ;;  %v11122_v26 = vrot.slane %v11079_v18, %v12542_v42 }
 0xbb6   : > { %v4791_v1 = vpop.f32.mrb[120].mxu1  ;;  %v5140_v30 = vpop.f32.mrb[158].mxu0 }
 0xbb7   : > { %v4793_v11 = vpop.f32.mrb[121].mxu1  ;;  %v5142_v4 = vpop.f32.mrb[159].mxu0  ;;  %12543 = vst [vmem:[#allocation29_spill] sm:$0xff] %v11122_v26 }
 0xbba   : > { %v4796_v34 = vpop.f32.mrb[122].mxu1  ;;  %v5145_v50 = vpop.f32.mrb[160].mxu0 }
 0xbbb   : > { %v4798_v27 = vpop.f32.mrb[123].mxu1  ;;  %v5147_v41 = vpop.f32.mrb[161].mxu0  ;;  %v5750_v50 = vadd.f32 %v5729_v0, %v5666_v33 }
 0xbbc   : > { %v5240_v24 = vld [vmem:[#allocation7 + $0x92] sm:$0xff]  ;;  %v5794_v27 = vmul.f32 %v11096_v12, %v5770_v56 }
 0xbbd   : > { %7670 = vmatmul.mubr.msk.f32.gmra.mrb[132].mxu1 %vm797_vm1, %v5240_v24 }
 0xbbe   : > { %v4801_v7 = vpop.f32.mrb[124].mxu1  ;;  %7696 = vmatprep.mubr.msk.f32.mxu1 %vm797_vm1, %v10958_v14  ;;  %v5150_v53 = vpop.f32.mrb[162].mxu0  ;;  %v11060_v14 = vld [vmem:[%s12366_s13] ss:$0 sm:$0xff]  ;;  %v5814_v21 = vadd.f32 %v5794_v27, %v5750_v50 }
 0xbbf   : > { %v4803_v59 = vpop.f32.mrb[125].mxu1  ;;  %v5152_v13 = vpop.f32.mrb[163].mxu0  ;;  %v5751_v7 = vadd.f32 %v5729_v0, %v5667_v43  ;;  %v5752_v53 = vadd.f32 %v5729_v0, %v5668_v5  ;;  %v12545_v43 = vld [vmem:[#allocation26_spill] sm:$0xff] }
 0xbc0   : > { %v5771_v59 = vld [vmem:[#allocation8 + $0x19] sm:$0xff]  ;;  %v11160_v5 = vrot.slane %v11079_v18, %v12545_v43 }
 0xbc1   : > { %7697 = vmatmul.mubr.msk.f32.vlgmr.msra.gmra.mrb[134].mxu1 %vm797_vm1, %v10974_v31  ;;  %v5795_v61 = vmul.f32 %v11096_v12, %v5771_v59 }
 0xbc2   : > { %7699 = vmatprep.mubr.msk.f32.mxu1 %vm797_vm1, %v10997_v8 }
 0xbc5   : > { %7700 = vmatmul.mubr.msk.f32.gmra.mrb[136].mxu1 %vm797_vm1, %v11019_v37 }
 0xbc6   : > { %7702 = vmatprep.mubr.msk.f32.mxu1 %vm797_vm1, %v5237_v52 }
 0xbc9   : > { %7703 = vmatmul.mubr.msk.f32.gmra.mrb[138].mxu1 %vm797_vm1, %v5238_v49  ;;  %v5769_v49 = vld [vmem:[#allocation8 + $0x9] sm:$0xff] }
 0xbca   : > { %7705 = vmatprep.mubr.msk.f32.mxu1 %vm797_vm1, %v5239_v47  ;;  %v5793_v11 = vmul.f32 %v11096_v12, %v5769_v49 }
 0xbcd   : > { %7706 = vmatmul.mubr.msk.f32.gmra.mrb[140].mxu1 %vm797_vm1, %v5240_v24 }
 0xc60   : > { %v7662_v31 = vpop.f32.mrb[126].mxu1 }
 0xc61   : > { %v11063_v32 = vadd.f32 %v7662_v31, %v11060_v14  ;;  %v5350_v8 = vpop.f32.mrb[127].mxu1 }
 0xc62   : > { %v11066_v20 = vadd.f32 %v11060_v14, %v5350_v8 }
 0xc63   : > { %v11069_v63 = vmul.f32 0.70710677, %v11063_v32 }
 0xc64   : > { %v11072_v37 = vmul.f32 0.70710677, %v11066_v20 }
 0xc65   : > { %v5406_v51 = vand.u32 2147483647, %v11069_v63  ;;  %vm5566_vm8 = vcmp.ge.f32.partialorder %v11069_v63, 0.0 }
 0xc66   : > { %v5405_v19 = vand.u32 2147483647, %v11072_v37  ;;  %vm5565_vm9 = vcmp.ge.f32.partialorder %v11072_v37, 0.0  ;;  %v5778_v37 = vld [vmem:[#allocation8 + $0x51] sm:$0xff] }
 0xc67   : > { %v5414_v10 = vmul.f32 0.3275911, %v5406_v51  ;;  %v5518_v52 = vsub.f32 0.0, %v5406_v51 }
 0xc68   : > { %v5413_v58 = vmul.f32 0.3275911, %v5405_v19  ;;  %v5517_v6 = vsub.f32 0.0, %v5405_v19 }
 0xc69   : > { %v5422_v28 = vadd.f32 1.0, %v5414_v10  ;;  %v5526_v55 = vmul.f32 %v5518_v52, %v5406_v51  ;;  %v5772_v51 = vld [vmem:[#allocation8 + $0x21] sm:$0xff]  ;;  %v11142_v52 = vld [vmem:[#allocation8 + $0x31] sm:$0xff] }
 0xc6a   : > { %v5421_v39 = vadd.f32 1.0, %v5413_v58  ;;  %v5525_v30 = vmul.f32 %v5517_v6, %v5405_v19  ;;  %v5839_v19 = vmul.f32 %v11103_v17, %v5643_v44  ;;  %v5796_v0 = vmul.f32 %v11096_v12, %v5772_v51  ;;  %v6828_v44 = vld [vmem:[%s12369_s16] sm:$0xff] }
 0xc6b   : > { %8324 = vrcp.f32 %v5422_v28  ;;  %v5535_v31 = vmul.f32 1.442695, %v5526_v55  ;;  %v8066_v2 = vpack.c.bf16 %v6829_v54, %v6828_v44  ;;  %v11165_v62 = vmul.f32 %v11096_v12, %v11142_v52 }
 0xc6c   : > { %8326 = vrcp.f32 %v5421_v39  ;;  %v5533_v28 = vmul.f32 1.442695, %v5525_v30  ;;  %v5813_v39 = vadd.f32 %v5793_v11, %v5749_v22  ;;  %v5860_v55 = vadd.f32 %v5840_v40, %v5814_v21  ;;  %v11170_v22 = vld [vmem:[%s12367_s14 + $0x8] ss:$0 sm:$0xff] }
 0xc6d   : > { %v11174_v30 = vadd.f32 %v5796_v0, %v5752_v53  ;;  %8067 = vmatprep.subr.bf16.mxu1 %v8066_v2  ;;  %v11178_v50 = vmul.f32 %v11122_v26, %v5772_v51  ;;  %v11182_v27 = vmul.f32 %v11170_v22, %v11142_v52  ;;  %v6831_v53 = vld [vmem:[%s12369_s16 + $0x18] sm:$0xff]  ;;  %v11216_v21 = vmul.f32 0.5, %v11063_v32 }
 0xc6e   : > { %v5859_v49 = vadd.f32 %v5839_v19, %v5813_v39  ;;  %8069 = vmatpush3.bf16.msra.mxu1 %v8066_v2  ;;  %v6833_v19 = vld [vmem:[%s12369_s16 + $0x28] sm:$0xff] }
 0xc70   : > { %v7665_v38 = vpop.f32.mrb[128].mxu1 }
 0xc71   : > { %v11092_v35 = vadd.f32 %v7665_v38, %v11060_v14  ;;  %v5360_v57 = vpop.f32.mrb[129].mxu1 }
 0xc72   : > { %v11099_v36 = vadd.f32 %v11060_v14, %v5360_v57  ;;  %v12544_v57 = vld [vmem:[#allocation25_spill] sm:$0xff] }
 0xc73   : > { %v11107_v3 = vmul.f32 0.70710677, %v11092_v35  ;;  %v11148_v9 = vrot.slane %v11079_v18, %v12544_v57  ;;  %v5931_v18 = vmul.f32 %v11122_v26, %v5771_v59  ;;  %v6832_v59 = vld [vmem:[%s12369_s16 + $0x20] sm:$0xff]  ;;  %v11225_v57 = vmul.f32 0.5, %v11066_v20 }
 0xc74   : > { %v11116_v25 = vmul.f32 0.70710677, %v11099_v36  ;;  %v8074_v39 = vpack.c.bf16 %v6833_v19, %v6832_v59 }
 0xc75   : > { %v11118_v46 = vpop.eup %8324  ;;  %v11125_v60 = vand.u32 2147483647, %v11107_v3  ;;  %vm5568_vm10 = vcmp.ge.f32.partialorder %v11107_v3, 0.0 }
 0xc76   : > { %v11127_v47 = vpop.eup %8326  ;;  %v5446_v1 = vmul.f32 1.0614054, %v11118_v46  ;;  %v11132_v4 = vand.u32 2147483647, %v11116_v25  ;;  %vm5567_vm11 = vcmp.ge.f32.partialorder %v11116_v25, 0.0 }
 0xc77   : > { %v5445_v34 = vmul.f32 1.0614054, %v11127_v47  ;;  %v5416_v41 = vmul.f32 0.3275911, %v11125_v60 }
 0xc78   : > { %v5454_v24 = vadd.f32 -1.4531521, %v5446_v1  ;;  %v5415_v13 = vmul.f32 0.3275911, %v11132_v4  ;;  %v11172_v1 = vadd.f32 %v5795_v61, %v5751_v7  ;;  %v6830_v7 = vld [vmem:[%s12369_s16 + $0x10] sm:$0xff] }
 0xc79   : > { %v5453_v8 = vadd.f32 -1.4531521, %v5445_v34  ;;  %v5424_v10 = vadd.f32 1.0, %v5416_v41  ;;  %v8070_v51 = vpack.c.bf16 %v6831_v53, %v6830_v7 }
 0xc7a   : > { %v5462_v58 = vmul.f32 %v11118_v46, %v5454_v24  ;;  %v5423_v23 = vadd.f32 1.0, %v5415_v13 }
 0xc7b   : > { %v5461_v45 = vmul.f32 %v11127_v47, %v5453_v8  ;;  %8328 = vrcp.f32 %v5424_v10  ;;  %8071 = vmatprep.subr.bf16.mxu1 %v8070_v51 }
 0xc7c   : > { %v5470_v38 = vadd.f32 1.4214138, %v5462_v58  ;;  %8330 = vrcp.f32 %v5423_v23  ;;  %v11204_v58 = vadd.f32 %v5885_v29, %v5860_v55  ;;  %v6834_v23 = vld [vmem:[%s12369_s16 + $0x30] sm:$0xff]  ;;  %8073 = vmatpush3.bf16.msra.mxu1 %v8070_v51 }
 0xc7d   : > { %8332 = vpow2.f32 %v5535_v31  ;;  %v5469_v6 = vadd.f32 1.4214138, %v5461_v45  ;;  %v5905_v31 = vadd.f32 %v5885_v29, %v5859_v49  ;;  %v6835_v45 = vld [vmem:[%s12369_s16 + $0x38] sm:$0xff]  ;;  %v5519_v29 = vsub.f32 0.0, %v11132_v4  ;;  %8075 = vmatprep.subr.bf16.mxu1 %v8074_v39 }
 0xc7e   : > { %v5478_v33 = vmul.f32 %v11118_v46, %v5470_v38  ;;  %8334 = vpow2.f32 %v5533_v28  ;;  %v5520_v38 = vsub.f32 0.0, %v11125_v60  ;;  %v8078_v2 = vpack.c.bf16 %v6835_v45, %v6834_v23 }
 0xc7f   : > { %v5477_v56 = vmul.f32 %v11127_v47, %v5469_v6 }
 0xc80   : > { %v5486_v42 = vadd.f32 -0.28449672, %v5478_v33  ;;  %v7668_v11 = vpop.f32.mrb[130].mxu1  ;;  %v5528_v53 = vmul.f32 %v5520_v38, %v11125_v60  ;;  %8077 = vmatpush3.bf16.msra.mxu1 %v8074_v39  ;;  %v6838_v60 = vld [vmem:[%s12369_s16 + $0x50] sm:$0xff]  ;;  %v6839_v39 = vld [vmem:[%s12369_s16 + $0x58] sm:$0xff] }
 0xc81   : > { %v5485_v34 = vadd.f32 -0.28449672, %v5477_v56  ;;  %v11185_v41 = vadd.f32 %v7668_v11, %v11060_v14  ;;  %v5370_v24 = vpop.f32.mrb[131].mxu1  ;;  %v11235_v56 = vadd.f32 %v5931_v18, %v5905_v31  ;;  %v6836_v11 = vld [vmem:[%s12369_s16 + $0x40] sm:$0xff]  ;;  %8079 = vmatprep.subr.bf16.mxu1 %v8078_v2 }
 0xc82   : > { %v5494_v13 = vmul.f32 %v11118_v46, %v5486_v42  ;;  %v11198_v8 = vadd.f32 %v11060_v14, %v5370_v24 }
 0xc83   : > { %v5493_v10 = vmul.f32 %v11127_v47, %v5485_v34  ;;  %v11207_v28 = vmul.f32 0.70710677, %v11185_v41 }
 0xc84   : > { %v5502_v40 = vadd.f32 0.2548296, %v5494_v13  ;;  %v11220_v61 = vmul.f32 0.70710677, %v11198_v8  ;;  %8081 = vmatpush3.bf16.msra.mxu1 %v8078_v2  ;;  %v5776_v2 = vld [vmem:[#allocation8 + $0x41] sm:$0xff] }
 0xc85   : > { %v11222_v0 = vpop.eup %8328  ;;  %v5501_v6 = vadd.f32 0.2548296, %v5493_v10  ;;  %v5410_v44 = vand.u32 2147483647, %v11207_v28  ;;  %vm5570_vm12 = vcmp.ge.f32.partialorder %v11207_v28, 0.0 }
 0xc86   : > { %v11229_v32 = vpop.eup %8330  ;;  %v5510_v54 = vmul.f32 %v11118_v46, %v5502_v40  ;;  %v5448_v33 = vmul.f32 1.0614054, %v11222_v0  ;;  %v5409_v49 = vand.u32 2147483647, %v11220_v61  ;;  %v6837_v46 = vld [vmem:[%s12369_s16 + $0x48] sm:$0xff]  ;;  %v5527_v40 = vmul.f32 %v5519_v29, %v11132_v4 }
 0xc87   : > { %v8333_v43 = vpop.eup %8332  ;;  %v5509_v20 = vmul.f32 %v11127_v47, %v5501_v6  ;;  %v5447_v55 = vmul.f32 1.0614054, %v11229_v32  ;;  %v5418_v42 = vmul.f32 0.3275911, %v5410_v44  ;;  %v8082_v10 = vpack.c.bf16 %v6837_v46, %v6836_v11 }
 0xc88   : > { %v8335_v34 = vpop.eup %8334  ;;  %v5550_v24 = vmul.f32 %v8333_v43, %v5510_v54  ;;  %v5456_v7 = vadd.f32 -1.4531521, %v5448_v33  ;;  %v5417_v59 = vmul.f32 0.3275911, %v5409_v49  ;;  %v5539_v54 = vmul.f32 1.442695, %v5528_v53 }
 0xc89   : > { %v5549_v47 = vmul.f32 %v8335_v34, %v5509_v20  ;;  %v5455_v18 = vadd.f32 -1.4531521, %v5447_v55  ;;  %v5426_v13 = vadd.f32 1.0, %v5418_v42  ;;  %v5522_v33 = vsub.f32 0.0, %v5410_v44  ;;  %8083 = vmatprep.subr.bf16.mxu1 %v8082_v10 }
 0xc8a   : > { %v5558_v31 = vsub.f32 1.0, %v5550_v24  ;;  %v5464_v51 = vmul.f32 %v11222_v0, %v5456_v7  ;;  %v5425_v19 = vadd.f32 1.0, %v5417_v59  ;;  %v5521_v55 = vsub.f32 0.0, %v5409_v49  ;;  %8085 = vmatpush3.bf16.msra.mxu1 %v8082_v10 }
 0xc8b   : > { %v5557_v23 = vsub.f32 1.0, %v5549_v47  ;;  %v5463_v45 = vmul.f32 %v11229_v32, %v5455_v18  ;;  %8336 = vrcp.f32 %v5426_v13  ;;  %v8086_v42 = vpack.c.bf16 %v6839_v39, %v6838_v60 }
 0xc8c   : > { %v5574_v38 = vsub.f32 0.0, %v5558_v31  ;;  %v5472_v6 = vadd.f32 1.4214138, %v5464_v51  ;;  %8338 = vrcp.f32 %v5425_v19  ;;  %v5537_v24 = vmul.f32 1.442695, %v5527_v40 }
 0xc8d   : > { %v5573_v43 = vsub.f32 0.0, %v5557_v23  ;;  %v5471_v20 = vadd.f32 1.4214138, %v5463_v45  ;;  %8340 = vpow2.f32 %v5539_v54  ;;  %v5530_v59 = vmul.f32 %v5522_v33, %v5410_v44  ;;  %8087 = vmatprep.subr.bf16.mxu1 %v8086_v42 }
 0xc8e   : > { %v5582_v4 = vsel %vm5566_vm8, %v5558_v31, %v5574_v38  ;;  %v5480_v29 = vmul.f32 %v11222_v0, %v5472_v6  ;;  %v5529_v13 = vmul.f32 %v5521_v55, %v5409_v49  ;;  %v11278_v10 = vmul.f32 %v11096_v12, %v5778_v37  ;;  %8089 = vmatpush3.bf16.msra.mxu1 %v8086_v42  ;;  %v5782_v55 = vld [vmem:[#allocation8 + $0x71] sm:$0xff] }
 0xc8f   : > { %v5590_v11 = vadd.f32 1.0, %v5582_v4  ;;  %v5581_v46 = vsel %vm5565_vm9, %v5557_v23, %v5573_v43  ;;  %v5479_v34 = vmul.f32 %v11229_v32, %v5471_v20  ;;  %v11269_v23 = vadd.f32 %v11178_v50, %v11204_v58  ;;  %v5784_v4 = vld [vmem:[#allocation8 + $0x81] sm:$0xff] }
 0xc90   : > { %v5589_v7 = vadd.f32 1.0, %v5581_v46  ;;  %v5488_v53 = vadd.f32 -0.28449672, %v5480_v29  ;;  %v7671_v47 = vpop.f32.mrb[132].mxu1  ;;  %12546 = vst [vmem:[#allocation63_spill] sm:$0xff] %v11278_v10  ;;  %v11285_v50 = vmul.f32 %v11122_v26, %v11142_v52  ;;  %8342 = vpow2.f32 %v5537_v24 }
 0xc91   : > { %v11261_v63 = vmul.f32 %v5590_v11, %v11216_v21  ;;  %v5487_v18 = vadd.f32 -0.28449672, %v5479_v34  ;;  %v5386_v31 = vadd.f32 %v7671_v47, %v11060_v14  ;;  %v5380_v51 = vpop.f32.mrb[133].mxu1  ;;  %v5780_v21 = vld [vmem:[#allocation8 + $0x61] sm:$0xff]  ;;  %v5543_v58 = vmul.f32 1.442695, %v5530_v59 }
 0xc92   : > { %v11265_v19 = vmul.f32 %v5589_v7, %v11225_v57  ;;  %v5496_v44 = vmul.f32 %v11222_v0, %v5488_v53  ;;  %v11273_v45 = vadd.f32 %v11060_v14, %v5380_v51  ;;  %v11281_v57 = vmul.f32 %v11096_v12, %v5776_v2  ;;  %12548 = vst [vmem:[#allocation64_spill] sm:$0xff] %v11285_v50  ;;  %v11434_v10 = vld [vmem:[%s12368_s15] ss:$0 sm:$0xff] }
 0xc93   : > { %5632 = vst [vmem:[#allocation8 + $0x39] sm:$0xff] %v11261_v63  ;;  %v5495_v49 = vmul.f32 %v11229_v32, %v5487_v18  ;;  %v11289_v40 = vmul.f32 %v11122_v26, %v5776_v2  ;;  %v5541_v39 = vmul.f32 1.442695, %v5529_v13  ;;  %v11294_v38 = vmul.f32 %v11170_v22, %v5776_v2 }
 0xc94   : > { %12547 = vst [vmem:[#allocation30_spill] sm:$0xff] %v11281_v57  ;;  %5631 = vst [vmem:[#allocation8 + $0x29] sm:$0xff] %v11265_v19  ;;  %v5504_v14 = vadd.f32 0.2548296, %v5496_v44  ;;  %v11297_v6 = vmul.f32 %v11170_v22, %v5778_v37  ;;  %v11300_v52 = vmul.f32 %v11096_v12, %v5780_v21  ;;  %v11303_v54 = vmul.f32 0.5, %v11092_v35  ;;  %v6840_v35 = vld [vmem:[%s12369_s16 + $0x60] sm:$0xff] }
 0xc95   : > { %12549 = vst [vmem:[#allocation65_spill] sm:$0xff] %v11289_v40  ;;  %v11291_v60 = vpop.eup %8336  ;;  %12550 = vst [vmem:[#allocation58_spill] sm:$0xff] %v11294_v38  ;;  %v11306_v33 = vmul.f32 0.5, %v11099_v36  ;;  %v11309_v43 = vmul.f32 %v11122_v26, %v5778_v37  ;;  %v11312_v20 = vmul.f32 %v11122_v26, %v5780_v21  ;;  %v5503_v42 = vadd.f32 0.2548296, %v5495_v49  ;;  %v6841_v36 = vld [vmem:[%s12369_s16 + $0x68] sm:$0xff] }
 0xc96   : > { %12551 = vst [vmem:[#allocation67_spill] sm:$0xff] %v11297_v6  ;;  %12552 = vst [vmem:[#allocation33_spill] sm:$0xff] %v11300_v52  ;;  %v5512_v29 = vmul.f32 %v11222_v0, %v5504_v14  ;;  %v11315_v11 = vmul.f32 0.70710677, %v5386_v31  ;;  %v11324_v46 = vmul.f32 %v11170_v22, %v5780_v21  ;;  %v11326_v34 = vpop.eup %8338  ;;  %v11329_v24 = vmul.f32 0.5, %v11185_v41 }
 0xc97   : > { %12553 = vst [vmem:[#allocation66_spill] sm:$0xff] %v11309_v43  ;;  %12554 = vst [vmem:[#allocation60_spill] sm:$0xff] %v11312_v20  ;;  %v5450_v0 = vmul.f32 1.0614054, %v11291_v60  ;;  %8344 = vpow2.f32 %v5543_v58  ;;  %v11333_v7 = vmul.f32 0.5, %v11198_v8  ;;  %v11339_v37 = vmul.f32 %v11096_v12, %v5782_v55  ;;  %v8341_v47 = vpop.eup %8340 }
 0xc98   : > { %12555 = vst [vmem:[#allocation61_spill] sm:$0xff] %v11315_v11  ;;  %12556 = vst [vmem:[#allocation44_spill] sm:$0xff] %v11324_v46  ;;  %8346 = vpow2.f32 %v5541_v39  ;;  %v11336_v53 = vmul.f32 0.70710677, %v11273_v45  ;;  %v11342_v59 = vmul.f32 %v11122_v26, %v5782_v55  ;;  %v8090_v2 = vpack.c.bf16 %v6841_v36, %v6840_v35 }
 0xc99   : > { %12557 = vst [vmem:[#allocation62_spill] sm:$0xff] %v11329_v24  ;;  %12558 = vst [vmem:[#allocation39_spill] sm:$0xff] %v11333_v7  ;;  %v11345_v41 = vmul.f32 %v11170_v22, %v5782_v55  ;;  %v11348_v18 = vmul.f32 %v11096_v12, %v5784_v4  ;;  %v11351_v8 = vmul.f32 %v11122_v26, %v5784_v4  ;;  %v5449_v21 = vmul.f32 1.0614054, %v11326_v34 }
 0xc9a   : > { %12559 = vst [vmem:[#allocation34_spill] sm:$0xff] %v11336_v53  ;;  %12560 = vst [vmem:[#allocation37_spill] sm:$0xff] %v11339_v37  ;;  %v5552_v51 = vmul.f32 %v8341_v47, %v5512_v29  ;;  %v5511_v44 = vmul.f32 %v11229_v32, %v5503_v42  ;;  %v11356_v49 = vand.u32 2147483647, %v11315_v11  ;;  %v11360_v14 = vmul.f32 %v11096_v12, %v11261_v63  ;;  %v8343_v36 = vpop.eup %8342  ;;  %v11381_v47 = vld [vmem:[#allocation8 + $0x3f] sm:$0xff] }
 0xc9b   : > { %12561 = vst [vmem:[#allocation40_spill] sm:$0xff] %v11342_v59  ;;  %12562 = vst [vmem:[#allocation32_spill] sm:$0xff] %v11345_v41  ;;  %v5645_v13 = vld [vmem:[#allocation8 + $0x27] sm:$0xff]  ;;  %v11364_v58 = vmul.f32 %v11122_v26, %v11261_v63  ;;  %v5458_v55 = vadd.f32 -1.4531521, %v5450_v0  ;;  %v11369_v4 = vmul.f32 0.5, %v5386_v31  ;;  %8091 = vmatprep.subr.bf16.mxu1 %v8090_v2  ;;  %v5797_v29 = vmul.f32 %v11096_v12, %v11265_v19 }
 0xc9c   : > { %12563 = vst [vmem:[#allocation35_spill] sm:$0xff] %v11348_v18  ;;  %12564 = vst [vmem:[#allocation43_spill] sm:$0xff] %v11351_v8  ;;  %v11366_v39 = vld [vmem:[#allocation8 + $0x28] sm:$0xff]  ;;  %v5669_v32 = vmul.f32 %v11083_v48, %v5645_v13  ;;  %v11376_v42 = vmul.f32 %v11122_v26, %v11265_v19  ;;  %v11379_v35 = vand.u32 2147483647, %v11336_v53  ;;  %8093 = vmatpush3.bf16.msra.mxu1 %v8090_v2  ;;  %v11383_v0 = vld [vmem:[#allocation8 + $0x38] sm:$0xff] }
 0xc9d   : > { %12565 = vst [vmem:[#allocation46_spill] sm:$0xff] %v11369_v4  ;;  %v5646_v31 = vld [vmem:[#allocation8 + $0x2f] sm:$0xff]  ;;  %v5733_v8 = vmul.f32 %v11087_v16, %v11366_v39  ;;  %v6069_v59 = vmul.f32 %v11170_v22, %v11265_v19  ;;  %v11391_v41 = vmul.f32 0.5, %v11273_v45  ;;  %v11395_v2 = vmul.f32 %v11170_v22, %v11261_v63  ;;  %v11397_v18 = vld [vmem:[#allocation8 + $0x37] sm:$0xff] }
 0xc9e   : > { %12566 = vst [vmem:[#allocation27_spill] sm:$0xff] %v11379_v35  ;;  %v5560_v37 = vsub.f32 1.0, %v5552_v51  ;;  %v5551_v20 = vmul.f32 %v8343_v36, %v5511_v44  ;;  %v5457_v46 = vadd.f32 -1.4531521, %v5449_v21  ;;  %v5420_v43 = vmul.f32 0.3275911, %v11356_v49 }
 0xc9f   : > { %12567 = vst [vmem:[#allocation28_spill] sm:$0xff] %v11391_v41  ;;  %12568 = vst [vmem:[#allocation31_spill] sm:$0xff] %v11395_v2  ;;  %v11400_v52 = vld [vmem:[#allocation8 + $0x30] sm:$0xff]  ;;  %v5753_v53 = vadd.f32 %v5733_v8, %v5669_v32  ;;  %v5977_v19 = vmul.f32 %v11148_v9, %v5645_v13  ;;  %v5466_v4 = vmul.f32 %v11291_v60, %v5458_v55  ;;  %v11413_v21 = vmul.f32 0.3275911, %v11379_v35 }
 0xca0   : > { %v11407_v63 = vmul.f32 %v11083_v48, %v11381_v47  ;;  %v5889_v51 = vmul.f32 %v11111_v15, %v11383_v0  ;;  %v5978_v44 = vmul.f32 %v11148_v9, %v5646_v31  ;;  %v5843_v55 = vmul.f32 %v11103_v17, %v11397_v18 }
 0xca1   : > { %v11415_v36 = vpop.eup %8344  ;;  %v5817_v8 = vadd.f32 %v5797_v29, %v5753_v53  ;;  %v5997_v32 = vadd.f32 %v5977_v19, %v11235_v56  ;;  %v6023_v45 = vmul.f32 %v11160_v5, %v11366_v39  ;;  %v6024_v11 = vmul.f32 %v11160_v5, %v11400_v52 }
 0xca2   : > { %v11422_v41 = vpop.eup %8346  ;;  %v5998_v6 = vadd.f32 %v5978_v44, %v11269_v23  ;;  %v5576_v57 = vsub.f32 0.0, %v5560_v37  ;;  %v5559_v38 = vsub.f32 1.0, %v5551_v20  ;;  %v5670_v2 = vmul.f32 %v11083_v48, %v5646_v31  ;;  %v5712_v20 = vld [vmem:[#allocation8 + $0x40] sm:$0xff] }
 0xca3   : > { %v5734_v53 = vmul.f32 %v11087_v16, %v11400_v52  ;;  %v5863_v29 = vadd.f32 %v5843_v55, %v5817_v8  ;;  %v6043_v40 = vadd.f32 %v6023_v45, %v5997_v32  ;;  %v5841_v56 = vmul.f32 %v11103_v17, %v5645_v13 }
 0xca4   : > { %v6044_v19 = vadd.f32 %v6024_v11, %v5998_v6  ;;  %v5584_v23 = vsel %vm5568_vm10, %v5560_v37, %v5576_v57  ;;  %v5575_v44 = vsub.f32 0.0, %v5559_v38  ;;  %v5474_v50 = vadd.f32 1.4214138, %v5466_v4 }
 0xca5   : > { %v6089_v7 = vadd.f32 %v6069_v59, %v6043_v40  ;;  %v5592_v35 = vadd.f32 1.0, %v5584_v23  ;;  %v5909_v24 = vadd.f32 %v5889_v51, %v5863_v29  ;;  %v5735_v45 = vmul.f32 %v11087_v16, %v11383_v0 }
 0xca6   : > { %v6090_v13 = vadd.f32 %v11182_v27, %v6044_v19  ;;  %v5583_v6 = vsel %vm5567_vm11, %v5559_v38, %v5575_v44  ;;  %v5465_v11 = vmul.f32 %v11326_v34, %v5457_v46  ;;  %v5736_v37 = vmul.f32 %v11087_v16, %v5712_v20 }
 0xca7   : > { %v6116_v8 = vadd.f32 %v11434_v10, %v6089_v7  ;;  %v11446_v3 = vmul.f32 %v5592_v35, %v11303_v54  ;;  %v5591_v57 = vadd.f32 1.0, %v5583_v6  ;;  %v11449_v40 = vadd.f32 %v11364_v58, %v5909_v24 }
 0xca8   : > { %v5754_v59 = vadd.f32 %v5734_v53, %v5670_v2  ;;  %v5842_v4 = vmul.f32 %v11103_v17, %v5646_v31  ;;  %v6117_v27 = vadd.f32 %v11434_v10, %v6090_v13  ;;  %v5844_v25 = vmul.f32 %v11103_v17, %v11381_v47 }
 0xca9   : > { %v5861_v38 = vadd.f32 %v5841_v56, %v11172_v1  ;;  %v6156_v46 = vmul.f32 0.70710677, %v6116_v8  ;;  %5634 = vst [vmem:[#allocation8 + $0x59] sm:$0xff] %v11446_v3  ;;  %v5482_v54 = vmul.f32 %v11291_v60, %v5474_v50  ;;  %v5599_v24 = vmul.f32 %v5591_v57, %v11306_v33 }
 0xcaa   : > { %v6157_v7 = vmul.f32 0.70710677, %v6117_v27  ;;  %v5473_v58 = vadd.f32 1.4214138, %v5465_v11  ;;  %v5428_v35 = vadd.f32 1.0, %v5420_v43  ;;  %v11461_v2 = vmul.f32 %v11111_v15, %v5712_v20 }
 0xcab   : > { %v5671_v31 = vmul.f32 %v11083_v48, %v11397_v18  ;;  %v5887_v51 = vmul.f32 %v11111_v15, %v11366_v39  ;;  %v6176_v1 = vand.u32 2147483647, %v6156_v46  ;;  %v11469_v55 = vmul.f32 %v11148_v9, %v11381_v47  ;;  %5633 = vst [vmem:[#allocation8 + $0x49] sm:$0xff] %v5599_v24 }
 0xcac   : > { %v5818_v50 = vadd.f32 %v11165_v62, %v5754_v59  ;;  %v5862_v33 = vadd.f32 %v5842_v4, %v11174_v30  ;;  %v6177_v32 = vand.u32 2147483647, %v6157_v7  ;;  %v5490_v56 = vadd.f32 -0.28449672, %v5482_v54 }
 0xcad   : > { %v5907_v43 = vadd.f32 %v5887_v51, %v5861_v38  ;;  %v6196_v53 = vmul.f32 0.3275911, %v6176_v1  ;;  %v6456_v29 = vsub.f32 0.0, %v6176_v1  ;;  %v5481_v44 = vmul.f32 %v11326_v34, %v5473_v58 }
 0xcae   : > { %v6197_v19 = vmul.f32 0.3275911, %v6177_v32  ;;  %v6457_v23 = vsub.f32 0.0, %v6177_v32  ;;  %8348 = vrcp.f32 %v5428_v35  ;;  %v11476_v39 = vmul.f32 %v11160_v5, %v11383_v0 }
 0xcaf   : > { %v5888_v62 = vmul.f32 %v11111_v15, %v11400_v52  ;;  %v6216_v47 = vadd.f32 1.0, %v6196_v53  ;;  %v5755_v30 = vadd.f32 %v5735_v45, %v5671_v31  ;;  %v11481_v13 = vadd.f32 %v5736_v37, %v11407_v63 }
 0xcb0   : > { %v11484_v6 = vmul.f32 %v11160_v5, %v5712_v20  ;;  %v6217_v11 = vadd.f32 1.0, %v6197_v19  ;;  %v6476_v8 = vmul.f32 %v6456_v29, %v6176_v1  ;;  %v6477_v59 = vmul.f32 %v6457_v23, %v6177_v32  ;;  %v5652_v63 = vld [vmem:[#allocation8 + $0x5f] sm:$0xff] }
 0xcb1   : > { %v11486_v57 = vadd.f32 %v5888_v62, %v5862_v33  ;;  %8350 = vrcp.f32 %v6216_v47  ;;  %v5498_v0 = vmul.f32 %v11291_v60, %v5490_v56  ;;  %v11489_v4 = vadd.f32 %v5844_v25, %v5818_v50  ;;  %v5716_v37 = vld [vmem:[#allocation8 + $0x60] sm:$0xff]  ;;  %v5715_v7 = vld [vmem:[#allocation8 + $0x58] sm:$0xff] }
 0xcb2   : > { %v11492_v52 = vadd.f32 %v11376_v42, %v5907_v43  ;;  %8352 = vrcp.f32 %v6217_v11  ;;  %v5489_v45 = vadd.f32 -0.28449672, %v5481_v44  ;;  %v11496_v20 = vmul.f32 %v11096_v12, %v11446_v3  ;;  %v5649_v27 = vld [vmem:[#allocation8 + $0x47] sm:$0xff]  ;;  %v11531_v19 = vld [vmem:[#allocation8 + $0x4f] sm:$0xff] }
 0xcb3   : > { %v5819_v38 = vadd.f32 %v11360_v14, %v5755_v30  ;;  %v12569_v46 = vsub.f32 0.0, %v11356_v49  ;;  %v6496_v25 = vmul.f32 1.442695, %v6476_v8  ;;  %v11504_v42 = vmul.f32 %v11122_v26, %v11446_v3  ;;  %v5713_v31 = vld [vmem:[#allocation8 + $0x48] sm:$0xff] }
 0xcb4   : > { %v11507_v58 = vmul.f32 %v11096_v12, %v5599_v24  ;;  %v6498_v35 = vmul.f32 1.442695, %v6477_v59  ;;  %v5937_v51 = vmul.f32 %v11122_v26, %v5599_v24  ;;  %v11511_v1 = vmul.f32 %v11170_v22, %v5599_v24 }
 0xcb5   : > { %v5532_v54 = vmul.f32 %v12569_v46, %v11356_v49  ;;  %12570 = vst [vmem:[#allocation48_spill] sm:$0xff] %v11504_v42  ;;  %v5506_v14 = vadd.f32 0.2548296, %v5498_v0  ;;  %v5676_v50 = vmul.f32 %v11083_v48, %v5652_v63  ;;  %v5740_v49 = vmul.f32 %v11087_v16, %v5716_v37 }
 0xcb6   : > { %v5845_v33 = vmul.f32 %v11103_v17, %v5649_v27  ;;  %v5497_v32 = vmul.f32 %v11326_v34, %v5489_v45  ;;  %v11518_v43 = vmul.f32 %v11087_v16, %v5715_v7  ;;  %v11521_v53 = vmul.f32 %v11103_v17, %v5652_v63 }
 0xcb7   : > { %v11523_v29 = vmul.f32 1.442695, %v5532_v54  ;;  %v5427_v22 = vadd.f32 1.0, %v11413_v21  ;;  %8354 = vpow2.f32 %v6496_v25  ;;  %v11529_v56 = vmul.f32 %v11111_v15, %v5715_v7  ;;  %v11541_v21 = vld [vmem:[#allocation8 + $0x50] sm:$0xff] }
 0xcb8   : > { %v11526_v24 = vpop.eup %8348  ;;  %v5865_v23 = vadd.f32 %v5845_v33, %v5819_v38  ;;  %v5891_v44 = vmul.f32 %v11111_v15, %v5713_v31  ;;  %8356 = vpow2.f32 %v6498_v35  ;;  %v11536_v62 = vmul.f32 %v11111_v15, %v5716_v37 }
 0xcb9   : > { %v11539_v47 = vmul.f32 %v11148_v9, %v5652_v63  ;;  %v5514_v30 = vmul.f32 %v11291_v60, %v5506_v14  ;;  %v11544_v11 = vadd.f32 %v5740_v49, %v5676_v50  ;;  %v5673_v8 = vmul.f32 %v11083_v48, %v5649_v27  ;;  %v11553_v60 = vld [vmem:[#allocation8 + $0x57] sm:$0xff] }
 0xcba   : > { %v5911_v59 = vadd.f32 %v5891_v44, %v5865_v23  ;;  %v5505_v0 = vadd.f32 0.2548296, %v5497_v32  ;;  %v5674_v38 = vmul.f32 %v11083_v48, %v11531_v19  ;;  %v5737_v46 = vmul.f32 %v11087_v16, %v5713_v31 }
 0xcbb   : > { %v8351_v45 = vpop.eup %8350  ;;  %v5554_v54 = vmul.f32 %v11415_v36, %v5514_v30  ;;  %vm5569_vm13 = vcmp.ge.f32.partialorder %v11220_v61, 0.0  ;;  %v5452_v63 = vmul.f32 1.0614054, %v11526_v24  ;;  %v5738_v35 = vmul.f32 %v11087_v16, %v11541_v21 }
 0xcbc   : > { %v8353_v25 = vpop.eup %8352  ;;  %v11557_v14 = vadd.f32 %v5937_v51, %v5911_v59  ;;  %v5513_v50 = vmul.f32 %v11326_v34, %v5505_v0  ;;  %v11561_v49 = vmul.f32 %v11160_v5, %v5715_v7  ;;  %v11564_v36 = vmul.f32 %v11160_v5, %v5716_v37 }
 0xcbd   : > { %v5562_v33 = vsub.f32 1.0, %v5554_v54  ;;  %v5460_v32 = vadd.f32 -1.4531521, %v5452_v63  ;;  %v5981_v23 = vmul.f32 %v11148_v9, %v5649_v27  ;;  %v5675_v30 = vmul.f32 %v11083_v48, %v11553_v60 }
 0xcbe   : > { %v5553_v44 = vmul.f32 %v11422_v41, %v5513_v50  ;;  %v5757_v59 = vadd.f32 %v5737_v46, %v5673_v8  ;;  %v5758_v34 = vadd.f32 %v5738_v35, %v5674_v38  ;;  %8358 = vrcp.f32 %v5427_v22  ;;  %v12572_v38 = vld [vmem:[#allocation62_spill] sm:$0xff]  ;;  %v12574_v22 = vld [vmem:[#allocation27_spill] sm:$0xff] }
 0xcbf   : > { %v5578_v45 = vsub.f32 0.0, %v5562_v33  ;;  %v5468_v51 = vmul.f32 %v11526_v24, %v5460_v32  ;;  %v6001_v63 = vadd.f32 %v5981_v23, %v11449_v40  ;;  %v6027_v50 = vmul.f32 %v11160_v5, %v5713_v31  ;;  %v12571_v32 = vld [vmem:[#allocation64_spill] sm:$0xff]  ;;  %v6842_v31 = vld [vmem:[%s12369_s16 + $0x70] sm:$0xff] }
 0xcc0   : > { %v5561_v0 = vsub.f32 1.0, %v5553_v44  ;;  %v5954_v8 = vadd.f32 %v12571_v32, %v11486_v57  ;;  %v5523_v35 = vsub.f32 0.0, %v12574_v22  ;;  %v5979_v23 = vmul.f32 %v11148_v9, %v11397_v18  ;;  %v6843_v57 = vld [vmem:[%s12369_s16 + $0x78] sm:$0xff]  ;;  %v12578_v32 = vld [vmem:[#allocation31_spill] sm:$0xff] }
 0xcc1   : > { %v5586_v7 = vsel %vm5570_vm12, %v5562_v33, %v5578_v45  ;;  %v5476_v54 = vadd.f32 1.4214138, %v5468_v51  ;;  %v8355_v37 = vpop.eup %8354  ;;  %v6047_v44 = vadd.f32 %v6027_v50, %v6001_v63  ;;  %v5910_v61 = vadd.f32 %v11461_v2, %v11489_v4  ;;  %v12576_v4 = vld [vmem:[#allocation63_spill] sm:$0xff] }
 0xcc2   : > { %v5594_v27 = vadd.f32 1.0, %v5586_v7  ;;  %v5577_v25 = vsub.f32 0.0, %v5561_v0  ;;  %v8357_v41 = vpop.eup %8356  ;;  %v6000_v45 = vadd.f32 %v11469_v55, %v5954_v8  ;;  %v5982_v7 = vmul.f32 %v11148_v9, %v11531_v19 }
 0xcc3   : > { %v5484_v42 = vmul.f32 %v11526_v24, %v5476_v54  ;;  %8360 = vpow2.f32 %v11523_v29  ;;  %v8094_v54 = vpack.c.bf16 %v6843_v57, %v6842_v31  ;;  %v5821_v37 = vadd.f32 %v11507_v58, %v5757_v59 }
 0xcc4   : > { %v11579_v46 = vmul.f32 %v5594_v27, %v12572_v38  ;;  %v5585_v28 = vsel %vm5569_vm13, %v5561_v0, %v5577_v25  ;;  %v5999_v0 = vadd.f32 %v5979_v23, %v11492_v52  ;;  %v5847_v2 = vmul.f32 %v11103_v17, %v11553_v60  ;;  %v12577_v27 = vld [vmem:[#allocation65_spill] sm:$0xff]  ;;  %v12580_v23 = vld [vmem:[#allocation30_spill] sm:$0xff] }
 0xcc5   : > { %v5593_v33 = vadd.f32 1.0, %v5585_v28  ;;  %v5492_v40 = vadd.f32 -0.28449672, %v5484_v42  ;;  %v12575_v42 = vld [vmem:[#allocation39_spill] sm:$0xff]  ;;  %v5531_v55 = vmul.f32 %v5523_v35, %v12574_v22  ;;  %v5822_v63 = vadd.f32 %v12576_v4, %v5758_v34  ;;  %8095 = vmatprep.subr.bf16.mxu1 %v8094_v54  ;;  %v12579_v35 = vld [vmem:[#allocation58_spill] sm:$0xff] }
 0xcc6   : > { %12573 = vst [vmem:[#allocation47_spill] sm:$0xff] %v11579_v46  ;;  %5636 = vst [vmem:[#allocation8 + $0x79] sm:$0xff] %v11579_v46  ;;  %v5956_v25 = vadd.f32 %v12577_v27, %v5910_v61  ;;  %v6045_v52 = vadd.f32 %v11476_v39, %v5999_v0  ;;  %v6046_v50 = vadd.f32 %v11484_v6, %v6000_v45  ;;  %8097 = vmatpush3.bf16.msra.mxu1 %v8094_v54  ;;  %v12582_v54 = vld [vmem:[#allocation61_spill] sm:$0xff]  ;;  %v12583_v4 = vld [vmem:[#allocation67_spill] sm:$0xff] }
 0xcc7   : > { %v11597_v51 = vmul.f32 %v5593_v33, %v12575_v42  ;;  %v5500_v18 = vmul.f32 %v11526_v24, %v5492_v40  ;;  %v6093_v58 = vadd.f32 %v11511_v1, %v6047_v44  ;;  %v5759_v59 = vadd.f32 %v11518_v43, %v5675_v30 }
 0xcc8   : > { %v11612_v41 = vpop.eup %8358  ;;  %v6091_v8 = vadd.f32 %v12578_v32, %v6045_v52  ;;  %v6002_v38 = vadd.f32 %v5982_v7, %v5956_v25  ;;  %v11620_v34 = vmul.f32 %v11103_v17, %v11531_v19  ;;  %v11624_v39 = vmul.f32 %v11111_v15, %v11541_v21 }
 0xcc9   : > { %5635 = vst [vmem:[#allocation8 + $0x69] sm:$0xff] %v11597_v51  ;;  %v5508_v29 = vadd.f32 0.2548296, %v5500_v18  ;;  %v5545_v28 = vmul.f32 1.442695, %v5531_v55  ;;  %v11626_v22 = vadd.f32 %v5847_v2, %v5821_v37  ;;  %v6028_v6 = vmul.f32 %v11160_v5, %v11541_v21 }
 0xcca   : > { %v5451_v1 = vmul.f32 1.0614054, %v11612_v41  ;;  %v11632_v43 = vadd.f32 %v11521_v53, %v5822_v63  ;;  %v6092_v19 = vadd.f32 %v12579_v35, %v6046_v50  ;;  %v5823_v40 = vadd.f32 %v11496_v20, %v5759_v59 }
 0xccb   : > { %v5516_v30 = vmul.f32 %v11526_v24, %v5508_v29  ;;  %v11641_v31 = vadd.f32 %v12580_v23, %v11481_v13  ;;  %v6048_v57 = vadd.f32 %v6028_v6, %v6002_v38  ;;  %v11645_v61 = vmul.f32 %v11096_v12, %v11579_v46 }
 0xccc   : > { %v11649_v53 = vmul.f32 %v11122_v26, %v11579_v46  ;;  %8362 = vpow2.f32 %v5545_v28  ;;  %v11655_v20 = vmul.f32 %v11096_v12, %v11597_v51  ;;  %v5941_v13 = vmul.f32 %v11122_v26, %v11597_v51 }
 0xccd   : > { %v5656_v44 = vld [vmem:[#allocation8 + $0x7f] sm:$0xff]  ;;  %v8361_v24 = vpop.eup %8360  ;;  %v5459_v42 = vadd.f32 -1.4531521, %v5451_v1  ;;  %vm5572_vm14 = vcmp.ge.f32.partialorder %v12582_v54, 0.0  ;;  %v11663_v37 = vadd.f32 %v11434_v10, %v6092_v19  ;;  %v6094_v63 = vadd.f32 %v12583_v4, %v6048_v57  ;;  %v11691_v19 = vld [vmem:[#allocation8 + $0x77] sm:$0xff]  ;;  %v12592_v54 = vld [vmem:[#allocation46_spill] sm:$0xff] }
 0xcce   : > { %v5720_v21 = vld [vmem:[#allocation8 + $0x80] sm:$0xff]  ;;  %12581 = vst [vmem:[#allocation49_spill] sm:$0xff] %v11649_v53  ;;  %v5719_v18 = vld [vmem:[#allocation8 + $0x78] sm:$0xff]  ;;  %v5556_v7 = vmul.f32 %v8361_v24, %v5516_v30  ;;  %v5680_v2 = vmul.f32 %v11083_v48, %v5656_v44  ;;  %v11674_v29 = vmul.f32 %v11103_v17, %v5656_v44  ;;  %v11677_v50 = vadd.f32 %v11434_v10, %v6093_v58 }
 0xccf   : > { %v5744_v55 = vmul.f32 %v11087_v16, %v5720_v21  ;;  %v11671_v52 = vmul.f32 %v11087_v16, %v5719_v18  ;;  %v11680_v59 = vmul.f32 %v11111_v15, %v5719_v18  ;;  %v11683_v32 = vmul.f32 %v11111_v15, %v5720_v21  ;;  %12588 = vst [vmem:[#allocation51_spill] sm:$0xff] %v11691_v19 }
 0xcd0   : > { %v11636_v33 = vld [vmem:[#allocation8 + $0x67] sm:$0xff]  ;;  %12584 = vst [vmem:[#allocation50_spill] sm:$0xff] %v11674_v29  ;;  %v5654_v6 = vld [vmem:[#allocation8 + $0x6f] sm:$0xff]  ;;  %v5564_v1 = vsub.f32 1.0, %v5556_v7  ;;  %v5467_v30 = vmul.f32 %v11612_v41, %v5459_v42  ;;  %v11689_v35 = vmul.f32 %v11148_v9, %v5656_v44  ;;  %v11698_v23 = vadd.f32 %v11434_v10, %v6091_v8 }
 0xcd1   : > { %v11651_v45 = vld [vmem:[#allocation8 + $0x68] sm:$0xff]  ;;  %v5849_v0 = vmul.f32 %v11103_v17, %v11636_v33  ;;  %12585 = vst [vmem:[#allocation41_spill] sm:$0xff] %v11680_v59  ;;  %12586 = vst [vmem:[#allocation42_spill] sm:$0xff] %v11683_v32  ;;  %v11685_v28 = vadd.f32 %v5744_v55, %v5680_v2  ;;  %v5677_v58 = vmul.f32 %v11083_v48, %v11636_v33  ;;  %v5718_v57 = vld [vmem:[#allocation8 + $0x70] sm:$0xff]  ;;  %v11703_v42 = vmul.f32 0.70710677, %v11663_v37 }
 0xcd2   : > { %v5895_v25 = vmul.f32 %v11111_v15, %v11651_v45  ;;  %12587 = vst [vmem:[#allocation45_spill] sm:$0xff] %v11689_v35  ;;  %v5741_v24 = vmul.f32 %v11087_v16, %v11651_v45  ;;  %v5475_v7 = vadd.f32 1.4214138, %v5467_v30  ;;  %v11706_v2 = vmul.f32 %v11160_v5, %v5719_v18 }
 0xcd3   : > { %v5869_v27 = vadd.f32 %v5849_v0, %v5823_v40  ;;  %v5580_v0 = vsub.f32 0.0, %v5564_v1  ;;  %v11709_v55 = vmul.f32 %v11160_v5, %v5720_v21  ;;  %v11713_v8 = vmul.f32 0.70710677, %v11698_v23 }
 0xcd4   : > { %12590 = vst [vmem:[#allocation53_spill] sm:$0xff] %v11706_v2  ;;  %v5679_v18 = vmul.f32 %v11083_v48, %v11691_v19  ;;  %v5742_v21 = vmul.f32 %v11087_v16, %v5718_v57  ;;  %v5761_v32 = vadd.f32 %v5741_v24, %v5677_v58  ;;  %v11728_v46 = vmul.f32 0.70710677, %v11677_v50 }
 0xcd5   : > { %v5915_v38 = vadd.f32 %v5895_v25, %v5869_v27  ;;  %12591 = vst [vmem:[#allocation52_spill] sm:$0xff] %v11709_v55  ;;  %v5588_v4 = vsel %vm5572_vm14, %v5564_v1, %v5580_v0  ;;  %v5483_v27 = vmul.f32 %v11612_v41, %v5475_v7  ;;  %v6179_v25 = vand.u32 2147483647, %v11703_v42 }
 0xcd6   : > { %v8363_v44 = vpop.eup %8362  ;;  %v5596_v30 = vadd.f32 1.0, %v5588_v4  ;;  %v6178_v53 = vand.u32 2147483647, %v11713_v8  ;;  %v5851_v24 = vmul.f32 %v11103_v17, %v11691_v19  ;;  %v11752_v19 = vmul.f32 %v11148_v9, %v5654_v6 }
 0xcd7   : > { %v11695_v40 = vadd.f32 %v5941_v13, %v5915_v38  ;;  %v5678_v13 = vmul.f32 %v11083_v48, %v5654_v6  ;;  %v6121_v38 = vadd.f32 %v11434_v10, %v6094_v63  ;;  %v5491_v59 = vadd.f32 -0.28449672, %v5483_v27 }
 0xcd8   : > { %v6199_v29 = vmul.f32 0.3275911, %v6179_v25  ;;  %v6459_v55 = vsub.f32 0.0, %v6179_v25  ;;  %v11725_v1 = vmul.f32 %v5596_v30, %v12592_v54  ;;  %v6198_v0 = vmul.f32 0.3275911, %v6178_v53 }
 0xcd9   : > { %12589 = vst [vmem:[#allocation36_spill] sm:$0xff] %v11695_v40  ;;  %v6458_v7 = vsub.f32 0.0, %v6178_v53  ;;  %v11731_v63 = vmul.f32 %v11103_v17, %v5654_v6  ;;  %v5499_v2 = vmul.f32 %v11612_v41, %v5491_v59  ;;  %v11734_v35 = vmul.f32 0.70710677, %v6121_v38 }
 0xcda   : > { %12593 = vst [vmem:[#allocation55_spill] sm:$0xff] %v11725_v1  ;;  %v6219_v4 = vadd.f32 1.0, %v6199_v29  ;;  %v11736_v58 = vadd.f32 %v5742_v21, %v5678_v13  ;;  %v11741_v27 = vmul.f32 %v11111_v15, %v5718_v57  ;;  %5638 = vst [vmem:[#allocation8 + $0x99] sm:$0xff] %v11725_v1  ;;  %v6218_v30 = vadd.f32 1.0, %v6198_v0 }
 0xcdb   : > { %12594 = vst [vmem:[#allocation38_spill] sm:$0xff] %v11731_v63  ;;  %12595 = vst [vmem:[#allocation54_spill] sm:$0xff] %v11734_v35  ;;  %v5507_v54 = vadd.f32 0.2548296, %v5499_v2  ;;  %v6479_v40 = vmul.f32 %v6459_v55, %v6179_v25  ;;  %v6180_v63 = vand.u32 2147483647, %v11728_v46  ;;  %v5825_v29 = vadd.f32 %v11655_v20, %v5761_v32 }
 0xcdc   : > { %12596 = vst [vmem:[#allocation56_spill] sm:$0xff] %v11741_v27  ;;  %8364 = vrcp.f32 %v6219_v4  ;;  %v6478_v59 = vmul.f32 %v6458_v7, %v6178_v53  ;;  %v6181_v13 = vand.u32 2147483647, %v11734_v35  ;;  %v11749_v21 = vmul.f32 %v11148_v9, %v11636_v33  ;;  %v12597_v2 = vld [vmem:[#allocation34_spill] sm:$0xff] }
 0xcdd   : > { %8366 = vrcp.f32 %v6218_v30  ;;  %v5515_v0 = vmul.f32 %v11612_v41, %v5507_v54  ;;  %vm5571_vm15 = vcmp.ge.f32.partialorder %v12597_v2, 0.0  ;;  %v6200_v55 = vmul.f32 0.3275911, %v6180_v63 }
 0xcde   : > { %v11758_v25 = vmul.f32 %v11160_v5, %v11651_v45  ;;  %v5763_v53 = vadd.f32 %v11671_v52, %v5679_v18  ;;  %v6201_v20 = vmul.f32 0.3275911, %v6181_v13  ;;  %v6460_v32 = vsub.f32 0.0, %v6180_v63 }
 0xcdf   : > { %v5555_v7 = vmul.f32 %v8363_v44, %v5515_v0  ;;  %v6502_v4 = vmul.f32 1.442695, %v6479_v40  ;;  %v6220_v33 = vadd.f32 1.0, %v6200_v55  ;;  %v5866_v6 = vadd.f32 %v11620_v34, %v11641_v31  ;;  %v12600_v0 = vld [vmem:[#allocation66_spill] sm:$0xff] }
 0xce0   : > { %v11763_v30 = vadd.f32 %v5851_v24, %v5825_v29  ;;  %v11766_v41 = vmul.f32 %v11160_v5, %v5718_v57  ;;  %v6500_v54 = vmul.f32 1.442695, %v6478_v59  ;;  %v6461_v27 = vsub.f32 0.0, %v6181_v13  ;;  %v12598_v24 = vld [vmem:[#allocation33_spill] sm:$0xff] }
 0xce1   : > { %v5563_v35 = vsub.f32 1.0, %v5555_v7  ;;  %v6221_v45 = vadd.f32 1.0, %v6201_v20  ;;  %8368 = vrcp.f32 %v6220_v33  ;;  %v5912_v52 = vadd.f32 %v11624_v39, %v5866_v6  ;;  %v5660_v39 = vld [vmem:[#allocation8 + $0x9f] sm:$0xff] }
 0xce2   : > { %v11770_v18 = vadd.f32 %v11645_v61, %v5763_v53  ;;  %v11773_v40 = vmul.f32 0.5, %v11698_v23  ;;  %v11776_v34 = vmul.f32 0.5, %v11663_v37  ;;  %v6480_v31 = vmul.f32 %v6460_v32, %v6180_v63 }
 0xce3   : > { %8370 = vpow2.f32 %v6502_v4  ;;  %v11779_v57 = vmul.f32 0.5, %v11677_v50  ;;  %v11781_v44 = vmul.f32 0.5, %v6121_v38  ;;  %v11785_v29 = vadd.f32 %v12598_v24, %v11544_v11  ;;  %v5723_v50 = vld [vmem:[#allocation8 + $0x98] sm:$0xff]  ;;  %v5724_v38 = vld [vmem:[#allocation8 + $0xa0] sm:$0xff] }
 0xce4   : > { %v11789_v61 = vmul.f32 %v11096_v12, %v11725_v1  ;;  %v11793_v37 = vmul.f32 %v11122_v26, %v11725_v1  ;;  %v5579_v23 = vsub.f32 0.0, %v5563_v35  ;;  %8372 = vpow2.f32 %v6500_v54  ;;  %v11808_v4 = vld [vmem:[%s12367_s14 + $0x8] ss:$0 sm:$0xff] }
 0xce5   : > { %8374 = vrcp.f32 %v6221_v45  ;;  %v6481_v59 = vmul.f32 %v6461_v27, %v6181_v13  ;;  %v5958_v11 = vadd.f32 %v12600_v0, %v5912_v52  ;;  %v5983_v55 = vmul.f32 %v11148_v9, %v11553_v60  ;;  %v11813_v60 = vld [vmem:[#allocation8 + $0x97] sm:$0xff] }
 0xce6   : > { %12599 = vst [vmem:[#allocation57_spill] sm:$0xff] %v11793_v37  ;;  %v11795_v63 = vpop.eup %8364  ;;  %v5587_v20 = vsel %vm5571_vm15, %v5563_v35, %v5579_v23  ;;  %v6504_v7 = vmul.f32 1.442695, %v6480_v31  ;;  %v6075_v27 = vmul.f32 %v11808_v4, %v11446_v3  ;;  %v5684_v13 = vmul.f32 %v11083_v48, %v5660_v39  ;;  %12601 = vst [vmem:[#allocation19_spill] sm:$0xff] %v11813_v60  ;;  %v12602_v31 = vld [vmem:[#allocation28_spill] sm:$0xff] }
 0xce7   : > { %v11800_v53 = vpop.eup %8366  ;;  %v6279_v32 = vmul.f32 1.0614054, %v11795_v63  ;;  %v5595_v33 = vadd.f32 1.0, %v5587_v20  ;;  %v6003_v35 = vadd.f32 %v5983_v55, %v11557_v14  ;;  %v5747_v2 = vmul.f32 %v11087_v16, %v5723_v50 }
 0xce8   : > { %v6278_v6 = vmul.f32 1.0614054, %v11800_v53  ;;  %v5748_v54 = vmul.f32 %v11087_v16, %v5724_v38  ;;  %v6004_v52 = vadd.f32 %v11539_v47, %v5958_v11  ;;  %v5913_v0 = vadd.f32 %v11529_v56, %v11626_v22 }
 0xce9   : > { %v6299_v45 = vadd.f32 -1.4531521, %v6279_v32  ;;  %v11821_v24 = vmul.f32 %v5595_v33, %v12602_v31  ;;  %v6049_v23 = vadd.f32 %v11561_v49, %v6003_v35  ;;  %v11827_v20 = vmul.f32 %v11103_v17, %v5660_v39  ;;  %v12605_v35 = vld [vmem:[#allocation44_spill] sm:$0xff] }
 0xcea   : > { %v6298_v3 = vadd.f32 -1.4531521, %v6278_v6  ;;  %v5683_v14 = vmul.f32 %v11083_v48, %v11813_v60  ;;  %v6050_v32 = vadd.f32 %v11564_v36, %v6004_v52  ;;  %v11836_v11 = vmul.f32 %v11111_v15, %v5723_v50  ;;  %v12606_v31 = vld [vmem:[#allocation48_spill] sm:$0xff] }
 0xceb   : > { %12603 = vst [vmem:[#allocation20_spill] sm:$0xff] %v11827_v20  ;;  %v6319_v55 = vmul.f32 %v11795_v63, %v6299_v45  ;;  %v11833_v47 = vpop.eup %8368  ;;  %5637 = vst [vmem:[#allocation8 + $0x89] sm:$0xff] %v11821_v24  ;;  %v6095_v56 = vadd.f32 %v6075_v27, %v6049_v23  ;;  %v5914_v22 = vadd.f32 %v11536_v62, %v11632_v43  ;;  %v6506_v27 = vmul.f32 1.442695, %v6481_v59 }
 0xcec   : > { %12604 = vst [vmem:[#allocation21_spill] sm:$0xff] %v11836_v11  ;;  %v6318_v49 = vmul.f32 %v11800_v53, %v6298_v3  ;;  %v6280_v6 = vmul.f32 1.0614054, %v11833_v47  ;;  %v6096_v45 = vadd.f32 %v12605_v35, %v6050_v32  ;;  %v5959_v36 = vadd.f32 %v12606_v31, %v5913_v0 }
 0xced   : > { %v6339_v33 = vadd.f32 1.4214138, %v6319_v55  ;;  %v11845_v52 = vpop.eup %8370  ;;  %v11848_v37 = vmul.f32 %v11111_v15, %v5724_v38  ;;  %v11851_v11 = vmul.f32 %v11148_v9, %v5660_v39  ;;  %v11856_v62 = vmul.f32 %v11160_v5, %v5723_v50  ;;  %v12610_v39 = vld [vmem:[#allocation60_spill] sm:$0xff] }
 0xcee   : > { %v6338_v3 = vadd.f32 1.4214138, %v6318_v49  ;;  %v11853_v23 = vpop.eup %8372  ;;  %v5767_v43 = vadd.f32 %v5747_v2, %v5683_v14  ;;  %v6122_v0 = vadd.f32 %v11434_v10, %v6095_v56  ;;  %v6300_v31 = vadd.f32 -1.4531521, %v6280_v6 }
 0xcef   : > { %12607 = vst [vmem:[#allocation22_spill] sm:$0xff] %v11848_v37  ;;  %12608 = vst [vmem:[#allocation23_spill] sm:$0xff] %v11851_v11  ;;  %v6359_v55 = vmul.f32 %v11795_v63, %v6339_v33  ;;  %v11860_v32 = vpop.eup %8374  ;;  %8376 = vpow2.f32 %v6504_v7  ;;  %v5960_v37 = vadd.f32 %v12610_v39, %v5914_v22  ;;  %v6123_v20 = vadd.f32 %v11434_v10, %v6096_v45 }
 0xcf0   : > { %12609 = vst [vmem:[#allocation24_spill] sm:$0xff] %v11856_v62  ;;  %v6358_v35 = vmul.f32 %v11800_v53, %v6338_v3  ;;  %v6281_v59 = vmul.f32 1.0614054, %v11860_v32  ;;  %v6005_v50 = vadd.f32 %v11749_v21, %v5959_v36  ;;  %v11867_v2 = vadd.f32 %v5748_v54, %v5684_v13 }
 0xcf1   : > { %v6379_v49 = vadd.f32 -0.28449672, %v6359_v55  ;;  %v11870_v14 = vmul.f32 %v11160_v5, %v5724_v38  ;;  %v11874_v56 = vmul.f32 %v11103_v17, %v11813_v60  ;;  %8378 = vpow2.f32 %v6506_v27  ;;  %v12614_v38 = vld [vmem:[#allocation37_spill] sm:$0xff] }
 0xcf2   : > { %12611 = vst [vmem:[#allocation25_spill] sm:$0xff] %v11867_v2  ;;  %v11877_v7 = vadd.f32 %v11789_v61, %v5767_v43  ;;  %v6378_v22 = vadd.f32 -0.28449672, %v6358_v35  ;;  %v11879_v33 = vmul.f32 0.70710677, %v6122_v0  ;;  %v6006_v6 = vadd.f32 %v11752_v19, %v5960_v37  ;;  %v5657_v45 = vld [vmem:[#allocation8 + $0x87] sm:$0xff] }
 0xcf3   : > { %12612 = vst [vmem:[#allocation26_spill] sm:$0xff] %v11870_v14  ;;  %v6399_v21 = vmul.f32 %v11795_v63, %v6379_v49  ;;  %v6301_v13 = vadd.f32 -1.4531521, %v6281_v59  ;;  %v11885_v54 = vadd.f32 %v12614_v38, %v11736_v58  ;;  %v6077_v36 = vmul.f32 %v11808_v4, %v11597_v51  ;;  %v5658_v3 = vld [vmem:[#allocation8 + $0x8f] sm:$0xff] }
 0xcf4   : > { %12613 = vst [vmem:[#allocation64_spill] sm:$0xff] %v11877_v7  ;;  %v11889_v27 = vld [vmem:[#allocation8 + $0x88] sm:$0xff]  ;;  %v11893_v61 = vmul.f32 %v11096_v12, %v11821_v24  ;;  %v6320_v19 = vmul.f32 %v11833_v47, %v6300_v31  ;;  %v11896_v37 = vmul.f32 0.70710677, %v6123_v20  ;;  %v6051_v43 = vadd.f32 %v11758_v25, %v6005_v50  ;;  %v12616_v35 = vld [vmem:[#allocation35_spill] sm:$0xff] }
 0xcf5   : > { %v11901_v58 = vmul.f32 %v11122_v26, %v11821_v24  ;;  %v11903_v55 = vmul.f32 0.5, %v6122_v0  ;;  %v11905_v51 = vmul.f32 0.5, %v6123_v20  ;;  %v11909_v39 = vadd.f32 %v12616_v35, %v11685_v28  ;;  %v11912_v59 = vld [vmem:[#allocation8 + $0x90] sm:$0xff] }
 0xcf6   : > { %v5681_v49 = vmul.f32 %v11083_v48, %v5657_v45  ;;  %v6398_v31 = vmul.f32 %v11800_v53, %v6378_v22  ;;  %v6182_v25 = vand.u32 2147483647, %v11879_v33  ;;  %v6052_v50 = vadd.f32 %v11766_v41, %v6006_v6 }
 0xcf7   : > { %12615 = vst [vmem:[#allocation62_spill] sm:$0xff] %v11905_v51  ;;  %v5682_v38 = vmul.f32 %v11083_v48, %v5658_v3  ;;  %v5745_v20 = vmul.f32 %v11087_v16, %v11889_v27  ;;  %v6419_v0 = vadd.f32 0.2548296, %v6399_v21  ;;  %v6321_v7 = vmul.f32 %v11860_v32, %v6301_v13 }
 0xcf8   : > { %v6418_v28 = vadd.f32 0.2548296, %v6398_v31  ;;  %vm6579_vm0 = vcmp.ge.f32.partialorder %v11703_v42, 0.0  ;;  %v6340_v35 = vadd.f32 1.4214138, %v6320_v19  ;;  %v6097_v22 = vadd.f32 %v6077_v36, %v6051_v43 }
 0xcf9   : > { %v11923_v2 = vand.u32 2147483647, %v11896_v37  ;;  %v8377_v1 = vpop.eup %8376  ;;  %v5746_v41 = vmul.f32 %v11087_v16, %v11912_v59  ;;  %v5853_v48 = vmul.f32 %v11103_v17, %v5657_v45  ;;  %v6439_v6 = vmul.f32 %v11795_v63, %v6419_v0 }
 0xcfa   : > { %vm6578_vm1 = vcmp.ge.f32.partialorder %v11713_v8, 0.0  ;;  %v6341_v21 = vadd.f32 1.4214138, %v6321_v7  ;;  %v6438_v13 = vmul.f32 %v11800_v53, %v6418_v28  ;;  %v6360_v31 = vmul.f32 %v11833_v47, %v6340_v35 }
 0xcfb   : > { %v6202_v19 = vmul.f32 0.3275911, %v6182_v25  ;;  %v6203_v14 = vmul.f32 0.3275911, %v11923_v2  ;;  %v8379_v62 = vpop.eup %8378  ;;  %v11934_v36 = vmul.f32 %v11103_v17, %v5658_v3  ;;  %v5899_v16 = vmul.f32 %v11111_v15, %v11889_v27 }
 0xcfc   : > { %v6539_v43 = vmul.f32 %v11845_v52, %v6439_v6  ;;  %v6361_v63 = vmul.f32 %v11860_v32, %v6341_v21  ;;  %v6538_v7 = vmul.f32 %v11853_v23, %v6438_v13  ;;  %v6380_v0 = vadd.f32 -0.28449672, %v6360_v31  ;;  %v12618_v21 = vld [vmem:[#allocation32_spill] sm:$0xff] }
 0xcfd   : > { %12617 = vst [vmem:[#allocation27_spill] sm:$0xff] %v11934_v36  ;;  %v6222_v53 = vadd.f32 1.0, %v6202_v19  ;;  %v6223_v28 = vadd.f32 1.0, %v6203_v14  ;;  %v5765_v35 = vadd.f32 %v5745_v20, %v5681_v49  ;;  %v11943_v11 = vmul.f32 %v11111_v15, %v11912_v59 }
 0xcfe   : > { %v6559_v60 = vsub.f32 1.0, %v6539_v43  ;;  %v6381_v17 = vadd.f32 -0.28449672, %v6361_v63  ;;  %v5873_v26 = vadd.f32 %v5853_v48, %v11770_v18  ;;  %v6558_v51 = vsub.f32 1.0, %v6538_v7  ;;  %v12619_v43 = vld [vmem:[#allocation54_spill] sm:$0xff] }
 0xcff   : > { %v6400_v36 = vmul.f32 %v11833_v47, %v6380_v0  ;;  %8380 = vrcp.f32 %v6222_v53  ;;  %v6462_v23 = vsub.f32 0.0, %v6182_v25  ;;  %v11949_v14 = vmul.f32 %v11148_v9, %v5657_v45 }
 0xd00   : > { %v6599_v52 = vsub.f32 0.0, %v6559_v60  ;;  %v6401_v6 = vmul.f32 %v11860_v32, %v6381_v17  ;;  %8382 = vrcp.f32 %v6223_v28  ;;  %v6598_v49 = vsub.f32 0.0, %v6558_v51 }
 0xd01   : > { %v6420_v20 = vadd.f32 0.2548296, %v6400_v36  ;;  %v6098_v13 = vadd.f32 %v12618_v21, %v6052_v50  ;;  %v11953_v31 = vmul.f32 %v11148_v9, %v5658_v3  ;;  %vm6580_vm2 = vcmp.ge.f32.partialorder %v11728_v46, 0.0 }
 0xd02   : > { %v6619_v18 = vsel %vm6579_vm0, %v6559_v60, %v6599_v52  ;;  %v6421_v48 = vadd.f32 0.2548296, %v6401_v6  ;;  %v11959_v17 = vadd.f32 %v11434_v10, %v6097_v22  ;;  %v6618_v45 = vsel %vm6578_vm1, %v6558_v51, %v6598_v49  ;;  %v12620_v51 = vld [vmem:[#allocation38_spill] sm:$0xff] }
 0xd03   : > { %v6639_v19 = vadd.f32 1.0, %v6619_v18  ;;  %v6440_v36 = vmul.f32 %v11833_v47, %v6420_v20  ;;  %vm6581_vm3 = vcmp.ge.f32.partialorder %v12619_v43, 0.0  ;;  %v6463_v3 = vsub.f32 0.0, %v11923_v2 }
 0xd04   : > { %v6638_v50 = vadd.f32 1.0, %v6618_v45  ;;  %v6441_v42 = vmul.f32 %v11860_v32, %v6421_v48  ;;  %v6482_v60 = vmul.f32 %v6462_v23, %v6182_v25  ;;  %v11968_v63 = vadd.f32 %v11434_v10, %v6098_v13  ;;  %v12621_v25 = vld [vmem:[#allocation56_spill] sm:$0xff] }
 0xd05   : > { %v6659_v22 = vmul.f32 %v6639_v19, %v11776_v34  ;;  %v6540_v7 = vmul.f32 %v8377_v1, %v6440_v36  ;;  %v11972_v8 = vmul.f32 0.70710677, %v11959_v17  ;;  %v5870_v47 = vadd.f32 %v12620_v51, %v11785_v29 }
 0xd06   : > { %v11976_v0 = vadd.f32 %v5746_v41, %v5682_v38  ;;  %v6658_v53 = vmul.f32 %v6638_v50, %v11773_v40  ;;  %v6541_v28 = vmul.f32 %v8379_v62, %v6441_v42  ;;  %v11980_v32 = vmul.f32 0.70710677, %v11968_v63 }
 0xd07   : > { %v11983_v10 = vadd.f32 %v11893_v61, %v5765_v35  ;;  %6679 = vst [vmem:[#allocation9 + $0x18] sm:$0xff] %v6659_v22  ;;  %v6560_v34 = vsub.f32 1.0, %v6540_v7  ;;  %v6184_v1 = vand.u32 2147483647, %v11972_v8  ;;  %v5916_v52 = vadd.f32 %v12621_v25, %v5870_v47  ;;  %v12623_v22 = vld [vmem:[#allocation51_spill] sm:$0xff]  ;;  %v12624_v25 = vld [vmem:[#allocation36_spill] sm:$0xff] }
 0xd08   : > { %v11987_v6 = vadd.f32 %v5899_v16, %v5873_v26  ;;  %6678 = vst [vmem:[#allocation9 + $0x10] sm:$0xff] %v6658_v53  ;;  %v6561_v29 = vsub.f32 1.0, %v6541_v28  ;;  %v6483_v38 = vmul.f32 %v6463_v3, %v11923_v2  ;;  %v6185_v40 = vand.u32 2147483647, %v11980_v32  ;;  %v12622_v26 = vld [vmem:[#allocation40_spill] sm:$0xff] }
 0xd09   : > { %v11991_v62 = vpop.eup %8380  ;;  %v6600_v41 = vsub.f32 0.0, %v6560_v34  ;;  %v6508_v23 = vmul.f32 1.442695, %v6482_v60  ;;  %v6204_v61 = vmul.f32 0.3275911, %v6184_v1  ;;  %v6464_v35 = vsub.f32 0.0, %v6184_v1 }
 0xd0a   : > { %v11993_v49 = vpop.eup %8382  ;;  %v6601_v20 = vsub.f32 0.0, %v6561_v29  ;;  %v6282_v21 = vmul.f32 1.0614054, %v11991_v62  ;;  %v6205_v13 = vmul.f32 0.3275911, %v6185_v40  ;;  %v5962_v16 = vadd.f32 %v12622_v26, %v5916_v52 }
 0xd0b   : > { %v6620_v18 = vsel %vm6580_vm2, %v6560_v34, %v6600_v41  ;;  %v6283_v2 = vmul.f32 1.0614054, %v11993_v49  ;;  %v6224_v48 = vadd.f32 1.0, %v6204_v61  ;;  %v6465_v45 = vsub.f32 0.0, %v6185_v40  ;;  %v12625_v61 = vld [vmem:[#allocation45_spill] sm:$0xff] }
 0xd0c   : > { %v6621_v19 = vsel %vm6581_vm3, %v6561_v29, %v6601_v20  ;;  %v6640_v36 = vadd.f32 1.0, %v6620_v18  ;;  %v6302_v3 = vadd.f32 -1.4531521, %v6282_v21  ;;  %v6225_v50 = vadd.f32 1.0, %v6205_v13  ;;  %v12626_v21 = vld [vmem:[#allocation53_spill] sm:$0xff]  ;;  %v12627_v13 = vld [vmem:[#allocation47_spill] sm:$0xff] }
 0xd0d   : > { %v6641_v42 = vadd.f32 1.0, %v6621_v19  ;;  %v6303_v60 = vadd.f32 -1.4531521, %v6283_v2  ;;  %8384 = vrcp.f32 %v6224_v48  ;;  %v5987_v7 = vmul.f32 %v11148_v9, %v12623_v22 }
 0xd0e   : > { %v6660_v51 = vmul.f32 %v6640_v36, %v11779_v57  ;;  %v6322_v46 = vmul.f32 %v11991_v62, %v6302_v3  ;;  %v6510_v47 = vmul.f32 1.442695, %v6483_v38  ;;  %8386 = vrcp.f32 %v6225_v50 }
 0xd0f   : > { %v6696_v53 = vld [vmem:[#allocation9 + $0x11] sm:$0xff]  ;;  %v6661_v28 = vmul.f32 %v6641_v42, %v11781_v44  ;;  %v6323_v43 = vmul.f32 %v11993_v49, %v6303_v60  ;;  %v6484_v34 = vmul.f32 %v6464_v35, %v6184_v1  ;;  %v6007_v52 = vadd.f32 %v5987_v7, %v12624_v25  ;;  %v12628_v35 = vld [vmem:[#allocation52_spill] sm:$0xff] }
 0xd10   : > { %7740 = vmatprep.mubr.f32.mxu1 %v6696_v53  ;;  %6680 = vst [vmem:[#allocation9 + $0x20] sm:$0xff] %v6660_v51  ;;  %v6342_v29 = vadd.f32 1.4214138, %v6322_v46  ;;  %8388 = vpow2.f32 %v6508_v23  ;;  %v6485_v41 = vmul.f32 %v6465_v45, %v6185_v40  ;;  %v6008_v20 = vadd.f32 %v12625_v61, %v5962_v16  ;;  %v8451_v44 = vld [vmem:[#allocation8 + $0x81] sm:$0xff]  ;;  %v12039_v7 = vld [vmem:[#allocation8 + $0x91] sm:$0xff] }
 0xd11   : > { %6681 = vst [vmem:[#allocation9 + $0x28] sm:$0xff] %v6661_v28  ;;  %v6343_v57 = vadd.f32 1.4214138, %v6323_v43  ;;  %v6053_v38 = vadd.f32 %v12626_v21, %v6007_v52  ;;  %v6079_v26 = vmul.f32 %v11808_v4, %v12627_v13  ;;  %v6080_v18 = vmul.f32 %v8451_v44, %v11808_v4  ;;  %v12629_v23 = vld [vmem:[#allocation50_spill] sm:$0xff]  ;;  %v12633_v44 = vld [vmem:[#allocation43_spill] sm:$0xff] }
 0xd12   : > { %v6362_v1 = vmul.f32 %v11991_v62, %v6342_v29  ;;  %8390 = vpow2.f32 %v6510_v47  ;;  %v6054_v2 = vadd.f32 %v12628_v35, %v6008_v20  ;;  %v5872_v40 = vadd.f32 %v12629_v23, %v11885_v54  ;;  %v12631_v47 = vld [vmem:[#allocation42_spill] sm:$0xff]  ;;  %v12632_v20 = vld [vmem:[#allocation49_spill] sm:$0xff] }
 0xd13   : > { %v12020_v16 = vmul.f32 %v11160_v5, %v11889_v27  ;;  %v6363_v48 = vmul.f32 %v11993_v49, %v6343_v57  ;;  %v6512_v45 = vmul.f32 1.442695, %v6484_v34  ;;  %v6099_v19 = vadd.f32 %v6079_v26, %v6053_v38  ;;  %v12034_v27 = vld [vmem:[%s12368_s15] ss:$0 sm:$0xff] }
 0xd14   : > { %v12025_v36 = vmul.f32 %v11160_v5, %v11912_v59  ;;  %v6382_v3 = vadd.f32 -0.28449672, %v6362_v1  ;;  %v6514_v50 = vmul.f32 1.442695, %v6485_v41  ;;  %v6100_v42 = vadd.f32 %v6080_v18, %v6054_v2  ;;  %v12630_v59 = vld [vmem:[#allocation41_spill] sm:$0xff] }
 0xd15   : > { %v12029_v60 = vadd.f32 %v11874_v56, %v11983_v10  ;;  %v6383_v54 = vadd.f32 -0.28449672, %v6363_v48  ;;  %v12037_v22 = vadd.f32 %v12034_v27, %v6099_v19  ;;  %v5917_v51 = vadd.f32 %v12630_v59, %v11763_v30 }
 0xd16   : > { %v12045_v46 = vadd.f32 %v11901_v58, %v11987_v6  ;;  %v6402_v56 = vmul.f32 %v11991_v62, %v6382_v3  ;;  %v12049_v10 = vadd.f32 %v12034_v27, %v6100_v42  ;;  %v5918_v53 = vadd.f32 %v12631_v47, %v5872_v40 }
 0xd17   : > { %v12052_v28 = vpop.eup %8384  ;;  %v6403_v43 = vmul.f32 %v11993_v49, %v6383_v54  ;;  %v12056_v34 = vmul.f32 0.5, %v11959_v17  ;;  %8392 = vpow2.f32 %v6512_v45  ;;  %v12059_v30 = vmul.f32 0.70710677, %v12037_v22 }
 0xd18   : > { %v12061_v58 = vpop.eup %8386  ;;  %v6697_v6 = vld [vmem:[#allocation9 + $0x21] sm:$0xff]  ;;  %v6422_v25 = vadd.f32 0.2548296, %v6402_v56  ;;  %v6284_v52 = vmul.f32 1.0614054, %v12052_v28  ;;  %8394 = vpow2.f32 %v6514_v50  ;;  %v12066_v29 = vmul.f32 %v11096_v12, %v12039_v7 }
 0xd19   : > { %7741 = vmatmul.mubr.f32.vlgmr.msra.gmra.mrb[134].mxu1 %v6697_v6  ;;  %v6423_v41 = vadd.f32 0.2548296, %v6403_v43  ;;  %vm6582_vm4 = vcmp.ge.f32.partialorder %v11879_v33, 0.0  ;;  %v6285_v17 = vmul.f32 1.0614054, %v12061_v58  ;;  %v5963_v57 = vadd.f32 %v12632_v20, %v5917_v51 }
 0xd1a   : > { %v12071_v61 = vmul.f32 0.70710677, %v12049_v10  ;;  %v8389_v21 = vpop.eup %8388  ;;  %v6442_v38 = vmul.f32 %v11991_v62, %v6422_v25  ;;  %vm6583_vm5 = vcmp.ge.f32.partialorder %v11896_v37, 0.0  ;;  %v6304_v13 = vadd.f32 -1.4531521, %v6284_v52 }
 0xd1b   : > { %v6186_v26 = vand.u32 2147483647, %v12059_v30  ;;  %v5964_v18 = vadd.f32 %v12633_v44, %v5918_v53  ;;  %v6443_v1 = vmul.f32 %v11993_v49, %v6423_v41  ;;  %v6305_v35 = vadd.f32 -1.4531521, %v6285_v17 }
 0xd1c   : > { %v6187_v2 = vand.u32 2147483647, %v12071_v61  ;;  %v6082_v23 = vmul.f32 %v11808_v4, %v12039_v7  ;;  %v8391_v40 = vpop.eup %8390  ;;  %v6542_v48 = vmul.f32 %v8389_v21, %v6442_v38  ;;  %v6324_v45 = vmul.f32 %v12052_v28, %v6304_v13 }
 0xd1d   : > { %v6206_v62 = vmul.f32 0.3275911, %v6186_v26  ;;  %v6009_v19 = vadd.f32 %v11949_v14, %v5963_v57  ;;  %v6543_v3 = vmul.f32 %v8391_v40, %v6443_v1  ;;  %v6325_v50 = vmul.f32 %v12061_v58, %v6305_v35 }
 0xd1e   : > { %v6207_v42 = vmul.f32 0.3275911, %v6187_v2  ;;  %v6466_v54 = vsub.f32 0.0, %v6186_v26  ;;  %v6562_v59 = vsub.f32 1.0, %v6542_v48  ;;  %v6344_v49 = vadd.f32 1.4214138, %v6324_v45 }
 0xd1f   : > { %v6226_v51 = vadd.f32 1.0, %v6206_v62  ;;  %v6010_v56 = vadd.f32 %v11953_v31, %v5964_v18  ;;  %v6563_v47 = vsub.f32 1.0, %v6543_v3  ;;  %v6345_v53 = vadd.f32 1.4214138, %v6325_v50 }
 0xd20   : > { %v6227_v43 = vadd.f32 1.0, %v6207_v42  ;;  %v6467_v6 = vsub.f32 0.0, %v6187_v2  ;;  %v6602_v25 = vsub.f32 0.0, %v6562_v59  ;;  %v6364_v52 = vmul.f32 %v12052_v28, %v6344_v49  ;;  %v12636_v49 = vld [vmem:[#allocation29_spill] sm:$0xff] }
 0xd21   : > { %8396 = vrcp.f32 %v6226_v51  ;;  %v6055_v14 = vadd.f32 %v12020_v16, %v6009_v19  ;;  %v8393_v41 = vpop.eup %8392  ;;  %v6603_v17 = vsub.f32 0.0, %v6563_v47  ;;  %v6365_v20 = vmul.f32 %v12061_v58, %v6345_v53 }
 0xd22   : > { %8398 = vrcp.f32 %v6227_v43  ;;  %v6486_v57 = vmul.f32 %v6466_v54, %v6186_v26  ;;  %v8395_v21 = vpop.eup %8394  ;;  %v6622_v31 = vsel %vm6582_vm4, %v6562_v59, %v6602_v25  ;;  %v6384_v38 = vadd.f32 -0.28449672, %v6364_v52 }
 0xd23   : > { %v6056_v13 = vadd.f32 %v12025_v36, %v6010_v56  ;;  %v6081_v44 = vmul.f32 %v11808_v4, %v11821_v24  ;;  %v6623_v18 = vsel %vm6583_vm5, %v6563_v47, %v6603_v17  ;;  %v6642_v16 = vadd.f32 1.0, %v6622_v31  ;;  %v12634_v36 = vld [vmem:[#allocation27_spill] sm:$0xff]  ;;  %v12635_v24 = vld [vmem:[#allocation62_spill] sm:$0xff] }
 0xd24   : > { %v6385_v1 = vadd.f32 -0.28449672, %v6365_v20  ;;  %v6487_v35 = vmul.f32 %v6467_v6, %v6187_v2  ;;  %v6643_v40 = vadd.f32 1.0, %v6623_v18  ;;  %v6404_v48 = vmul.f32 %v12052_v28, %v6384_v38 }
 0xd25   : > { %v6101_v26 = vadd.f32 %v6081_v44, %v6055_v14  ;;  %v6102_v45 = vadd.f32 %v6082_v23, %v6056_v13  ;;  %v6662_v33 = vmul.f32 %v6642_v16, %v11903_v55  ;;  %v6516_v19 = vmul.f32 1.442695, %v6486_v57 }
 0xd26   : > { %v6405_v62 = vmul.f32 %v12061_v58, %v6385_v1  ;;  %v5874_v3 = vadd.f32 %v12634_v36, %v11909_v39  ;;  %v6663_v50 = vmul.f32 %v6643_v40, %v12635_v24  ;;  %v6424_v37 = vadd.f32 0.2548296, %v6404_v48  ;;  %v12637_v40 = vld [vmem:[#allocation19_spill] sm:$0xff] }
 0xd27   : > { %v12103_v42 = vadd.f32 %v12034_v27, %v6101_v26  ;;  %v12106_v2 = vadd.f32 %v12034_v27, %v6102_v45  ;;  %6682 = vst [vmem:[#allocation9 + $0x30] sm:$0xff] %v6662_v33  ;;  %v6145_v23 = vmul.f32 0.5, %v11968_v63  ;;  %vm6584_vm6 = vcmp.ge.f32.partialorder %v11972_v8, 0.0 }
 0xd28   : > { %v6425_v54 = vadd.f32 0.2548296, %v6405_v62  ;;  %v6518_v55 = vmul.f32 1.442695, %v6487_v35  ;;  %6683 = vst [vmem:[#allocation9 + $0x38] sm:$0xff] %v6663_v50  ;;  %v6444_v59 = vmul.f32 %v12052_v28, %v6424_v37  ;;  %vm6585_vm8 = vcmp.ge.f32.partialorder %v11980_v32, 0.0 }
 0xd29   : > { %v12114_v39 = vadd.f32 %v12066_v29, %v11976_v0  ;;  %v5946_v51 = vmul.f32 %v12636_v49, %v12039_v7  ;;  %v12119_v56 = vmul.f32 0.70710677, %v12103_v42  ;;  %v12123_v47 = vmul.f32 0.5, %v12037_v22  ;;  %v5788_v35 = vld [vmem:[#allocation8 + $0xa1] sm:$0xff] }
 0xd2a   : > { %v6445_v63 = vmul.f32 %v12061_v58, %v6425_v54  ;;  %v12126_v53 = vmul.f32 0.70710677, %v12106_v2  ;;  %v5920_v28 = vadd.f32 %v11943_v11, %v5874_v3  ;;  %v6544_v0 = vmul.f32 %v8393_v41, %v6444_v59  ;;  %v12638_v59 = vld [vmem:[#allocation23_spill] sm:$0xff] }
 0xd2b   : > { %v12129_v43 = vpop.eup %8396  ;;  %v12132_v29 = vmul.f32 0.5, %v12049_v10  ;;  %8400 = vpow2.f32 %v6516_v19  ;;  %v6188_v7 = vand.u32 2147483647, %v12119_v56  ;;  %v5991_v48 = vmul.f32 %v11148_v9, %v12637_v40 }
 0xd2c   : > { %v12135_v6 = vpop.eup %8398  ;;  %v6545_v58 = vmul.f32 %v8395_v21, %v6445_v63  ;;  %v6286_v22 = vmul.f32 1.0614054, %v12129_v43  ;;  %8402 = vpow2.f32 %v6518_v55  ;;  %v6189_v25 = vand.u32 2147483647, %v12126_v53  ;;  %v12153_v63 = vld [vmem:[#allocation8 + $0xa7] sm:$0xff] }
 0xd2d   : > { %v6564_v52 = vsub.f32 1.0, %v6544_v0  ;;  %v6287_v11 = vmul.f32 1.0614054, %v12135_v6  ;;  %v6208_v14 = vmul.f32 0.3275911, %v6188_v7  ;;  %v6468_v17 = vsub.f32 0.0, %v6188_v7 }
 0xd2e   : > { %v6565_v41 = vsub.f32 1.0, %v6545_v58  ;;  %v6306_v20 = vadd.f32 -1.4531521, %v6286_v22  ;;  %v6209_v10 = vmul.f32 0.3275911, %v6189_v25  ;;  %v5966_v57 = vadd.f32 %v5946_v51, %v5920_v28  ;;  %v12157_v22 = vld [vmem:[#allocation8 + $0xaf] sm:$0xff] }
 0xd2f   : > { %v6604_v31 = vsub.f32 0.0, %v6564_v52  ;;  %v6307_v38 = vadd.f32 -1.4531521, %v6287_v11  ;;  %v6228_v13 = vadd.f32 1.0, %v6208_v14  ;;  %v6469_v44 = vsub.f32 0.0, %v6189_v25  ;;  %v6698_v18 = vld [vmem:[#allocation9 + $0x31] sm:$0xff] }
 0xd30   : > { %v6605_v21 = vsub.f32 0.0, %v6565_v41  ;;  %v6326_v16 = vmul.f32 %v12129_v43, %v6306_v20  ;;  %v6229_v1 = vadd.f32 1.0, %v6209_v10  ;;  %7743 = vmatprep.mubr.f32.mxu1 %v6698_v18  ;;  %v6488_v33 = vmul.f32 %v6468_v17, %v6188_v7  ;;  %v12640_v11 = vld [vmem:[#allocation26_spill] sm:$0xff]  ;;  %v12641_v14 = vld [vmem:[#allocation55_spill] sm:$0xff]  ;;  %v12642_v20 = vld [vmem:[#allocation25_spill] sm:$0xff] }
 0xd31   : > { %v6624_v26 = vsel %vm6584_vm6, %v6564_v52, %v6604_v31  ;;  %v6327_v45 = vmul.f32 %v12135_v6, %v6307_v38  ;;  %8404 = vrcp.f32 %v6228_v13  ;;  %v6489_v50 = vmul.f32 %v6469_v44, %v6189_v25  ;;  %v12639_v25 = vld [vmem:[#allocation24_spill] sm:$0xff] }
 0xd32   : > { %v6625_v62 = vsel %vm6585_vm8, %v6565_v41, %v6605_v21  ;;  %v6644_v19 = vadd.f32 1.0, %v6624_v26  ;;  %v6346_v36 = vadd.f32 1.4214138, %v6326_v16  ;;  %8406 = vrcp.f32 %v6229_v1 }
 0xd33   : > { %v6645_v3 = vadd.f32 1.0, %v6625_v62  ;;  %v6347_v24 = vadd.f32 1.4214138, %v6327_v45  ;;  %v5812_v37 = vmul.f32 %v11096_v12, %v5788_v35  ;;  %v6011_v55 = vadd.f32 %v5991_v48, %v12045_v46  ;;  %v12644_v45 = vld [vmem:[#allocation20_spill] sm:$0xff] }
 0xd34   : > { %v6664_v54 = vmul.f32 %v6644_v19, %v12056_v34  ;;  %v6366_v8 = vmul.f32 %v12129_v43, %v6346_v36  ;;  %v6012_v51 = vadd.f32 %v12638_v59, %v5966_v57  ;;  %v6520_v7 = vmul.f32 1.442695, %v6488_v33  ;;  %v12643_v57 = vld [vmem:[#allocation59_spill] sm:$0xff] }
 0xd35   : > { %v8401_v32 = vpop.eup %8400  ;;  %v6665_v28 = vmul.f32 %v6645_v3, %v6145_v23  ;;  %v6367_v0 = vmul.f32 %v12135_v6, %v6347_v24  ;;  %v6084_v58 = vmul.f32 %v11808_v4, %v5788_v35  ;;  %v6057_v52 = vadd.f32 %v12639_v25, %v6011_v55 }
 0xd36   : > { %v8403_v12 = vpop.eup %8402  ;;  %6684 = vst [vmem:[#allocation9 + $0x40] sm:$0xff] %v6664_v54  ;;  %v6386_v34 = vadd.f32 -0.28449672, %v6366_v8  ;;  %v6058_v46 = vadd.f32 %v12640_v11, %v6012_v51  ;;  %v6083_v17 = vmul.f32 %v11808_v4, %v12641_v14  ;;  %v6522_v23 = vmul.f32 1.442695, %v6489_v50  ;;  %v12645_v50 = vld [vmem:[#allocation64_spill] sm:$0xff] }
 0xd37   : > { %6685 = vst [vmem:[#allocation9 + $0x48] sm:$0xff] %v6665_v28  ;;  %v6387_v41 = vadd.f32 -0.28449672, %v6367_v0  ;;  %v5832_v10 = vadd.f32 %v5812_v37, %v12642_v20  ;;  %v5857_v31 = vmul.f32 %v12643_v57, %v12153_v63  ;;  %v5858_v18 = vmul.f32 %v12643_v57, %v12157_v22  ;;  %v12646_v28 = vld [vmem:[#allocation21_spill] sm:$0xff] }
 0xd38   : > { %v6406_v38 = vmul.f32 %v12129_v43, %v6386_v34  ;;  %v6103_v13 = vadd.f32 %v6083_v17, %v6057_v52  ;;  %v6104_v44 = vadd.f32 %v6084_v58, %v6058_v46  ;;  %v12171_v16 = vmul.f32 0.5, %v12103_v42  ;;  %v5925_v34 = vld [vmem:[#allocation8 + $0xa9] sm:$0xff] }
 0xd39   : > { %v6407_v21 = vmul.f32 %v12135_v6, %v6387_v41  ;;  %8408 = vpow2.f32 %v6520_v7  ;;  %v12174_v1 = vmul.f32 %v12636_v49, %v5788_v35  ;;  %v5876_v33 = vadd.f32 %v12644_v45, %v12114_v39  ;;  %v12190_v35 = vld [vmem:[#allocation8] sm:$0xff]  ;;  %v12647_v7 = vld [vmem:[#allocation22_spill] sm:$0xff] }
 0xd3a   : > { %v6426_v40 = vadd.f32 0.2548296, %v6406_v38  ;;  %v12177_v48 = vadd.f32 %v12034_v27, %v6103_v13  ;;  %v12180_v26 = vadd.f32 %v12034_v27, %v6104_v44  ;;  %vm6586_vm9 = vcmp.ge.f32.partialorder %v12059_v30, 0.0 }
 0xd3b   : > { %v12184_v62 = vpop.eup %8404  ;;  %v6427_v19 = vadd.f32 0.2548296, %v6407_v21  ;;  %v12188_v42 = vmul.f32 0.5, %v12106_v2  ;;  %8410 = vpow2.f32 %v6522_v23  ;;  %v5903_v36 = vmul.f32 %v12190_v35, %v11111_v15 }
 0xd3c   : > { %v12194_v3 = vpop.eup %8406  ;;  %v6446_v24 = vmul.f32 %v12129_v43, %v6426_v40  ;;  %vm6587_vm10 = vcmp.ge.f32.partialorder %v12071_v61, 0.0  ;;  %v6288_v39 = vmul.f32 1.0614054, %v12184_v62  ;;  %v5877_v37 = vadd.f32 %v5857_v31, %v12645_v50 }
 0xd3d   : > { %v5878_v54 = vadd.f32 %v5858_v18, %v5832_v10  ;;  %v6447_v2 = vmul.f32 %v12135_v6, %v6427_v19  ;;  %v6289_v8 = vmul.f32 1.0614054, %v12194_v3  ;;  %v12203_v55 = vmul.f32 0.70710677, %v12177_v48  ;;  %v5926_v10 = vld [vmem:[#allocation8 + $0xb1] sm:$0xff] }
 0xd3e   : > { %v12206_v15 = vmul.f32 0.70710677, %v12180_v26  ;;  %v6699_v59 = vld [vmem:[#allocation9 + $0x41] sm:$0xff]  ;;  %v6546_v51 = vmul.f32 %v8401_v32, %v6446_v24  ;;  %v6308_v43 = vadd.f32 -1.4531521, %v6288_v39  ;;  %v5921_v0 = vadd.f32 %v12646_v28, %v12029_v60 }
 0xd3f   : > { %v5922_v58 = vadd.f32 %v12647_v7, %v5876_v33  ;;  %7744 = vmatmul.mubr.f32.gmra.mrb[136].mxu1 %v6699_v59  ;;  %v6547_v25 = vmul.f32 %v8403_v12, %v6447_v2  ;;  %v6309_v6 = vadd.f32 -1.4531521, %v6289_v8  ;;  %v6190_v52 = vand.u32 2147483647, %v12203_v55  ;;  %v12648_v8 = vld [vmem:[#allocation57_spill] sm:$0xff] }
 0xd40   : > { %v6191_v11 = vand.u32 2147483647, %v12206_v15  ;;  %v6566_v46 = vsub.f32 1.0, %v6546_v51  ;;  %v6328_v14 = vmul.f32 %v12184_v62, %v6308_v43  ;;  %v5923_v17 = vadd.f32 %v5903_v36, %v5877_v37  ;;  %v5972_v7 = vld [vmem:[#allocation8 + $0xbf] sm:$0xff] }
 0xd41   : > { %v5924_v41 = vadd.f32 %v5903_v36, %v5878_v54  ;;  %v6567_v32 = vsub.f32 1.0, %v6547_v25  ;;  %v6329_v23 = vmul.f32 %v12194_v3, %v6309_v6  ;;  %v6210_v20 = vmul.f32 0.3275911, %v6190_v52 }
 0xd42   : > { %v6211_v60 = vmul.f32 0.3275911, %v6191_v11  ;;  %v6606_v57 = vsub.f32 0.0, %v6566_v46  ;;  %v6348_v31 = vadd.f32 1.4214138, %v6328_v14  ;;  %v6470_v38 = vsub.f32 0.0, %v6190_v52 }
 0xd43   : > { %v5949_v12 = vmul.f32 %v12636_v49, %v5925_v34  ;;  %v8409_v13 = vpop.eup %8408  ;;  %v6607_v44 = vsub.f32 0.0, %v6567_v32  ;;  %v6349_v18 = vadd.f32 1.4214138, %v6329_v23  ;;  %v6230_v21 = vadd.f32 1.0, %v6210_v20 }
 0xd44   : > { %v6231_v40 = vadd.f32 1.0, %v6211_v60  ;;  %v6626_v45 = vsel %vm6586_vm9, %v6566_v46, %v6606_v57  ;;  %v6368_v33 = vmul.f32 %v12184_v62, %v6348_v31  ;;  %v6471_v19 = vsub.f32 0.0, %v6191_v11 }
 0xd45   : > { %v5950_v36 = vmul.f32 %v12636_v49, %v5926_v10  ;;  %v8411_v24 = vpop.eup %8410  ;;  %v6627_v39 = vsel %vm6587_vm10, %v6567_v32, %v6607_v44  ;;  %v6646_v50 = vadd.f32 1.0, %v6626_v45  ;;  %v6369_v37 = vmul.f32 %v12194_v3, %v6349_v18  ;;  %v5971_v49 = vld [vmem:[#allocation8 + $0xb7] sm:$0xff] }
 0xd46   : > { %8412 = vrcp.f32 %v6230_v21  ;;  %v6647_v54 = vadd.f32 1.0, %v6627_v39  ;;  %v6388_v2 = vadd.f32 -0.28449672, %v6368_v33  ;;  %v5967_v59 = vadd.f32 %v12648_v8, %v5921_v0 }
 0xd47   : > { %8414 = vrcp.f32 %v6231_v40  ;;  %v6666_v30 = vmul.f32 %v6646_v50, %v12123_v47  ;;  %v6389_v51 = vadd.f32 -0.28449672, %v6369_v37  ;;  %v6490_v43 = vmul.f32 %v6470_v38, %v6190_v52 }
 0xd48   : > { %v5968_v28 = vadd.f32 %v12174_v1, %v5922_v58  ;;  %v6667_v61 = vmul.f32 %v6647_v54, %v12132_v29  ;;  %v6408_v25 = vmul.f32 %v12184_v62, %v6388_v2  ;;  %v5969_v6 = vadd.f32 %v5949_v12, %v5923_v17  ;;  %v6063_v17 = vld [vmem:[#allocation8 + $0xb9] sm:$0xff] }
 0xd49   : > { %v5970_v46 = vadd.f32 %v5950_v36, %v5924_v41  ;;  %6686 = vst [vmem:[#allocation9 + $0x50] sm:$0xff] %v6666_v30  ;;  %v6409_v14 = vmul.f32 %v12194_v3, %v6389_v51  ;;  %v6491_v32 = vmul.f32 %v6471_v19, %v6191_v11  ;;  %v5993_v0 = vmul.f32 %v11148_v9, %v12153_v63  ;;  %v6064_v11 = vld [vmem:[#allocation8 + $0xc1] sm:$0xff] }
 0xd4a   : > { %v5994_v47 = vmul.f32 %v11148_v9, %v12157_v22  ;;  %6687 = vst [vmem:[#allocation9 + $0x58] sm:$0xff] %v6667_v61  ;;  %v6428_v1 = vadd.f32 0.2548296, %v6408_v25  ;;  %v5995_v58 = vmul.f32 %v11148_v9, %v5971_v49  ;;  %v5996_v29 = vmul.f32 %v11148_v9, %v5972_v7 }
 0xd4b   : > { %v6039_v52 = vmul.f32 %v12190_v35, %v11160_v5  ;;  %v6429_v41 = vadd.f32 0.2548296, %v6409_v14  ;;  %v6013_v23 = vadd.f32 %v5993_v0, %v5967_v59  ;;  %v6085_v60 = vmul.f32 %v11808_v4, %v5925_v34 }
 0xd4c   : > { %v6014_v20 = vadd.f32 %v5994_v47, %v5968_v28  ;;  %v6448_v63 = vmul.f32 %v12184_v62, %v6428_v1  ;;  %v6015_v57 = vadd.f32 %v5995_v58, %v5969_v6  ;;  %v6016_v22 = vadd.f32 %v5996_v29, %v5970_v46 }
 0xd4d   : > { %v6086_v31 = vmul.f32 %v11808_v4, %v5926_v10  ;;  %v6449_v38 = vmul.f32 %v12194_v3, %v6429_v41  ;;  %v6059_v12 = vadd.f32 %v6039_v52, %v6013_v23  ;;  %v6087_v44 = vmul.f32 %v11808_v4, %v6063_v17 }
 0xd4e   : > { %v6060_v9 = vadd.f32 %v6039_v52, %v6014_v20  ;;  %v6548_v5 = vmul.f32 %v8409_v13, %v6448_v63  ;;  %v6061_v35 = vadd.f32 %v6039_v52, %v6015_v57  ;;  %v6062_v18 = vadd.f32 %v6039_v52, %v6016_v22 }
 0xd4f   : > { %v6088_v21 = vmul.f32 %v11808_v4, %v6064_v11  ;;  %v6549_v34 = vmul.f32 %v8411_v24, %v6449_v38  ;;  %v6524_v45 = vmul.f32 1.442695, %v6490_v43  ;;  %v6105_v62 = vadd.f32 %v6085_v60, %v6059_v12 }
 0xd50   : > { %v12243_v40 = vpop.eup %8412  ;;  %v6106_v33 = vadd.f32 %v6086_v31, %v6060_v9  ;;  %v6568_v10 = vsub.f32 1.0, %v6548_v5  ;;  %v6107_v36 = vadd.f32 %v6087_v44, %v6061_v35  ;;  %vm6588_vm11 = vcmp.ge.f32.partialorder %v12119_v56, 0.0 }
 0xd51   : > { %v12245_v19 = vpop.eup %8414  ;;  %v6290_v3 = vmul.f32 1.0614054, %v12243_v40  ;;  %v6108_v39 = vadd.f32 %v6088_v21, %v6062_v18  ;;  %v6700_v50 = vld [vmem:[#allocation9 + $0x51] sm:$0xff]  ;;  %v6569_v37 = vsub.f32 1.0, %v6549_v34  ;;  %v12251_v4 = vadd.f32 %v12034_v27, %v6105_v62 }
 0xd52   : > { %v6291_v13 = vmul.f32 1.0614054, %v12245_v19  ;;  %7746 = vmatprep.mubr.f32.mxu1 %v6700_v50  ;;  %v6608_v24 = vsub.f32 0.0, %v6568_v10  ;;  %v6526_v2 = vmul.f32 1.442695, %v6491_v32  ;;  %v12254_v8 = vadd.f32 %v12034_v27, %v6106_v33 }
 0xd53   : > { %v6310_v54 = vadd.f32 -1.4531521, %v6290_v3  ;;  %v6609_v59 = vsub.f32 0.0, %v6569_v37  ;;  %v6134_v51 = vadd.f32 %v12034_v27, %v6107_v36  ;;  %v6135_v43 = vadd.f32 %v12034_v27, %v6108_v39 }
 0xd54   : > { %v6311_v30 = vadd.f32 -1.4531521, %v6291_v13  ;;  %vm6589_vm12 = vcmp.ge.f32.partialorder %v12126_v53, 0.0  ;;  %v6628_v56 = vsel %vm6588_vm11, %v6568_v10, %v6608_v24  ;;  %8416 = vpow2.f32 %v6524_v45 }
 0xd55   : > { %v6330_v28 = vmul.f32 %v12243_v40, %v6310_v54  ;;  %v6629_v49 = vsel %vm6589_vm12, %v6569_v37, %v6609_v59  ;;  %v6648_v7 = vadd.f32 1.0, %v6628_v56  ;;  %v12262_v25 = vmul.f32 0.70710677, %v12251_v4 }
 0xd56   : > { %v6331_v61 = vmul.f32 %v12245_v19, %v6311_v30  ;;  %v6649_v6 = vadd.f32 1.0, %v6629_v49  ;;  %8418 = vpow2.f32 %v6526_v2  ;;  %v12265_v14 = vmul.f32 0.70710677, %v12254_v8 }
 0xd57   : > { %v6350_v46 = vadd.f32 1.4214138, %v6330_v28  ;;  %v6668_v27 = vmul.f32 %v6648_v7, %v12171_v16  ;;  %v6174_v32 = vmul.f32 0.70710677, %v6134_v51  ;;  %v6175_v0 = vmul.f32 0.70710677, %v6135_v43 }
 0xd58   : > { %v6351_v53 = vadd.f32 1.4214138, %v6331_v61  ;;  %v6669_v47 = vmul.f32 %v6649_v6, %v12188_v42  ;;  %v6192_v58 = vand.u32 2147483647, %v12262_v25  ;;  %v6193_v29 = vand.u32 2147483647, %v12265_v14 }
 0xd59   : > { %v6370_v1 = vmul.f32 %v12243_v40, %v6350_v46  ;;  %6688 = vst [vmem:[#allocation9 + $0x60] sm:$0xff] %v6668_v27  ;;  %v6194_v17 = vand.u32 2147483647, %v6174_v32  ;;  %v6195_v41 = vand.u32 2147483647, %v6175_v0  ;;  %vm6590_vm13 = vcmp.ge.f32.partialorder %v12203_v55, 0.0 }
 0xd5a   : > { %v6371_v52 = vmul.f32 %v12245_v19, %v6351_v53  ;;  %6689 = vst [vmem:[#allocation9 + $0x68] sm:$0xff] %v6669_v47  ;;  %v6212_v20 = vmul.f32 0.3275911, %v6192_v58  ;;  %v6213_v16 = vmul.f32 0.3275911, %v6193_v29  ;;  %v6472_v10 = vsub.f32 0.0, %v6192_v58 }
 0xd5b   : > { %v6390_v23 = vadd.f32 -0.28449672, %v6370_v1  ;;  %v6214_v60 = vmul.f32 0.3275911, %v6194_v17  ;;  %v6215_v63 = vmul.f32 0.3275911, %v6195_v41 }
 0xd5c   : > { %v6391_v11 = vadd.f32 -0.28449672, %v6371_v52  ;;  %v6232_v57 = vadd.f32 1.0, %v6212_v20  ;;  %v6233_v22 = vadd.f32 1.0, %v6213_v16  ;;  %v6473_v36 = vsub.f32 0.0, %v6193_v29 }
 0xd5d   : > { %v6410_v42 = vmul.f32 %v12243_v40, %v6390_v23  ;;  %v6234_v38 = vadd.f32 1.0, %v6214_v60  ;;  %v6235_v12 = vadd.f32 1.0, %v6215_v63  ;;  %v6474_v50 = vsub.f32 0.0, %v6194_v17 }
 0xd5e   : > { %v6411_v31 = vmul.f32 %v12245_v19, %v6391_v11  ;;  %v8417_v9 = vpop.eup %8416  ;;  %8420 = vrcp.f32 %v6232_v57  ;;  %v6475_v13 = vsub.f32 0.0, %v6195_v41  ;;  %vm6591_vm14 = vcmp.ge.f32.partialorder %v12206_v15, 0.0 }
 0xd5f   : > { %v6430_v44 = vadd.f32 0.2548296, %v6410_v42  ;;  %8422 = vrcp.f32 %v6233_v22  ;;  %v6492_v54 = vmul.f32 %v6472_v10, %v6192_v58  ;;  %v6493_v43 = vmul.f32 %v6473_v36, %v6193_v29 }
 0xd60   : > { %v6431_v5 = vadd.f32 0.2548296, %v6411_v31  ;;  %v8419_v35 = vpop.eup %8418  ;;  %8424 = vrcp.f32 %v6234_v38  ;;  %v6151_v28 = vmul.f32 0.5, %v12180_v26  ;;  %v6494_v55 = vmul.f32 %v6474_v50, %v6194_v17 }
 0xd61   : > { %v6450_v18 = vmul.f32 %v12243_v40, %v6430_v44  ;;  %v6701_v21 = vld [vmem:[#allocation9 + $0x61] sm:$0xff]  ;;  %8426 = vrcp.f32 %v6235_v12  ;;  %v6150_v40 = vmul.f32 0.5, %v12177_v48  ;;  %v6495_v27 = vmul.f32 %v6475_v13, %v6195_v41 }
 0xd62   : > { %v6451_v34 = vmul.f32 %v12245_v19, %v6431_v5  ;;  %7747 = vmatmul.mubr.f32.gmra.mrb[138].mxu1 %v6701_v21  ;;  %v6528_v15 = vmul.f32 1.442695, %v6492_v54  ;;  %v6530_v0 = vmul.f32 1.442695, %v6493_v43  ;;  %v6532_v1 = vmul.f32 1.442695, %v6494_v55 }
 0xd63   : > { %v6550_v45 = vmul.f32 %v8417_v9, %v6450_v18  ;;  %v6534_v29 = vmul.f32 1.442695, %v6495_v27  ;;  %vm6592_vm15 = vcmp.ge.f32.partialorder %v12262_v25, 0.0  ;;  %vm6593_vm0 = vcmp.ge.f32.partialorder %v12265_v14, 0.0  ;;  %v7285_v25 = vld [vmem:[%s12372_s19] ss:$0 sm:$0xff] }
 0xd64   : > { %v6551_v62 = vmul.f32 %v8419_v35, %v6451_v34  ;;  %8428 = vpow2.f32 %v6528_v15  ;;  %v6152_v34 = vmul.f32 0.5, %v12251_v4  ;;  %v6153_v10 = vmul.f32 0.5, %v12254_v8  ;;  %v7294_v14 = vld [vmem:[%s12370_s17] ss:$0 sm:$0xff] }
 0xd65   : > { %v6570_v33 = vsub.f32 1.0, %v6550_v45  ;;  %8430 = vpow2.f32 %v6530_v0 }
 0xd66   : > { %v6571_v3 = vsub.f32 1.0, %v6551_v62  ;;  %8432 = vpow2.f32 %v6532_v1 }
 0xd67   : > { %v6610_v39 = vsub.f32 0.0, %v6570_v33  ;;  %8434 = vpow2.f32 %v6534_v29 }
 0xd68   : > { %v6611_v37 = vsub.f32 0.0, %v6571_v3  ;;  %v8421_v24 = vpop.eup %8420 }
 0xd69   : > { %v6630_v19 = vsel %vm6590_vm13, %v6570_v33, %v6610_v39  ;;  %v8423_v2 = vpop.eup %8422  ;;  %v6292_v51 = vmul.f32 1.0614054, %v8421_v24 }
 0xd6a   : > { %v6631_v59 = vsel %vm6591_vm14, %v6571_v3, %v6611_v37  ;;  %v6650_v30 = vadd.f32 1.0, %v6630_v19  ;;  %v8425_v56 = vpop.eup %8424  ;;  %v6293_v7 = vmul.f32 1.0614054, %v8423_v2 }
 0xd6b   : > { %v6651_v49 = vadd.f32 1.0, %v6631_v59  ;;  %v8427_v61 = vpop.eup %8426  ;;  %v6312_v46 = vadd.f32 -1.4531521, %v6292_v51 }
 0xd6c   : > { %v6670_v6 = vmul.f32 %v6650_v30, %v6150_v40  ;;  %v6313_v53 = vadd.f32 -1.4531521, %v6293_v7 }
 0xd6d   : > { %v6671_v48 = vmul.f32 %v6651_v49, %v6151_v28  ;;  %v6332_v32 = vmul.f32 %v8421_v24, %v6312_v46 }
 0xd6e   : > { %6690 = vst [vmem:[#allocation9 + $0x70] sm:$0xff] %v6670_v6  ;;  %v6333_v47 = vmul.f32 %v8423_v2, %v6313_v53  ;;  %v8429_v57 = vpop.eup %8428 }
 0xd6f   : > { %6691 = vst [vmem:[#allocation9 + $0x78] sm:$0xff] %v6671_v48  ;;  %v6352_v58 = vadd.f32 1.4214138, %v6332_v32  ;;  %v8431_v31 = vpop.eup %8430 }
 0xd70   : > { %v6353_v52 = vadd.f32 1.4214138, %v6333_v47  ;;  %v8433_v12 = vpop.eup %8432 }
 0xd71   : > { %v6372_v26 = vmul.f32 %v8421_v24, %v6352_v58  ;;  %v8435_v44 = vpop.eup %8434 }
 0xd72   : > { %v6373_v17 = vmul.f32 %v8423_v2, %v6353_v52 }
 0xd73   : > { %v6392_v23 = vadd.f32 -0.28449672, %v6372_v26 }
 0xd74   : > { %v6393_v41 = vadd.f32 -0.28449672, %v6373_v17 }
 0xd75   : > { %v6412_v16 = vmul.f32 %v8421_v24, %v6392_v23 }
 0xd76   : > { %v6702_v20 = vld [vmem:[#allocation9 + $0x71] sm:$0xff]  ;;  %v6413_v11 = vmul.f32 %v8423_v2, %v6393_v41 }
 0xd77   : > { %7749 = vmatprep.mubr.f32.mxu1 %v6702_v20  ;;  %v6432_v60 = vadd.f32 0.2548296, %v6412_v16 }
 0xd78   : > { %v6433_v63 = vadd.f32 0.2548296, %v6413_v11 }
 0xd79   : > { %v6452_v42 = vmul.f32 %v8421_v24, %v6432_v60 }
 0xd7a   : > { %v6453_v22 = vmul.f32 %v8423_v2, %v6433_v63 }
 0xd7b   : > { %v6552_v38 = vmul.f32 %v8429_v57, %v6452_v42 }
 0xd7c   : > { %v6553_v9 = vmul.f32 %v8431_v31, %v6453_v22 }
 0xd7d   : > { %v6572_v5 = vsub.f32 1.0, %v6552_v38 }
 0xd7e   : > { %v6573_v35 = vsub.f32 1.0, %v6553_v9 }
 0xd7f   : > { %v6612_v18 = vsub.f32 0.0, %v6572_v5 }
 0xd80   : > { %v6613_v21 = vsub.f32 0.0, %v6573_v35 }
 0xd81   : > { %v6632_v45 = vsel %vm6592_vm15, %v6572_v5, %v6612_v18 }
 0xd82   : > { %v6633_v62 = vsel %vm6593_vm0, %v6573_v35, %v6613_v21  ;;  %v6652_v33 = vadd.f32 1.0, %v6632_v45 }
 0xd83   : > { %v6653_v3 = vadd.f32 1.0, %v6633_v62 }
 0xd84   : > { %v6672_v36 = vmul.f32 %v6652_v33, %v6152_v34 }
 0xd85   : > { %v6673_v39 = vmul.f32 %v6653_v3, %v6153_v10 }
 0xd86   : > { %6692 = vst [vmem:[#allocation9 + $0x80] sm:$0xff] %v6672_v36 }
 0xd87   : > { %6693 = vst [vmem:[#allocation9 + $0x88] sm:$0xff] %v6673_v39 }
 0xd8e   : > { %v6703_v50 = vld [vmem:[#allocation9 + $0x81] sm:$0xff] }
 0xd8f   : > { %7750 = vmatmul.mubr.f32.gmra.mrb[140].mxu1 %v6703_v50 }
 0xdec   : > { %v7742_v4 = vpop.f32.mrb[134].mxu1 }
 0xded   : > { %v8098_v8 = vadd.f32 %v7742_v4, %v7285_v25  ;;  %v6910_v37 = vpop.f32.mrb[135].mxu1 }
 0xdee   : > { %v8099_v13 = vadd.f32 %v7285_v25, %v6910_v37 }
 0xdef   : > { %v6965_v24 = vadd.f32 %v8098_v8, %v7294_v14 }
 0xdf0   : > { %v6964_v40 = vadd.f32 %v8099_v13, %v7294_v14 }
 0xdf1   : > { %6973 = vst.msk [vmem:[%s637_s23 + $0x8] sm:$0xff] %vm1743_vm7, %v6965_v24 }
 0xdf2   : > { %6972 = vst.msk [vmem:[%s637_s23] sm:$0xff] %vm1743_vm7, %v6964_v40 }
 0xe12   : > { %v7745_v19 = vpop.f32.mrb[136].mxu1 }
 0xe13   : > { %v8100_v54 = vadd.f32 %v7745_v19, %v7285_v25  ;;  %v6920_v2 = vpop.f32.mrb[137].mxu1 }
 0xe14   : > { %v8101_v59 = vadd.f32 %v7285_v25, %v6920_v2 }
 0xe15   : > { %v6967_v30 = vadd.f32 %v8100_v54, %v7294_v14 }
 0xe16   : > { %v6966_v51 = vadd.f32 %v8101_v59, %v7294_v14 }
 0xe17   : > { %6975 = vst.msk [vmem:[%s637_s23 + $0x18] sm:$0xff] %vm1743_vm7, %v6967_v30 }
 0xe18   : > { %6974 = vst.msk [vmem:[%s637_s23 + $0x10] sm:$0xff] %vm1743_vm7, %v6966_v51 }
 0xe35   : > { %v7748_v43 = vpop.f32.mrb[138].mxu1 }
 0xe36   : > { %v8102_v56 = vadd.f32 %v7748_v43, %v7285_v25  ;;  %v6930_v28 = vpop.f32.mrb[139].mxu1 }
 0xe37   : > { %v8103_v49 = vadd.f32 %v7285_v25, %v6930_v28 }
 0xe38   : > { %v6969_v7 = vadd.f32 %v8102_v56, %v7294_v14 }
 0xe39   : > { %v6968_v55 = vadd.f32 %v8103_v49, %v7294_v14 }
 0xe3a   : > { %6977 = vst.msk [vmem:[%s637_s23 + $0x28] sm:$0xff] %vm1743_vm7, %v6969_v7 }
 0xe3b   : > { %6976 = vst.msk [vmem:[%s637_s23 + $0x20] sm:$0xff] %vm1743_vm7, %v6968_v55 }
 0xe62   : > { %v7751_v61 = vpop.f32.mrb[140].mxu1 }
 0xe63   : > { %v8104_v6 = vadd.f32 %v7751_v61, %v7285_v25  ;;  %v6940_v46 = vpop.f32.mrb[141].mxu1 }
 0xe64   : > { %v8105_v27 = vadd.f32 %v7285_v25, %v6940_v46 }
 0xe65   : > { %v6971_v48 = vadd.f32 %v8104_v6, %v7294_v14 }
 0xe66   : > { %v6970_v53 = vadd.f32 %v8105_v27, %v7294_v14 }
 0xe67   : > { %6979 = vst.msk [vmem:[%s637_s23 + $0x38] sm:$0xff] %vm1743_vm7, %v6971_v48 }
 0xe68   : > { %6978 = vst.msk [vmem:[%s637_s23 + $0x30] sm:$0xff] %vm1743_vm7, %v6970_v53 }
 0xe69   : > { %8467 = shalt.err (!%p8464_p3)
}
 0xe6a   : > { %s8468_s26 = scalar_lea.hbm %s12304_s28, 1024  ;;  %s8472_s1 = scalar_lea.hbm %s12373_s20, 2048 }
 0xe6b   : > { %p8469_p4 = scmp.ne.s32.totalorder %s12304_s28, %s8468_s26  ;;  %p8473_p9 = scmp.lt.u32.totalorder %s12304_s28, %s12373_s20 }
 0xe6c   : > { %p8474_p10 = scmp.lt.u32.totalorder %s8472_s1, %s8468_s26  ;;  %p8476_p12 = scmp.lt.u32.totalorder %s8468_s26, %s12304_s28 }
 0xe6d   : > { %p8470_p7 = pnand %p8469_p4, %p8673_p5 }
 0xe6e   : > { %p8475_p11 = por %p8474_p10, %p8473_p9 }
 0xe6f   : > { %p8471_p8 = pneg %p8470_p7 }
 0xe70   : > { %p8477_p13 = por %p8476_p12, %p8475_p11 }
 0xe72   : > { %p8478_p0 = pnand %p8477_p13, %p8471_p8 }
 0xe74   : > { %8481 = shalt.err (!%p8478_p0)
}
 0xe75   : > { %s8528_s24 = smov 128   ;;  %s8529_s30 = smov 8  }
 0xe76   : > { %8114 = dma.vmem_to_hbm [thread:$0]  (%p8673_p5), %s12306_s0, 1024, %s12304_s28, %s12312_s2, %s8528_s24, %s8528_s24, %s8529_s30  }
 0xe77 PF: > { %s12649_s21 = sld [smem:[#allocation15_spill]]  ;;  %s12650_s23 = sld [smem:[#allocation13_spill]] }
 0xe7d   : > { %p8120_p1 = scmp.ge.s32.totalorder %s12649_s21, 2  ;;  %s7009_s25 = sand.u32 1, %s12650_s23  }
 0xe7e   : > { %s7010_s26 = scalar_lea.sflag [#allocation11], %s7009_s25 }
 0xe7f   : > { %p8117_p2 = pnand %p8120_p1, %p8677_p6 }
 0xe81   : > { %8499 = dma.done.wait (!%p8117_p2), %s7010_s26, 1024  }
 0xe82   : > { %8501 = vsyncadd (!%p8117_p2), %s7010_s26, 4294966272  ;;  %s12652_s24 = sld [smem:[#allocation16_spill]]  ;;  %s12653_s29 = sld [smem:[#allocation14_spill]] }
 0xe83   : > { %s12654_s23 = sld [smem:[#allocation17_spill]]  ;;  %s12655_s1 = smov %s8508_s22 }
 0xe88   : > { %p30_p3 = scmp.ge.s32.totalorder %s12652_s24, 4   ;;  %s12656_s22 = smov %s12653_s29 }
 0xe8a   :  { %32 = sbr.rel (!%p30_p3) target bundleno = 9 (0x9), region = 138 }
 0xe91   :  { %7015 = vsyncpa [#allocation11], 1 }
 0xe92   :  { %7017 = vsyncpa [#allocation11 + $0x1], 1 }

</bundles_post_ra>
